<compile_context>
chip_gen: v5e
topology: v5e:2x2
jax: 0.10.0
libtpu: 0.0.40
codegen_flags: <defaults>
</compile_context>

<pallas_src>
import math
import jax
import jax.numpy as jnp
from jax.experimental import pallas as pl


# --------------------------------------------------------------------------
# Fused forward kernel (no grid: all weights + activations resident in VMEM)
# --------------------------------------------------------------------------
def _make_fused_kernel(B, co_list):
    n_gat = len(co_list)

    def _gatv2_dense(hl, hr, a_row):
        # Dense full-graph GATv2-style attention (PyG convention):
        #   e[i, j] = a . leaky_relu(hr[i] + hl[j])
        #   out[i]  = sum_j softmax_j(e[i, :]) * hl[j]
        s = hr[:, None, :] + hl[None, :, :]                       # (V, V, Co)
        s = jnp.maximum(s, 0.2 * s)                               # LeakyReLU(0.2)
        e = jnp.sum(s * a_row[None, :, :], axis=-1)               # (V, V)
        e = e - jnp.max(e, axis=-1, keepdims=True)
        p = jnp.exp(e)
        inv = pl.reciprocal(jnp.sum(p, axis=-1, keepdims=True), approx=True)
        alpha = (p * inv).astype(jnp.bfloat16)
        return jnp.dot(alpha, hl.astype(jnp.bfloat16),
                       preferred_element_type=jnp.float32)        # (V, Co)

    def kernel(*refs):
        it = iter(refs)
        x_ref, ftw_ref, ftb_ref = next(it), next(it), next(it)
        wlr1_ref, a1_ref, bg1_ref = next(it), next(it), next(it)
        gat_rest = [(next(it), next(it), next(it)) for _ in range(n_gat - 1)]
        w1_parts = [next(it) for _ in range(n_gat)]
        bb1_ref, w2_ref, bb2_ref, w3_ref, bb3_ref = (
            next(it), next(it), next(it), next(it), next(it))
        feat_ref = next(it)
        o_ref = next(it)

        co1 = co_list[0]
        x16 = x_ref[...].astype(jnp.bfloat16)                     # (V, F)

        # --- FeatureTransform for all B copies: one lane-dense matmul -------
        h_all = (jnp.dot(x16, ftw_ref[...],
                         preferred_element_type=jnp.float32)
                 + ftb_ref[...])                                   # (V, B*Ct)

        # --- GAT layer_1: block-diag [W_l|W_r] -> one matmul for all copies -
        hlr_all = jnp.dot(h_all.astype(jnp.bfloat16), wlr1_ref[...],
                          preferred_element_type=jnp.float32)      # (V, B*2*Co1)

        # Attention per graph copy + in-register batch mean (no HBM traffic).
        a1 = a1_ref[...]
        acc = None
        for b in range(B):
            blk = hlr_all[:, b * 2 * co1:(b + 1) * 2 * co1]        # (V, 2*Co1)
            yb = _gatv2_dense(blk[:, :co1], blk[:, co1:], a1)
            acc = yb if acc is None else acc + yb
        y = acc * jnp.float32(1.0 / B) + bg1_ref[...]              # (V, Co1)

        # --- GAT layers 2..L on the merged graph ----------------------------
        outs = [y]
        h = y
        for l in range(1, n_gat):
            wlr_ref, a_ref, bg_ref = gat_rest[l - 1]
            co = co_list[l]
            hlr = jnp.dot(h.astype(jnp.bfloat16), wlr_ref[...],
                          preferred_element_type=jnp.float32)      # (V, 2*Co)
            h = _gatv2_dense(hlr[:, :co], hlr[:, co:], a_ref[...]) + bg_ref[...]
            outs.append(h)

        # --- MLP head.  torch.max over the re-split concat is an identity
        # here (every out already has V rows); the channel concat is consumed
        # implicitly as split-weight partial matmuls:
        #   cat(outs, dim=1) @ W1 == sum_l outs[l] @ W1_l
        h1 = bb1_ref[...]
        for l in range(n_gat):
            h1 = h1 + jnp.dot(outs[l].astype(jnp.bfloat16), w1_parts[l][...],
                              preferred_element_type=jnp.float32)
        h1 = jnp.maximum(h1, 0.0)                                  # (V, 256)
        h2 = jnp.maximum(
            jnp.dot(h1.astype(jnp.bfloat16), w2_ref[...],
                    preferred_element_type=jnp.float32) + bb2_ref[...], 0.0)
        # GeodLinear (scale pre-folded into W3/b3): feat * tanh(h2 @ W3s + b3s)
        z = (jnp.dot(h2.astype(jnp.bfloat16), w3_ref[...],
                     preferred_element_type=jnp.float32)
             + bb3_ref[...])                                       # (V, 128) padded
        o_ref[...] = feat_ref[...] * jnp.tanh(z)

    return kernel


# --------------------------------------------------------------------------
# Forward pass mirroring MultiMeanDisplacerNet.forward (one pallas_call)
# --------------------------------------------------------------------------
@jax.jit
def multi_mean_displacer_forward(x, params):
    V = x.shape[0]
    co1 = params["a1"].shape[1]
    B = params["Wlr1_bd"].shape[1] // (2 * co1)
    co_list = [co1] + [a.shape[1] for (_, a, _) in params["gat_rest"]]

    inputs = [x, params["ft_Wall"], params["ft_ball"],
              params["Wlr1_bd"], params["a1"], params["bg1"]]
    for (wlr, a, bg) in params["gat_rest"]:
        inputs += [wlr, a, bg]
    inputs += list(params["w1_parts"])
    inputs += [params["b1"], params["W2"], params["b2"],
               params["W3s"], params["b3s"], params["geod_feat"]]

    slab = pl.pallas_call(
        _make_fused_kernel(B, co_list),
        out_shape=jax.ShapeDtypeStruct((V, 128), jnp.float32),
    )(*inputs)
    # Lane-dense (V, 128) store inside the kernel; the 3 displacement
    # components are sliced out in the wrapper.
    return slab[:, :3]


# --------------------------------------------------------------------------
# Parameter init (deterministic, seed 42 to mirror seed_everything(42))
# --------------------------------------------------------------------------
def _dense_init(key, fan_in, shape):
    return (jax.random.normal(key, shape, dtype=jnp.float32)
            / jnp.sqrt(jnp.float32(fan_in)))


def init_params(F, B, Ct, out_channels_list, V):
    key = jax.random.PRNGKey(42)
    keys = iter(jax.random.split(key, 64))

    # FeatureTransformLayer: per-copy boolean feature mask folded into the
    # per-copy linear weight, all copies concatenated along the output lanes.
    masks = jnp.stack([
        (jnp.arange(F) < F // 2).astype(jnp.float32),
        (jnp.arange(F) >= F // 2).astype(jnp.float32),
    ])[:B]                                                         # (B, F)
    ft_W = _dense_init(next(keys), F, (B, F, Ct))                  # (B, F, Ct)
    ft_W = masks[:, :, None] * ft_W
    ft_Wall = jnp.concatenate([ft_W[b] for b in range(B)],
                              axis=1).astype(jnp.bfloat16)         # (F, B*Ct)
    ft_ball = _dense_init(next(keys), F, (B, Ct)).reshape(1, B * Ct)

    # GAT layer_1: [W_l | W_r] replicated block-diagonally over the B graph
    # copies so the projection of every copy is one lane-dense matmul.
    co1 = out_channels_list[0]
    Wl = _dense_init(next(keys), Ct, (Ct, co1))
    Wr = _dense_init(next(keys), Ct, (Ct, co1))
    Wlr = jnp.concatenate([Wl, Wr], axis=1)                        # (Ct, 2*co1)
    Wlr1_bd = jnp.zeros((B * Ct, B * 2 * co1), jnp.float32)
    for b in range(B):
        Wlr1_bd = Wlr1_bd.at[b * Ct:(b + 1) * Ct,
                             b * 2 * co1:(b + 1) * 2 * co1].set(Wlr)
    Wlr1_bd = Wlr1_bd.astype(jnp.bfloat16)
    a1 = _dense_init(next(keys), co1, (1, co1))
    bg1 = jnp.zeros((1, co1), jnp.float32)

    # GAT layers 2..L (merged graph).
    gat_rest = []
    cin = co1
    for co in out_channels_list[1:]:
        Wl = _dense_init(next(keys), cin, (cin, co))
        Wr = _dense_init(next(keys), cin, (cin, co))
        gat_rest.append((
            jnp.concatenate([Wl, Wr], axis=1).astype(jnp.bfloat16),  # (cin, 2co)
            _dense_init(next(keys), co, (1, co)),
            jnp.zeros((1, co), jnp.float32)))
        cin = co

    # MLP head (lazy Linear(-1, .) resolved to sum(out_channels_list)).
    c_tot = sum(out_channels_list)
    W1 = _dense_init(next(keys), c_tot, (c_tot, 256))
    w1_parts, off = [], 0
    for co in out_channels_list:               # split so the kernel never concats
        w1_parts.append(W1[off:off + co, :].astype(jnp.bfloat16))
        off += co
    b1 = jnp.zeros((1, 256), jnp.float32)
    W2 = _dense_init(next(keys), 256, (256, 64)).astype(jnp.bfloat16)
    b2 = jnp.zeros((1, 64), jnp.float32)

    # GeodLinear: scale = atanh(0.5)/mean(edge_lengths) folded into W3/b3;
    # output projection padded to a 128-lane slab (lane-dense store).
    geod_feat = jax.random.normal(next(keys), (V, 1), dtype=jnp.float32)
    edge_lengths = jax.random.uniform(next(keys), (4 * V,), dtype=jnp.float32,
                                      minval=0.05, maxval=0.15)
    scale = jnp.float32(math.atanh(0.5)) / jnp.mean(edge_lengths)
    W3 = _dense_init(next(keys), 64, (64, 3)) * scale
    W3s = jnp.zeros((64, 128), jnp.float32).at[:, :3].set(W3).astype(jnp.bfloat16)
    b3s = jnp.zeros((1, 128), jnp.float32)     # zero bias -> scale*0 == 0

    return dict(ft_Wall=ft_Wall, ft_ball=ft_ball,
                Wlr1_bd=Wlr1_bd, a1=a1, bg1=bg1,
                gat_rest=tuple(gat_rest),
                w1_parts=tuple(w1_parts), b1=b1, W2=W2, b2=b2,
                W3s=W3s, b3s=b3s, geod_feat=geod_feat)


if __name__ == "__main__":
    V, F = 16, 16               # vertices, total input features
    B = 2                       # len(in_feature_mask)
    Ct = 32                     # out_transf_channels (scaled down from 256)
    out_channels_list = [32, 64, 64, 64]   # scaled down from [256,512,512,512]

    params = init_params(F, B, Ct, out_channels_list, V)

    key = jax.random.PRNGKey(0)
    x = jax.random.normal(key, (V, F), dtype=jnp.float32)

    out = multi_mean_displacer_forward(x, params)
    out = jax.block_until_ready(out)
    assert out.shape == (V, 3) and out.dtype == jnp.float32
    assert bool(jnp.all(jnp.isfinite(out)))
    print("KERNEL_OK")
</pallas_src>

<mosaic_0001>
module attributes {stable_mosaic.version = 11 : i64} {
  func.func @kernel(%arg0: memref<16x16xf32, #tpu.memory_space<vmem>>, %arg1: memref<16x64xbf16, #tpu.memory_space<vmem>>, %arg2: memref<1x64xf32, #tpu.memory_space<vmem>>, %arg3: memref<64x128xbf16, #tpu.memory_space<vmem>>, %arg4: memref<1x32xf32, #tpu.memory_space<vmem>>, %arg5: memref<1x32xf32, #tpu.memory_space<vmem>>, %arg6: memref<32x128xbf16, #tpu.memory_space<vmem>>, %arg7: memref<1x64xf32, #tpu.memory_space<vmem>>, %arg8: memref<1x64xf32, #tpu.memory_space<vmem>>, %arg9: memref<64x128xbf16, #tpu.memory_space<vmem>>, %arg10: memref<1x64xf32, #tpu.memory_space<vmem>>, %arg11: memref<1x64xf32, #tpu.memory_space<vmem>>, %arg12: memref<64x128xbf16, #tpu.memory_space<vmem>>, %arg13: memref<1x64xf32, #tpu.memory_space<vmem>>, %arg14: memref<1x64xf32, #tpu.memory_space<vmem>>, %arg15: memref<32x256xbf16, #tpu.memory_space<vmem>>, %arg16: memref<64x256xbf16, #tpu.memory_space<vmem>>, %arg17: memref<64x256xbf16, #tpu.memory_space<vmem>>, %arg18: memref<64x256xbf16, #tpu.memory_space<vmem>>, %arg19: memref<1x256xf32, #tpu.memory_space<vmem>>, %arg20: memref<256x64xbf16, #tpu.memory_space<vmem>>, %arg21: memref<1x64xf32, #tpu.memory_space<vmem>>, %arg22: memref<64x128xbf16, #tpu.memory_space<vmem>>, %arg23: memref<1x128xf32, #tpu.memory_space<vmem>>, %arg24: memref<16x1xf32, #tpu.memory_space<vmem>>, %arg25: memref<16x128xf32, #tpu.memory_space<vmem>>) attributes {dimension_semantics = [], scalar_prefetch = 0 : i64, scratch_operands = 0 : i64, tpu.core_type = #tpu.core_type<tc>} {
    %c0 = arith.constant 0 : index
    %c0_0 = arith.constant 0 : index
    %0 = vector.load %arg0[%c0, %c0_0] : memref<16x16xf32, #tpu.memory_space<vmem>>, vector<16x16xf32>
    %1 = arith.truncf %0 : vector<16x16xf32> to vector<16x16xbf16>
    %c0_1 = arith.constant 0 : index
    %c0_2 = arith.constant 0 : index
    %2 = vector.load %arg1[%c0_1, %c0_2] : memref<16x64xbf16, #tpu.memory_space<vmem>>, vector<16x64xbf16>
    %cst = arith.constant dense<0.000000e+00> : vector<16x64xf32>
    %3 = tpu.matmul %1, %2, %cst {dimension_numbers = #tpu.dot_dimension_numbers<[1], [0], [0], [1], [0, 0, 1, 1], [], []>} : vector<16x16xbf16>, vector<16x64xbf16>, vector<16x64xf32> -> vector<16x64xf32>
    %c0_3 = arith.constant 0 : index
    %c0_4 = arith.constant 0 : index
    %4 = vector.load %arg2[%c0_3, %c0_4] : memref<1x64xf32, #tpu.memory_space<vmem>>, vector<1x64xf32>
    %5 = vector.broadcast %4 : vector<1x64xf32> to vector<16x64xf32>
    %6 = arith.addf %3, %5 : vector<16x64xf32>
    %7 = arith.truncf %6 : vector<16x64xf32> to vector<16x64xbf16>
    %c0_5 = arith.constant 0 : index
    %c0_6 = arith.constant 0 : index
    %8 = vector.load %arg3[%c0_5, %c0_6] : memref<64x128xbf16, #tpu.memory_space<vmem>>, vector<64x128xbf16>
    %cst_7 = arith.constant dense<0.000000e+00> : vector<16x128xf32>
    %9 = tpu.matmul %7, %8, %cst_7 {dimension_numbers = #tpu.dot_dimension_numbers<[1], [0], [0], [1], [0, 0, 1, 1], [], []>} : vector<16x64xbf16>, vector<64x128xbf16>, vector<16x128xf32> -> vector<16x128xf32>
    %c0_8 = arith.constant 0 : index
    %c0_9 = arith.constant 0 : index
    %10 = vector.load %arg4[%c0_8, %c0_9] : memref<1x32xf32, #tpu.memory_space<vmem>>, vector<1x32xf32>
    %11 = vector.extract_strided_slice %9 {offsets = [0, 0], sizes = [16, 64], strides = [1, 1]} : vector<16x128xf32> to vector<16x64xf32>
    %12 = vector.extract_strided_slice %11 {offsets = [0, 0], sizes = [16, 32], strides = [1, 1]} : vector<16x64xf32> to vector<16x32xf32>
    %13 = vector.extract_strided_slice %11 {offsets = [0, 32], sizes = [16, 32], strides = [1, 1]} : vector<16x64xf32> to vector<16x32xf32>
    %14 = vector.shape_cast %13 : vector<16x32xf32> to vector<16x1x32xf32>
    %15 = vector.shape_cast %12 : vector<16x32xf32> to vector<1x16x32xf32>
    %16 = vector.broadcast %14 : vector<16x1x32xf32> to vector<16x16x32xf32>
    %17 = vector.broadcast %15 : vector<1x16x32xf32> to vector<16x16x32xf32>
    %18 = arith.addf %16, %17 : vector<16x16x32xf32>
    %cst_10 = arith.constant 2.000000e-01 : f32
    %19 = vector.broadcast %cst_10 : f32 to vector<16x16x32xf32>
    %20 = arith.mulf %19, %18 : vector<16x16x32xf32>
    %21 = arith.maximumf %18, %20 : vector<16x16x32xf32>
    %22 = vector.shape_cast %10 : vector<1x32xf32> to vector<1x1x32xf32>
    %23 = vector.broadcast %22 : vector<1x1x32xf32> to vector<16x16x32xf32>
    %24 = arith.mulf %21, %23 : vector<16x16x32xf32>
    %cst_11 = arith.constant dense<0.000000e+00> : vector<16x16xf32>
    %25 = vector.multi_reduction <add>, %24, %cst_11 [2] : vector<16x16x32xf32> to vector<16x16xf32>
    %cst_12 = arith.constant dense<0xFF800000> : vector<16xf32>
    %26 = vector.multi_reduction <maximumf>, %25, %cst_12 [1] : vector<16x16xf32> to vector<16xf32>
    %27 = vector.shape_cast %26 : vector<16xf32> to vector<16x1xf32>
    %28 = vector.broadcast %27 : vector<16x1xf32> to vector<16x16xf32>
    %29 = arith.subf %25, %28 : vector<16x16xf32>
    %30 = math.exp %29 : vector<16x16xf32>
    %cst_13 = arith.constant dense<0.000000e+00> : vector<16xf32>
    %31 = vector.multi_reduction <add>, %30, %cst_13 [1] : vector<16x16xf32> to vector<16xf32>
    %32 = vector.shape_cast %31 : vector<16xf32> to vector<16x1xf32>
    %33 = tpu.reciprocal %32 {approx = true} : vector<16x1xf32> -> vector<16x1xf32>
    %34 = vector.broadcast %33 : vector<16x1xf32> to vector<16x16xf32>
    %35 = arith.mulf %30, %34 : vector<16x16xf32>
    %36 = arith.truncf %35 : vector<16x16xf32> to vector<16x16xbf16>
    %37 = arith.truncf %12 : vector<16x32xf32> to vector<16x32xbf16>
    %cst_14 = arith.constant dense<0.000000e+00> : vector<16x32xf32>
    %38 = tpu.matmul %36, %37, %cst_14 {dimension_numbers = #tpu.dot_dimension_numbers<[1], [0], [0], [1], [0, 0, 1, 1], [], []>} : vector<16x16xbf16>, vector<16x32xbf16>, vector<16x32xf32> -> vector<16x32xf32>
    %39 = vector.extract_strided_slice %9 {offsets = [0, 64], sizes = [16, 64], strides = [1, 1]} : vector<16x128xf32> to vector<16x64xf32>
    %40 = vector.extract_strided_slice %39 {offsets = [0, 0], sizes = [16, 32], strides = [1, 1]} : vector<16x64xf32> to vector<16x32xf32>
    %41 = vector.extract_strided_slice %39 {offsets = [0, 32], sizes = [16, 32], strides = [1, 1]} : vector<16x64xf32> to vector<16x32xf32>
    %42 = vector.shape_cast %41 : vector<16x32xf32> to vector<16x1x32xf32>
    %43 = vector.shape_cast %40 : vector<16x32xf32> to vector<1x16x32xf32>
    %44 = vector.broadcast %42 : vector<16x1x32xf32> to vector<16x16x32xf32>
    %45 = vector.broadcast %43 : vector<1x16x32xf32> to vector<16x16x32xf32>
    %46 = arith.addf %44, %45 : vector<16x16x32xf32>
    %cst_15 = arith.constant 2.000000e-01 : f32
    %47 = vector.broadcast %cst_15 : f32 to vector<16x16x32xf32>
    %48 = arith.mulf %47, %46 : vector<16x16x32xf32>
    %49 = arith.maximumf %46, %48 : vector<16x16x32xf32>
    %50 = vector.shape_cast %10 : vector<1x32xf32> to vector<1x1x32xf32>
    %51 = vector.broadcast %50 : vector<1x1x32xf32> to vector<16x16x32xf32>
    %52 = arith.mulf %49, %51 : vector<16x16x32xf32>
    %cst_16 = arith.constant dense<0.000000e+00> : vector<16x16xf32>
    %53 = vector.multi_reduction <add>, %52, %cst_16 [2] : vector<16x16x32xf32> to vector<16x16xf32>
    %cst_17 = arith.constant dense<0xFF800000> : vector<16xf32>
    %54 = vector.multi_reduction <maximumf>, %53, %cst_17 [1] : vector<16x16xf32> to vector<16xf32>
    %55 = vector.shape_cast %54 : vector<16xf32> to vector<16x1xf32>
    %56 = vector.broadcast %55 : vector<16x1xf32> to vector<16x16xf32>
    %57 = arith.subf %53, %56 : vector<16x16xf32>
    %58 = math.exp %57 : vector<16x16xf32>
    %cst_18 = arith.constant dense<0.000000e+00> : vector<16xf32>
    %59 = vector.multi_reduction <add>, %58, %cst_18 [1] : vector<16x16xf32> to vector<16xf32>
    %60 = vector.shape_cast %59 : vector<16xf32> to vector<16x1xf32>
    %61 = tpu.reciprocal %60 {approx = true} : vector<16x1xf32> -> vector<16x1xf32>
    %62 = vector.broadcast %61 : vector<16x1xf32> to vector<16x16xf32>
    %63 = arith.mulf %58, %62 : vector<16x16xf32>
    %64 = arith.truncf %63 : vector<16x16xf32> to vector<16x16xbf16>
    %65 = arith.truncf %40 : vector<16x32xf32> to vector<16x32xbf16>
    %cst_19 = arith.constant dense<0.000000e+00> : vector<16x32xf32>
    %66 = tpu.matmul %64, %65, %cst_19 {dimension_numbers = #tpu.dot_dimension_numbers<[1], [0], [0], [1], [0, 0, 1, 1], [], []>} : vector<16x16xbf16>, vector<16x32xbf16>, vector<16x32xf32> -> vector<16x32xf32>
    %67 = arith.addf %38, %66 : vector<16x32xf32>
    %cst_20 = arith.constant 5.000000e-01 : f32
    %68 = vector.broadcast %cst_20 : f32 to vector<16x32xf32>
    %69 = arith.mulf %67, %68 : vector<16x32xf32>
    %c0_21 = arith.constant 0 : index
    %c0_22 = arith.constant 0 : index
    %70 = vector.load %arg5[%c0_21, %c0_22] : memref<1x32xf32, #tpu.memory_space<vmem>>, vector<1x32xf32>
    %71 = vector.broadcast %70 : vector<1x32xf32> to vector<16x32xf32>
    %72 = arith.addf %69, %71 : vector<16x32xf32>
    %73 = arith.truncf %72 : vector<16x32xf32> to vector<16x32xbf16>
    %c0_23 = arith.constant 0 : index
    %c0_24 = arith.constant 0 : index
    %74 = vector.load %arg6[%c0_23, %c0_24] : memref<32x128xbf16, #tpu.memory_space<vmem>>, vector<32x128xbf16>
    %cst_25 = arith.constant dense<0.000000e+00> : vector<16x128xf32>
    %75 = tpu.matmul %73, %74, %cst_25 {dimension_numbers = #tpu.dot_dimension_numbers<[1], [0], [0], [1], [0, 0, 1, 1], [], []>} : vector<16x32xbf16>, vector<32x128xbf16>, vector<16x128xf32> -> vector<16x128xf32>
    %76 = vector.extract_strided_slice %75 {offsets = [0, 0], sizes = [16, 64], strides = [1, 1]} : vector<16x128xf32> to vector<16x64xf32>
    %77 = vector.extract_strided_slice %75 {offsets = [0, 64], sizes = [16, 64], strides = [1, 1]} : vector<16x128xf32> to vector<16x64xf32>
    %c0_26 = arith.constant 0 : index
    %c0_27 = arith.constant 0 : index
    %78 = vector.load %arg7[%c0_26, %c0_27] : memref<1x64xf32, #tpu.memory_space<vmem>>, vector<1x64xf32>
    %79 = vector.shape_cast %77 : vector<16x64xf32> to vector<16x1x64xf32>
    %80 = vector.shape_cast %76 : vector<16x64xf32> to vector<1x16x64xf32>
    %81 = vector.broadcast %79 : vector<16x1x64xf32> to vector<16x16x64xf32>
    %82 = vector.broadcast %80 : vector<1x16x64xf32> to vector<16x16x64xf32>
    %83 = arith.addf %81, %82 : vector<16x16x64xf32>
    %cst_28 = arith.constant 2.000000e-01 : f32
    %84 = vector.broadcast %cst_28 : f32 to vector<16x16x64xf32>
    %85 = arith.mulf %84, %83 : vector<16x16x64xf32>
    %86 = arith.maximumf %83, %85 : vector<16x16x64xf32>
    %87 = vector.shape_cast %78 : vector<1x64xf32> to vector<1x1x64xf32>
    %88 = vector.broadcast %87 : vector<1x1x64xf32> to vector<16x16x64xf32>
    %89 = arith.mulf %86, %88 : vector<16x16x64xf32>
    %cst_29 = arith.constant dense<0.000000e+00> : vector<16x16xf32>
    %90 = vector.multi_reduction <add>, %89, %cst_29 [2] : vector<16x16x64xf32> to vector<16x16xf32>
    %cst_30 = arith.constant dense<0xFF800000> : vector<16xf32>
    %91 = vector.multi_reduction <maximumf>, %90, %cst_30 [1] : vector<16x16xf32> to vector<16xf32>
    %92 = vector.shape_cast %91 : vector<16xf32> to vector<16x1xf32>
    %93 = vector.broadcast %92 : vector<16x1xf32> to vector<16x16xf32>
    %94 = arith.subf %90, %93 : vector<16x16xf32>
    %95 = math.exp %94 : vector<16x16xf32>
    %cst_31 = arith.constant dense<0.000000e+00> : vector<16xf32>
    %96 = vector.multi_reduction <add>, %95, %cst_31 [1] : vector<16x16xf32> to vector<16xf32>
    %97 = vector.shape_cast %96 : vector<16xf32> to vector<16x1xf32>
    %98 = tpu.reciprocal %97 {approx = true} : vector<16x1xf32> -> vector<16x1xf32>
    %99 = vector.broadcast %98 : vector<16x1xf32> to vector<16x16xf32>
    %100 = arith.mulf %95, %99 : vector<16x16xf32>
    %101 = arith.truncf %100 : vector<16x16xf32> to vector<16x16xbf16>
    %102 = arith.truncf %76 : vector<16x64xf32> to vector<16x64xbf16>
    %cst_32 = arith.constant dense<0.000000e+00> : vector<16x64xf32>
    %103 = tpu.matmul %101, %102, %cst_32 {dimension_numbers = #tpu.dot_dimension_numbers<[1], [0], [0], [1], [0, 0, 1, 1], [], []>} : vector<16x16xbf16>, vector<16x64xbf16>, vector<16x64xf32> -> vector<16x64xf32>
    %c0_33 = arith.constant 0 : index
    %c0_34 = arith.constant 0 : index
    %104 = vector.load %arg8[%c0_33, %c0_34] : memref<1x64xf32, #tpu.memory_space<vmem>>, vector<1x64xf32>
    %105 = vector.broadcast %104 : vector<1x64xf32> to vector<16x64xf32>
    %106 = arith.addf %103, %105 : vector<16x64xf32>
    %107 = arith.truncf %106 : vector<16x64xf32> to vector<16x64xbf16>
    %c0_35 = arith.constant 0 : index
    %c0_36 = arith.constant 0 : index
    %108 = vector.load %arg9[%c0_35, %c0_36] : memref<64x128xbf16, #tpu.memory_space<vmem>>, vector<64x128xbf16>
    %cst_37 = arith.constant dense<0.000000e+00> : vector<16x128xf32>
    %109 = tpu.matmul %107, %108, %cst_37 {dimension_numbers = #tpu.dot_dimension_numbers<[1], [0], [0], [1], [0, 0, 1, 1], [], []>} : vector<16x64xbf16>, vector<64x128xbf16>, vector<16x128xf32> -> vector<16x128xf32>
    %110 = vector.extract_strided_slice %109 {offsets = [0, 0], sizes = [16, 64], strides = [1, 1]} : vector<16x128xf32> to vector<16x64xf32>
    %111 = vector.extract_strided_slice %109 {offsets = [0, 64], sizes = [16, 64], strides = [1, 1]} : vector<16x128xf32> to vector<16x64xf32>
    %c0_38 = arith.constant 0 : index
    %c0_39 = arith.constant 0 : index
    %112 = vector.load %arg10[%c0_38, %c0_39] : memref<1x64xf32, #tpu.memory_space<vmem>>, vector<1x64xf32>
    %113 = vector.shape_cast %111 : vector<16x64xf32> to vector<16x1x64xf32>
    %114 = vector.shape_cast %110 : vector<16x64xf32> to vector<1x16x64xf32>
    %115 = vector.broadcast %113 : vector<16x1x64xf32> to vector<16x16x64xf32>
    %116 = vector.broadcast %114 : vector<1x16x64xf32> to vector<16x16x64xf32>
    %117 = arith.addf %115, %116 : vector<16x16x64xf32>
    %cst_40 = arith.constant 2.000000e-01 : f32
    %118 = vector.broadcast %cst_40 : f32 to vector<16x16x64xf32>
    %119 = arith.mulf %118, %117 : vector<16x16x64xf32>
    %120 = arith.maximumf %117, %119 : vector<16x16x64xf32>
    %121 = vector.shape_cast %112 : vector<1x64xf32> to vector<1x1x64xf32>
    %122 = vector.broadcast %121 : vector<1x1x64xf32> to vector<16x16x64xf32>
    %123 = arith.mulf %120, %122 : vector<16x16x64xf32>
    %cst_41 = arith.constant dense<0.000000e+00> : vector<16x16xf32>
    %124 = vector.multi_reduction <add>, %123, %cst_41 [2] : vector<16x16x64xf32> to vector<16x16xf32>
    %cst_42 = arith.constant dense<0xFF800000> : vector<16xf32>
    %125 = vector.multi_reduction <maximumf>, %124, %cst_42 [1] : vector<16x16xf32> to vector<16xf32>
    %126 = vector.shape_cast %125 : vector<16xf32> to vector<16x1xf32>
    %127 = vector.broadcast %126 : vector<16x1xf32> to vector<16x16xf32>
    %128 = arith.subf %124, %127 : vector<16x16xf32>
    %129 = math.exp %128 : vector<16x16xf32>
    %cst_43 = arith.constant dense<0.000000e+00> : vector<16xf32>
    %130 = vector.multi_reduction <add>, %129, %cst_43 [1] : vector<16x16xf32> to vector<16xf32>
    %131 = vector.shape_cast %130 : vector<16xf32> to vector<16x1xf32>
    %132 = tpu.reciprocal %131 {approx = true} : vector<16x1xf32> -> vector<16x1xf32>
    %133 = vector.broadcast %132 : vector<16x1xf32> to vector<16x16xf32>
    %134 = arith.mulf %129, %133 : vector<16x16xf32>
    %135 = arith.truncf %134 : vector<16x16xf32> to vector<16x16xbf16>
    %136 = arith.truncf %110 : vector<16x64xf32> to vector<16x64xbf16>
    %cst_44 = arith.constant dense<0.000000e+00> : vector<16x64xf32>
    %137 = tpu.matmul %135, %136, %cst_44 {dimension_numbers = #tpu.dot_dimension_numbers<[1], [0], [0], [1], [0, 0, 1, 1], [], []>} : vector<16x16xbf16>, vector<16x64xbf16>, vector<16x64xf32> -> vector<16x64xf32>
    %c0_45 = arith.constant 0 : index
    %c0_46 = arith.constant 0 : index
    %138 = vector.load %arg11[%c0_45, %c0_46] : memref<1x64xf32, #tpu.memory_space<vmem>>, vector<1x64xf32>
    %139 = vector.broadcast %138 : vector<1x64xf32> to vector<16x64xf32>
    %140 = arith.addf %137, %139 : vector<16x64xf32>
    %141 = arith.truncf %140 : vector<16x64xf32> to vector<16x64xbf16>
    %c0_47 = arith.constant 0 : index
    %c0_48 = arith.constant 0 : index
    %142 = vector.load %arg12[%c0_47, %c0_48] : memref<64x128xbf16, #tpu.memory_space<vmem>>, vector<64x128xbf16>
    %cst_49 = arith.constant dense<0.000000e+00> : vector<16x128xf32>
    %143 = tpu.matmul %141, %142, %cst_49 {dimension_numbers = #tpu.dot_dimension_numbers<[1], [0], [0], [1], [0, 0, 1, 1], [], []>} : vector<16x64xbf16>, vector<64x128xbf16>, vector<16x128xf32> -> vector<16x128xf32>
    %144 = vector.extract_strided_slice %143 {offsets = [0, 0], sizes = [16, 64], strides = [1, 1]} : vector<16x128xf32> to vector<16x64xf32>
    %145 = vector.extract_strided_slice %143 {offsets = [0, 64], sizes = [16, 64], strides = [1, 1]} : vector<16x128xf32> to vector<16x64xf32>
    %c0_50 = arith.constant 0 : index
    %c0_51 = arith.constant 0 : index
    %146 = vector.load %arg13[%c0_50, %c0_51] : memref<1x64xf32, #tpu.memory_space<vmem>>, vector<1x64xf32>
    %147 = vector.shape_cast %145 : vector<16x64xf32> to vector<16x1x64xf32>
    %148 = vector.shape_cast %144 : vector<16x64xf32> to vector<1x16x64xf32>
    %149 = vector.broadcast %147 : vector<16x1x64xf32> to vector<16x16x64xf32>
    %150 = vector.broadcast %148 : vector<1x16x64xf32> to vector<16x16x64xf32>
    %151 = arith.addf %149, %150 : vector<16x16x64xf32>
    %cst_52 = arith.constant 2.000000e-01 : f32
    %152 = vector.broadcast %cst_52 : f32 to vector<16x16x64xf32>
    %153 = arith.mulf %152, %151 : vector<16x16x64xf32>
    %154 = arith.maximumf %151, %153 : vector<16x16x64xf32>
    %155 = vector.shape_cast %146 : vector<1x64xf32> to vector<1x1x64xf32>
    %156 = vector.broadcast %155 : vector<1x1x64xf32> to vector<16x16x64xf32>
    %157 = arith.mulf %154, %156 : vector<16x16x64xf32>
    %cst_53 = arith.constant dense<0.000000e+00> : vector<16x16xf32>
    %158 = vector.multi_reduction <add>, %157, %cst_53 [2] : vector<16x16x64xf32> to vector<16x16xf32>
    %cst_54 = arith.constant dense<0xFF800000> : vector<16xf32>
    %159 = vector.multi_reduction <maximumf>, %158, %cst_54 [1] : vector<16x16xf32> to vector<16xf32>
    %160 = vector.shape_cast %159 : vector<16xf32> to vector<16x1xf32>
    %161 = vector.broadcast %160 : vector<16x1xf32> to vector<16x16xf32>
    %162 = arith.subf %158, %161 : vector<16x16xf32>
    %163 = math.exp %162 : vector<16x16xf32>
    %cst_55 = arith.constant dense<0.000000e+00> : vector<16xf32>
    %164 = vector.multi_reduction <add>, %163, %cst_55 [1] : vector<16x16xf32> to vector<16xf32>
    %165 = vector.shape_cast %164 : vector<16xf32> to vector<16x1xf32>
    %166 = tpu.reciprocal %165 {approx = true} : vector<16x1xf32> -> vector<16x1xf32>
    %167 = vector.broadcast %166 : vector<16x1xf32> to vector<16x16xf32>
    %168 = arith.mulf %163, %167 : vector<16x16xf32>
    %169 = arith.truncf %168 : vector<16x16xf32> to vector<16x16xbf16>
    %170 = arith.truncf %144 : vector<16x64xf32> to vector<16x64xbf16>
    %cst_56 = arith.constant dense<0.000000e+00> : vector<16x64xf32>
    %171 = tpu.matmul %169, %170, %cst_56 {dimension_numbers = #tpu.dot_dimension_numbers<[1], [0], [0], [1], [0, 0, 1, 1], [], []>} : vector<16x16xbf16>, vector<16x64xbf16>, vector<16x64xf32> -> vector<16x64xf32>
    %c0_57 = arith.constant 0 : index
    %c0_58 = arith.constant 0 : index
    %172 = vector.load %arg14[%c0_57, %c0_58] : memref<1x64xf32, #tpu.memory_space<vmem>>, vector<1x64xf32>
    %173 = vector.broadcast %172 : vector<1x64xf32> to vector<16x64xf32>
    %174 = arith.addf %171, %173 : vector<16x64xf32>
    %c0_59 = arith.constant 0 : index
    %c0_60 = arith.constant 0 : index
    %175 = vector.load %arg19[%c0_59, %c0_60] : memref<1x256xf32, #tpu.memory_space<vmem>>, vector<1x256xf32>
    %176 = arith.truncf %72 : vector<16x32xf32> to vector<16x32xbf16>
    %c0_61 = arith.constant 0 : index
    %c0_62 = arith.constant 0 : index
    %177 = vector.load %arg15[%c0_61, %c0_62] : memref<32x256xbf16, #tpu.memory_space<vmem>>, vector<32x256xbf16>
    %cst_63 = arith.constant dense<0.000000e+00> : vector<16x256xf32>
    %178 = tpu.matmul %176, %177, %cst_63 {dimension_numbers = #tpu.dot_dimension_numbers<[1], [0], [0], [1], [0, 0, 1, 1], [], []>} : vector<16x32xbf16>, vector<32x256xbf16>, vector<16x256xf32> -> vector<16x256xf32>
    %179 = vector.broadcast %175 : vector<1x256xf32> to vector<16x256xf32>
    %180 = arith.addf %179, %178 : vector<16x256xf32>
    %181 = arith.truncf %106 : vector<16x64xf32> to vector<16x64xbf16>
    %c0_64 = arith.constant 0 : index
    %c0_65 = arith.constant 0 : index
    %182 = vector.load %arg16[%c0_64, %c0_65] : memref<64x256xbf16, #tpu.memory_space<vmem>>, vector<64x256xbf16>
    %cst_66 = arith.constant dense<0.000000e+00> : vector<16x256xf32>
    %183 = tpu.matmul %181, %182, %cst_66 {dimension_numbers = #tpu.dot_dimension_numbers<[1], [0], [0], [1], [0, 0, 1, 1], [], []>} : vector<16x64xbf16>, vector<64x256xbf16>, vector<16x256xf32> -> vector<16x256xf32>
    %184 = arith.addf %180, %183 : vector<16x256xf32>
    %185 = arith.truncf %140 : vector<16x64xf32> to vector<16x64xbf16>
    %c0_67 = arith.constant 0 : index
    %c0_68 = arith.constant 0 : index
    %186 = vector.load %arg17[%c0_67, %c0_68] : memref<64x256xbf16, #tpu.memory_space<vmem>>, vector<64x256xbf16>
    %cst_69 = arith.constant dense<0.000000e+00> : vector<16x256xf32>
    %187 = tpu.matmul %185, %186, %cst_69 {dimension_numbers = #tpu.dot_dimension_numbers<[1], [0], [0], [1], [0, 0, 1, 1], [], []>} : vector<16x64xbf16>, vector<64x256xbf16>, vector<16x256xf32> -> vector<16x256xf32>
    %188 = arith.addf %184, %187 : vector<16x256xf32>
    %189 = arith.truncf %174 : vector<16x64xf32> to vector<16x64xbf16>
    %c0_70 = arith.constant 0 : index
    %c0_71 = arith.constant 0 : index
    %190 = vector.load %arg18[%c0_70, %c0_71] : memref<64x256xbf16, #tpu.memory_space<vmem>>, vector<64x256xbf16>
    %cst_72 = arith.constant dense<0.000000e+00> : vector<16x256xf32>
    %191 = tpu.matmul %189, %190, %cst_72 {dimension_numbers = #tpu.dot_dimension_numbers<[1], [0], [0], [1], [0, 0, 1, 1], [], []>} : vector<16x64xbf16>, vector<64x256xbf16>, vector<16x256xf32> -> vector<16x256xf32>
    %192 = arith.addf %188, %191 : vector<16x256xf32>
    %cst_73 = arith.constant 0.000000e+00 : f32
    %193 = vector.broadcast %cst_73 : f32 to vector<16x256xf32>
    %194 = arith.maximumf %192, %193 : vector<16x256xf32>
    %195 = arith.truncf %194 : vector<16x256xf32> to vector<16x256xbf16>
    %c0_74 = arith.constant 0 : index
    %c0_75 = arith.constant 0 : index
    %196 = vector.load %arg20[%c0_74, %c0_75] : memref<256x64xbf16, #tpu.memory_space<vmem>>, vector<256x64xbf16>
    %cst_76 = arith.constant dense<0.000000e+00> : vector<16x64xf32>
    %197 = tpu.matmul %195, %196, %cst_76 {dimension_numbers = #tpu.dot_dimension_numbers<[1], [0], [0], [1], [0, 0, 1, 1], [], []>} : vector<16x256xbf16>, vector<256x64xbf16>, vector<16x64xf32> -> vector<16x64xf32>
    %c0_77 = arith.constant 0 : index
    %c0_78 = arith.constant 0 : index
    %198 = vector.load %arg21[%c0_77, %c0_78] : memref<1x64xf32, #tpu.memory_space<vmem>>, vector<1x64xf32>
    %199 = vector.broadcast %198 : vector<1x64xf32> to vector<16x64xf32>
    %200 = arith.addf %197, %199 : vector<16x64xf32>
    %cst_79 = arith.constant 0.000000e+00 : f32
    %201 = vector.broadcast %cst_79 : f32 to vector<16x64xf32>
    %202 = arith.maximumf %200, %201 : vector<16x64xf32>
    %203 = arith.truncf %202 : vector<16x64xf32> to vector<16x64xbf16>
    %c0_80 = arith.constant 0 : index
    %c0_81 = arith.constant 0 : index
    %204 = vector.load %arg22[%c0_80, %c0_81] : memref<64x128xbf16, #tpu.memory_space<vmem>>, vector<64x128xbf16>
    %cst_82 = arith.constant dense<0.000000e+00> : vector<16x128xf32>
    %205 = tpu.matmul %203, %204, %cst_82 {dimension_numbers = #tpu.dot_dimension_numbers<[1], [0], [0], [1], [0, 0, 1, 1], [], []>} : vector<16x64xbf16>, vector<64x128xbf16>, vector<16x128xf32> -> vector<16x128xf32>
    %c0_83 = arith.constant 0 : index
    %c0_84 = arith.constant 0 : index
    %206 = vector.load %arg23[%c0_83, %c0_84] : memref<1x128xf32, #tpu.memory_space<vmem>>, vector<1x128xf32>
    %207 = vector.broadcast %206 : vector<1x128xf32> to vector<16x128xf32>
    %208 = arith.addf %205, %207 : vector<16x128xf32>
    %c0_85 = arith.constant 0 : index
    %c0_86 = arith.constant 0 : index
    %209 = vector.load %arg24[%c0_85, %c0_86] : memref<16x1xf32, #tpu.memory_space<vmem>>, vector<16x1xf32>
    %210 = math.tanh %208 : vector<16x128xf32>
    %211 = vector.broadcast %209 : vector<16x1xf32> to vector<16x128xf32>
    %212 = arith.mulf %211, %210 : vector<16x128xf32>
    %c0_87 = arith.constant 0 : index
    %c0_88 = arith.constant 0 : index
    %213 = vector.load %arg25[%c0_87, %c0_88] : memref<16x128xf32, #tpu.memory_space<vmem>>, vector<16x128xf32>
    tpu.vector_store %arg25[%c0_87, %c0_88], %212 {strides = array<i32>} : memref<16x128xf32, #tpu.memory_space<vmem>>, vector<16x128xf32>,
    return
  }
}

</mosaic_0001>

<bundles_post_ra>
// kernel: multi_mean_displacer_forward.1
= control target key start
LH: loop header
LB: loop body
LE: loop exit
PB: predicated region body
PF: predicated region fallthrough
CT: control target
= control target key end

     0   :  { %s12142_s0 = inlined_call_operand.vmem [shape: f32[16,16], index: 0, kind: input, shape index: {}]   ;;  %s12143_s1 = inlined_call_operand.hbm [shape: bf16[16,64], index: 1, kind: input, shape index: {}]   ;;  %s12144_s2 = inlined_call_operand.vmem [shape: f32[1,64], index: 2, kind: input, shape index: {}]   ;;  %s12145_s3 = inlined_call_operand.hbm [shape: bf16[64,128], index: 3, kind: input, shape index: {}]   ;;  %s12146_s4 = inlined_call_operand.vmem [shape: f32[1,32], index: 4, kind: input, shape index: {}]   ;;  %s12147_s5 = inlined_call_operand.vmem [shape: f32[1,32], index: 5, kind: input, shape index: {}]   ;;  %s12148_s6 = inlined_call_operand.hbm [shape: bf16[32,128], index: 6, kind: input, shape index: {}]   ;;  %s12149_s7 = inlined_call_operand.vmem [shape: f32[1,64], index: 7, kind: input, shape index: {}]   ;;  %s12150_s8 = inlined_call_operand.vmem [shape: f32[1,64], index: 8, kind: input, shape index: {}]   ;;  %s12151_s9 = inlined_call_operand.hbm [shape: bf16[64,128], index: 9, kind: input, shape index: {}]   ;;  %s12152_s10 = inlined_call_operand.vmem [shape: f32[1,64], index: 10, kind: input, shape index: {}]   ;;  %s12153_s11 = inlined_call_operand.vmem [shape: f32[1,64], index: 11, kind: input, shape index: {}]   ;;  %s12154_s12 = inlined_call_operand.hbm [shape: bf16[64,128], index: 12, kind: input, shape index: {}]   ;;  %s12155_s13 = inlined_call_operand.vmem [shape: f32[1,64], index: 13, kind: input, shape index: {}]   ;;  %s12156_s14 = inlined_call_operand.vmem [shape: f32[1,64], index: 14, kind: input, shape index: {}]   ;;  %s12157_s15 = inlined_call_operand.hbm [shape: bf16[32,256], index: 15, kind: input, shape index: {}]   ;;  %s12158_s16 = inlined_call_operand.vmem [shape: bf16[64,256], index: 16, kind: input, shape index: {}]   ;;  %s12159_s17 = inlined_call_operand.vmem [shape: bf16[64,256], index: 17, kind: input, shape index: {}]   ;;  %s12160_s18 = inlined_call_operand.vmem [shape: bf16[64,256], index: 18, kind: input, shape index: {}]   ;;  %s12161_s19 = inlined_call_operand.hbm [shape: f32[1,256], index: 19, kind: input, shape index: {}]   ;;  %s12162_s20 = inlined_call_operand.vmem [shape: bf16[256,64], index: 20, kind: input, shape index: {}]   ;;  %s12163_s21 = inlined_call_operand.hbm [shape: f32[1,64], index: 21, kind: input, shape index: {}]   ;;  %s12164_s22 = inlined_call_operand.hbm [shape: bf16[64,128], index: 22, kind: input, shape index: {}]   ;;  %s12165_s23 = inlined_call_operand.hbm [shape: f32[1,128], index: 23, kind: input, shape index: {}]   ;;  %s12166_s24 = inlined_call_operand.vmem [shape: f32[16,1], index: 24, kind: input, shape index: {}]   ;;  %s12167_s25 = inlined_call_operand.vmem [shape: f32[16,128], index: 25, kind: output, shape index: {}]  }
   0x1   :  { %12270 = sst [smem:[#allocation69_spill]] %s12142_s0 }
   0x2   :  { %12271 = sst [smem:[#allocation70_spill]] %s12143_s1 }
   0x3   :  { %12272 = sst [smem:[#allocation71_spill]] %s12144_s2 }
   0x4   :  { %12273 = sst [smem:[#allocation72_spill]] %s12145_s3 }
   0x5   :  { %12274 = sst [smem:[#allocation73_spill]] %s12146_s4 }
   0x6   :  { %12275 = sst [smem:[#allocation74_spill]] %s12147_s5 }
   0x7   :  { %12276 = sst [smem:[#allocation75_spill]] %s12148_s6 }
   0x8   :  { %12277 = sst [smem:[#allocation76_spill]] %s12149_s7 }
   0x9   :  { %12278 = sst [smem:[#allocation77_spill]] %s12150_s8 }
   0xa   :  { %12279 = sst [smem:[#allocation78_spill]] %s12151_s9 }
   0xb   :  { %12280 = sst [smem:[#allocation79_spill]] %s12156_s14 }
   0xc   :  { %12281 = sst [smem:[#allocation80_spill]] %s12167_s25 }
   0xd   :  { %30 = vsyncpa [#allocation3], 0 }
   0xe   :  { %31 = vsyncpa [#allocation5], 0 }
   0xf   :  { %32 = vsyncpa [#allocation8], 0 }
  0x10   :  { %33 = vsyncpa [#allocation11], 0 }
  0x11   :  { %34 = vsyncpa [#allocation14], 0 }
  0x12   :  { %35 = vsyncpa [#allocation17], 0  ;;  %s12282_s6 = sld [smem:[#allocation72_spill]]  ;;  %s7603_s7 = smov [#allocation4]  }
  0x13   :  { %s59_s3 = sshll.u32 %s7603_s7, 4  ;;  %s12283_s8 = sld [smem:[#allocation78_spill]]  ;;  %s60_s3 = int_to_ptr.vmem [resolvable:$true] %s59_s3 }
  0x14   :  { %s12170_s4 = smov 64   ;;  %s12172_s28 = smov 4  }
  0x15   :  { %s7606_s9 = smov [#allocation7]   ;;  %s125_s2 = sshll.u32 %s12157_s15, 4  ;;  %s126_s2 = int_to_ptr.hbm [resolvable:$true] %s125_s2 }
  0x16   :  { %s93_s5 = sshll.u32 %s7606_s9, 4  ;;  %s7610_s9 = smov [#allocation13]   ;;  %s94_s5 = int_to_ptr.vmem [resolvable:$true] %s93_s5 }
  0x17   :  { %s160_s0 = sshll.u32 %s7610_s9, 4  ;;  %s12284_s25 = sld [smem:[#allocation70_spill]]  ;;  %s161_s0 = int_to_ptr.vmem [resolvable:$true] %s160_s0 }
  0x18   :  { %s57_s30 = sshll.u32 %s12282_s6, 4  ;;  %s7607_s6 = smov [#allocation10]   ;;  %s58_s30 = int_to_ptr.hbm [resolvable:$true] %s57_s30 }
  0x19   :  { %s91_s27 = sshll.u32 %s12283_s8, 4  ;;  %s127_s7 = sshll.u32 %s7607_s6, 4  ;;  %s92_s27 = int_to_ptr.hbm [resolvable:$true] %s91_s27  ;;  %s128_s7 = int_to_ptr.vmem [resolvable:$true] %s127_s7 }
  0x1a   :  { %65 = dma.hbm_to_vmem [thread:$0]  %s58_s30, 512, %s60_s3, [#allocation5], %s12170_s4, %s12170_s4, %s12172_s28  }
  0x1b   :  { %99 = dma.hbm_to_vmem [thread:$0]  %s92_s27, 512, %s94_s5, [#allocation8], %s12170_s4, %s12170_s4, %s12172_s28  }
  0x1c   :  { %s158_s30 = sshll.u32 %s12163_s21, 4  ;;  %s7608_s3 = smov 128   ;;  %s159_s30 = int_to_ptr.hbm [resolvable:$true] %s158_s30 }
  0x1d   :  { %s7609_s8 = smov 8   ;;  %s42_s14 = sshll.u32 %s12284_s25, 4  ;;  %s43_s14 = int_to_ptr.hbm [resolvable:$true] %s42_s14 }
  0x1e   :  { %133 = dma.hbm_to_vmem [thread:$0]  %s126_s2, 512, %s128_s7, [#allocation11], %s7608_s3, %s7608_s3, %s7609_s8  }
  0x1f   :  { %163 = dma.hbm_to_vmem [thread:$0]  %s159_s30, 16, %s161_s0, [#allocation14]  }
  0x20   :  { %s12285_s6 = sld [smem:[#allocation75_spill]]  ;;  %s7611_s28 = smov [#allocation2]  }
  0x21   :  { %s44_s26 = sshll.u32 %s7611_s28, 4  ;;  %s12286_s21 = smov 4   ;;  %s45_s26 = int_to_ptr.vmem [resolvable:$true] %s44_s26 }
  0x22   :  { %s12287_s2 = smov 64   ;;  %s7612_s7 = smov [#allocation6]  }
  0x23   :  { %50 = dma.hbm_to_vmem [thread:$0]  %s43_s14, 128, %s45_s26, [#allocation3], %s12287_s2, %s12287_s2, %s12286_s21  }
  0x24   :  { %s76_s1 = sshll.u32 %s7612_s7, 4  ;;  %s108_s25 = sshll.u32 %s12154_s12, 4  ;;  %s77_s1 = int_to_ptr.vmem [resolvable:$true] %s76_s1  ;;  %s109_s25 = int_to_ptr.hbm [resolvable:$true] %s108_s25 }
  0x25   :  { %s145_s9 = sshll.u32 %s12161_s19, 4  ;;  %s7613_s0 = smov [#allocation9]   ;;  %s146_s9 = int_to_ptr.hbm [resolvable:$true] %s145_s9 }
  0x26   :  { %s74_s4 = sshll.u32 %s12285_s6, 4  ;;  %s110_s15 = sshll.u32 %s7613_s0, 4  ;;  %s75_s4 = int_to_ptr.hbm [resolvable:$true] %s74_s4  ;;  %s111_s15 = int_to_ptr.vmem [resolvable:$true] %s110_s15 }
  0x27   :  { %82 = dma.hbm_to_vmem [thread:$0]  %s75_s4, 256, %s77_s1, [#allocation5], %s12287_s2, %s12287_s2, %s12286_s21  }
  0x28   :  { %116 = dma.hbm_to_vmem [thread:$0]  %s109_s25, 512, %s111_s15, [#allocation8], %s12287_s2, %s12287_s2, %s12286_s21  }
  0x29   :  { %s7614_s14 = smov [#allocation12]   ;;  %s168_s5 = sshll.u32 %s12164_s22, 4  ;;  %s169_s5 = int_to_ptr.hbm [resolvable:$true] %s168_s5 }
  0x2a   :  { %s147_s12 = sshll.u32 %s7614_s14, 4  ;;  %s182_s19 = sshll.u32 %s12165_s23, 4  ;;  %s148_s12 = int_to_ptr.vmem [resolvable:$true] %s147_s12  ;;  %s183_s19 = int_to_ptr.hbm [resolvable:$true] %s182_s19 }
  0x2b   :  { %150 = dma.hbm_to_vmem [thread:$0]  %s146_s9, 32, %s148_s12, [#allocation11]  }
  0x2c   :  { %s7615_s26 = smov [#allocation15]   ;;  %s7616_s1 = smov [#allocation16]  }
  0x2d   :  { %s170_s7 = sshll.u32 %s7615_s26, 4  ;;  %s184_s3 = sshll.u32 %s7616_s1, 4  ;;  %s171_s7 = int_to_ptr.vmem [resolvable:$true] %s170_s7  ;;  %s185_s3 = int_to_ptr.vmem [resolvable:$true] %s184_s3 }
  0x2e   :  { %176 = dma.hbm_to_vmem [thread:$0]  %s169_s5, 512, %s171_s7, [#allocation14], %s12287_s2, %s12287_s2, %s12286_s21  }
  0x2f   :  { %187 = dma.hbm_to_vmem [thread:$0]  %s183_s19, 16, %s185_s3, [#allocation17]  }
  0x30   :  { %7591 = dma.done.wait [#allocation3], 128  }
  0x31   :  { %7592 = vsyncadd [#allocation3], 4294967168 }
  0x32   :  { %7593 = dma.done.wait [#allocation5], 768  }
  0x33   :  { %7594 = vsyncadd [#allocation5], 4294966528 }
  0x34   :  { %7595 = dma.done.wait [#allocation8], 1024  }
  0x35   :  { %7596 = vsyncadd [#allocation8], 4294966272 }
  0x36   :  { %7597 = dma.done.wait [#allocation11], 544  }
  0x37   :  { %7598 = vsyncadd [#allocation11], 4294966752 }
  0x38   :  { %7599 = dma.done.wait [#allocation14], 528  }
  0x39   :  { %7600 = vsyncadd [#allocation14], 4294966768 }
  0x3a   :  { %7601 = dma.done.wait [#allocation17], 16  }
  0x3b   :  { %7602 = vsyncadd [#allocation17], 4294967280  ;;  %v6913_v0 = vld [vmem:[#allocation2] sm:$0xff]  ;;  %s12288_s21 = sld [smem:[#allocation69_spill]]  ;;  %vm246_vm0 = vcmask 130048   ;;  %v6916_v5 = vld [vmem:[#allocation4 + $0x10] sm:$0xff] }
  0x3c   :  { %v6917_v4 = vld [vmem:[#allocation4 + $0x18] sm:$0xff]  ;;  %257 = vmatpush.bf16.msra.mxu0 %v6913_v0  ;;  %v6915_v6 = vld [vmem:[#allocation4 + $0x8] sm:$0xff]  ;;  %v6914_v7 = vld [vmem:[#allocation4] sm:$0xff]  ;;  %s12289_s9 = sld [smem:[#allocation73_spill]]  ;;  %s7617_s0 = smov 96   ;;  %vm297_vm1 = vcmask 523264  }
  0x3d   :  { %305 = vmatpush.bf16.msra.mxu1 %v6917_v4  ;;  %s12290_s12 = sld [smem:[#allocation71_spill]]  ;;  %s7618_s29 = smov 32   ;;  %vm631_vm2 = vcmask 261120   ;;  %vm765_vm3 = vcmask 130112   ;;  %vm812_vm4 = vcmask 1041409   ;;  %vm814_vm5 = vcmask 1042434  }
  0x3e   :  { %vm816_vm6 = vcmask 1043459   ;;  %vm818_vm7 = vcmask 1044484   ;;  %vm820_vm8 = vcmask 1045509   ;;  %vm822_vm9 = vcmask 1046534   ;;  %s12432_s4 = sld [smem:[#allocation76_spill]] }
  0x3f   :  { %vm824_vm10 = vcmask 1047559   ;;  %s12433_s26 = sld [smem:[#allocation74_spill]] }
  0x40   :  { %s12451_s23 = sld [smem:[#allocation77_spill]] }
  0x41   :  { %v231_v1 = vld [vmem:[%s12288_s21] sm:$0xff]  ;;  %v232_v2 = vld [vmem:[%s12288_s21 + $0x8] sm:$0xff]  ;;  %306 = vmatpush.bf16.msra.mxu1 %v6916_v5 }
  0x42   :  { %v233_v3 = vpack.c.bf16 %v232_v2, %v231_v1  ;;  %v6997_v8 = vld [vmem:[%s12289_s9] ss:$0 sm:$0xff] }
  0x43   :  { %1254 = vrot.lane.b32.xlu0 %v6997_v8, %s7617_s0  ;;  %v6996_v10 = vld [vmem:[%s12290_s12] ss:$0 sm:$0xff]  ;;  %468 = vrot.lane.b32.xlu1 %v6997_v8, %s7618_s29  ;;  %s12482_s12 = sld [smem:[#allocation79_spill]] }
  0x44   :  { %6646 = vmatmul.msk.bf16.vlgmr.msra.gmra.mxu0 %vm246_vm0, %v233_v3 }
  0x45   :  { %307 = vmatpush.bf16.msra.mxu1 %v6915_v6 }
  0x49   :  { %308 = vmatpush.bf16.msra.mxu1 %v6914_v7 }
  0xb5   :  { %v7827_v18 = vpop.permute.xlu0 %1254  ;;  %v7858_v39 = vpop.permute.xlu1 %468 }
  0xc1   :  { %v259_v9 = vpop.f32.mrf.mxu0 }
  0xc2   :  { %v260_v12 = vadd.f32 %v6996_v10, %v259_v9 }
  0xc9   :  { %v261_v11 = vpop.f32.mrf.mxu0 }
  0xca   :  { %v262_v13 = vadd.f32 %v6996_v10, %v261_v11 }
  0xcc   :  { %v264_v14 = vpack.c.bf16 %v262_v13, %v260_v12 }
  0xce   :  { %6663 = vmatmul.msk.bf16.vlgmr.msra.gmra.mxu1 %vm297_vm1, %v264_v14 }
 0x14b   :  { %v7814_v15 = vpop.f32.mrf.mxu1 }
 0x14c   :  { %364 = vrot.lane.b32.xlu0 %v7814_v15, %s7618_s29  ;;  %v318_v19 = vrot.slane %v7814_v15, 1  ;;  %v320_v20 = vrot.slane %v7814_v15, 3  ;;  %v319_v21 = vrot.slane %v7814_v15, 2  ;;  %v321_v22 = vrot.slane %v7814_v15, 4 }
 0x14d   :  { %v323_v23 = vrot.slane %v7814_v15, 6  ;;  %v332_v24 = vperm.slane %v7814_v15, 0  ;;  %v322_v41 = vrot.slane %v7814_v15, 5  ;;  %v324_v45 = vrot.slane %v7814_v15, 7 }
 0x14e   :  { %v7835_v25 = vperm.slane %v318_v19, 0  ;;  %v7837_v26 = vperm.slane %v320_v20, 0  ;;  %v7841_v28 = vperm.slane %v319_v21, 0  ;;  %v7850_v32 = vperm.slane %v321_v22, 0 }
 0x14f   :  { %v7854_v34 = vperm.slane %v323_v23, 0  ;;  %v7879_v53 = vperm.slane %v322_v41, 0  ;;  %v7881_v54 = vperm.slane %v324_v45, 0 }
 0x153   :  { %v7818_v16 = vpop.f32.mrf.mxu1 }
 0x154   :  { %366 = vrot.lane.b32.xlu0 %v7818_v16, %s7618_s29  ;;  %v7824_v17 = vpack.c.bf16 %v7818_v16, %v7814_v15  ;;  %v325_v47 = vrot.slane %v7818_v16, 1  ;;  %v326_v62 = vrot.slane %v7818_v16, 2  ;;  %v328_v63 = vrot.slane %v7818_v16, 4 }
 0x155   :  { %v340_v6 = vperm.slane %v7818_v16, 0  ;;  %v327_v19 = vrot.slane %v7818_v16, 3  ;;  %v329_v20 = vrot.slane %v7818_v16, 5  ;;  %v331_v21 = vrot.slane %v7818_v16, 7 }
 0x156   :  { %12291 = vst [vmem:[#allocation24_spill] sm:$0xff] %v7824_v17  ;;  %2472 = vmatpush.bf16.msra.mxu3 %v7824_v17  ;;  %v7884_v55 = vperm.slane %v325_v47, 0  ;;  %v7909_v7 = vperm.slane %v326_v62, 0  ;;  %v7912_v8 = vperm.slane %v328_v63, 0 }
 0x1be   :  { %v7839_v27 = vpop.permute.xlu0 %364 }
 0x1bf   :  { %v370_v29 = vadd.f32 %v7839_v27, %v332_v24  ;;  %v372_v30 = vadd.f32 %v7839_v27, %v7835_v25  ;;  %v376_v31 = vadd.f32 %v7839_v27, %v7837_v26  ;;  %v374_v33 = vadd.f32 %v7839_v27, %v7841_v28 }
 0x1c0   :  { %v378_v38 = vadd.f32 %v7839_v27, %v7850_v32  ;;  %v382_v40 = vadd.f32 %v7839_v27, %v7854_v34  ;;  %v380_v58 = vadd.f32 %v7839_v27, %v7879_v53  ;;  %v384_v59 = vadd.f32 %v7839_v27, %v7881_v54 }
 0x1c1   :  { %v402_v35 = vmul.f32 0.2, %v370_v29  ;;  %v404_v36 = vmul.f32 0.2, %v372_v30  ;;  %v408_v37 = vmul.f32 0.2, %v376_v31  ;;  %v388_v61 = vadd.f32 %v7839_v27, %v7884_v55 }
 0x1c2   :  { %v406_v46 = vmul.f32 0.2, %v374_v33  ;;  %v410_v51 = vmul.f32 0.2, %v378_v38  ;;  %v414_v52 = vmul.f32 0.2, %v382_v40  ;;  %v386_v11 = vadd.f32 %v7839_v27, %v340_v6 }
 0x1c3   :  { %v7863_v42 = vmax.f32 %v370_v29, %v402_v35  ;;  %v7865_v43 = vmax.f32 %v372_v30, %v404_v36  ;;  %v7867_v44 = vmax.f32 %v376_v31, %v408_v37  ;;  %v412_v2 = vmul.f32 0.2, %v380_v58 }
 0x1c4   :  { %v7886_v56 = vmax.f32 %v374_v33, %v406_v46  ;;  %v7888_v57 = vmax.f32 %v378_v38, %v410_v51  ;;  %v7894_v60 = vmax.f32 %v382_v40, %v414_v52  ;;  %v416_v3 = vmul.f32 0.2, %v384_v59 }
 0x1c5   :  { %v471_v48 = vmul.f32 %v7858_v39, %v7863_v42  ;;  %v473_v49 = vmul.f32 %v7858_v39, %v7865_v43  ;;  %v477_v50 = vmul.f32 %v7858_v39, %v7867_v44  ;;  %v420_v5 = vmul.f32 0.2, %v388_v61 }
 0x1c6   :  { %v475_v0 = vmul.f32 %v7858_v39, %v7886_v56  ;;  %v479_v1 = vmul.f32 %v7858_v39, %v7888_v57  ;;  %v483_v4 = vmul.f32 %v7858_v39, %v7894_v60  ;;  %v7914_v9 = vmax.f32 %v380_v58, %v412_v2 }
 0x1c7   :  { %535 = vrot.lane.b32.xlu1 %v471_v48, %s7617_s0  ;;  %539 = vrot.lane.b32.xlu2 %v473_v49, %s7617_s0  ;;  %v7916_v10 = vmax.f32 %v384_v59, %v416_v3  ;;  %v390_v12 = vadd.f32 %v7839_v27, %v7909_v7  ;;  %v452_v13 = vmax.f32 %v388_v61, %v420_v5  ;;  %v418_v29 = vmul.f32 0.2, %v386_v11 }
 0x1c8   :  { %547 = vrot.lane.b32.xlu0 %v477_v50, %s7617_s0  ;;  %v394_v14 = vadd.f32 %v7839_v27, %v7912_v8  ;;  %v481_v22 = vmul.f32 %v7858_v39, %v7914_v9  ;;  %v7935_v35 = vperm.slane %v327_v19, 0  ;;  %v7937_v36 = vperm.slane %v329_v20, 0 }
 0x1c9   :  { %v485_v23 = vmul.f32 %v7858_v39, %v7916_v10  ;;  %v422_v30 = vmul.f32 0.2, %v390_v12  ;;  %v489_v31 = vmul.f32 %v7858_v39, %v452_v13  ;;  %v7940_v37 = vperm.slane %v331_v21, 0 }
 0x1ca   :  { %v426_v33 = vmul.f32 0.2, %v394_v14  ;;  %v450_v38 = vmax.f32 %v386_v11, %v418_v29  ;;  %v392_v41 = vadd.f32 %v7839_v27, %v7935_v35  ;;  %v396_v45 = vadd.f32 %v7839_v27, %v7937_v36  ;;  %v7990_v29 = vpop.permute.xlu0 %366 }
 0x1cb   :  { %v454_v40 = vmax.f32 %v390_v12, %v422_v30  ;;  %v400_v47 = vadd.f32 %v7839_v27, %v7940_v37  ;;  %v330_v48 = vrot.slane %v7818_v16, 6  ;;  %v1257_v19 = vmul.f32 %v7827_v18, %v7863_v42 }
 0x1cc   :  { %v458_v46 = vmax.f32 %v394_v14, %v426_v33  ;;  %v487_v49 = vmul.f32 %v7858_v39, %v450_v38  ;;  %v424_v51 = vmul.f32 0.2, %v392_v41  ;;  %v428_v52 = vmul.f32 0.2, %v396_v45 }
 0x1cd   :  { %v491_v50 = vmul.f32 %v7858_v39, %v454_v40  ;;  %v432_v59 = vmul.f32 0.2, %v400_v47  ;;  %v7954_v61 = vperm.slane %v330_v48, 0  ;;  %v1273_v14 = vmul.f32 %v7827_v18, %v450_v38 }
 0x1ce   :  { %v495_v58 = vmul.f32 %v7858_v39, %v458_v46  ;;  %v456_v62 = vmax.f32 %v392_v41, %v424_v51  ;;  %v460_v63 = vmax.f32 %v396_v45, %v428_v52  ;;  %v1277_v20 = vmul.f32 %v7827_v18, %v454_v40 }
 0x1cf   :  { %543 = vrot.lane.b32.xlu1 %v475_v0, %s7617_s0  ;;  %551 = vrot.lane.b32.xlu2 %v479_v1, %s7617_s0  ;;  %v398_v0 = vadd.f32 %v7839_v27, %v7954_v61  ;;  %v464_v1 = vmax.f32 %v400_v47, %v432_v59  ;;  %v1259_v27 = vmul.f32 %v7827_v18, %v7865_v43 }
 0x1d0   :  { %559 = vrot.lane.b32.xlu0 %v483_v4, %s7617_s0  ;;  %v493_v2 = vmul.f32 %v7858_v39, %v456_v62  ;;  %v497_v3 = vmul.f32 %v7858_v39, %v460_v63  ;;  %v1261_v21 = vmul.f32 %v7827_v18, %v7886_v56  ;;  %v1265_v43 = vmul.f32 %v7827_v18, %v7888_v57 }
 0x1d1   :  { %v430_v4 = vmul.f32 0.2, %v398_v0  ;;  %v501_v5 = vmul.f32 %v7858_v39, %v464_v1  ;;  %v1283_v42 = vmul.f32 %v7827_v18, %v460_v63  ;;  %v1263_v56 = vmul.f32 %v7827_v18, %v7867_v44 }
 0x1d2   :  { %v1267_v57 = vmul.f32 %v7827_v18, %v7914_v9  ;;  %v373_v30 = vadd.f32 %v7990_v29, %v7835_v25  ;;  %v1271_v44 = vmul.f32 %v7827_v18, %v7916_v10  ;;  %v379_v10 = vadd.f32 %v7990_v29, %v7850_v32 }
 0x1d3   :  { %v462_v11 = vmax.f32 %v398_v0, %v430_v4  ;;  %v1269_v41 = vmul.f32 %v7827_v18, %v7894_v60  ;;  %v381_v32 = vadd.f32 %v7990_v29, %v7879_v53  ;;  %v377_v48 = vadd.f32 %v7990_v29, %v7837_v26 }
 0x1d4   :  { %v405_v38 = vmul.f32 0.2, %v373_v30  ;;  %v411_v47 = vmul.f32 0.2, %v379_v10  ;;  %v1287_v51 = vmul.f32 %v7827_v18, %v464_v1  ;;  %v383_v63 = vadd.f32 %v7990_v29, %v7854_v34 }
 0x1d5   :  { %v499_v12 = vmul.f32 %v7858_v39, %v462_v11  ;;  %v1285_v9 = vmul.f32 %v7827_v18, %v462_v11  ;;  %v413_v52 = vmul.f32 0.2, %v381_v32  ;;  %v391_v1 = vadd.f32 %v7990_v29, %v7909_v7 }
 0x1d6   :  { %v8013_v25 = vmax.f32 %v373_v30, %v405_v38  ;;  %v8032_v60 = vmax.f32 %v379_v10, %v411_v47  ;;  %v393_v11 = vadd.f32 %v7990_v29, %v7935_v35 }
 0x1d7   :  { %555 = vrot.lane.b32.xlu1 %v481_v22, %s7617_s0  ;;  %563 = vrot.lane.b32.xlu2 %v485_v23, %s7617_s0  ;;  %v1275_v22 = vmul.f32 %v7827_v18, %v452_v13  ;;  %v1279_v23 = vmul.f32 %v7827_v18, %v456_v62  ;;  %v371_v13 = vadd.f32 %v7990_v29, %v332_v24 }
 0x1d8   :  { %571 = vrot.lane.b32.xlu0 %v489_v31, %s7617_s0  ;;  %v1281_v31 = vmul.f32 %v7827_v18, %v458_v46  ;;  %v375_v24 = vadd.f32 %v7990_v29, %v7841_v28  ;;  %v474_v46 = vmul.f32 %v7858_v39, %v8013_v25  ;;  %v480_v59 = vmul.f32 %v7858_v39, %v8032_v60 }
 0x1d9   :  { %v403_v33 = vmul.f32 0.2, %v371_v13  ;;  %v8044_v26 = vmax.f32 %v381_v32, %v413_v52 }
 0x1da   :  { %v407_v45 = vmul.f32 0.2, %v375_v24 }
 0x1db   :  { %v8009_v15 = vmax.f32 %v371_v13, %v403_v33 }
 0x1dc   :  { %v8026_v28 = vmax.f32 %v375_v24, %v407_v45 }
 0x1dd   :  { %v472_v40 = vmul.f32 %v7858_v39, %v8009_v15 }
 0x1df   :  { %567 = vrot.lane.b32.xlu1 %v487_v49, %s7617_s0  ;;  %575 = vrot.lane.b32.xlu2 %v491_v50, %s7617_s0  ;;  %v385_v49 = vadd.f32 %v7990_v29, %v7881_v54  ;;  %v476_v50 = vmul.f32 %v7858_v39, %v8026_v28  ;;  %v387_v54 = vadd.f32 %v7990_v29, %v340_v6  ;;  %v423_v6 = vmul.f32 0.2, %v391_v1 }
 0x1e0   :  { %583 = vrot.lane.b32.xlu0 %v495_v58, %s7617_s0  ;;  %v409_v58 = vmul.f32 0.2, %v377_v48 }
 0x1e1   :  { %v417_v62 = vmul.f32 0.2, %v385_v49  ;;  %v419_v4 = vmul.f32 0.2, %v387_v54 }
 0x1e2   :  { %v8046_v53 = vmax.f32 %v377_v48, %v409_v58  ;;  %v1258_v48 = vmul.f32 %v7827_v18, %v8009_v15 }
 0x1e3   :  { %v8053_v0 = vmax.f32 %v385_v49, %v417_v62  ;;  %v451_v34 = vmax.f32 %v387_v54, %v419_v4 }
 0x1e5   :  { %v486_v16 = vmul.f32 %v7858_v39, %v8053_v0 }
 0x1e7   :  { %579 = vrot.lane.b32.xlu1 %v493_v2, %s7617_s0  ;;  %587 = vrot.lane.b32.xlu2 %v497_v3, %s7617_s0  ;;  %v482_v2 = vmul.f32 %v7858_v39, %v8044_v26  ;;  %v478_v3 = vmul.f32 %v7858_v39, %v8046_v53 }
 0x1e8   :  { %595 = vrot.lane.b32.xlu0 %v501_v5, %s7617_s0  ;;  %v415_v5 = vmul.f32 0.2, %v383_v63 }
 0x1ea   :  { %v8066_v7 = vmax.f32 %v383_v63, %v415_v5  ;;  %v1264_v63 = vmul.f32 %v7827_v18, %v8046_v53  ;;  %v1272_v53 = vmul.f32 %v7827_v18, %v8053_v0 }
 0x1ef   :  { %591 = vrot.lane.b32.xlu1 %v499_v12, %s7617_s0  ;;  %1353 = vrot.lane.b32.xlu2 %v1273_v14, %s7618_s29  ;;  %v389_v12 = vadd.f32 %v7990_v29, %v7884_v55  ;;  %v455_v14 = vmax.f32 %v391_v1, %v423_v6  ;;  %v1270_v6 = vmul.f32 %v7827_v18, %v8066_v7 }
 0x1f0   :  { %1325 = vrot.lane.b32.xlu0 %v1259_v27, %s7618_s29  ;;  %v397_v27 = vadd.f32 %v7990_v29, %v7937_v36 }
 0x1f7   :  { %1321 = vrot.lane.b32.xlu1 %v1257_v19, %s7618_s29  ;;  %1361 = vrot.lane.b32.xlu2 %v1277_v20, %s7618_s29  ;;  %v488_v19 = vmul.f32 %v7858_v39, %v451_v34  ;;  %v484_v20 = vmul.f32 %v7858_v39, %v8066_v7 }
 0x1f8   :  { %1329 = vrot.lane.b32.xlu0 %v1261_v21, %s7618_s29  ;;  %v425_v21 = vmul.f32 0.2, %v393_v11 }
 0x1fa   :  { %v457_v35 = vmax.f32 %v393_v11, %v425_v21 }
 0x1fc   :  { %v494_v13 = vmul.f32 %v7858_v39, %v457_v35  ;;  %v1280_v4 = vmul.f32 %v7827_v18, %v457_v35 }
 0x1ff   :  { %1337 = vrot.lane.b32.xlu2 %v1265_v43, %s7618_s29  ;;  %1357 = vrot.lane.b32.xlu1 %v1275_v22, %s7618_s29  ;;  %v421_v43 = vmul.f32 0.2, %v389_v12  ;;  %v492_v22 = vmul.f32 %v7858_v39, %v455_v14 }
 0x200   :  { %1365 = vrot.lane.b32.xlu0 %v1279_v23, %s7618_s29  ;;  %v429_v23 = vmul.f32 0.2, %v397_v27 }
 0x201   :  { %v453_v36 = vmax.f32 %v389_v12, %v421_v43 }
 0x203   :  { %v490_v30 = vmul.f32 %v7858_v39, %v453_v36  ;;  %v1276_v58 = vmul.f32 %v7827_v18, %v453_v36 }
 0x207   :  { %1373 = vrot.lane.b32.xlu2 %v1283_v42, %s7618_s29  ;;  %1333 = vrot.lane.b32.xlu1 %v1263_v56, %s7618_s29  ;;  %v399_v42 = vadd.f32 %v7990_v29, %v7954_v61  ;;  %v395_v56 = vadd.f32 %v7990_v29, %v7912_v8  ;;  %v401_v8 = vadd.f32 %v7990_v29, %v7940_v37 }
 0x208   :  { %1341 = vrot.lane.b32.xlu0 %v1267_v57, %s7618_s29  ;;  %v461_v57 = vmax.f32 %v397_v27, %v429_v23 }
 0x209   :  { %v433_v45 = vmul.f32 0.2, %v401_v8 }
 0x20a   :  { %v498_v33 = vmul.f32 %v7858_v39, %v461_v57  ;;  %v1284_v1 = vmul.f32 %v7827_v18, %v461_v57 }
 0x20b   :  { %v465_v37 = vmax.f32 %v401_v8, %v433_v45 }
 0x20d   :  { %v502_v49 = vmul.f32 %v7858_v39, %v465_v37  ;;  %v1288_v12 = vmul.f32 %v7827_v18, %v465_v37 }
 0x20f   :  { %1349 = vrot.lane.b32.xlu2 %v1271_v44, %s7618_s29  ;;  %1369 = vrot.lane.b32.xlu1 %v1281_v31, %s7618_s29  ;;  %v431_v44 = vmul.f32 0.2, %v399_v42  ;;  %v427_v31 = vmul.f32 0.2, %v395_v56 }
 0x210   :  { %1377 = vrot.lane.b32.xlu0 %v1285_v9, %s7618_s29 }
 0x211   :  { %v463_v61 = vmax.f32 %v399_v42, %v431_v44  ;;  %v459_v38 = vmax.f32 %v395_v56, %v427_v31 }
 0x217   :  { %537 = vrot.lane.b32.xlu2 %v472_v40, %s7617_s0  ;;  %1345 = vrot.lane.b32.xlu1 %v1269_v41, %s7618_s29  ;;  %v500_v40 = vmul.f32 %v7858_v39, %v463_v61  ;;  %v496_v41 = vmul.f32 %v7858_v39, %v459_v38  ;;  %v1266_v39 = vmul.f32 %v7827_v18, %v8032_v60 }
 0x218   :  { %541 = vrot.lane.b32.xlu0 %v474_v46, %s7617_s0  ;;  %v1274_v46 = vmul.f32 %v7827_v18, %v451_v34  ;;  %v1268_v34 = vmul.f32 %v7827_v18, %v8044_v26 }
 0x21f   :  { %545 = vrot.lane.b32.xlu2 %v476_v50, %s7617_s0  ;;  %1381 = vrot.lane.b32.xlu1 %v1287_v51, %s7618_s29  ;;  %v1278_v50 = vmul.f32 %v7827_v18, %v455_v14  ;;  %v1286_v14 = vmul.f32 %v7827_v18, %v463_v61 }
 0x220   :  { %553 = vrot.lane.b32.xlu0 %v480_v59, %s7617_s0  ;;  %v1260_v59 = vmul.f32 %v7827_v18, %v8013_v25  ;;  %v1262_v25 = vmul.f32 %v7827_v18, %v8026_v28 }
 0x221   :  { %v8081_v55 = vpop.permute.xlu2 %539 }
 0x227   :  { %557 = vrot.lane.b32.xlu2 %v482_v2, %s7617_s0  ;;  %549 = vrot.lane.b32.xlu1 %v478_v3, %s7617_s0  ;;  %v1282_v3 = vmul.f32 %v7827_v18, %v459_v38 }
 0x228   :  { %565 = vrot.lane.b32.xlu0 %v486_v16, %s7617_s0 }
 0x229   :  { %v8099_v10 = vpop.permute.xlu2 %551 }
 0x22a   :  { %v656_v18 = vsel %vm631_vm2, %v8099_v10, 0.0 }
 0x22f   :  { %569 = vrot.lane.b32.xlu2 %v488_v19, %s7617_s0  ;;  %561 = vrot.lane.b32.xlu1 %v484_v20, %s7617_s0 }
 0x230   :  { %577 = vrot.lane.b32.xlu0 %v492_v22, %s7617_s0 }
 0x231   :  { %v564_v32 = vpop.permute.xlu2 %563 }
 0x232   :  { %v674_v42 = vsel %vm631_vm2, %v564_v32, 0.0 }
 0x237   :  { %581 = vrot.lane.b32.xlu2 %v494_v13, %s7617_s0  ;;  %573 = vrot.lane.b32.xlu1 %v490_v30, %s7617_s0  ;;  %v638_v30 = vsel %vm631_vm2, %v8081_v55, 0.0 }
 0x238   :  { %589 = vrot.lane.b32.xlu0 %v498_v33, %s7617_s0 }
 0x239   :  { %v8093_v9 = vpop.permute.xlu1 %535  ;;  %v576_v15 = vpop.permute.xlu2 %575 }
 0x23a   :  { %v8097_v24 = vpop.permute.xlu0 %547  ;;  %v632_v13 = vsel %vm631_vm2, %v8093_v9, 0.0  ;;  %v692_v44 = vsel %vm631_vm2, %v576_v15, 0.0 }
 0x23b   :  { %v650_v9 = vsel %vm631_vm2, %v8097_v24, 0.0 }
 0x23f   :  { %593 = vrot.lane.b32.xlu2 %v500_v40, %s7617_s0  ;;  %585 = vrot.lane.b32.xlu1 %v496_v41, %s7617_s0 }
 0x240   :  { %1355 = vrot.lane.b32.xlu0 %v1274_v46, %s7618_s29 }
 0x241   :  { %v8107_v47 = vpop.permute.xlu1 %543  ;;  %v588_v60 = vpop.permute.xlu2 %587 }
 0x242   :  { %v8109_v29 = vpop.permute.xlu0 %559  ;;  %v644_v61 = vsel %vm631_vm2, %v8107_v47, 0.0  ;;  %v710_v8 = vsel %vm631_vm2, %v588_v60, 0.0 }
 0x243   :  { %v668_v40 = vsel %vm631_vm2, %v8109_v29, 0.0 }
 0x247   :  { %1323 = vrot.lane.b32.xlu2 %v1258_v48, %s7618_s29  ;;  %597 = vrot.lane.b32.xlu1 %v502_v49, %s7617_s0 }
 0x248   :  { %1363 = vrot.lane.b32.xlu0 %v1278_v50, %s7618_s29 }
 0x249   :  { %v8118_v51 = vpop.permute.xlu1 %555  ;;  %v8153_v28 = vpop.permute.xlu2 %1353 }
 0x24a   :  { %v8120_v52 = vpop.permute.xlu0 %571  ;;  %v662_v10 = vsel %vm631_vm2, %v8118_v51, 0.0  ;;  %v1465_v60 = vsel %vm631_vm2, %v8153_v28, 0.0 }
 0x24b   :  { %v686_v37 = vsel %vm631_vm2, %v8120_v52, 0.0 }
 0x24f   :  { %1359 = vrot.lane.b32.xlu2 %v1276_v58, %s7618_s29  ;;  %1327 = vrot.lane.b32.xlu1 %v1260_v59, %s7618_s29 }
 0x250   :  { %1339 = vrot.lane.b32.xlu0 %v1266_v39, %s7618_s29 }
 0x251   :  { %v8130_v62 = vpop.permute.xlu1 %567  ;;  %v8165_v11 = vpop.permute.xlu2 %1361 }
 0x252   :  { %v8132_v54 = vpop.permute.xlu0 %583  ;;  %v680_v47 = vsel %vm631_vm2, %v8130_v62, 0.0 }
 0x253   :  { %v704_v50 = vsel %vm631_vm2, %v8132_v54, 0.0 }
 0x257   :  { %1335 = vrot.lane.b32.xlu2 %v1264_v63, %s7618_s29  ;;  %1331 = vrot.lane.b32.xlu1 %v1262_v25, %s7618_s29 }
 0x258   :  { %1375 = vrot.lane.b32.xlu0 %v1284_v1, %s7618_s29 }
 0x259   :  { %v8142_v2 = vpop.permute.xlu1 %579  ;;  %v8173_v26 = vpop.permute.xlu2 %1337 }
 0x25a   :  { %v8148_v5 = vpop.permute.xlu0 %595  ;;  %v698_v49 = vsel %vm631_vm2, %v8142_v2, 0.0 }
 0x25b   :  { %v722_v15 = vsel %vm631_vm2, %v8148_v5, 0.0 }
 0x25f   :  { %1371 = vrot.lane.b32.xlu2 %v1282_v3, %s7618_s29  ;;  %1367 = vrot.lane.b32.xlu1 %v1280_v4, %s7618_s29 }
 0x260   :  { %1351 = vrot.lane.b32.xlu0 %v1272_v53, %s7618_s29  ;;  %v1477_v53 = vsel %vm631_vm2, %v8165_v11, 0.0 }
 0x261   :  { %v8155_v16 = vpop.permute.xlu1 %591  ;;  %v8177_v21 = vpop.permute.xlu2 %1373 }
 0x262   :  { %v8163_v0 = vpop.permute.xlu0 %1325  ;;  %v716_v39 = vsel %vm631_vm2, %v8155_v16, 0.0 }
 0x263   :  { %v1423_v25 = vsel %vm631_vm2, %v8163_v0, 0.0  ;;  %v1441_v0 = vsel %vm631_vm2, %v8173_v26, 0.0 }
 0x267   :  { %1347 = vrot.lane.b32.xlu2 %v1270_v6, %s7618_s29  ;;  %1343 = vrot.lane.b32.xlu1 %v1268_v34, %s7618_s29 }
 0x269   :  { %v1322_v27 = vpop.permute.xlu1 %1321  ;;  %v8183_v23 = vpop.permute.xlu2 %1349 }
 0x26a   :  { %v8171_v7 = vpop.permute.xlu0 %1329  ;;  %v1417_v45 = vsel %vm631_vm2, %v1322_v27, 0.0 }
 0x26b   :  { %v1429_v4 = vsel %vm631_vm2, %v8171_v7, 0.0  ;;  %v1495_v7 = vsel %vm631_vm2, %v8177_v21, 0.0 }
 0x26f   :  { %1383 = vrot.lane.b32.xlu2 %v1288_v12, %s7618_s29  ;;  %1379 = vrot.lane.b32.xlu1 %v1286_v14, %s7618_s29 }
 0x271   :  { %v1358_v19 = vpop.permute.xlu1 %1357  ;;  %v8188_v56 = vpop.permute.xlu2 %537 }
 0x272   :  { %v8175_v20 = vpop.permute.xlu0 %1365  ;;  %v1471_v32 = vsel %vm631_vm2, %v1358_v19, 0.0  ;;  %v635_v11 = vsel %vm631_vm2, %v8188_v56, 0.0 }
 0x273   :  { %v1483_v34 = vsel %vm631_vm2, %v8175_v20, 0.0 }
 0x279   :  { %v1334_v43 = vpop.permute.xlu1 %1333  ;;  %v8197_v33 = vpop.permute.xlu2 %545 }
 0x27a   :  { %v8179_v22 = vpop.permute.xlu0 %1341  ;;  %v1435_v58 = vsel %vm631_vm2, %v1334_v43, 0.0  ;;  %v647_v26 = vsel %vm631_vm2, %v8197_v33, 0.0 }
 0x27b   :  { %v1447_v27 = vsel %vm631_vm2, %v8179_v22, 0.0  ;;  %v1459_v22 = vsel %vm631_vm2, %v8183_v23, 0.0 }
 0x281   :  { %v1370_v35 = vpop.permute.xlu1 %1369  ;;  %v8210_v41 = vpop.permute.xlu2 %557 }
 0x282   :  { %v8185_v36 = vpop.permute.xlu0 %1377  ;;  %v1489_v62 = vsel %vm631_vm2, %v1370_v35, 0.0  ;;  %v665_v21 = vsel %vm631_vm2, %v8210_v41, 0.0 }
 0x289   :  { %v1346_v57 = vpop.permute.xlu1 %1345  ;;  %v8222_v29 = vpop.permute.xlu2 %569 }
 0x28a   :  { %657 = vadd.xlane.f32.xlu0 %v656_v18  ;;  %v8195_v31 = vpop.permute.xlu0 %541  ;;  %v1453_v2 = vsel %vm631_vm2, %v1346_v57, 0.0  ;;  %v1501_v18 = vsel %vm631_vm2, %v8185_v36, 0.0  ;;  %v683_v23 = vsel %vm631_vm2, %v8222_v29, 0.0 }
 0x28b   :  { %v641_v56 = vsel %vm631_vm2, %v8195_v31, 0.0 }
 0x291   :  { %v1382_v38 = vpop.permute.xlu1 %1381  ;;  %v8233_v52 = vpop.permute.xlu2 %581 }
 0x292   :  { %675 = vadd.xlane.f32.xlu0 %v674_v42  ;;  %v8204_v55 = vpop.permute.xlu0 %553  ;;  %v1507_v16 = vsel %vm631_vm2, %v1382_v38, 0.0  ;;  %v701_v33 = vsel %vm631_vm2, %v8233_v52, 0.0 }
 0x293   :  { %v659_v36 = vsel %vm631_vm2, %v8204_v55, 0.0 }
 0x298   :  { %633 = vadd.xlane.f32.xlu2 %v632_v13 }
 0x299   :  { %639 = vadd.xlane.f32.xlu1 %v638_v30  ;;  %v8213_v46 = vpop.permute.xlu1 %549  ;;  %v8244_v63 = vpop.permute.xlu2 %593 }
 0x29a   :  { %693 = vadd.xlane.f32.xlu0 %v692_v44  ;;  %v8215_v24 = vpop.permute.xlu0 %565  ;;  %v653_v30 = vsel %vm631_vm2, %v8213_v46, 0.0  ;;  %v719_v55 = vsel %vm631_vm2, %v8244_v63, 0.0 }
 0x29b   :  { %v677_v44 = vsel %vm631_vm2, %v8215_v24, 0.0 }
 0x2a0   :  { %645 = vadd.xlane.f32.xlu2 %v644_v61 }
 0x2a1   :  { %651 = vadd.xlane.f32.xlu1 %v650_v9  ;;  %v8224_v48 = vpop.permute.xlu1 %561  ;;  %v8259_v5 = vpop.permute.xlu2 %1323 }
 0x2a2   :  { %711 = vadd.xlane.f32.xlu0 %v710_v8  ;;  %v8230_v51 = vpop.permute.xlu0 %577  ;;  %v671_v9 = vsel %vm631_vm2, %v8224_v48, 0.0  ;;  %v1420_v48 = vsel %vm631_vm2, %v8259_v5, 0.0 }
 0x2a3   :  { %v695_v8 = vsel %vm631_vm2, %v8230_v51, 0.0 }
 0x2a8   :  { %663 = vadd.xlane.f32.xlu2 %v662_v10 }
 0x2a9   :  { %669 = vadd.xlane.f32.xlu1 %v668_v40  ;;  %v8235_v59 = vpop.permute.xlu1 %573  ;;  %v8272_v12 = vpop.permute.xlu2 %1359 }
 0x2aa   :  { %1418 = vadd.xlane.f32.xlu0 %v1417_v45  ;;  %v8242_v54 = vpop.permute.xlu0 %589  ;;  %v689_v45 = vsel %vm631_vm2, %v8235_v59, 0.0  ;;  %v1474_v59 = vsel %vm631_vm2, %v8272_v12, 0.0 }
 0x2ab   :  { %v713_v46 = vsel %vm631_vm2, %v8242_v54, 0.0 }
 0x2b0   :  { %681 = vadd.xlane.f32.xlu2 %v680_v47 }
 0x2b1   :  { %687 = vadd.xlane.f32.xlu1 %v686_v37  ;;  %v8248_v1 = vpop.permute.xlu1 %585  ;;  %v8282_v20 = vpop.permute.xlu2 %1335 }
 0x2b2   :  { %1472 = vadd.xlane.f32.xlu0 %v1471_v32  ;;  %v8253_v3 = vpop.permute.xlu0 %1355  ;;  %v707_v29 = vsel %vm631_vm2, %v8248_v1, 0.0 }
 0x2b3   :  { %v1468_v63 = vsel %vm631_vm2, %v8253_v3, 0.0 }
 0x2b8   :  { %699 = vadd.xlane.f32.xlu2 %v698_v49 }
 0x2b9   :  { %705 = vadd.xlane.f32.xlu1 %v704_v50  ;;  %v8262_v6 = vpop.permute.xlu1 %597  ;;  %v8292_v42 = vpop.permute.xlu2 %1371 }
 0x2ba   :  { %1436 = vadd.xlane.f32.xlu0 %v1435_v58  ;;  %v8264_v28 = vpop.permute.xlu0 %1363  ;;  %v725_v52 = vsel %vm631_vm2, %v8262_v6, 0.0  ;;  %v1492_v3 = vsel %vm631_vm2, %v8292_v42, 0.0 }
 0x2c0   :  { %717 = vadd.xlane.f32.xlu2 %v716_v39 }
 0x2c1   :  { %723 = vadd.xlane.f32.xlu1 %v722_v15  ;;  %v1328_v14 = vpop.permute.xlu1 %1327  ;;  %v1348_v31 = vpop.permute.xlu2 %1347 }
 0x2c2   :  { %1490 = vadd.xlane.f32.xlu0 %v1489_v62  ;;  %v8278_v19 = vpop.permute.xlu0 %1339  ;;  %v1426_v24 = vsel %vm631_vm2, %v1328_v14, 0.0 }
 0x2c8   :  { %1424 = vadd.xlane.f32.xlu2 %v1423_v25  ;;  %v1438_v25 = vsel %vm631_vm2, %v8282_v20, 0.0 }
 0x2c9   :  { %1466 = vadd.xlane.f32.xlu1 %v1465_v60  ;;  %v1332_v43 = vpop.permute.xlu1 %1331  ;;  %v1384_v10 = vpop.permute.xlu2 %1383 }
 0x2ca   :  { %1454 = vadd.xlane.f32.xlu0 %v1453_v2  ;;  %v8290_v35 = vpop.permute.xlu0 %1375  ;;  %v1432_v49 = vsel %vm631_vm2, %v1332_v43, 0.0 }
 0x2d0   :  { %1430 = vadd.xlane.f32.xlu2 %v1429_v4 }
 0x2d1   :  { %1478 = vadd.xlane.f32.xlu1 %v1477_v53  ;;  %v1368_v57 = vpop.permute.xlu1 %1367  ;;  %v1480_v53 = vsel %vm631_vm2, %v8264_v28, 0.0  ;;  %v1456_v28 = vsel %vm631_vm2, %v1348_v31, 0.0 }
 0x2d2   :  { %1508 = vadd.xlane.f32.xlu0 %v1507_v16  ;;  %v8300_v13 = vpop.permute.xlu0 %1351  ;;  %v1486_v39 = vsel %vm631_vm2, %v1368_v57, 0.0 }
 0x2d3   :  { %v1462_v43 = vsel %vm631_vm2, %v8300_v13, 0.0 }
 0x2d8   :  { %1484 = vadd.xlane.f32.xlu2 %v1483_v34 }
 0x2d9   :  { %1442 = vadd.xlane.f32.xlu1 %v1441_v0  ;;  %v1344_v61 = vpop.permute.xlu1 %1343  ;;  %v1444_v0 = vsel %vm631_vm2, %v8278_v19, 0.0 }
 0x2da   :  { %636 = vadd.xlane.f32.xlu0 %v635_v11  ;;  %v1450_v1 = vsel %vm631_vm2, %v1344_v61, 0.0 }
 0x2e0   :  { %1448 = vadd.xlane.f32.xlu2 %v1447_v27  ;;  %v1498_v27 = vsel %vm631_vm2, %v8290_v35, 0.0 }
 0x2e1   :  { %1496 = vadd.xlane.f32.xlu1 %v1495_v7  ;;  %v1380_v40 = vpop.permute.xlu1 %1379  ;;  %v1510_v7 = vsel %vm631_vm2, %v1384_v10, 0.0 }
 0x2e2   :  { %648 = vadd.xlane.f32.xlu0 %v647_v26  ;;  %v1504_v5 = vsel %vm631_vm2, %v1380_v40, 0.0 }
 0x2e8   :  { %1502 = vadd.xlane.f32.xlu2 %v1501_v18 }
 0x2e9   :  { %1460 = vadd.xlane.f32.xlu1 %v1459_v22 }
 0x2ea   :  { %666 = vadd.xlane.f32.xlu0 %v665_v21 }
 0x2f0   :  { %642 = vadd.xlane.f32.xlu2 %v641_v56 }
 0x2f1   :  { %660 = vadd.xlane.f32.xlu1 %v659_v36 }
 0x2f2   :  { %684 = vadd.xlane.f32.xlu0 %v683_v23 }
 0x2f8   :  { %654 = vadd.xlane.f32.xlu2 %v653_v30 }
 0x2f9   :  { %678 = vadd.xlane.f32.xlu1 %v677_v44  ;;  %v760_v44 = vlaneseq }
 0x2fa   :  { %702 = vadd.xlane.f32.xlu0 %v701_v33 }
 0x2fb   :  { %v8417_v33 = vand.u32 127, %v760_v44 }
 0x2fd   :  { %v8308_v38 = vpop.xlane.xlu0 %657  ;;  %v8420_v61 = vadd.s32 4294967288, %v8417_v33 }
 0x300   :  { %672 = vadd.xlane.f32.xlu2 %v671_v9 }
 0x301   :  { %696 = vadd.xlane.f32.xlu1 %v695_v8 }
 0x302   :  { %720 = vadd.xlane.f32.xlu0 %v719_v55 }
 0x305   :  { %v8316_v41 = vpop.xlane.xlu0 %675 }
 0x308   :  { %690 = vadd.xlane.f32.xlu2 %v689_v45 }
 0x309   :  { %714 = vadd.xlane.f32.xlu1 %v713_v46 }
 0x30a   :  { %1427 = vadd.xlane.f32.xlu0 %v1426_v24 }
 0x30b   :  { %v8323_v47 = vpop.xlane.xlu2 %633 }
 0x30c   :  { %v8325_v37 = vpop.xlane.xlu1 %639  ;;  %v762_v46 = vperm.slane %v8323_v47, %v8417_v33 }
 0x30d   :  { %v8327_v32 = vpop.xlane.xlu0 %693  ;;  %v767_v40 = vperm.slane %v8325_v37, %v8417_v33 }
 0x310   :  { %708 = vadd.xlane.f32.xlu2 %v707_v29 }
 0x311   :  { %1421 = vadd.xlane.f32.xlu1 %v1420_v48 }
 0x312   :  { %1433 = vadd.xlane.f32.xlu0 %v1432_v49 }
 0x313   :  { %v8334_v50 = vpop.xlane.xlu2 %645 }
 0x314   :  { %v8336_v51 = vpop.xlane.xlu1 %651  ;;  %v770_v48 = vperm.slane %v8334_v50, %v8417_v33 }
 0x315   :  { %v8338_v58 = vpop.xlane.xlu0 %711 }
 0x316   :  { %12292 = vst [vmem:[#allocation25_spill] sm:$0xff] %v8338_v58 }
 0x318   :  { %726 = vadd.xlane.f32.xlu2 %v725_v52 }
 0x319   :  { %1475 = vadd.xlane.f32.xlu1 %v1474_v59  ;;  %v773_v59 = vperm.slane %v8336_v51, %v8417_v33 }
 0x31a   :  { %1487 = vadd.xlane.f32.xlu0 %v1486_v39 }
 0x31b   :  { %v8345_v15 = vpop.xlane.xlu2 %663 }
 0x31c   :  { %v8347_v62 = vpop.xlane.xlu1 %669  ;;  %v779_v44 = vperm.slane %v8345_v15, %v8417_v33 }
 0x31d   :  { %v8349_v54 = vpop.xlane.xlu0 %1418 }
 0x31e   :  { %12293 = vst [vmem:[#allocation26_spill] sm:$0xff] %v8349_v54 }
 0x320   :  { %1469 = vadd.xlane.f32.xlu2 %v1468_v63 }
 0x321   :  { %1439 = vadd.xlane.f32.xlu1 %v1438_v25 }
 0x322   :  { %1451 = vadd.xlane.f32.xlu0 %v1450_v1 }
 0x323   :  { %v8356_v60 = vpop.xlane.xlu2 %681 }
 0x324   :  { %v8358_v2 = vpop.xlane.xlu1 %687 }
 0x325   :  { %v8360_v4 = vpop.xlane.xlu0 %1472 }
 0x326   :  { %12294 = vst [vmem:[#allocation27_spill] sm:$0xff] %v8360_v4 }
 0x328   :  { %1481 = vadd.xlane.f32.xlu2 %v1480_v53 }
 0x329   :  { %1493 = vadd.xlane.f32.xlu1 %v1492_v3 }
 0x32a   :  { %1505 = vadd.xlane.f32.xlu0 %v1504_v5 }
 0x32b   :  { %v8367_v16 = vpop.xlane.xlu2 %699 }
 0x32c   :  { %v8369_v6 = vpop.xlane.xlu1 %705 }
 0x32d   :  { %v8371_v34 = vpop.xlane.xlu0 %1436 }
 0x32e   :  { %12295 = vst [vmem:[#allocation28_spill] sm:$0xff] %v8371_v34 }
 0x330   :  { %1445 = vadd.xlane.f32.xlu2 %v1444_v0 }
 0x331   :  { %1457 = vadd.xlane.f32.xlu1 %v1456_v28  ;;  %v776_v28 = vperm.slane %v8308_v38, %v8417_v33 }
 0x333   :  { %v8376_v11 = vpop.xlane.xlu2 %717 }
 0x334   :  { %v8378_v12 = vpop.xlane.xlu1 %723 }
 0x335   :  { %12296 = vst [vmem:[#allocation29_spill] sm:$0xff] %v8378_v12  ;;  %v8380_v14 = vpop.xlane.xlu0 %1490 }
 0x336   :  { %12297 = vst [vmem:[#allocation30_spill] sm:$0xff] %v8380_v14 }
 0x338   :  { %1499 = vadd.xlane.f32.xlu2 %v1498_v27 }
 0x339   :  { %1511 = vadd.xlane.f32.xlu1 %v1510_v7 }
 0x33b   :  { %v8385_v26 = vpop.xlane.xlu2 %1424 }
 0x33c   :  { %v8387_v19 = vpop.xlane.xlu1 %1466 }
 0x33d   :  { %12298 = vst [vmem:[#allocation31_spill] sm:$0xff] %v8387_v19  ;;  %v8389_v20 = vpop.xlane.xlu0 %1454 }
 0x340   :  { %1463 = vadd.xlane.f32.xlu2 %v1462_v43 }
 0x343   :  { %v8393_v18 = vpop.xlane.xlu2 %1430 }
 0x344   :  { %v8395_v22 = vpop.xlane.xlu1 %1478 }
 0x345   :  { %12299 = vst [vmem:[#allocation32_spill] sm:$0xff] %v8395_v22  ;;  %v8397_v21 = vpop.xlane.xlu0 %1508 }
 0x346   :  { %12300 = vst [vmem:[#allocation33_spill] sm:$0xff] %v8397_v21 }
 0x34b   :  { %v8399_v35 = vpop.xlane.xlu2 %1484 }
 0x34c   :  { %12301 = vst [vmem:[#allocation34_spill] sm:$0xff] %v8399_v35  ;;  %v8401_v42 = vpop.xlane.xlu1 %1442 }
 0x34d   :  { %v8403_v56 = vpop.xlane.xlu0 %636 }
 0x34e   :  { %v764_v45 = vperm.slane %v8403_v56, %v8420_v61 }
 0x350   :  { %v766_v49 = vsel %vm765_vm3, %v764_v45, %v762_v46  ;;  %v782_v46 = vperm.slane %v8347_v62, %v8417_v33 }
 0x353   :  { %v8405_v57 = vpop.xlane.xlu2 %1448 }
 0x354   :  { %v8407_v36 = vpop.xlane.xlu1 %1496 }
 0x355   :  { %v8409_v23 = vpop.xlane.xlu0 %648 }
 0x356   :  { %v771_v29 = vperm.slane %v8409_v23, %v8420_v61 }
 0x358   :  { %v772_v53 = vsel %vm765_vm3, %v771_v29, %v770_v48  ;;  %v785_v48 = vperm.slane %v8316_v41, %v8417_v33 }
 0x35b   :  { %v8411_v13 = vpop.xlane.xlu2 %1502 }
 0x35c   :  { %v8413_v30 = vpop.xlane.xlu1 %1460 }
 0x35d   :  { %v8415_v31 = vpop.xlane.xlu0 %666 }
 0x35e   :  { %v780_v7 = vperm.slane %v8415_v31, %v8420_v61 }
 0x363   :  { %v8422_v9 = vpop.xlane.xlu2 %642 }
 0x364   :  { %v8424_v8 = vpop.xlane.xlu1 %660  ;;  %v768_v55 = vperm.slane %v8422_v9, %v8420_v61 }
 0x365   :  { %v8428_v10 = vpop.xlane.xlu0 %684  ;;  %v777_v3 = vperm.slane %v8424_v8, %v8420_v61 }
 0x366   :  { %v769_v24 = vsel %vm765_vm3, %v768_v55, %v767_v40 }
 0x367   :  { %v813_v39 = vsel %vm812_vm4, %v769_v24, %v766_v49  ;;  %v778_v43 = vsel %vm765_vm3, %v777_v3, %v776_v28  ;;  %v781_v49 = vsel %vm765_vm3, %v780_v7, %v779_v44  ;;  %v789_v7 = vperm.slane %v8428_v10, %v8420_v61 }
 0x368   :  { %v815_v0 = vsel %vm814_vm5, %v772_v53, %v813_v39 }
 0x36b   :  { %v8442_v52 = vpop.xlane.xlu2 %654 }
 0x36c   :  { %v774_v63 = vperm.slane %v8442_v52, %v8420_v61  ;;  %v8449_v25 = vpop.xlane.xlu1 %678 }
 0x36d   :  { %v8451_v1 = vpop.xlane.xlu0 %702  ;;  %v786_v55 = vperm.slane %v8449_v25, %v8420_v61 }
 0x36e   :  { %v775_v5 = vsel %vm765_vm3, %v774_v63, %v773_v59 }
 0x36f   :  { %v817_v27 = vsel %vm816_vm6, %v775_v5, %v815_v0  ;;  %v787_v53 = vsel %vm765_vm3, %v786_v55, %v785_v48  ;;  %v788_v55 = vperm.slane %v8356_v60, %v8417_v33 }
 0x370   :  { %v819_v45 = vsel %vm818_vm7, %v778_v43, %v817_v27  ;;  %v791_v27 = vperm.slane %v8358_v2, %v8417_v33 }
 0x371   :  { %v821_v63 = vsel %vm820_vm8, %v781_v49, %v819_v45  ;;  %v794_v49 = vperm.slane %v8327_v32, %v8417_v33 }
 0x373   :  { %v8468_v40 = vpop.xlane.xlu2 %672 }
 0x374   :  { %v783_v24 = vperm.slane %v8468_v40, %v8420_v61  ;;  %v8475_v29 = vpop.xlane.xlu1 %696 }
 0x375   :  { %v8480_v59 = vpop.xlane.xlu0 %720 }
 0x376   :  { %12302 = vst [vmem:[#allocation35_spill] sm:$0xff] %v8480_v59  ;;  %v784_v39 = vsel %vm765_vm3, %v783_v24, %v782_v46  ;;  %v795_v46 = vperm.slane %v8475_v29, %v8420_v61  ;;  %v790_v24 = vsel %vm765_vm3, %v789_v7, %v788_v55 }
 0x377   :  { %v823_v3 = vsel %vm822_vm9, %v784_v39, %v821_v63  ;;  %v798_v63 = vperm.slane %v8451_v1, %v8420_v61 }
 0x378   :  { %v825_v5 = vsel %vm824_vm10, %v787_v53, %v823_v3  ;;  %v796_v53 = vsel %vm765_vm3, %v795_v46, %v794_v49  ;;  %v803_v49 = vperm.slane %v8338_v58, %v8417_v33 }
 0x379   :  { %v835_v0 = vsel %vm246_vm0, %v825_v5, -inf  ;;  %v797_v5 = vperm.slane %v8367_v16, %v8417_v33 }
 0x37a   :  { %836 = vmax.xlane.f32.xlu0 %v835_v0  ;;  %v800_v0 = vperm.slane %v8369_v6, %v8417_v33 }
 0x37b   :  { %v8488_v28 = vpop.xlane.xlu2 %690  ;;  %v799_v55 = vsel %vm765_vm3, %v798_v63, %v797_v5  ;;  %v806_v63 = vperm.slane %v8376_v11, %v8417_v33 }
 0x37c   :  { %v792_v43 = vperm.slane %v8488_v28, %v8420_v61  ;;  %v8496_v44 = vpop.xlane.xlu1 %714 }
 0x37d   :  { %12303 = vst [vmem:[#allocation36_spill] sm:$0xff] %v8496_v44  ;;  %v8504_v48 = vpop.xlane.xlu0 %1427 }
 0x37e   :  { %v793_v45 = vsel %vm765_vm3, %v792_v43, %v791_v27  ;;  %12304 = vst [vmem:[#allocation37_spill] sm:$0xff] %v8504_v48 }
 0x37f   :  { %v826_v39 = vsel %vm812_vm4, %v793_v45, %v790_v24  ;;  %v804_v45 = vperm.slane %v8496_v44, %v8420_v61 }
 0x380   :  { %v827_v27 = vsel %vm814_vm5, %v796_v53, %v826_v39  ;;  %v807_v39 = vperm.slane %v8480_v59, %v8420_v61 }
 0x381   :  { %v828_v24 = vsel %vm816_vm6, %v799_v55, %v827_v27  ;;  %v805_v53 = vsel %vm765_vm3, %v804_v45, %v803_v49  ;;  %v809_v27 = vperm.slane %v8378_v12, %v8417_v33 }
 0x383   :  { %v8512_v3 = vpop.xlane.xlu2 %708 }
 0x384   :  { %12305 = vst [vmem:[#allocation38_spill] sm:$0xff] %v8512_v3  ;;  %v801_v7 = vperm.slane %v8512_v3, %v8420_v61  ;;  %v8521_v43 = vpop.xlane.xlu1 %1421 }
 0x385   :  { %12306 = vst [vmem:[#allocation39_spill] sm:$0xff] %v8521_v43  ;;  %v8534_v3 = vpop.xlane.xlu0 %1433 }
 0x386   :  { %v802_v46 = vsel %vm765_vm3, %v801_v7, %v800_v0  ;;  %12307 = vst [vmem:[#allocation40_spill] sm:$0xff] %v8534_v3 }
 0x387   :  { %v829_v17 = vsel %vm818_vm7, %v802_v46, %v828_v24  ;;  %v808_v46 = vsel %vm765_vm3, %v807_v39, %v806_v63 }
 0x388   :  { %v830_v0 = vsel %vm820_vm8, %v805_v53, %v829_v17 }
 0x389   :  { %v831_v24 = vsel %vm822_vm9, %v808_v46, %v830_v0  ;;  %v1546_v46 = vperm.slane %v8521_v43, %v8420_v61  ;;  %v1548_v43 = vperm.slane %v8385_v26, %v8417_v33 }
 0x38b   :  { %v8538_v5 = vpop.xlane.xlu2 %726 }
 0x38c   :  { %v810_v7 = vperm.slane %v8538_v5, %v8420_v61  ;;  %v8545_v55 = vpop.xlane.xlu1 %1475 }
 0x38d   :  { %12308 = vst [vmem:[#allocation41_spill] sm:$0xff] %v8545_v55  ;;  %v8554_v53 = vpop.xlane.xlu0 %1487 }
 0x38e   :  { %v811_v45 = vsel %vm765_vm3, %v810_v7, %v809_v27  ;;  %12310 = vst [vmem:[#allocation43_spill] sm:$0xff] %v8554_v53  ;;  %v1573_v27 = vperm.slane %v8545_v55, %v8420_v61  ;;  %v1575_v7 = vperm.slane %v8395_v22, %v8417_v33  ;;  %v1549_v55 = vperm.slane %v8504_v48, %v8420_v61 }
 0x38f   :  { %v832_v49 = vsel %vm824_vm10, %v811_v45, %v831_v24  ;;  %v1572_v24 = vperm.slane %v8360_v4, %v8417_v33 }
 0x390   :  { %v838_v44 = vsel %vm246_vm0, %v832_v49, -inf }
 0x391   :  { %839 = vmax.xlane.f32.xlu1 %v838_v44  ;;  %v1569_v44 = vperm.slane %v8387_v19, %v8417_v33  ;;  %v1552_v19 = vperm.slane %v8534_v3, %v8420_v61  ;;  %v1574_v4 = vsel %vm765_vm3, %v1573_v27, %v1572_v24  ;;  %v1578_v3 = vperm.slane %v8399_v35, %v8417_v33 }
 0x393   :  { %v8552_v17 = vpop.xlane.xlu2 %1469 }
 0x394   :  { %12309 = vst [vmem:[#allocation42_spill] sm:$0xff] %v8552_v17  ;;  %v8556_v12 = vpop.xlane.xlu1 %1439  ;;  %v1570_v63 = vperm.slane %v8552_v17, %v8420_v61  ;;  %v1545_v17 = vperm.slane %v8349_v54, %v8417_v33 }
 0x395   :  { %v8562_v39 = vpop.xlane.xlu0 %1451  ;;  %v1555_v48 = vperm.slane %v8556_v12, %v8420_v61 }
 0x396   :  { %v1571_v49 = vsel %vm765_vm3, %v1570_v63, %v1569_v44  ;;  %v1579_v63 = vperm.slane %v8554_v53, %v8420_v61  ;;  %v1547_v44 = vsel %vm765_vm3, %v1546_v46, %v1545_v17  ;;  %v1554_v17 = vperm.slane %v8371_v34, %v8417_v33 }
 0x397   :  { %v1600_v54 = vsel %vm812_vm4, %v1574_v4, %v1571_v49  ;;  %v1581_v4 = vperm.slane %v8380_v14, %v8417_v33  ;;  %v1550_v46 = vsel %vm765_vm3, %v1549_v55, %v1548_v43  ;;  %v1557_v53 = vperm.slane %v8401_v42, %v8417_v33 }
 0x398   :  { %v1593_v35 = vsel %vm812_vm4, %v1550_v46, %v1547_v44  ;;  %v1584_v44 = vperm.slane %v8407_v36, %v8417_v33 }
 0x39b   :  { %v8558_v59 = vpop.xlane.xlu2 %1481 }
 0x39c   :  { %12311 = vst [vmem:[#allocation44_spill] sm:$0xff] %v8558_v59  ;;  %v8560_v58 = vpop.xlane.xlu1 %1493  ;;  %v1576_v0 = vperm.slane %v8558_v59, %v8420_v61 }
 0x39d   :  { %12312 = vst [vmem:[#allocation45_spill] sm:$0xff] %v8560_v58  ;;  %v8606_v24 = vpop.xlane.xlu0 %1505 }
 0x39e   :  { %v1577_v22 = vsel %vm765_vm3, %v1576_v0, %v1575_v7  ;;  %v1582_v0 = vperm.slane %v8560_v58, %v8420_v61  ;;  %v1551_v7 = vperm.slane %v8393_v18, %v8417_v33  ;;  %v1556_v58 = vsel %vm765_vm3, %v1555_v48, %v1554_v17 }
 0x39f   :  { %v1601_v27 = vsel %vm814_vm5, %v1577_v22, %v1600_v54  ;;  %v1580_v22 = vsel %vm765_vm3, %v1579_v63, %v1578_v3  ;;  %v1588_v14 = vperm.slane %v8606_v24, %v8420_v61  ;;  %v1587_v48 = vperm.slane %v8411_v13, %v8417_v33 }
 0x3a0   :  { %v1553_v54 = vsel %vm765_vm3, %v1552_v19, %v1551_v7  ;;  %v1583_v34 = vsel %vm765_vm3, %v1582_v0, %v1581_v4  ;;  %v1602_v55 = vsel %vm816_vm6, %v1580_v22, %v1601_v27  ;;  %v1561_v17 = vperm.slane %v8562_v39, %v8420_v61 }
 0x3a1   :  { %v1594_v63 = vsel %vm814_vm5, %v1553_v54, %v1593_v35  ;;  %v1603_v46 = vsel %vm818_vm7, %v1583_v34, %v1602_v55 }
 0x3a2   :  { %v1595_v27 = vsel %vm816_vm6, %v1556_v58, %v1594_v63 }
 0x3a3   :  { %v8576_v45 = vpop.xlane.xlu2 %1445 }
 0x3a4   :  { %12313 = vst [vmem:[#allocation46_spill] sm:$0xff] %v8576_v45  ;;  %v8581_v59 = vpop.xlane.xlu1 %1457  ;;  %v1558_v49 = vperm.slane %v8576_v45, %v8420_v61  ;;  %v1590_v45 = vperm.slane %v8397_v21, %v8417_v33  ;;  %v1589_v21 = vsel %vm765_vm3, %v1588_v14, %v1587_v48 }
 0x3a5   :  { %v1564_v22 = vperm.slane %v8581_v59, %v8420_v61 }
 0x3a6   :  { %v1559_v0 = vsel %vm765_vm3, %v1558_v49, %v1557_v53  ;;  %v1560_v49 = vperm.slane %v8405_v57, %v8417_v33 }
 0x3a7   :  { %v1596_v54 = vsel %vm818_vm7, %v1559_v0, %v1595_v27 }
 0x3a8   :  { %v1562_v55 = vsel %vm765_vm3, %v1561_v17, %v1560_v49 }
 0x3a9   :  { %v1597_v48 = vsel %vm820_vm8, %v1562_v55, %v1596_v54 }
 0x3ab   :  { %v8624_v43 = vpop.xlane.xlu2 %1499 }
 0x3ac   :  { %v1585_v19 = vperm.slane %v8624_v43, %v8420_v61  ;;  %v8633_v3 = vpop.xlane.xlu1 %1511 }
 0x3ad   :  { %v1591_v7 = vperm.slane %v8633_v3, %v8420_v61 }
 0x3ae   :  { %v1586_v4 = vsel %vm765_vm3, %v1585_v19, %v1584_v44  ;;  %v1563_v44 = vperm.slane %v8389_v20, %v8417_v33 }
 0x3af   :  { %v1592_v35 = vsel %vm765_vm3, %v1591_v7, %v1590_v45  ;;  %v1604_v53 = vsel %vm820_vm8, %v1586_v4, %v1603_v46  ;;  %v7619_v4 = vmov 0  }
 0x3b0   :  { %v1605_v58 = vsel %vm822_vm9, %v1589_v21, %v1604_v53  ;;  %v1565_v45 = vsel %vm765_vm3, %v1564_v22, %v1563_v44  ;;  %v1566_v21 = vperm.slane %v8413_v30, %v8417_v33  ;;  %6995 = vset.pattern.permute.xlu1 %v7619_v4  ;;  %6994 = vset.pattern.permute.xlu0 %v7619_v4 }
 0x3b1   :  { %v1606_v34 = vsel %vm824_vm10, %v1592_v35, %v1605_v58  ;;  %v1598_v7 = vsel %vm822_vm9, %v1565_v45, %v1597_v48  ;;  %6993 = vset.pattern.permute.xlu2 %v7619_v4 }
 0x3b2   :  { %v1612_v14 = vsel %vm246_vm0, %v1606_v34, -inf }
 0x3b3   :  { %v8660_v19 = vpop.xlane.xlu2 %1463  ;;  %1613 = vmax.xlane.f32.xlu0 %v1612_v14 }
 0x3b4   :  { %v1567_v63 = vperm.slane %v8660_v19, %v8420_v61 }
 0x3b6   :  { %v1568_v0 = vsel %vm765_vm3, %v1567_v63, %v1566_v21 }
 0x3b7   :  { %v1599_v27 = vsel %vm824_vm10, %v1568_v0, %v1598_v7 }
 0x3b8   :  { %v1609_v17 = vsel %vm246_vm0, %v1599_v27, -inf }
 0x3b9   :  { %1610 = vmax.xlane.f32.xlu2 %v1609_v17 }
 0x3ed   :  { %v8672_v46 = vpop.xlane.xlu0 %836 }
 0x3ee   :  { %v844_v22 = vperm.slane %v8672_v46, 1  ;;  %v843_v35 = vperm.slane %v8672_v46, 0  ;;  %v845_v54 = vperm.slane %v8672_v46, 2  ;;  %v847_v44 = vperm.slane %v8672_v46, 4 }
 0x3ef   :  { %v848_v63 = vperm.slane %v8672_v46, 5 }
 0x3f0   :  { %v877_v53 = vsub.f32 %v8325_v37, %v844_v22  ;;  %v876_v49 = vsub.f32 %v8403_v56, %v843_v35  ;;  %v875_v58 = vsub.f32 %v8323_v47, %v843_v35  ;;  %v879_v45 = vsub.f32 %v8334_v50, %v845_v54 }
 0x3f1   :  { %v883_v48 = vsub.f32 %v8308_v38, %v847_v44  ;;  %v878_v37 = vsub.f32 %v8422_v9, %v844_v22  ;;  %v846_v56 = vperm.slane %v8672_v46, 3  ;;  %v886_v9 = vsub.f32 %v8415_v31, %v848_v63 }
 0x3f2   :  { %v911_v34 = vmul.f32 1.442695, %v877_v53  ;;  %v909_v55 = vmul.f32 1.442695, %v876_v49  ;;  %v907_v14 = vmul.f32 1.442695, %v875_v58  ;;  %v880_v17 = vsub.f32 %v8409_v23, %v845_v54 }
 0x3f3   :  { %v915_v21 = vmul.f32 1.442695, %v879_v45  ;;  %v923_v47 = vmul.f32 1.442695, %v883_v48  ;;  %v913_v7 = vmul.f32 1.442695, %v878_v37  ;;  %v881_v38 = vsub.f32 %v8336_v51, %v846_v56 }
 0x3f4   :  { %7007 = vpow2.f32 %v911_v34  ;;  %v850_v22 = vperm.slane %v8672_v46, 7  ;;  %v929_v35 = vmul.f32 1.442695, %v886_v9  ;;  %v917_v49 = vmul.f32 1.442695, %v880_v17 }
 0x3f5   :  { %7009 = vpow2.f32 %v909_v55  ;;  %v919_v4 = vmul.f32 1.442695, %v881_v38  ;;  %v884_v31 = vsub.f32 %v8424_v8, %v847_v44  ;;  %v882_v34 = vsub.f32 %v8442_v52, %v846_v56 }
 0x3f6   :  { %7011 = vpow2.f32 %v907_v14  ;;  %v889_v23 = vsub.f32 %v8316_v41, %v850_v22  ;;  %v849_v55 = vperm.slane %v8672_v46, 6  ;;  %v885_v46 = vsub.f32 %v8345_v15, %v848_v63 }
 0x3f7   :  { %7013 = vpow2.f32 %v915_v21  ;;  %v925_v14 = vmul.f32 1.442695, %v884_v31  ;;  %v921_v21 = vmul.f32 1.442695, %v882_v34 }
 0x3f8   :  { %7015 = vpow2.f32 %v923_v47  ;;  %v935_v45 = vmul.f32 1.442695, %v889_v23  ;;  %v887_v44 = vsub.f32 %v8347_v62, %v849_v55  ;;  %v927_v9 = vmul.f32 1.442695, %v885_v46 }
 0x3f9   :  { %7017 = vpow2.f32 %v913_v7  ;;  %v888_v63 = vsub.f32 %v8468_v40, %v849_v55 }
 0x3fa   :  { %v8686_v0 = vpop.eup %7007  ;;  %7019 = vpow2.f32 %v919_v4  ;;  %v931_v56 = vmul.f32 1.442695, %v887_v44 }
 0x3fb   :  { %v8688_v27 = vpop.eup %7009  ;;  %1010 = vperm.xlu1 %6995, %v8686_v0   ;;  %7021 = vpow2.f32 %v929_v35 }
 0x3fc   :  { %v8691_v50 = vpop.eup %7011  ;;  %1007 = vperm.xlu0 %6994, %v8688_v27   ;;  %7023 = vpow2.f32 %v917_v49 }
 0x3fd   :  { %1004 = vperm.xlu2 %6993, %v8691_v50   ;;  %v8699_v53 = vpop.eup %7013  ;;  %7025 = vpow2.f32 %v925_v14 }
 0x3fe   :  { %12314 = vst [vmem:[#allocation47_spill] sm:$0xff] %v8699_v53  ;;  %v8701_v58 = vpop.eup %7015  ;;  %7027 = vpow2.f32 %v935_v45 }
 0x3ff   :  { %12315 = vst [vmem:[#allocation48_spill] sm:$0xff] %v8701_v58  ;;  %v8704_v51 = vpop.eup %7017  ;;  %7029 = vpow2.f32 %v921_v21 }
 0x400   :  { %v8715_v37 = vpop.eup %7019  ;;  %7031 = vpow2.f32 %v931_v56 }
 0x401   :  { %12316 = vst [vmem:[#allocation49_spill] sm:$0xff] %v8715_v37  ;;  %v8717_v8 = vpop.eup %7021 }
 0x402   :  { %12317 = vst [vmem:[#allocation50_spill] sm:$0xff] %v8717_v8  ;;  %v8720_v41 = vpop.eup %7023 }
 0x403   :  { %1016 = vperm.xlu1 %6995, %v8699_v53   ;;  %12318 = vst [vmem:[#allocation51_spill] sm:$0xff] %v8720_v41  ;;  %v8728_v38 = vpop.eup %7025 }
 0x404   :  { %1028 = vperm.xlu0 %6994, %v8701_v58   ;;  %v8710_v54 = vpop.xlane.xlu1 %839  ;;  %12319 = vst [vmem:[#allocation52_spill] sm:$0xff] %v8728_v38  ;;  %v8730_v17 = vpop.eup %7027 }
 0x405   :  { %1013 = vperm.xlu2 %6993, %v8704_v51   ;;  %v851_v48 = vperm.slane %v8710_v54, 0  ;;  %v853_v47 = vperm.slane %v8710_v54, 2  ;;  %12320 = vst [vmem:[#allocation53_spill] sm:$0xff] %v8730_v17  ;;  %v8733_v62 = vpop.eup %7029  ;;  %v852_v35 = vperm.slane %v8710_v54, 1  ;;  %v854_v49 = vperm.slane %v8710_v54, 3 }
 0x406   :  { %12321 = vst [vmem:[#allocation54_spill] sm:$0xff] %v8733_v62  ;;  %v8742_v23 = vpop.eup %7031  ;;  %v857_v45 = vperm.slane %v8710_v54, 6  ;;  %v855_v56 = vperm.slane %v8710_v54, 4 }
 0x407   :  { %v892_v52 = vsub.f32 %v8428_v10, %v851_v48  ;;  %v890_v10 = vsub.f32 %v8449_v25, %v850_v22  ;;  %v895_v15 = vsub.f32 %v8327_v32, %v853_v47  ;;  %12322 = vst [vmem:[#allocation55_spill] sm:$0xff] %v8742_v23  ;;  %v933_v25 = vmul.f32 1.442695, %v888_v63 }
 0x408   :  { %v893_v34 = vsub.f32 %v8358_v2, %v852_v35  ;;  %v898_v40 = vsub.f32 %v8451_v1, %v854_v49  ;;  %v891_v55 = vsub.f32 %v8356_v60, %v851_v48  ;;  %v896_v1 = vsub.f32 %v8475_v29, %v853_v47 }
 0x409   :  { %v941_v7 = vmul.f32 1.442695, %v892_v52  ;;  %v937_v4 = vmul.f32 1.442695, %v890_v10  ;;  %v947_v31 = vmul.f32 1.442695, %v895_v15  ;;  %v903_v60 = vsub.f32 %v8376_v11, %v857_v45 }
 0x40a   :  { %v943_v14 = vmul.f32 1.442695, %v893_v34  ;;  %v953_v21 = vmul.f32 1.442695, %v898_v40  ;;  %v939_v52 = vmul.f32 1.442695, %v891_v55  ;;  %v894_v48 = vsub.f32 %v8488_v28, %v852_v35 }
 0x40b   :  { %1022 = vperm.xlu1 %6995, %v8715_v37   ;;  %7033 = vpow2.f32 %v941_v7  ;;  %v949_v7 = vmul.f32 1.442695, %v896_v1  ;;  %v963_v10 = vmul.f32 1.442695, %v903_v60  ;;  %v899_v63 = vsub.f32 %v8369_v6, %v855_v56 }
 0x40c   :  { %1037 = vperm.xlu0 %6994, %v8717_v8   ;;  %7035 = vpow2.f32 %v927_v9  ;;  %v12197_v9 = vperm.slane %v8710_v54, 7  ;;  %v945_v29 = vmul.f32 1.442695, %v894_v48 }
 0x40d   :  { %1019 = vperm.xlu2 %6993, %v8720_v41   ;;  %7037 = vpow2.f32 %v937_v4  ;;  %v897_v4 = vsub.f32 %v8367_v16, %v854_v49 }
 0x40e   :  { %7039 = vpow2.f32 %v947_v31  ;;  %v906_v28 = vsub.f32 %v8538_v5, %v12197_v9  ;;  %v856_v31 = vperm.slane %v8710_v54, 5 }
 0x40f   :  { %7041 = vpow2.f32 %v933_v25  ;;  %v955_v25 = vmul.f32 1.442695, %v899_v63  ;;  %v951_v55 = vmul.f32 1.442695, %v897_v4  ;;  %v12335_v4 = vld [vmem:[#allocation35_spill] sm:$0xff] }
 0x410   :  { %7043 = vpow2.f32 %v943_v14  ;;  %v969_v34 = vmul.f32 1.442695, %v906_v28 }
 0x411   :  { %v8744_v22 = vpop.eup %7033  ;;  %7045 = vpow2.f32 %v953_v21  ;;  %v12330_v21 = vld [vmem:[#allocation25_spill] sm:$0xff] }
 0x412   :  { %v8747_v32 = vpop.eup %7035  ;;  %7047 = vpow2.f32 %v939_v52  ;;  %v901_v16 = vsub.f32 %v12330_v21, %v856_v31  ;;  %v12331_v52 = vld [vmem:[#allocation38_spill] sm:$0xff] }
 0x413   :  { %1031 = vperm.xlu1 %6995, %v8728_v38   ;;  %12323 = vst [vmem:[#allocation56_spill] sm:$0xff] %v8747_v32  ;;  %v8755_v44 = vpop.eup %7037  ;;  %7049 = vpow2.f32 %v949_v7  ;;  %v900_v1 = vsub.f32 %v12331_v52, %v855_v56  ;;  %v12336_v56 = vld [vmem:[#allocation31_spill] sm:$0xff] }
 0x414   :  { %1046 = vperm.xlu0 %6994, %v8730_v17   ;;  %12324 = vst [vmem:[#allocation57_spill] sm:$0xff] %v8755_v44  ;;  %v8757_v46 = vpop.eup %7039  ;;  %7051 = vpow2.f32 %v963_v10  ;;  %v959_v48 = vmul.f32 1.442695, %v901_v16 }
 0x415   :  { %1025 = vperm.xlu2 %6993, %v8733_v62   ;;  %12325 = vst [vmem:[#allocation58_spill] sm:$0xff] %v8757_v46  ;;  %v8760_v2 = vpop.eup %7041  ;;  %7053 = vpow2.f32 %v945_v29  ;;  %v957_v63 = vmul.f32 1.442695, %v900_v1 }
 0x416   :  { %12326 = vst [vmem:[#allocation59_spill] sm:$0xff] %v8760_v2  ;;  %v8769_v15 = vpop.eup %7043  ;;  %7055 = vpow2.f32 %v955_v25  ;;  %v904_v25 = vsub.f32 %v12335_v4, %v857_v45 }
 0x417   :  { %v8771_v47 = vpop.eup %7045  ;;  %7057 = vpow2.f32 %v969_v34 }
 0x418   :  { %12327 = vst [vmem:[#allocation60_spill] sm:$0xff] %v8771_v47  ;;  %v8774_v11 = vpop.eup %7047  ;;  %7059 = vpow2.f32 %v951_v55  ;;  %v12337_v55 = vld [vmem:[#allocation36_spill] sm:$0xff]  ;;  %v965_v16 = vmul.f32 1.442695, %v904_v25  ;;  %v12342_v25 = vperm.slane %v8710_v54, 7 }
 0x419   :  { %v8787_v40 = vpop.eup %7049  ;;  %7061 = vpow2.f32 %v959_v48  ;;  %v902_v21 = vsub.f32 %v12337_v55, %v856_v31  ;;  %v12341_v31 = vld [vmem:[#allocation41_spill] sm:$0xff]  ;;  %v12347_v54 = vld [vmem:[#allocation32_spill] sm:$0xff] }
 0x41a   :  { %12328 = vst [vmem:[#allocation61_spill] sm:$0xff] %v8787_v40  ;;  %v8789_v14 = vpop.eup %7051 }
 0x41b   :  { %1040 = vperm.xlu1 %6995, %v8742_v23   ;;  %12329 = vst [vmem:[#allocation62_spill] sm:$0xff] %v8789_v14  ;;  %v8792_v5 = vpop.eup %7053  ;;  %v961_v45 = vmul.f32 1.442695, %v902_v21 }
 0x41c   :  { %1055 = vperm.xlu0 %6994, %v8744_v22   ;;  %v8802_v29 = vpop.eup %7055 }
 0x41d   :  { %1034 = vperm.xlu2 %6993, %v8747_v32   ;;  %12332 = vst [vmem:[#allocation25_spill] sm:$0xff] %v8802_v29  ;;  %v8804_v28 = vpop.eup %7057  ;;  %v12359_v32 = vld [vmem:[#allocation43_spill] sm:$0xff] }
 0x41e   :  { %12333 = vst [vmem:[#allocation38_spill] sm:$0xff] %v8804_v28 }
 0x423   :  { %1049 = vperm.xlu1 %6995, %v8755_v44  }
 0x424   :  { %1064 = vperm.xlu0 %6994, %v8757_v46  }
 0x425   :  { %1043 = vperm.xlu2 %6993, %v8760_v2  }
 0x426   :  { %v8799_v60 = vpop.xlane.xlu0 %1613 }
 0x427   :  { %v1625_v7 = vperm.slane %v8799_v60, 0  ;;  %v1626_v52 = vperm.slane %v8799_v60, 1 }
 0x429   :  { %v1665_v34 = vsub.f32 %v12336_v56, %v1625_v7  ;;  %v12340_v56 = vld [vmem:[#allocation26_spill] sm:$0xff] }
 0x42b   :  { %1058 = vperm.xlu1 %6995, %v8769_v15   ;;  %v1713_v1 = vmul.f32 1.442695, %v1665_v34  ;;  %v12343_v34 = vld [vmem:[#allocation29_spill] sm:$0xff] }
 0x42c   :  { %1073 = vperm.xlu0 %6994, %v8771_v47   ;;  %v8783_v35 = vpop.xlane.xlu2 %1610  ;;  %v905_v55 = vsub.f32 %v12343_v34, %v12342_v25 }
 0x42d   :  { %1052 = vperm.xlu2 %6993, %v8774_v11   ;;  %v1618_v6 = vperm.slane %v8783_v35, 1 }
 0x42f   :  { %v1651_v49 = vsub.f32 %v8385_v26, %v1618_v6  ;;  %v8807_v26 = vpop.eup %7059 }
 0x430   :  { %12334 = vst [vmem:[#allocation63_spill] sm:$0xff] %v8807_v26  ;;  %v8816_v9 = vpop.eup %7061 }
 0x431   :  { %v1685_v10 = vmul.f32 1.442695, %v1651_v49  ;;  %v1617_v49 = vperm.slane %v8783_v35, 0  ;;  %12338 = vst [vmem:[#allocation35_spill] sm:$0xff] %v8816_v9 }
 0x433   :  { %1067 = vperm.xlu1 %6995, %v8787_v40   ;;  %7063 = vpow2.f32 %v1685_v10  ;;  %v1649_v10 = vsub.f32 %v12340_v56, %v1617_v49  ;;  %v967_v56 = vmul.f32 1.442695, %v905_v55  ;;  %v1620_v55 = vperm.slane %v8783_v35, 3 }
 0x434   :  { %1088 = vperm.xlu0 %6994, %v8789_v14   ;;  %7065 = vpow2.f32 %v957_v63  ;;  %v1668_v63 = vsub.f32 %v12341_v31, %v1626_v52  ;;  %v12346_v31 = vld [vmem:[#allocation37_spill] sm:$0xff] }
 0x435   :  { %1061 = vperm.xlu2 %6993, %v8792_v5   ;;  %7067 = vpow2.f32 %v965_v16  ;;  %v1681_v21 = vmul.f32 1.442695, %v1649_v10  ;;  %v12348_v10 = vld [vmem:[#allocation39_spill] sm:$0xff] }
 0x436   :  { %7069 = vpow2.f32 %v1713_v1  ;;  %v1719_v44 = vmul.f32 1.442695, %v1668_v63  ;;  %v1652_v1 = vsub.f32 %v12346_v31, %v1618_v6  ;;  %v1650_v63 = vsub.f32 %v12348_v10, %v1617_v49  ;;  %v12351_v49 = vld [vmem:[#allocation42_spill] sm:$0xff] }
 0x437   :  { %7071 = vpow2.f32 %v961_v45  ;;  %v1619_v10 = vperm.slane %v8783_v35, 2 }
 0x438   :  { %7073 = vpow2.f32 %v1681_v21  ;;  %v1687_v25 = vmul.f32 1.442695, %v1652_v1  ;;  %v1683_v6 = vmul.f32 1.442695, %v1650_v63  ;;  %v12207_v63 = vperm.slane %v8783_v35, 4 }
 0x439   :  { %v8818_v4 = vpop.eup %7063  ;;  %7075 = vpow2.f32 %v1719_v44  ;;  %v1656_v44 = vsub.f32 %v8556_v12, %v1620_v55 }
 0x43a   :  { %v8821_v48 = vpop.eup %7065  ;;  %7077 = vpow2.f32 %v967_v56  ;;  %v1666_v56 = vsub.f32 %v12351_v49, %v1625_v7 }
 0x43b   :  { %1076 = vperm.xlu1 %6995, %v8802_v29   ;;  %12339 = vst [vmem:[#allocation31_spill] sm:$0xff] %v8821_v48  ;;  %v8831_v17 = vpop.eup %7067  ;;  %7079 = vpow2.f32 %v1687_v25  ;;  %v1695_v2 = vmul.f32 1.442695, %v1656_v44 }
 0x43c   :  { %1097 = vperm.xlu0 %6994, %v8804_v28   ;;  %v12203_v28 = vperm.slane %v8799_v60, 2  ;;  %12344 = vst [vmem:[#allocation36_spill] sm:$0xff] %v8831_v17  ;;  %v8833_v14 = vpop.eup %7069 }
 0x43d   :  { %1070 = vperm.xlu2 %6993, %v8807_v26   ;;  %v8836_v16 = vpop.eup %7071 }
 0x43e   :  { %12345 = vst [vmem:[#allocation26_spill] sm:$0xff] %v8836_v16  ;;  %v1669_v45 = vsub.f32 %v12347_v54, %v12203_v28  ;;  %v12350_v54 = vld [vmem:[#allocation27_spill] sm:$0xff] }
 0x43f   :  { %v1667_v28 = vsub.f32 %v12350_v54, %v1626_v52  ;;  %v1715_v54 = vmul.f32 1.442695, %v1666_v56  ;;  %v1629_v56 = vperm.slane %v8799_v60, 4 }
 0x440   :  { %v1721_v34 = vmul.f32 1.442695, %v1669_v45 }
 0x441   :  { %v1717_v45 = vmul.f32 1.442695, %v1667_v28  ;;  %v1657_v28 = vsub.f32 %v8401_v42, %v12207_v63  ;;  %v12354_v63 = vld [vmem:[#allocation28_spill] sm:$0xff] }
 0x442   :  { %7081 = vpow2.f32 %v1721_v34  ;;  %v12352_v34 = vld [vmem:[#allocation40_spill] sm:$0xff] }
 0x443   :  { %1082 = vperm.xlu1 %6995, %v8816_v9   ;;  %7083 = vpow2.f32 %v1683_v6  ;;  %v1654_v7 = vsub.f32 %v12352_v34, %v1619_v10  ;;  %v1653_v6 = vsub.f32 %v8393_v18, %v1619_v10  ;;  %v12355_v18 = vld [vmem:[#allocation45_spill] sm:$0xff] }
 0x444   :  { %1784 = vperm.xlu0 %6994, %v8818_v4   ;;  %7085 = vpow2.f32 %v1717_v45  ;;  %v1674_v10 = vsub.f32 %v12355_v18, %v1629_v56 }
 0x445   :  { %1079 = vperm.xlu2 %6993, %v8821_v48   ;;  %7087 = vpow2.f32 %v1695_v2  ;;  %v1691_v49 = vmul.f32 1.442695, %v1654_v7  ;;  %v1689_v23 = vmul.f32 1.442695, %v1653_v6  ;;  %v1655_v2 = vsub.f32 %v12354_v63, %v1620_v55  ;;  %v12357_v7 = vld [vmem:[#allocation44_spill] sm:$0xff] }
 0x446   :  { %7089 = vpow2.f32 %v1715_v54  ;;  %v12356_v54 = vperm.slane %v8799_v60, 2  ;;  %v12216_v55 = vperm.slane %v8799_v60, 5  ;;  %v1731_v63 = vmul.f32 1.442695, %v1674_v10  ;;  %v12360_v10 = vld [vmem:[#allocation34_spill] sm:$0xff] }
 0x447   :  { %7091 = vpow2.f32 %v1691_v49  ;;  %v1693_v9 = vmul.f32 1.442695, %v1655_v2 }
 0x44b   :  { %1091 = vperm.xlu1 %6995, %v8831_v17   ;;  %v8846_v17 = vpop.eup %7073 }
 0x44c   :  { %1826 = vperm.xlu0 %6994, %v8833_v14   ;;  %v8848_v31 = vpop.eup %7075 }
 0x44d   :  { %1085 = vperm.xlu2 %6993, %v8836_v16   ;;  %v8851_v21 = vpop.eup %7077  ;;  %v1628_v16 = vperm.slane %v8799_v60, 3 }
 0x44e   :  { %12349 = vst [vmem:[#allocation41_spill] sm:$0xff] %v8851_v21  ;;  %v8862_v52 = vpop.eup %7079 }
 0x44f   :  { %v8864_v25 = vpop.eup %7081 }
 0x450   :  { %v8867_v12 = vpop.eup %7083 }
 0x451   :  { %v8879_v34 = vpop.eup %7085 }
 0x452   :  { %v8881_v45 = vpop.eup %7087 }
 0x453   :  { %1778 = vperm.xlu1 %6995, %v8846_v17   ;;  %12353 = vst [vmem:[#allocation29_spill] sm:$0xff] %v8881_v45  ;;  %v8884_v42 = vpop.eup %7089 }
 0x454   :  { %1835 = vperm.xlu0 %6994, %v8848_v31   ;;  %v8897_v8 = vpop.eup %7091 }
 0x455   :  { %1094 = vperm.xlu2 %6993, %v8851_v21   ;;  %v1697_v21 = vmul.f32 1.442695, %v1657_v28  ;;  %v1670_v28 = vsub.f32 %v12357_v7, %v12356_v54  ;;  %v1672_v54 = vsub.f32 %v12359_v32, %v1628_v16  ;;  %v1671_v7 = vsub.f32 %v12360_v10, %v1628_v16  ;;  %v12365_v10 = vld [vmem:[#allocation46_spill] sm:$0xff] }
 0x457   :  { %v8858_v1 = vpop.permute.xlu2 %1004  ;;  %7093 = vpow2.f32 %v1697_v21  ;;  %v1723_v49 = vmul.f32 1.442695, %v1670_v28  ;;  %v1727_v32 = vmul.f32 1.442695, %v1672_v54  ;;  %v1725_v58 = vmul.f32 1.442695, %v1671_v7 }
 0x458   :  { %7095 = vpow2.f32 %v1689_v23  ;;  %v1675_v23 = vsub.f32 %v8407_v36, %v12216_v55 }
 0x459   :  { %7097 = vpow2.f32 %v1693_v9  ;;  %v1623_v9 = vperm.slane %v8783_v35, 6 }
 0x45a   :  { %7099 = vpow2.f32 %v1731_v63  ;;  %v1733_v29 = vmul.f32 1.442695, %v1675_v23  ;;  %v12363_v63 = vld [vmem:[#allocation30_spill] sm:$0xff]  ;;  %v12364_v23 = vperm.slane %v8783_v35, 4 }
 0x45b   :  { %1787 = vperm.xlu1 %6995, %v8862_v52   ;;  %7101 = vpow2.f32 %v1723_v49  ;;  %v1673_v16 = vsub.f32 %v12363_v63, %v1629_v56  ;;  %v1662_v49 = vsub.f32 %v8581_v59, %v1623_v9  ;;  %v1622_v63 = vperm.slane %v8783_v35, 5 }
 0x45c   :  { %1838 = vperm.xlu0 %6994, %v8864_v25   ;;  %7103 = vpow2.f32 %v1727_v32  ;;  %v1658_v7 = vsub.f32 %v12365_v10, %v12364_v23  ;;  %v12225_v32 = vperm.slane %v8783_v35, 7 }
 0x45d   :  { %1781 = vperm.xlu2 %6993, %v8867_v12   ;;  %v8899_v18 = vpop.eup %7093  ;;  %7105 = vpow2.f32 %v1733_v29  ;;  %v1729_v56 = vmul.f32 1.442695, %v1673_v16  ;;  %v1707_v59 = vmul.f32 1.442695, %v1662_v49  ;;  %v1660_v23 = vsub.f32 %v8562_v39, %v1622_v63 }
 0x45e   :  { %12358 = vst [vmem:[#allocation37_spill] sm:$0xff] %v8899_v18  ;;  %v8902_v21 = vpop.eup %7095  ;;  %7107 = vpow2.f32 %v1725_v58  ;;  %v1699_v26 = vmul.f32 1.442695, %v1658_v7  ;;  %v1663_v58 = vsub.f32 %v8413_v30, %v12225_v32  ;;  %v1659_v49 = vsub.f32 %v8405_v57, %v1622_v63 }
 0x45f   :  { %v8876_v44 = vpop.permute.xlu2 %1013  ;;  %v8918_v38 = vpop.eup %7097  ;;  %7109 = vpow2.f32 %v1729_v56  ;;  %v1703_v39 = vmul.f32 1.442695, %v1660_v23  ;;  %v1661_v57 = vsub.f32 %v8389_v20, %v1623_v9  ;;  %v1631_v20 = vperm.slane %v8799_v60, 6 }
 0x460   :  { %12361 = vst [vmem:[#allocation32_spill] sm:$0xff] %v8918_v38  ;;  %v8920_v36 = vpop.eup %7099  ;;  %7111 = vpow2.f32 %v1707_v59  ;;  %v1709_v56 = vmul.f32 1.442695, %v1663_v58  ;;  %v12372_v59 = vperm.slane %v8799_v60, 5 }
 0x461   :  { %12362 = vst [vmem:[#allocation39_spill] sm:$0xff] %v8920_v36  ;;  %v8923_v55 = vpop.eup %7101  ;;  %7113 = vpow2.f32 %v1699_v26  ;;  %v1705_v9 = vmul.f32 1.442695, %v1661_v57 }
 0x462   :  { %7115 = vpow2.f32 %v1703_v39  ;;  %v1676_v23 = vsub.f32 %v8624_v43, %v12372_v59  ;;  %v1678_v43 = vsub.f32 %v8606_v24, %v1631_v20 }
 0x463   :  { %1832 = vperm.xlu1 %6995, %v8879_v34   ;;  %7117 = vpow2.f32 %v1709_v56 }
 0x464   :  { %1799 = vperm.xlu0 %6994, %v8881_v45   ;;  %v1739_v59 = vmul.f32 1.442695, %v1678_v43 }
 0x465   :  { %1829 = vperm.xlu2 %6993, %v8884_v42  }
 0x467   :  { %v8893_v6 = vpop.permute.xlu2 %1019 }
 0x46b   :  { %1793 = vperm.xlu1 %6995, %v8897_v8  }
 0x46c   :  { %1802 = vperm.xlu0 %6994, %v8899_v18  }
 0x46d   :  { %1790 = vperm.xlu2 %6993, %v8902_v21   ;;  %v8910_v2 = vpop.permute.xlu1 %1010 }
 0x46e   :  { %v8913_v28 = vpop.permute.xlu0 %1007 }
 0x46f   :  { %v8915_v48 = vpop.permute.xlu2 %1025 }
 0x473   :  { %1796 = vperm.xlu1 %6995, %v8918_v38  }
 0x474   :  { %1853 = vperm.xlu0 %6994, %v8920_v36   ;;  %v8940_v36 = vpop.eup %7103 }
 0x475   :  { %1841 = vperm.xlu2 %6993, %v8923_v55   ;;  %v8929_v54 = vpop.permute.xlu1 %1016  ;;  %12366 = vst [vmem:[#allocation27_spill] sm:$0xff] %v8940_v36  ;;  %v8942_v62 = vpop.eup %7105 }
 0x476   :  { %v8934_v18 = vpop.permute.xlu0 %1028  ;;  %12367 = vst [vmem:[#allocation42_spill] sm:$0xff] %v8942_v62  ;;  %v8945_v29 = vpop.eup %7107 }
 0x477   :  { %v8936_v47 = vpop.permute.xlu2 %1034  ;;  %12368 = vst [vmem:[#allocation40_spill] sm:$0xff] %v8945_v29  ;;  %v8961_v37 = vpop.eup %7109 }
 0x478   :  { %12369 = vst [vmem:[#allocation28_spill] sm:$0xff] %v8961_v37  ;;  %v8963_v30 = vpop.eup %7111 }
 0x479   :  { %12370 = vst [vmem:[#allocation45_spill] sm:$0xff] %v8963_v30  ;;  %v8966_v32 = vpop.eup %7113 }
 0x47a   :  { %12371 = vst [vmem:[#allocation44_spill] sm:$0xff] %v8966_v32 }
 0x47b   :  { %1847 = vperm.xlu1 %6995, %v8940_v36   ;;  %v1701_v36 = vmul.f32 1.442695, %v1659_v49 }
 0x47c   :  { %1856 = vperm.xlu0 %6994, %v8942_v62   ;;  %v1632_v62 = vperm.slane %v8799_v60, 7  ;;  %v1677_v60 = vsub.f32 %v8411_v13, %v1631_v20  ;;  %v12380_v20 = vperm.slane %v8783_v35, 7 }
 0x47d   :  { %1844 = vperm.xlu2 %6993, %v8945_v29   ;;  %v8953_v16 = vpop.permute.xlu1 %1022  ;;  %7119 = vpow2.f32 %v1701_v36  ;;  %v1103_v29 = vperm.slane %v8876_v44, %v8420_v61  ;;  %v1106_v44 = vperm.slane %v8893_v6, %v8420_v61 }
 0x47e   :  { %v8956_v10 = vpop.permute.xlu0 %1037  ;;  %v1680_v26 = vsub.f32 %v8633_v3, %v1632_v62  ;;  %v1735_v3 = vmul.f32 1.442695, %v1676_v23  ;;  %7121 = vpow2.f32 %v1705_v9  ;;  %v12379_v9 = vld [vmem:[#allocation33_spill] sm:$0xff] }
 0x47f   :  { %v8958_v7 = vpop.permute.xlu2 %1043 }
 0x480   :  { %v1743_v39 = vmul.f32 1.442695, %v1680_v26 }
 0x482   :  { %7123 = vpow2.f32 %v1743_v39  ;;  %v1664_v39 = vsub.f32 %v8660_v19, %v12380_v20 }
 0x483   :  { %1850 = vperm.xlu1 %6995, %v8961_v37   ;;  %7125 = vpow2.f32 %v1735_v3 }
 0x484   :  { %1817 = vperm.xlu0 %6994, %v8963_v30   ;;  %v8982_v30 = vpop.eup %7115  ;;  %7127 = vpow2.f32 %v1739_v59 }
 0x485   :  { %1805 = vperm.xlu2 %6993, %v8966_v32   ;;  %v8972_v63 = vpop.permute.xlu1 %1031  ;;  %12373 = vst [vmem:[#allocation43_spill] sm:$0xff] %v8982_v30  ;;  %v8984_v37 = vpop.eup %7117 }
 0x486   :  { %v8977_v58 = vpop.permute.xlu0 %1046  ;;  %12374 = vst [vmem:[#allocation34_spill] sm:$0xff] %v8984_v37  ;;  %v8987_v56 = vpop.eup %7119 }
 0x487   :  { %v8979_v49 = vpop.permute.xlu2 %1052  ;;  %12375 = vst [vmem:[#allocation30_spill] sm:$0xff] %v8987_v56  ;;  %v8997_v23 = vpop.eup %7121 }
 0x488   :  { %12376 = vst [vmem:[#allocation46_spill] sm:$0xff] %v8997_v23  ;;  %v8999_v32 = vpop.eup %7123 }
 0x489   :  { %12377 = vst [vmem:[#allocation64_spill] sm:$0xff] %v8999_v32  ;;  %v9002_v24 = vpop.eup %7125 }
 0x48a   :  { %12378 = vst [vmem:[#allocation65_spill] sm:$0xff] %v9002_v24 }
 0x48b   :  { %1811 = vperm.xlu1 %6995, %v8982_v30   ;;  %v1737_v30 = vmul.f32 1.442695, %v1677_v60 }
 0x48c   :  { %1820 = vperm.xlu0 %6994, %v8984_v37   ;;  %v1679_v37 = vsub.f32 %v12379_v9, %v1632_v62 }
 0x48d   :  { %1808 = vperm.xlu2 %6993, %v8987_v56   ;;  %v8992_v36 = vpop.permute.xlu1 %1040  ;;  %7129 = vpow2.f32 %v1737_v30  ;;  %v1711_v56 = vmul.f32 1.442695, %v1664_v39 }
 0x48e   :  { %v8995_v57 = vpop.permute.xlu0 %1055  ;;  %v1741_v60 = vmul.f32 1.442695, %v1679_v37 }
 0x48f   :  { %v1062_v26 = vpop.permute.xlu2 %1061 }
 0x490   :  { %7131 = vpow2.f32 %v1741_v60  ;;  %v1127_v41 = vperm.slane %v1062_v26, %v8420_v61 }
 0x491   :  { %7133 = vpow2.f32 %v1711_v56  ;;  %v1102_v56 = vperm.slane %v8910_v2, %v8417_v33 }
 0x493   :  { %1814 = vperm.xlu1 %6995, %v8997_v23   ;;  %v9014_v23 = vpop.eup %7127  ;;  %v1104_v40 = vsel %vm765_vm3, %v1103_v29, %v1102_v56  ;;  %v1109_v29 = vperm.slane %v8915_v48, %v8420_v61  ;;  %v1112_v48 = vperm.slane %v8972_v63, %v8420_v61 }
 0x494   :  { %1871 = vperm.xlu0 %6994, %v8999_v32   ;;  %12381 = vst [vmem:[#allocation33_spill] sm:$0xff] %v9014_v23  ;;  %v9017_v62 = vpop.eup %7129 }
 0x495   :  { %1859 = vperm.xlu2 %6993, %v9002_v24   ;;  %v9007_v13 = vpop.permute.xlu1 %1049  ;;  %12382 = vst [vmem:[#allocation66_spill] sm:$0xff] %v9017_v62 }
 0x496   :  { %v1065_v3 = vpop.permute.xlu0 %1064  ;;  %v9020_v19 = vpop.eup %7131 }
 0x497   :  { %v9012_v43 = vpop.permute.xlu2 %1070  ;;  %12383 = vst [vmem:[#allocation67_spill] sm:$0xff] %v9020_v19  ;;  %v9023_v30 = vpop.eup %7133  ;;  %v1129_v53 = vperm.slane %v1065_v3, %v8417_v33 }
 0x498   :  { %12384 = vst [vmem:[#allocation68_spill] sm:$0xff] %v9023_v30 }
 0x49b   :  { %1865 = vperm.xlu1 %6995, %v9014_v23  }
 0x49d   :  { %1862 = vperm.xlu2 %6993, %v9017_v62   ;;  %v1059_v59 = vpop.permute.xlu1 %1058  ;;  %v1100_v62 = vperm.slane %v8913_v28, %v8420_v61  ;;  %v1105_v28 = vperm.slane %v8929_v54, %v8417_v33  ;;  %v1123_v54 = vperm.slane %v8979_v49, %v8417_v33 }
 0x49e   :  { %v1074_v9 = vpop.permute.xlu0 %1073  ;;  %v1126_v38 = vperm.slane %v1059_v59, %v8417_v33 }
 0x49f   :  { %v1080_v35 = vpop.permute.xlu2 %1079  ;;  %v1107_v26 = vsel %vm765_vm3, %v1106_v44, %v1105_v28  ;;  %v1117_v44 = vperm.slane %v8992_v36, %v8417_v33 }
 0x4a0   :  { %v1128_v59 = vsel %vm765_vm3, %v1127_v41, %v1126_v38  ;;  %v1111_v38 = vperm.slane %v8934_v18, %v8417_v33  ;;  %v1115_v18 = vperm.slane %v8956_v10, %v8420_v61 }
 0x4a3   :  { %1868 = vperm.xlu1 %6995, %v9020_v19  }
 0x4a5   :  { %1823 = vperm.xlu2 %6993, %v9023_v30   ;;  %v1068_v37 = vpop.permute.xlu1 %1067  ;;  %v1099_v30 = vperm.slane %v8858_v1, %v8417_v33  ;;  %v1124_v1 = vperm.slane %v8995_v57, %v8420_v61  ;;  %v1108_v57 = vperm.slane %v8953_v16, %v8417_v33 }
 0x4a6   :  { %v1089_v20 = vpop.permute.xlu0 %1088  ;;  %v1130_v46 = vperm.slane %v1068_v37, %v8420_v61  ;;  %v1133_v37 = vperm.slane %v1074_v9, %v8420_v61  ;;  %v1132_v9 = vperm.slane %v9012_v43, %v8417_v33 }
 0x4a7   :  { %v1086_v39 = vpop.permute.xlu2 %1085  ;;  %v1101_v2 = vsel %vm765_vm3, %v1100_v62, %v1099_v30 }
 0x4a8   :  { %v1147_v62 = vsel %vm812_vm4, %v1104_v40, %v1101_v2  ;;  %v1131_v30 = vsel %vm765_vm3, %v1130_v46, %v1129_v53  ;;  %v1125_v40 = vsel %vm765_vm3, %v1124_v1, %v1123_v54  ;;  %v1136_v53 = vperm.slane %v1080_v35, %v8420_v61 }
 0x4a9   :  { %v1154_v16 = vsel %vm812_vm4, %v1128_v59, %v1125_v40  ;;  %v1148_v63 = vsel %vm814_vm5, %v1107_v26, %v1147_v62  ;;  %v1139_v56 = vperm.slane %v1086_v39, %v8420_v61  ;;  %v1110_v2 = vsel %vm765_vm3, %v1109_v29, %v1108_v57 }
 0x4aa   :  { %v1141_v35 = vperm.slane %v1089_v20, %v8417_v33  ;;  %v1113_v1 = vsel %vm765_vm3, %v1112_v48, %v1111_v38  ;;  %v1134_v43 = vsel %vm765_vm3, %v1133_v37, %v1132_v9  ;;  %v1118_v39 = vperm.slane %v8958_v7, %v8420_v61 }
 0x4ab   :  { %v1121_v29 = vperm.slane %v9007_v13, %v8420_v61  ;;  %v1149_v54 = vsel %vm816_vm6, %v1110_v2, %v1148_v63  ;;  %v1114_v7 = vperm.slane %v8936_v47, %v8417_v33  ;;  %v1120_v13 = vperm.slane %v8977_v58, %v8417_v33 }
 0x4ac   :  { %v1150_v57 = vsel %vm818_vm7, %v1113_v1, %v1149_v54 }
 0x4ad   :  { %v1077_v32 = vpop.permute.xlu1 %1076  ;;  %v1116_v40 = vsel %vm765_vm3, %v1115_v18, %v1114_v7  ;;  %v1122_v37 = vsel %vm765_vm3, %v1121_v29, %v1120_v13 }
 0x4ae   :  { %v9026_v23 = vpop.permute.xlu0 %1097  ;;  %v1135_v6 = vperm.slane %v1077_v32, %v8417_v33  ;;  %v1151_v47 = vsel %vm820_vm8, %v1116_v40, %v1150_v57 }
 0x4af   :  { %v9028_v60 = vpop.permute.xlu2 %1094  ;;  %v1145_v26 = vperm.slane %v9026_v23, %v8420_v61 }
 0x4b0   :  { %v1137_v28 = vsel %vm765_vm3, %v1136_v53, %v1135_v6  ;;  %v1144_v36 = vperm.slane %v9028_v60, %v8417_v33 }
 0x4b5   :  { %v1083_v24 = vpop.permute.xlu1 %1082 }
 0x4b6   :  { %v9034_v19 = vpop.permute.xlu0 %1784  ;;  %v1138_v49 = vperm.slane %v1083_v24, %v8417_v33  ;;  %v1155_v24 = vsel %vm814_vm5, %v1131_v30, %v1154_v16 }
 0x4b7   :  { %v9040_v45 = vpop.permute.xlu2 %1781  ;;  %v1156_v10 = vsel %vm816_vm6, %v1134_v43, %v1155_v24  ;;  %v1876_v7 = vperm.slane %v9034_v19, %v8417_v33 }
 0x4b8   :  { %v1140_v62 = vsel %vm765_vm3, %v1139_v56, %v1138_v49  ;;  %v1157_v59 = vsel %vm818_vm7, %v1137_v28, %v1156_v10  ;;  %v1146_v49 = vsel %vm765_vm3, %v1145_v26, %v1144_v36 }
 0x4b9   :  { %v1158_v6 = vsel %vm820_vm8, %v1140_v62, %v1157_v59 }
 0x4bd   :  { %v1092_v3 = vpop.permute.xlu1 %1091 }
 0x4be   :  { %v9070_v41 = vpop.permute.xlu0 %1826  ;;  %v1142_v46 = vperm.slane %v1092_v3, %v8420_v61  ;;  %v1119_v3 = vsel %vm765_vm3, %v1118_v39, %v1117_v44 }
 0x4bf   :  { %v9077_v32 = vpop.permute.xlu2 %1829  ;;  %v1152_v58 = vsel %vm822_vm9, %v1119_v3, %v1151_v47 }
 0x4c0   :  { %v1143_v20 = vsel %vm765_vm3, %v1142_v46, %v1141_v35  ;;  %v1153_v16 = vsel %vm824_vm10, %v1122_v37, %v1152_v58 }
 0x4c1   :  { %v1159_v60 = vsel %vm822_vm9, %v1143_v20, %v1158_v6  ;;  %v1163_v46 = vsel %vm246_vm0, %v1153_v16, 0.0 }
 0x4c2   :  { %v1160_v38 = vsel %vm824_vm10, %v1146_v49, %v1159_v60  ;;  %v1874_v60 = vperm.slane %v9040_v45, %v8420_v61 }
 0x4c3   :  { %v1166_v53 = vsel %vm246_vm0, %v1160_v38, 0.0 }
 0x4c5   :  { %v1779_v30 = vpop.permute.xlu1 %1778 }
 0x4c6   :  { %v9113_v48 = vpop.permute.xlu0 %1835  ;;  %v1873_v57 = vperm.slane %v1779_v30, %v8417_v33 }
 0x4c7   :  { %v1791_v23 = vpop.permute.xlu2 %1790 }
 0x4c8   :  { %v1879_v3 = vperm.slane %v1791_v23, %v8417_v33  ;;  %v1875_v49 = vsel %vm765_vm3, %v1874_v60, %v1873_v57  ;;  %v1898_v60 = vperm.slane %v9077_v32, %v8420_v61 }
 0x4cd   :  { %v1788_v63 = vpop.permute.xlu1 %1787  ;;  %1167 = vadd.xlane.f32.xlu1 %v1166_v53 }
 0x4ce   :  { %1164 = vadd.xlane.f32.xlu2 %v1163_v46  ;;  %v9125_v9 = vpop.permute.xlu0 %1838  ;;  %v1877_v36 = vperm.slane %v1788_v63, %v8420_v61 }
 0x4cf   :  { %v9127_v24 = vpop.permute.xlu2 %1841  ;;  %v1903_v32 = vperm.slane %v9125_v9, %v8417_v33 }
 0x4d0   :  { %v1878_v40 = vsel %vm765_vm3, %v1877_v36, %v1876_v7 }
 0x4d1   :  { %v1921_v58 = vsel %vm812_vm4, %v1878_v40, %v1875_v49  ;;  %v1901_v40 = vperm.slane %v9113_v48, %v8420_v61 }
 0x4d5   :  { %v1833_v56 = vpop.permute.xlu1 %1832 }
 0x4d6   :  { %v1800_v2 = vpop.permute.xlu0 %1799  ;;  %v1900_v57 = vperm.slane %v1833_v56, %v8417_v33 }
 0x4d7   :  { %v9129_v18 = vpop.permute.xlu2 %1844  ;;  %v1883_v37 = vperm.slane %v1800_v2, %v8420_v61 }
 0x4dd   :  { %v1794_v35 = vpop.permute.xlu1 %1793 }
 0x4de   :  { %v1803_v28 = vpop.permute.xlu0 %1802  ;;  %v1880_v26 = vperm.slane %v1794_v35, %v8420_v61 }
 0x4df   :  { %v1806_v1 = vpop.permute.xlu2 %1805  ;;  %v1885_v23 = vperm.slane %v1803_v28, %v8417_v33 }
 0x4e0   :  { %v1881_v47 = vsel %vm765_vm3, %v1880_v26, %v1879_v3  ;;  %v1886_v38 = vperm.slane %v1806_v1, %v8420_v61 }
 0x4e1   :  { %v1922_v53 = vsel %vm814_vm5, %v1881_v47, %v1921_v58  ;;  %v1902_v47 = vsel %vm765_vm3, %v1901_v40, %v1900_v57  ;;  %v1906_v58 = vperm.slane %v9129_v18, %v8417_v33 }
 0x4e2   :  { %v1887_v26 = vsel %vm765_vm3, %v1886_v38, %v1885_v23 }
 0x4e5   :  { %v1797_v44 = vpop.permute.xlu1 %1796 }
 0x4e6   :  { %v9131_v43 = vpop.permute.xlu0 %1853  ;;  %v1882_v13 = vperm.slane %v1797_v44, %v8417_v33 }
 0x4e7   :  { %v1809_v62 = vpop.permute.xlu2 %1808 }
 0x4e8   :  { %v1884_v19 = vsel %vm765_vm3, %v1883_v37, %v1882_v13  ;;  %v1888_v46 = vperm.slane %v1809_v62, %v8417_v33 }
 0x4e9   :  { %v1923_v63 = vsel %vm816_vm6, %v1884_v19, %v1922_v53  ;;  %v1904_v19 = vperm.slane %v9127_v24, %v8420_v61 }
 0x4ea   :  { %v1924_v7 = vsel %vm818_vm7, %v1887_v26, %v1923_v63 }
 0x4eb   :  { %v1905_v24 = vsel %vm765_vm3, %v1904_v19, %v1903_v32 }
 0x4ed   :  { %v1848_v39 = vpop.permute.xlu1 %1847 }
 0x4ee   :  { %v9133_v29 = vpop.permute.xlu0 %1856  ;;  %v1907_v49 = vperm.slane %v1848_v39, %v8420_v61  ;;  %v1910_v39 = vperm.slane %v9131_v43, %v8420_v61 }
 0x4ef   :  { %v9135_v10 = vpop.permute.xlu2 %1859  ;;  %v1912_v18 = vperm.slane %v9133_v29, %v8417_v33 }
 0x4f0   :  { %v1908_v23 = vsel %vm765_vm3, %v1907_v49, %v1906_v58 }
 0x4f5   :  { %v1851_v20 = vpop.permute.xlu1 %1850 }
 0x4f6   :  { %v1818_v59 = vpop.permute.xlu0 %1817 }
 0x4f7   :  { %v9137_v54 = vpop.permute.xlu2 %1862  ;;  %v1892_v1 = vperm.slane %v1818_v59, %v8420_v61  ;;  %v1897_v59 = vperm.slane %v9070_v41, %v8417_v33  ;;  %v1909_v41 = vperm.slane %v1851_v20, %v8417_v33 }
 0x4f8   :  { %v1915_v43 = vperm.slane %v9137_v54, %v8417_v33 }
 0x4f9   :  { %v1899_v48 = vsel %vm765_vm3, %v1898_v60, %v1897_v59 }
 0x4fa   :  { %v1928_v38 = vsel %vm812_vm4, %v1902_v47, %v1899_v48 }
 0x4fb   :  { %v1929_v20 = vsel %vm814_vm5, %v1905_v24, %v1928_v38 }
 0x4fc   :  { %v1930_v53 = vsel %vm816_vm6, %v1908_v23, %v1929_v20 }
 0x4fd   :  { %v1812_v6 = vpop.permute.xlu1 %1811 }
 0x4fe   :  { %v1889_v30 = vperm.slane %v1812_v6, %v8420_v61  ;;  %v1821_v45 = vpop.permute.xlu0 %1820 }
 0x4ff   :  { %v1824_v16 = vpop.permute.xlu2 %1823  ;;  %v1894_v44 = vperm.slane %v1821_v45, %v8417_v33  ;;  %v1913_v45 = vperm.slane %v9135_v10, %v8420_v61 }
 0x500   :  { %v1890_v2 = vsel %vm765_vm3, %v1889_v30, %v1888_v46  ;;  %v1895_v35 = vperm.slane %v1824_v16, %v8420_v61  ;;  %v1911_v16 = vsel %vm765_vm3, %v1910_v39, %v1909_v41 }
 0x501   :  { %v1925_v13 = vsel %vm820_vm8, %v1890_v2, %v1924_v7  ;;  %v1931_v63 = vsel %vm818_vm7, %v1911_v16, %v1930_v53 }
 0x502   :  { %v1896_v6 = vsel %vm765_vm3, %v1895_v35, %v1894_v44  ;;  %v1914_v44 = vsel %vm765_vm3, %v1913_v45, %v1912_v18 }
 0x503   :  { %v1932_v26 = vsel %vm820_vm8, %v1914_v44, %v1931_v63 }
 0x505   :  { %v1815_v36 = vpop.permute.xlu1 %1814 }
 0x506   :  { %v1891_v28 = vperm.slane %v1815_v36, %v8417_v33  ;;  %v1872_v46 = vpop.permute.xlu0 %1871 }
 0x507   :  { %v1919_v36 = vperm.slane %v1872_v46, %v8420_v61 }
 0x508   :  { %v1893_v62 = vsel %vm765_vm3, %v1892_v1, %v1891_v28 }
 0x509   :  { %v1926_v3 = vsel %vm822_vm9, %v1893_v62, %v1925_v13 }
 0x50a   :  { %v1927_v37 = vsel %vm824_vm10, %v1896_v6, %v1926_v3 }
 0x50b   :  { %v1937_v56 = vsel %vm246_vm0, %v1927_v37, 0.0 }
 0x50c   :  { %1938 = vadd.xlane.f32.xlu0 %v1937_v56 }
 0x50d   :  { %v1866_v30 = vpop.permute.xlu1 %1865 }
 0x50e   :  { %v1916_v9 = vperm.slane %v1866_v30, %v8420_v61 }
 0x510   :  { %v1917_v2 = vsel %vm765_vm3, %v1916_v9, %v1915_v43 }
 0x511   :  { %v1933_v1 = vsel %vm822_vm9, %v1917_v2, %v1932_v26 }
 0x515   :  { %v1869_v35 = vpop.permute.xlu1 %1868 }
 0x516   :  { %v1918_v10 = vperm.slane %v1869_v35, %v8417_v33 }
 0x518   :  { %v1920_v29 = vsel %vm765_vm3, %v1919_v36, %v1918_v10 }
 0x519   :  { %v1934_v54 = vsel %vm824_vm10, %v1920_v29, %v1933_v1 }
 0x51a   :  { %v1940_v28 = vsel %vm246_vm0, %v1934_v54, 0.0 }
 0x51b   :  { %1941 = vadd.xlane.f32.xlu2 %v1940_v28 }
 0x541   :  { %v1165_v62 = vpop.xlane.xlu2 %1164 }
 0x57f   :  { %v1939_v7 = vpop.xlane.xlu0 %1938 }
 0x580   :  { %7135 = vrcp.f32 %v1939_v7 }
 0x581   :  { %7137 = vrcp.f32 %v1165_v62 }
 0x586   :  { %v9215_v57 = vpop.eup %7135 }
 0x587   :  { %v1948_v13 = vperm.slane %v9215_v57, 1  ;;  %v1947_v6 = vperm.slane %v9215_v57, 0  ;;  %v9223_v41 = vpop.eup %7137 }
 0x588   :  { %v1173_v48 = vperm.slane %v9223_v41, 0 }
 0x589   :  { %v1981_v3 = vmul.f32 %v8818_v4, %v1948_v13  ;;  %v1982_v60 = vmul.f32 %v8862_v52, %v1948_v13  ;;  %v1979_v59 = vmul.f32 %v8846_v17, %v1947_v6  ;;  %v1980_v40 = vmul.f32 %v8867_v12, %v1947_v6  ;;  %v1168_v4 = vpop.xlane.xlu1 %1167 }
 0x58a   :  { %v1205_v9 = vmul.f32 %v8691_v50, %v1173_v48  ;;  %v1206_v53 = vmul.f32 %v8688_v27, %v1173_v48 }
 0x58b   :  { %v2012_v37 = vpack.c.bf16 %v1982_v60, %v1981_v3  ;;  %v2011_v56 = vpack.c.bf16 %v1980_v40, %v1979_v59  ;;  %v1175_v60 = vperm.slane %v9223_v41, 2 }
 0x58d   :  { %v2045_v47 = vunpack.c.l.b16 %v2012_v37  ;;  %v2044_v49 = vunpack.c.h.b16 %v2011_v56  ;;  %v2043_v19 = vunpack.c.l.b16 %v2011_v56  ;;  %v2046_v52 = vunpack.c.h.b16 %v2012_v37  ;;  %v12385_v56 = vld [vmem:[#allocation47_spill] sm:$0xff] }
 0x58e   :  { %v1942_v32 = vpop.xlane.xlu2 %1941 }
 0x58f   :  { %7139 = vrcp.f32 %v1942_v32  ;;  %2082 = vperm.xlu2 %6993, %v2045_v47   ;;  %2079 = vperm.xlu0 %6994, %v2044_v49   ;;  %v1209_v47 = vmul.f32 %v12385_v56, %v1175_v60  ;;  %v12386_v49 = vld [vmem:[#allocation51_spill] sm:$0xff]  ;;  %v12399_v56 = vld [vmem:[#allocation28_spill] sm:$0xff] }
 0x590   :  { %2076 = vperm.xlu1 %6995, %v2043_v19   ;;  %7141 = vrcp.f32 %v1168_v4 }
 0x595   :  { %v9225_v30 = vpop.eup %7139 }
 0x596   :  { %v1955_v17 = vperm.slane %v9225_v30, 0  ;;  %v1956_v12 = vperm.slane %v9225_v30, 1  ;;  %v9236_v43 = vpop.eup %7141 }
 0x597   :  { %2085 = vperm.xlu0 %6994, %v2046_v52   ;;  %v1182_v36 = vperm.slane %v9236_v43, 1  ;;  %v12387_v52 = vld [vmem:[#allocation58_spill] sm:$0xff] }
 0x598   :  { %v1995_v58 = vmul.f32 %v8833_v14, %v1955_v17  ;;  %v1996_v38 = vmul.f32 %v8884_v42, %v1955_v17  ;;  %v1997_v39 = vmul.f32 %v8879_v34, %v1956_v12  ;;  %v1998_v23 = vmul.f32 %v8848_v31, %v1956_v12  ;;  %v12388_v12 = vld [vmem:[#allocation61_spill] sm:$0xff] }
 0x599   :  { %v1237_v14 = vpack.c.bf16 %v1206_v53, %v1205_v9  ;;  %v1174_v42 = vperm.slane %v9223_v41, 1  ;;  %v1181_v34 = vperm.slane %v9236_v43, 0  ;;  %v1223_v1 = vmul.f32 %v8769_v15, %v1182_v36  ;;  %v12391_v53 = vld [vmem:[#allocation40_spill] sm:$0xff] }
 0x59a   :  { %v2019_v24 = vpack.c.bf16 %v1996_v38, %v1995_v58  ;;  %v2020_v16 = vpack.c.bf16 %v1998_v23, %v1997_v39  ;;  %v12389_v38 = vld [vmem:[#allocation32_spill] sm:$0xff]  ;;  %v12390_v23 = vld [vmem:[#allocation29_spill] sm:$0xff]  ;;  %v1958_v9 = vperm.slane %v9225_v30, 3 }
 0x59b   :  { %v2271_v31 = vunpack.c.l.b16 %v1237_v14  ;;  %v1207_v63 = vmul.f32 %v8686_v0, %v1174_v42  ;;  %v1208_v50 = vmul.f32 %v8704_v51, %v1174_v42  ;;  %v2272_v2 = vunpack.c.h.b16 %v1237_v14  ;;  %v12392_v42 = vld [vmem:[#allocation27_spill] sm:$0xff] }
 0x59c   :  { %v2060_v20 = vunpack.c.h.b16 %v2019_v24  ;;  %v2059_v45 = vunpack.c.l.b16 %v2019_v24  ;;  %v2061_v18 = vunpack.c.l.b16 %v2020_v16  ;;  %v2062_v46 = vunpack.c.h.b16 %v2020_v16 }
 0x59d   :  { %v1221_v35 = vmul.f32 %v8774_v11, %v1181_v34  ;;  %v1222_v27 = vmul.f32 %v8744_v22, %v1181_v34  ;;  %v1238_v44 = vpack.c.bf16 %v1208_v50, %v1207_v63  ;;  %v1224_v0 = vmul.f32 %v8792_v5, %v1182_v36  ;;  %v12394_v36 = vld [vmem:[#allocation54_spill] sm:$0xff] }
 0x59e   :  { %2127 = vperm.xlu2 %6993, %v2060_v20   ;;  %2124 = vperm.xlu1 %6995, %v2059_v45   ;;  %v1949_v22 = vperm.slane %v9215_v57, 2  ;;  %v1957_v11 = vperm.slane %v9225_v30, 2  ;;  %v2001_v14 = vmul.f32 %v12391_v53, %v1958_v9  ;;  %v2002_v34 = vmul.f32 %v12392_v42, %v1958_v9 }
 0x59f   :  { %2130 = vperm.xlu0 %6994, %v2061_v18   ;;  %v1245_v10 = vpack.c.bf16 %v1222_v27, %v1221_v35  ;;  %v2274_v26 = vunpack.c.h.b16 %v1238_v44  ;;  %v2273_v29 = vunpack.c.l.b16 %v1238_v44  ;;  %v1246_v51 = vpack.c.bf16 %v1224_v0, %v1223_v1  ;;  %v12393_v27 = vld [vmem:[#allocation49_spill] sm:$0xff]  ;;  %v12396_v0 = vld [vmem:[#allocation60_spill] sm:$0xff] }
 0x5a0   :  { %v1983_v62 = vmul.f32 %v8902_v21, %v1949_v22  ;;  %v1984_v13 = vmul.f32 %v8897_v8, %v1949_v22  ;;  %v1999_v15 = vmul.f32 %v8864_v25, %v1957_v11  ;;  %v2000_v5 = vmul.f32 %v8923_v55, %v1957_v11 }
 0x5a1   :  { %v2287_v54 = vunpack.c.l.b16 %v1245_v10  ;;  %v2289_v28 = vunpack.c.l.b16 %v1246_v51  ;;  %v2288_v7 = vunpack.c.h.b16 %v1245_v10  ;;  %v2290_v6 = vunpack.c.h.b16 %v1246_v51 }
 0x5a2   :  { %v2013_v3 = vpack.c.bf16 %v1984_v13, %v1983_v62  ;;  %v2021_v59 = vpack.c.bf16 %v2000_v5, %v1999_v15  ;;  %v1210_v21 = vmul.f32 %v12386_v49, %v1175_v60  ;;  %v1183_v25 = vperm.slane %v9236_v43, 2  ;;  %v12397_v62 = vld [vmem:[#allocation37_spill] sm:$0xff]  ;;  %v12400_v49 = vld [vmem:[#allocation39_spill] sm:$0xff] }
 0x5a3   :  { %v1950_v55 = vperm.slane %v9215_v57, 3  ;;  %v1176_v63 = vperm.slane %v9223_v41, 3  ;;  %v1184_v50 = vperm.slane %v9236_v43, 3  ;;  %v1951_v22 = vperm.slane %v9215_v57, 4 }
 0x5a4   :  { %v2048_v40 = vunpack.c.h.b16 %v2013_v3  ;;  %v2047_v37 = vunpack.c.l.b16 %v2013_v3  ;;  %v2063_v19 = vunpack.c.l.b16 %v2021_v59  ;;  %v1239_v8 = vpack.c.bf16 %v1210_v21, %v1209_v47 }
 0x5a5   :  { %v2064_v4 = vunpack.c.h.b16 %v2021_v59  ;;  %v1225_v17 = vmul.f32 %v12387_v52, %v1183_v25  ;;  %v1226_v48 = vmul.f32 %v12388_v12, %v1183_v25  ;;  %v1985_v39 = vmul.f32 %v12389_v38, %v1950_v55 }
 0x5a6   :  { %2304 = vperm.xlu2 %6993, %v2271_v31   ;;  %2133 = vperm.xlu1 %6995, %v2062_v46   ;;  %v2275_v32 = vunpack.c.l.b16 %v1239_v8  ;;  %v2276_v58 = vunpack.c.h.b16 %v1239_v8  ;;  %v1986_v24 = vmul.f32 %v12390_v23, %v1950_v55  ;;  %v2022_v46 = vpack.c.bf16 %v2002_v34, %v2001_v14  ;;  %v12401_v8 = vld [vmem:[#allocation48_spill] sm:$0xff]  ;;  %v12405_v14 = vld [vmem:[#allocation30_spill] sm:$0xff]  ;;  %v12406_v34 = vld [vmem:[#allocation43_spill] sm:$0xff] }
 0x5a7   :  { %2307 = vperm.xlu0 %6994, %v2272_v2   ;;  %v1247_v16 = vpack.c.bf16 %v1226_v48, %v1225_v17  ;;  %v1211_v44 = vmul.f32 %v12393_v27, %v1176_v63  ;;  %v1212_v10 = vmul.f32 %v12394_v36, %v1176_v63  ;;  %v1987_v13 = vmul.f32 %v12397_v62, %v1951_v22  ;;  %v12402_v55 = vld [vmem:[#allocation52_spill] sm:$0xff]  ;;  %v12407_v63 = vld [vmem:[#allocation42_spill] sm:$0xff] }
 0x5a8   :  { %v2014_v20 = vpack.c.bf16 %v1986_v24, %v1985_v39  ;;  %v2065_v2 = vunpack.c.l.b16 %v2022_v46  ;;  %v1959_v60 = vperm.slane %v9225_v30, 4  ;;  %v1177_v59 = vperm.slane %v9223_v41, 4  ;;  %v12404_v39 = vld [vmem:[#allocation31_spill] sm:$0xff] }
 0x5a9   :  { %v2292_v45 = vunpack.c.h.b16 %v1247_v16  ;;  %v2291_v18 = vunpack.c.l.b16 %v1247_v16  ;;  %v1240_v51 = vpack.c.bf16 %v1212_v10, %v1211_v44  ;;  %v1185_v52 = vperm.slane %v9236_v43, 4 }
 0x5aa   :  { %v2049_v31 = vunpack.c.l.b16 %v2014_v20  ;;  %v2050_v35 = vunpack.c.h.b16 %v2014_v20  ;;  %v2003_v47 = vmul.f32 %v12399_v56, %v1959_v60  ;;  %v2004_v21 = vmul.f32 %v12400_v49, %v1959_v60  ;;  %v12412_v60 = vld [vmem:[#allocation26_spill] sm:$0xff] }
 0x5ab   :  { %v1213_v25 = vmul.f32 %v12401_v8, %v1177_v59  ;;  %v1230_v23 = vmul.f32 %v12404_v39, %v1185_v52  ;;  %v1952_v20 = vperm.slane %v9215_v57, 5  ;;  %v1178_v36 = vperm.slane %v9223_v41, 5 }
 0x5ad   :  { %v1989_v42 = vmul.f32 %v12405_v14, %v1952_v20  ;;  %v12417_v14 = vld [vmem:[#allocation55_spill] sm:$0xff] }
 0x5ae   :  { %2313 = vperm.xlu2 %6993, %v2274_v26   ;;  %2310 = vperm.xlu1 %6995, %v2273_v29   ;;  %v2066_v26 = vunpack.c.h.b16 %v2022_v46  ;;  %v12395_v29 = vld [vmem:[#allocation63_spill] sm:$0xff] }
 0x5af   :  { %2352 = vperm.xlu0 %6994, %v2287_v54   ;;  %v1227_v1 = vmul.f32 %v12395_v29, %v1184_v50  ;;  %v1228_v54 = vmul.f32 %v12396_v0, %v1184_v50 }
 0x5b1   :  { %v1248_v11 = vpack.c.bf16 %v1228_v54, %v1227_v1  ;;  %v12409_v1 = vld [vmem:[#allocation56_spill] sm:$0xff]  ;;  %v12410_v54 = vld [vmem:[#allocation50_spill] sm:$0xff] }
 0x5b2   :  { %v1215_v0 = vmul.f32 %v12409_v1, %v1178_v36 }
 0x5b3   :  { %v2293_v5 = vunpack.c.l.b16 %v1248_v11 }
 0x5b6   :  { %2358 = vperm.xlu2 %6993, %v2289_v28   ;;  %2355 = vperm.xlu1 %6995, %v2288_v7   ;;  %v2278_v28 = vunpack.c.h.b16 %v1240_v51  ;;  %v2277_v7 = vunpack.c.l.b16 %v1240_v51  ;;  %v1216_v51 = vmul.f32 %v12410_v54, %v1178_v36 }
 0x5b7   :  { %2361 = vperm.xlu0 %6994, %v2290_v6   ;;  %v12398_v6 = vld [vmem:[#allocation44_spill] sm:$0xff] }
 0x5b8   :  { %v1988_v15 = vmul.f32 %v12398_v6, %v1951_v22 }
 0x5ba   :  { %v2015_v3 = vpack.c.bf16 %v1988_v15, %v1987_v13  ;;  %v1953_v13 = vperm.slane %v9215_v57, 6 }
 0x5be   :  { %2091 = vperm.xlu2 %6993, %v2048_v40   ;;  %2088 = vperm.xlu1 %6995, %v2047_v37   ;;  %v2051_v40 = vunpack.c.l.b16 %v2015_v3  ;;  %v2294_v37 = vunpack.c.h.b16 %v1248_v11 }
 0x5bf   :  { %2136 = vperm.xlu0 %6994, %v2063_v19   ;;  %v2052_v19 = vunpack.c.h.b16 %v2015_v3 }
 0x5c6   :  { %2316 = vperm.xlu2 %6993, %v2275_v32   ;;  %2139 = vperm.xlu1 %6995, %v2064_v4   ;;  %v1214_v32 = vmul.f32 %v12402_v55, %v1177_v59  ;;  %v2023_v4 = vpack.c.bf16 %v2004_v21, %v2003_v47  ;;  %v12414_v47 = vld [vmem:[#allocation45_spill] sm:$0xff] }
 0x5c7   :  { %2319 = vperm.xlu0 %6994, %v2276_v58   ;;  %v12403_v58 = vld [vmem:[#allocation25_spill] sm:$0xff]  ;;  %v1992_v49 = vmul.f32 %v12414_v47, %v1953_v13  ;;  %v12424_v47 = vld [vmem:[#allocation64_spill] sm:$0xff] }
 0x5c8   :  { %v1241_v17 = vpack.c.bf16 %v1214_v32, %v1213_v25  ;;  %v2068_v12 = vunpack.c.h.b16 %v2023_v4  ;;  %v2067_v48 = vunpack.c.l.b16 %v2023_v4  ;;  %v1229_v38 = vmul.f32 %v12403_v58, %v1185_v52 }
 0x5c9   :  { %v1961_v25 = vperm.slane %v9225_v30, 6 }
 0x5ca   :  { %v2279_v24 = vunpack.c.l.b16 %v1241_v17  ;;  %v1249_v9 = vpack.c.bf16 %v1230_v23, %v1229_v38  ;;  %v2280_v53 = vunpack.c.h.b16 %v1241_v17  ;;  %v12415_v17 = vld [vmem:[#allocation66_spill] sm:$0xff] }
 0x5cc   :  { %v2296_v46 = vunpack.c.h.b16 %v1249_v9 }
 0x5ce   :  { %2367 = vperm.xlu2 %6993, %v2292_v45   ;;  %2364 = vperm.xlu1 %6995, %v2291_v18   ;;  %v1960_v45 = vperm.slane %v9225_v30, 5  ;;  %v2295_v18 = vunpack.c.l.b16 %v1249_v9  ;;  %v1179_v9 = vperm.slane %v9223_v41, 6 }
 0x5cf   :  { %2094 = vperm.xlu0 %6994, %v2049_v31   ;;  %v1990_v31 = vmul.f32 %v12406_v34, %v1952_v20  ;;  %v12418_v34 = vld [vmem:[#allocation59_spill] sm:$0xff] }
 0x5d0   :  { %v2005_v50 = vmul.f32 %v12407_v63, %v1960_v45  ;;  %v12419_v63 = vld [vmem:[#allocation62_spill] sm:$0xff] }
 0x5d1   :  { %v2016_v44 = vpack.c.bf16 %v1990_v31, %v1989_v42  ;;  %v1217_v42 = vmul.f32 %v12417_v14, %v1179_v9  ;;  %v1218_v31 = vmul.f32 %v12418_v34, %v1179_v9  ;;  %v12427_v9 = vld [vmem:[#allocation41_spill] sm:$0xff] }
 0x5d3   :  { %v2053_v29 = vunpack.c.l.b16 %v2016_v44 }
 0x5d6   :  { %2142 = vperm.xlu2 %6993, %v2065_v2   ;;  %2097 = vperm.xlu1 %6995, %v2050_v35   ;;  %v12408_v2 = vld [vmem:[#allocation65_spill] sm:$0xff] }
 0x5d7   :  { %2145 = vperm.xlu0 %6994, %v2066_v26   ;;  %v2006_v35 = vmul.f32 %v12408_v2, %v1960_v45  ;;  %v2054_v26 = vunpack.c.h.b16 %v2016_v44  ;;  %v1187_v45 = vperm.slane %v9236_v43, 6  ;;  %v12420_v2 = vld [vmem:[#allocation36_spill] sm:$0xff] }
 0x5d9   :  { %v2024_v10 = vpack.c.bf16 %v2006_v35, %v2005_v50  ;;  %v1233_v50 = vmul.f32 %v12419_v63, %v1187_v45  ;;  %v1234_v35 = vmul.f32 %v12420_v2, %v1187_v45 }
 0x5db   :  { %v2069_v22 = vunpack.c.l.b16 %v2024_v10  ;;  %v2070_v15 = vunpack.c.h.b16 %v2024_v10  ;;  %v1243_v10 = vpack.c.bf16 %v1218_v31, %v1217_v42  ;;  %v1251_v1 = vpack.c.bf16 %v1234_v35, %v1233_v50 }
 0x5dd   :  { %v2283_v54 = vunpack.c.l.b16 %v1243_v10 }
 0x5de   :  { %2325 = vperm.xlu2 %6993, %v2278_v28   ;;  %2322 = vperm.xlu1 %6995, %v2277_v7   ;;  %v1242_v28 = vpack.c.bf16 %v1216_v51, %v1215_v0  ;;  %v1186_v7 = vperm.slane %v9236_v43, 5  ;;  %v2284_v0 = vunpack.c.h.b16 %v1243_v10  ;;  %v12421_v51 = vld [vmem:[#allocation34_spill] sm:$0xff] }
 0x5df   :  { %2370 = vperm.xlu0 %6994, %v2293_v5   ;;  %v12411_v5 = vld [vmem:[#allocation35_spill] sm:$0xff] }
 0x5e0   :  { %v2281_v6 = vunpack.c.l.b16 %v1242_v28  ;;  %v1231_v3 = vmul.f32 %v12411_v5, %v1186_v7  ;;  %v1232_v59 = vmul.f32 %v12412_v60, %v1186_v7  ;;  %v1180_v60 = vperm.slane %v9223_v41, 7 }
 0x5e1   :  { %v1188_v41 = vperm.slane %v9236_v43, 7 }
 0x5e2   :  { %v1250_v8 = vpack.c.bf16 %v1232_v59, %v1231_v3 }
 0x5e3   :  { %v1235_v45 = vmul.f32 %v12427_v9, %v1188_v41 }
 0x5e4   :  { %v2298_v4 = vunpack.c.h.b16 %v1250_v8  ;;  %v2297_v52 = vunpack.c.l.b16 %v1250_v8 }
 0x5e6   :  { %2100 = vperm.xlu2 %6993, %v2051_v40   ;;  %2373 = vperm.xlu1 %6995, %v2294_v37   ;;  %v2282_v40 = vunpack.c.h.b16 %v1242_v28  ;;  %v12413_v37 = vld [vmem:[#allocation46_spill] sm:$0xff]  ;;  %v12422_v28 = vld [vmem:[#allocation68_spill] sm:$0xff] }
 0x5e7   :  { %2103 = vperm.xlu0 %6994, %v2052_v19   ;;  %v1991_v56 = vmul.f32 %v12413_v37, %v1953_v13  ;;  %v2299_v13 = vunpack.c.l.b16 %v1251_v1  ;;  %v12423_v37 = vld [vmem:[#allocation67_spill] sm:$0xff] }
 0x5e9   :  { %v9283_v16 = vpop.permute.xlu2 %2082  ;;  %v2017_v32 = vpack.c.bf16 %v1992_v49, %v1991_v56 }
 0x5eb   :  { %v2055_v38 = vunpack.c.l.b16 %v2017_v32 }
 0x5ee   :  { %2151 = vperm.xlu2 %6993, %v2068_v12   ;;  %2148 = vperm.xlu1 %6995, %v2067_v48   ;;  %v2007_v12 = vmul.f32 %v12415_v17, %v1961_v25  ;;  %v12416_v48 = vld [vmem:[#allocation33_spill] sm:$0xff] }
 0x5ef   :  { %2328 = vperm.xlu0 %6994, %v2279_v24   ;;  %v2008_v58 = vmul.f32 %v12416_v48, %v1961_v25  ;;  %v12425_v25 = vld [vmem:[#allocation53_spill] sm:$0xff] }
 0x5f1   :  { %v2025_v24 = vpack.c.bf16 %v2008_v58, %v2007_v12 }
 0x5f6   :  { %2376 = vperm.xlu2 %6993, %v2295_v18   ;;  %2331 = vperm.xlu1 %6995, %v2280_v53   ;;  %v2071_v18 = vunpack.c.l.b16 %v2025_v24  ;;  %v2056_v53 = vunpack.c.h.b16 %v2017_v32  ;;  %v1219_v32 = vmul.f32 %v12425_v25, %v1180_v60 }
 0x5f7   :  { %2379 = vperm.xlu0 %6994, %v2296_v46   ;;  %v2072_v46 = vunpack.c.h.b16 %v2025_v24 }
 0x5f8   :  { %v9291_v27 = vpop.permute.xlu2 %2127 }
 0x5fe   :  { %2109 = vperm.xlu2 %6993, %v2054_v26   ;;  %2106 = vperm.xlu1 %6995, %v2053_v29   ;;  %v1954_v26 = vperm.slane %v9215_v57, 7  ;;  %v1962_v57 = vperm.slane %v9225_v30, 7 }
 0x5ff   :  { %2154 = vperm.xlu0 %6994, %v2069_v22  }
 0x600   :  { %v9296_v11 = vpop.permute.xlu2 %2304  ;;  %v1993_v22 = vmul.f32 %v12421_v51, %v1954_v26  ;;  %v1994_v7 = vmul.f32 %v12422_v28, %v1954_v26  ;;  %v2009_v56 = vmul.f32 %v12423_v37, %v1962_v57  ;;  %v2010_v49 = vmul.f32 %v12424_v47, %v1962_v57  ;;  %v12429_v26 = vld [vmem:[#allocation24_spill] sm:$0xff] }
 0x601   :  { %v9299_v62 = vpop.permute.xlu0 %2079 }
 0x602   :  { %v9306_v21 = vpop.permute.xlu1 %2076  ;;  %v2018_v5 = vpack.c.bf16 %v1994_v7, %v1993_v22  ;;  %v2026_v12 = vpack.c.bf16 %v2010_v49, %v2009_v56 }
 0x604   :  { %v2057_v59 = vunpack.c.l.b16 %v2018_v5  ;;  %v2058_v8 = vunpack.c.h.b16 %v2018_v5  ;;  %v2073_v24 = vunpack.c.l.b16 %v2026_v12 }
 0x606   :  { %2334 = vperm.xlu2 %6993, %v2281_v6   ;;  %2157 = vperm.xlu1 %6995, %v2070_v15  }
 0x607   :  { %2337 = vperm.xlu0 %6994, %v2282_v40   ;;  %v2300_v40 = vunpack.c.h.b16 %v1251_v1 }
 0x608   :  { %v9308_v19 = vpop.permute.xlu2 %2313 }
 0x609   :  { %v9311_v55 = vpop.permute.xlu0 %2085 }
 0x60e   :  { %2385 = vperm.xlu2 %6993, %v2298_v4   ;;  %2382 = vperm.xlu1 %6995, %v2297_v52   ;;  %v12426_v4 = vld [vmem:[#allocation57_spill] sm:$0xff] }
 0x60f   :  { %2112 = vperm.xlu0 %6994, %v2055_v38   ;;  %v1220_v52 = vmul.f32 %v12426_v4, %v1180_v60  ;;  %v2074_v38 = vunpack.c.h.b16 %v2026_v12 }
 0x610   :  { %v9315_v39 = vpop.permute.xlu2 %2358  ;;  %v9317_v23 = vpop.permute.xlu1 %2124 }
 0x611   :  { %v9320_v20 = vpop.permute.xlu0 %2130  ;;  %v1244_v58 = vpack.c.bf16 %v1220_v52, %v1219_v32 }
 0x613   :  { %v2285_v14 = vunpack.c.l.b16 %v1244_v58  ;;  %v2286_v63 = vunpack.c.h.b16 %v1244_v58 }
 0x616   :  { %2160 = vperm.xlu2 %6993, %v2071_v18   ;;  %2115 = vperm.xlu1 %6995, %v2056_v53   ;;  %v12428_v18 = vld [vmem:[#allocation38_spill] sm:$0xff] }
 0x617   :  { %2163 = vperm.xlu0 %6994, %v2072_v46   ;;  %v1236_v53 = vmul.f32 %v12428_v18, %v1188_v41  ;;  %v2171_v18 = vperm.slane %v9306_v21, %v8417_v33  ;;  %v2403_v21 = vperm.slane %v9308_v19, %v8420_v61  ;;  %v2198_v19 = vperm.slane %v9320_v20, %v8417_v33 }
 0x618   :  { %v9327_v44 = vpop.permute.xlu2 %2091  ;;  %v9329_v36 = vpop.permute.xlu1 %2133 }
 0x619   :  { %v9332_v29 = vpop.permute.xlu0 %2307  ;;  %v1252_v31 = vpack.c.bf16 %v1236_v53, %v1235_v45  ;;  %v2172_v45 = vperm.slane %v9299_v62, %v8420_v61  ;;  %v2175_v53 = vperm.slane %v9311_v55, %v8420_v61  ;;  %v2199_v55 = vperm.slane %v9329_v36, %v8420_v61 }
 0x61b   :  { %v2301_v43 = vunpack.c.l.b16 %v1252_v31  ;;  %v2302_v50 = vunpack.c.h.b16 %v1252_v31  ;;  %v2174_v31 = vperm.slane %v9283_v16, %v8417_v33  ;;  %v2173_v62 = vsel %vm765_vm3, %v2172_v45, %v2171_v18 }
 0x61c   :  { %v2195_v45 = vperm.slane %v9317_v23, %v8417_v33 }
 0x61e   :  { %2343 = vperm.xlu2 %6993, %v2284_v0   ;;  %2340 = vperm.xlu1 %6995, %v2283_v54  }
 0x61f   :  { %2388 = vperm.xlu0 %6994, %v2299_v13  }
 0x620   :  { %v9336_v6 = vpop.permute.xlu2 %2316  ;;  %v9338_v15 = vpop.permute.xlu1 %2310 }
 0x621   :  { %v9341_v3 = vpop.permute.xlu0 %2352  ;;  %v2402_v16 = vperm.slane %v9338_v15, %v8417_v33 }
 0x622   :  { %v2423_v18 = vperm.slane %v9341_v3, %v8417_v33 }
 0x626   :  { %2118 = vperm.xlu2 %6993, %v2057_v59   ;;  %2391 = vperm.xlu1 %6995, %v2300_v40  }
 0x627   :  { %2121 = vperm.xlu0 %6994, %v2058_v8  }
 0x628   :  { %v9348_v17 = vpop.permute.xlu2 %2367  ;;  %v9350_v30 = vpop.permute.xlu1 %2355 }
 0x629   :  { %v9353_v48 = vpop.permute.xlu0 %2361 }
 0x62e   :  { %2169 = vperm.xlu2 %6993, %v2074_v38   ;;  %2166 = vperm.xlu1 %6995, %v2073_v24  }
 0x62f   :  { %2346 = vperm.xlu0 %6994, %v2285_v14  }
 0x630   :  { %v9357_v42 = vpop.permute.xlu2 %2142  ;;  %v9359_v34 = vpop.permute.xlu1 %2088 }
 0x631   :  { %v9361_v46 = vpop.permute.xlu0 %2136  ;;  %v2177_v36 = vperm.slane %v9359_v34, %v8417_v33  ;;  %v2178_v34 = vperm.slane %v9327_v44, %v8420_v61 }
 0x636   :  { %2394 = vperm.xlu2 %6993, %v2301_v43   ;;  %2349 = vperm.xlu1 %6995, %v2286_v63   ;;  %v2196_v43 = vperm.slane %v9291_v27, %v8420_v61  ;;  %v2424_v27 = vperm.slane %v9350_v30, %v8420_v61  ;;  %v2426_v30 = vperm.slane %v9315_v39, %v8417_v33 }
 0x637   :  { %2397 = vperm.xlu0 %6994, %v2302_v50   ;;  %v2399_v50 = vperm.slane %v9296_v11, %v8417_v33  ;;  %v2405_v39 = vperm.slane %v9336_v6, %v8417_v33 }
 0x638   :  { %v9363_v2 = vpop.permute.xlu1 %2139  ;;  %v9365_v35 = vpop.permute.xlu2 %2325  ;;  %v2425_v3 = vsel %vm765_vm3, %v2424_v27, %v2423_v18  ;;  %v2430_v27 = vperm.slane %v9348_v17, %v8420_v61 }
 0x639   :  { %v9367_v10 = vpop.permute.xlu0 %2319  ;;  %v2202_v15 = vperm.slane %v9363_v2, %v8420_v61  ;;  %v2201_v2 = vperm.slane %v9361_v46, %v8417_v33 }
 0x63a   :  { %v2406_v23 = vperm.slane %v9367_v10, %v8420_v61  ;;  %v2197_v10 = vsel %vm765_vm3, %v2196_v43, %v2195_v45 }
 0x63b   :  { %v2203_v44 = vsel %vm765_vm3, %v2202_v15, %v2201_v2 }
 0x63e   :  { %2235 = vrot.lane.b32.xlu1 %v12429_v26, %s12287_s2  ;;  %v2176_v26 = vsel %vm765_vm3, %v2175_v53, %v2174_v31  ;;  %v2200_v53 = vsel %vm765_vm3, %v2199_v55, %v2198_v19 }
 0x63f   :  { %v2219_v20 = vsel %vm812_vm4, %v2176_v26, %v2173_v62  ;;  %v2179_v62 = vsel %vm765_vm3, %v2178_v34, %v2177_v36  ;;  %v2226_v46 = vsel %vm812_vm4, %v2200_v53, %v2197_v10 }
 0x640   :  { %v9371_v1 = vpop.permute.xlu1 %2364  ;;  %v9375_v54 = vpop.permute.xlu2 %2100  ;;  %v9507_v19 = vsel %vm814_vm5, %v2179_v62, %v2219_v20  ;;  %v2227_v36 = vsel %vm814_vm5, %v2203_v44, %v2226_v46 }
 0x641   :  { %v9373_v0 = vpop.permute.xlu0 %2094  ;;  %v2429_v55 = vperm.slane %v9371_v1, %v8417_v33 }
 0x643   :  { %v2431_v17 = vsel %vm765_vm3, %v2430_v27, %v2429_v55 }
 0x648   :  { %v9377_v51 = vpop.permute.xlu1 %2097  ;;  %v9381_v28 = vpop.permute.xlu2 %2151 }
 0x649   :  { %v9379_v22 = vpop.permute.xlu0 %2145 }
 0x650   :  { %v9383_v7 = vpop.permute.xlu1 %2322  ;;  %v9387_v5 = vpop.permute.xlu2 %2376 }
 0x651   :  { %v9385_v13 = vpop.permute.xlu0 %2370  ;;  %v2408_v45 = vperm.slane %v9383_v7, %v8417_v33  ;;  %v2435_v34 = vperm.slane %v9387_v5, %v8417_v33 }
 0x658   :  { %v9389_v57 = vpop.permute.xlu1 %2373  ;;  %v9395_v40 = vpop.permute.xlu2 %2109 }
 0x659   :  { %v9391_v60 = vpop.permute.xlu0 %2103  ;;  %v2187_v62 = vperm.slane %v9395_v40, %v8420_v61 }
 0x65a   :  { %v2184_v53 = vperm.slane %v9391_v60, %v8420_v61 }
 0x660   :  { %v9393_v59 = vpop.permute.xlu1 %2148  ;;  %v9403_v49 = vpop.permute.xlu2 %2334 }
 0x661   :  { %v9397_v37 = vpop.permute.xlu0 %2328  ;;  %v2207_v7 = vperm.slane %v9393_v59, %v8417_v33  ;;  %v2414_v60 = vperm.slane %v9403_v49, %v8417_v33 }
 0x668   :  { %v9399_v56 = vpop.permute.xlu1 %2331  ;;  %v9409_v32 = vpop.permute.xlu2 %2385 }
 0x669   :  { %v9401_v47 = vpop.permute.xlu0 %2379  ;;  %v2412_v59 = vperm.slane %v9399_v56, %v8420_v61  ;;  %v2411_v56 = vperm.slane %v9397_v37, %v8417_v33  ;;  %v2439_v40 = vperm.slane %v9409_v32, %v8420_v61 }
 0x670   :  { %v9405_v8 = vpop.permute.xlu1 %2106  ;;  %v9415_v12 = vpop.permute.xlu2 %2160 }
 0x671   :  { %v9407_v25 = vpop.permute.xlu0 %2154  ;;  %v2186_v37 = vperm.slane %v9405_v8, %v8417_v33 }
 0x672   :  { %v2210_v46 = vperm.slane %v9407_v25, %v8417_v33  ;;  %v2213_v25 = vperm.slane %v9415_v12, %v8417_v33 }
 0x673   :  { %v2188_v27 = vsel %vm765_vm3, %v2187_v62, %v2186_v37  ;;  %v6930_v37 = vld [vmem:[#allocation10 + $0x14] sm:$0xf] }
 0x678   :  { %v9411_v4 = vpop.permute.xlu1 %2157  ;;  %v9423_v24 = vpop.permute.xlu2 %2343 }
 0x679   :  { %v9413_v52 = vpop.permute.xlu0 %2337 }
 0x680   :  { %v9417_v41 = vpop.permute.xlu1 %2382  ;;  %v9455_v11 = vpop.permute.xlu2 %2118 }
 0x681   :  { %v9419_v58 = vpop.permute.xlu0 %2112  ;;  %v2438_v8 = vperm.slane %v9417_v41, %v8417_v33  ;;  %v2418_v41 = vperm.slane %v9423_v24, %v8420_v61  ;;  %v2192_v32 = vperm.slane %v9455_v11, %v8417_v33 }
 0x683   :  { %v2440_v12 = vsel %vm765_vm3, %v2439_v40, %v2438_v8 }
 0x688   :  { %v9421_v38 = vpop.permute.xlu1 %2115 }
 0x689   :  { %12430 = vst [vmem:[#allocation47_spill] sm:$0xff] %v9421_v38  ;;  %v9425_v9 = vpop.permute.xlu0 %2163  ;;  %v2427_v38 = vperm.slane %v9353_v48, %v8420_v61  ;;  %v2400_v48 = vperm.slane %v9332_v29, %v8420_v61  ;;  %v2404_v29 = vsel %vm765_vm3, %v2403_v21, %v2402_v16  ;;  %v2407_v21 = vsel %vm765_vm3, %v2406_v23, %v2405_v39  ;;  %v9525_v23 = vpop.permute.xlu2 %2169 }
 0x68b   :  { %v2428_v31 = vsel %vm765_vm3, %v2427_v38, %v2426_v30  ;;  %v2401_v6 = vsel %vm765_vm3, %v2400_v48, %v2399_v50  ;;  %v2205_v38 = vperm.slane %v9379_v22, %v8420_v61  ;;  %v2204_v50 = vperm.slane %v9357_v42, %v8417_v33 }
 0x68c   :  { %v2447_v43 = vsel %vm812_vm4, %v2404_v29, %v2401_v6  ;;  %v2454_v1 = vsel %vm812_vm4, %v2428_v31, %v2425_v3  ;;  %v2409_v22 = vperm.slane %v9365_v35, %v8420_v61  ;;  %v2433_v30 = vperm.slane %v9389_v57, %v8420_v61 }
 0x68d   :  { %v2448_v15 = vsel %vm814_vm5, %v2407_v21, %v2447_v43  ;;  %v2183_v42 = vperm.slane %v9375_v54, %v8417_v33  ;;  %v2208_v48 = vperm.slane %v9381_v28, %v8420_v61  ;;  %v2181_v35 = vperm.slane %v9377_v51, %v8420_v61 }
 0x68e   :  { %v2206_v18 = vsel %vm765_vm3, %v2205_v38, %v2204_v50  ;;  %v2410_v20 = vsel %vm765_vm3, %v2409_v22, %v2408_v45  ;;  %v2432_v57 = vperm.slane %v9385_v13, %v8417_v33  ;;  %v2436_v54 = vperm.slane %v9401_v47, %v8420_v61 }
 0x68f   :  { %v2455_v28 = vsel %vm814_vm5, %v2431_v17, %v2454_v1  ;;  %v2180_v51 = vperm.slane %v9373_v0, %v8417_v33  ;;  %v2209_v13 = vsel %vm765_vm3, %v2208_v48, %v2207_v7  ;;  %v2415_v47 = vperm.slane %v9413_v52, %v8420_v61 }
 0x690   :  { %v9433_v14 = vpop.permute.xlu1 %2340  ;;  %v2434_v2 = vsel %vm765_vm3, %v2433_v30, %v2432_v57  ;;  %v2228_v0 = vsel %vm816_vm6, %v2206_v18, %v2227_v36  ;;  %v2449_v5 = vsel %vm816_vm6, %v2410_v20, %v2448_v15  ;;  %v2413_v31 = vsel %vm765_vm3, %v2412_v59, %v2411_v56  ;;  %v12431_v17 = vld [vmem:[#allocation47_spill] sm:$0xff] }
 0x691   :  { %v9439_v63 = vpop.permute.xlu0 %2388  ;;  %v2182_v29 = vsel %vm765_vm3, %v2181_v35, %v2180_v51  ;;  %v2437_v10 = vsel %vm765_vm3, %v2436_v54, %v2435_v34  ;;  %v2211_v52 = vperm.slane %v9411_v4, %v8420_v61  ;;  %v2456_v44 = vsel %vm816_vm6, %v2434_v2, %v2455_v28  ;;  %v2395_v50 = vpop.permute.xlu2 %2394 }
 0x692   :  { %v2185_v55 = vsel %vm765_vm3, %v2184_v53, %v2183_v42  ;;  %v2229_v49 = vsel %vm818_vm7, %v2209_v13, %v2228_v0  ;;  %v2416_v6 = vsel %vm765_vm3, %v2415_v47, %v2414_v60  ;;  %v2417_v4 = vperm.slane %v9433_v14, %v8417_v33 }
 0x693   :  { %v2450_v21 = vsel %vm818_vm7, %v2413_v31, %v2449_v5  ;;  %v2457_v38 = vsel %vm818_vm7, %v2437_v10, %v2456_v44  ;;  %v2212_v14 = vsel %vm765_vm3, %v2211_v52, %v2210_v46  ;;  %v2214_v45 = vperm.slane %v9425_v9, %v8420_v61  ;;  %v6919_v31 = vld [vmem:[#allocation6 + $0x8] sm:$0xff]  ;;  %v6918_v10 = vld [vmem:[#allocation6] sm:$0xff]  ;;  %v6928_v44 = vld [vmem:[#allocation10 + $0x4] sm:$0xf] }
 0x694   :  { %v2451_v1 = vsel %vm820_vm8, %v2416_v6, %v2450_v21  ;;  %v2189_v22 = vperm.slane %v9419_v58, %v8417_v33  ;;  %v2419_v24 = vsel %vm765_vm3, %v2418_v41, %v2417_v4  ;;  %v2190_v11 = vperm.slane %v12431_v17, %v8420_v61  ;;  %2513 = vmatpush.bf16.msrb.mxu0 %v6919_v31  ;;  %v6724_v52 = vld [vmem:[#allocation10 + $0x18] sm:$0xf0] }
 0x695   :  { %v2217_v42 = vperm.slane %v9525_v23, %v8420_v61  ;;  %v2444_v58 = vperm.slane %v2395_v50, %v8417_v33  ;;  %v2458_v18 = vsel %vm820_vm8, %v2440_v12, %v2457_v38  ;;  %v2215_v20 = vsel %vm765_vm3, %v2214_v45, %v2213_v25 }
 0x696   :  { %v2452_v59 = vsel %vm822_vm9, %v2419_v24, %v2451_v1  ;;  %v2230_v34 = vsel %vm820_vm8, %v2212_v14, %v2229_v49  ;;  %v2191_v53 = vsel %vm765_vm3, %v2190_v11, %v2189_v22  ;;  %v6727_v62 = vor.u32 %v6930_v37, %v6724_v52  ;;  %v6999_v49 = vld [vmem:[%s12432_s4] ss:$0 sm:$0xff] }
 0x697   :  { %2674 = vrot.lane.b32.xlu1 %v6999_v49, %s12287_s2 }
 0x698   :  { %v9489_v26 = vpop.permute.xlu1 %2391  ;;  %2514 = vmatpush.bf16.msrb.mxu0 %v6918_v10  ;;  %6131 = vmatpush.bf16.msrb.mxu1 %v6727_v62 }
 0x699   :  { %v9496_v16 = vpop.permute.xlu0 %2121  ;;  %v2442_v43 = vperm.slane %v9489_v26, %v8420_v61  ;;  %v2441_v26 = vperm.slane %v9439_v63, %v8417_v33 }
 0x69a   :  { %v2193_v48 = vperm.slane %v9496_v16, %v8420_v61  ;;  %v2221_v16 = vsel %vm816_vm6, %v2182_v29, %v9507_v19 }
 0x69b   :  { %v2443_v30 = vsel %vm765_vm3, %v2442_v43, %v2441_v26  ;;  %v2222_v13 = vsel %vm818_vm7, %v2185_v55, %v2221_v16  ;;  %v6716_v55 = vld [vmem:[#allocation10 + $0x8] sm:$0xf0]  ;;  %v6998_v43 = vld [vmem:[%s12433_s26] ss:$0 sm:$0xff] }
 0x69c   :  { %v2459_v51 = vsel %vm822_vm9, %v2443_v30, %v2458_v18  ;;  %v2194_v56 = vsel %vm765_vm3, %v2193_v48, %v2192_v32  ;;  %v2223_v0 = vsel %vm820_vm8, %v2188_v27, %v2222_v13  ;;  %v6719_v46 = vor.u32 %v6928_v44, %v6716_v55 }
 0x69d   :  { %v2224_v29 = vsel %vm822_vm9, %v2191_v53, %v2223_v0 }
 0x69e   :  { %v2225_v60 = vsel %vm824_vm10, %v2194_v56, %v2224_v29  ;;  %6132 = vmatpush.bf16.msrb.mxu1 %v6719_v46 }
 0x6a0   :  { %v2167_v39 = vpop.permute.xlu1 %2166 }
 0x6a1   :  { %v2347_v3 = vpop.permute.xlu0 %2346  ;;  %v2216_v36 = vperm.slane %v2167_v39, %v8417_v33  ;;  %v2231_v39 = vsel %vm822_vm9, %v2215_v20, %v2230_v34 }
 0x6a2   :  { %v2420_v9 = vperm.slane %v2347_v3, %v8417_v33 }
 0x6a3   :  { %v2218_v54 = vsel %vm765_vm3, %v2217_v42, %v2216_v36 }
 0x6a4   :  { %v2232_v5 = vsel %vm824_vm10, %v2218_v54, %v2231_v39 }
 0x6a5   :  { %v2233_v3 = vpack.c.b16 %v2232_v5, %v2225_v60 }
 0x6a8   :  { %v2350_v15 = vpop.permute.xlu1 %2349 }
 0x6a9   :  { %v2421_v7 = vperm.slane %v2350_v15, %v8420_v61  ;;  %v2398_v63 = vpop.permute.xlu0 %2397 }
 0x6aa   :  { %v2445_v35 = vperm.slane %v2398_v63, %v8420_v61 }
 0x6ab   :  { %v2422_v57 = vsel %vm765_vm3, %v2421_v7, %v2420_v9 }
 0x6ac   :  { %v2446_v28 = vsel %vm765_vm3, %v2445_v35, %v2444_v58  ;;  %v2453_v23 = vsel %vm824_vm10, %v2422_v57, %v2452_v59 }
 0x6ad   :  { %v2460_v2 = vsel %vm824_vm10, %v2446_v28, %v2459_v51 }
 0x6ae   :  { %v2461_v47 = vpack.c.b16 %v2460_v2, %v2453_v23 }
 0x6b0   :  { %6665 = vmatmul.msk.bf16.vlgmr.msra.gmra.mxu3 %vm246_vm0, %v2461_v47  ;;  %v2236_v19 = vpop.permute.xlu1 %2235 }
 0x6b1   :  { %2248 = vmatpush.bf16.msra.mxu2 %v2236_v19 }
 0x6b4   :  { %6664 = vmatmul.msk.bf16.vlgmr.msra.gmra.mxu2 %vm246_vm0, %v2233_v3 }
 0x709   :  { %v9678_v59 = vpop.permute.xlu1 %2674 }
 0x733   :  { %v2474_v6 = vpop.f32.mrf.mxu3 }
 0x737   :  { %v2250_v8 = vpop.f32.mrf.mxu2 }
 0x738   :  { %v2475_v4 = vadd.f32 %v2474_v6, %v2250_v8 }
 0x73a   :  { %v2479_v38 = vmul.f32 0.5, %v2475_v4 }
 0x73b   :  { %v2476_v40 = vpop.f32.mrf.mxu3 }
 0x73c   :  { %v2485_v41 = vadd.f32 %v6998_v43, %v2479_v38 }
 0x73f   :  { %v2252_v21 = vpop.f32.mrf.mxu2 }
 0x740   :  { %v2477_v25 = vadd.f32 %v2476_v40, %v2252_v21 }
 0x742   :  { %v2480_v27 = vmul.f32 0.5, %v2477_v25 }
 0x744   :  { %v2486_v14 = vadd.f32 %v6998_v43, %v2480_v27 }
 0x746   :  { %v9634_v1 = vpack.c.bf16 %v2486_v14, %v2485_v41 }
 0x748   :  { %12434 = vst [vmem:[#allocation51_spill] sm:$0xff] %v9634_v1  ;;  %6674 = vmatmul.msk.bf16.vlgmr.msrb.gmra.mxu0 %vm631_vm2, %v9634_v1  ;;  %6729 = vmatmul.msk.bf16.vlgmr.msrb.gmra.mxu1 %vm631_vm2, %v9634_v1 }
 0x7c5   :  { %v9640_v32 = vpop.f32.mrf.mxu0 }
 0x7c6   :  { %2570 = vrot.lane.b32.xlu2 %v9640_v32, %s12287_s2  ;;  %v2524_v26 = vrot.slane %v9640_v32, 1  ;;  %v2525_v22 = vrot.slane %v9640_v32, 2  ;;  %v2538_v17 = vperm.slane %v9640_v32, 0  ;;  %v2527_v28 = vrot.slane %v9640_v32, 4 }
 0x7c7   :  { %v2526_v2 = vrot.slane %v9640_v32, 3  ;;  %v2528_v44 = vrot.slane %v9640_v32, 5 }
 0x7c8   :  { %v9655_v15 = vperm.slane %v2524_v26, 0  ;;  %v9670_v42 = vperm.slane %v2525_v22, 0  ;;  %v9690_v5 = vperm.slane %v2527_v28, 0 }
 0x7c9   :  { %v9695_v29 = vperm.slane %v2526_v2, 0  ;;  %v9713_v38 = vperm.slane %v2528_v44, 0 }
 0x7cd   :  { %v9644_v45 = vpop.f32.mrf.mxu0 }
 0x7ce   :  { %2572 = vrot.lane.b32.xlu0 %v9644_v45, %s12287_s2  ;;  %v3447_v50 = vpack.c.bf16 %v9644_v45, %v9640_v32  ;;  %v2532_v12 = vrot.slane %v9644_v45, 2  ;;  %v2531_v24 = vrot.slane %v9644_v45, 1  ;;  %v2546_v36 = vperm.slane %v9644_v45, 0 }
 0x7cf   :  { %v2533_v34 = vrot.slane %v9644_v45, 3  ;;  %v2535_v62 = vrot.slane %v9644_v45, 5  ;;  %v2534_v55 = vrot.slane %v9644_v45, 4  ;;  %v2536_v22 = vrot.slane %v9644_v45, 6 }
 0x7d0   :  { %3669 = vmatpush.bf16.msrb.mxu2 %v3447_v50  ;;  %v9660_v30 = vperm.slane %v2532_v12, 0  ;;  %v9674_v48 = vperm.slane %v2531_v24, 0  ;;  %v2530_v12 = vrot.slane %v9640_v32, 7  ;;  %v2529_v24 = vrot.slane %v9640_v32, 6 }
 0x7d1   :  { %v9692_v19 = vperm.slane %v2533_v34, 0  ;;  %v9711_v21 = vperm.slane %v2535_v62, 0  ;;  %v9716_v43 = vperm.slane %v2534_v55, 0  ;;  %v2537_v2 = vrot.slane %v9644_v45, 7 }
 0x820   :  { %v9658_v11 = vpop.permute.xlu2 %2570 }
 0x821   :  { %v2592_v9 = vadd.f32 %v9658_v11, %v2546_v36  ;;  %v2578_v7 = vadd.f32 %v9658_v11, %v9655_v15  ;;  %v2576_v63 = vadd.f32 %v9658_v11, %v2538_v17  ;;  %v2596_v58 = vadd.f32 %v9658_v11, %v9660_v30 }
 0x822   :  { %v2580_v57 = vadd.f32 %v9658_v11, %v9670_v42  ;;  %v2594_v54 = vadd.f32 %v9658_v11, %v9674_v48  ;;  %v2584_v31 = vadd.f32 %v9658_v11, %v9690_v5  ;;  %v2598_v10 = vadd.f32 %v9658_v11, %v9692_v19 }
 0x823   :  { %v2624_v35 = vmul.f32 0.2, %v2592_v9  ;;  %v2610_v18 = vmul.f32 0.2, %v2578_v7  ;;  %v2608_v20 = vmul.f32 0.2, %v2576_v63  ;;  %v2582_v52 = vadd.f32 %v9658_v11, %v9695_v29 }
 0x824   :  { %v2628_v53 = vmul.f32 0.2, %v2596_v58  ;;  %v2612_v39 = vmul.f32 0.2, %v2580_v57  ;;  %v2626_v0 = vmul.f32 0.2, %v2594_v54  ;;  %v2602_v41 = vadd.f32 %v9658_v11, %v9711_v21 }
 0x825   :  { %v2656_v23 = vmax.f32 %v2592_v9, %v2624_v35  ;;  %v2642_v51 = vmax.f32 %v2578_v7, %v2610_v18  ;;  %v2640_v16 = vmax.f32 %v2576_v63, %v2608_v20  ;;  %v2616_v6 = vmul.f32 0.2, %v2584_v31 }
 0x826   :  { %v2660_v60 = vmax.f32 %v2596_v58, %v2628_v53  ;;  %v2644_v3 = vmax.f32 %v2580_v57, %v2612_v39  ;;  %v2658_v37 = vmax.f32 %v2594_v54, %v2626_v0  ;;  %v2630_v8 = vmul.f32 0.2, %v2598_v10 }
 0x827   :  { %v2693_v13 = vmul.f32 %v9678_v59, %v2656_v23  ;;  %v2679_v56 = vmul.f32 %v9678_v59, %v2642_v51  ;;  %v2677_v47 = vmul.f32 %v9678_v59, %v2640_v16  ;;  %v2614_v40 = vmul.f32 0.2, %v2582_v52 }
 0x828   :  { %v2697_v49 = vmul.f32 %v9678_v59, %v2660_v60  ;;  %v2681_v46 = vmul.f32 %v9678_v59, %v2644_v3  ;;  %v2695_v4 = vmul.f32 %v9678_v59, %v2658_v37  ;;  %v2648_v25 = vmax.f32 %v2584_v31, %v2616_v6 }
 0x829   :  { %2773 = vrot.lane.b32.xlu0 %v2693_v13, %s12287_s2  ;;  %2745 = vrot.lane.b32.xlu1 %v2679_v56, %s12287_s2  ;;  %v2662_v27 = vmax.f32 %v2598_v10, %v2630_v8  ;;  %v2586_v14 = vadd.f32 %v9658_v11, %v9713_v38  ;;  %v2646_v50 = vmax.f32 %v2582_v52, %v2614_v40  ;;  %v2634_v63 = vmul.f32 0.2, %v2602_v41 }
 0x82a   :  { %2741 = vrot.lane.b32.xlu2 %v2677_v47, %s12287_s2  ;;  %v2600_v26 = vadd.f32 %v9658_v11, %v9716_v43  ;;  %v2685_v9 = vmul.f32 %v9678_v59, %v2648_v25  ;;  %v9732_v20 = vperm.slane %v2530_v12, 0  ;;  %v9734_v57 = vperm.slane %v2536_v22, 0 }
 0x82b   :  { %v2699_v7 = vmul.f32 %v9678_v59, %v2662_v27  ;;  %v2618_v58 = vmul.f32 0.2, %v2586_v14  ;;  %v2683_v35 = vmul.f32 %v9678_v59, %v2646_v50  ;;  %v9737_v54 = vperm.slane %v2529_v24, 0 }
 0x82c   :  { %v2632_v18 = vmul.f32 0.2, %v2600_v26  ;;  %v2666_v28 = vmax.f32 %v2602_v41, %v2634_v63  ;;  %v2590_v51 = vadd.f32 %v9658_v11, %v9732_v20  ;;  %v2604_v16 = vadd.f32 %v9658_v11, %v9734_v57 }
 0x82d   :  { %v2650_v23 = vmax.f32 %v2586_v14, %v2618_v58  ;;  %v2588_v53 = vadd.f32 %v9658_v11, %v9737_v54  ;;  %v9754_v31 = vperm.slane %v2537_v2, 0 }
 0x82e   :  { %v2664_v34 = vmax.f32 %v2600_v26, %v2632_v18  ;;  %v2703_v13 = vmul.f32 %v9678_v59, %v2666_v28  ;;  %v2622_v47 = vmul.f32 0.2, %v2590_v51  ;;  %v2636_v39 = vmul.f32 0.2, %v2604_v16 }
 0x82f   :  { %v2687_v56 = vmul.f32 %v9678_v59, %v2650_v23  ;;  %v2620_v3 = vmul.f32 0.2, %v2588_v53  ;;  %v2606_v55 = vadd.f32 %v9658_v11, %v9754_v31 }
 0x830   :  { %v2701_v60 = vmul.f32 %v9678_v59, %v2664_v34  ;;  %v2654_v10 = vmax.f32 %v2590_v51, %v2622_v47  ;;  %v2668_v37 = vmax.f32 %v2604_v16, %v2636_v39 }
 0x831   :  { %2781 = vrot.lane.b32.xlu0 %v2697_v49, %s12287_s2  ;;  %2749 = vrot.lane.b32.xlu1 %v2681_v46, %s12287_s2  ;;  %v2652_v44 = vmax.f32 %v2588_v53, %v2620_v3  ;;  %v2638_v40 = vmul.f32 0.2, %v2606_v55 }
 0x832   :  { %2777 = vrot.lane.b32.xlu2 %v2695_v4, %s12287_s2  ;;  %v2691_v49 = vmul.f32 %v9678_v59, %v2654_v10  ;;  %v2705_v46 = vmul.f32 %v9678_v59, %v2668_v37 }
 0x833   :  { %v2689_v4 = vmul.f32 %v9678_v59, %v2652_v44  ;;  %v2670_v11 = vmax.f32 %v2606_v55, %v2638_v40 }
 0x835   :  { %v2707_v26 = vmul.f32 %v9678_v59, %v2670_v11 }
 0x839   :  { %2757 = vrot.lane.b32.xlu0 %v2685_v9, %s12287_s2  ;;  %2785 = vrot.lane.b32.xlu1 %v2699_v7, %s12287_s2 }
 0x83a   :  { %2753 = vrot.lane.b32.xlu2 %v2683_v35, %s12287_s2 }
 0x840   :  { %v9748_v0 = vpop.permute.xlu0 %2572 }
 0x841   :  { %2793 = vrot.lane.b32.xlu0 %v2703_v13, %s12287_s2  ;;  %2761 = vrot.lane.b32.xlu1 %v2687_v56, %s12287_s2  ;;  %v2593_v52 = vadd.f32 %v9748_v0, %v2546_v36  ;;  %v2577_v62 = vadd.f32 %v9748_v0, %v2538_v17  ;;  %v2597_v36 = vadd.f32 %v9748_v0, %v9660_v30 }
 0x842   :  { %2789 = vrot.lane.b32.xlu2 %v2701_v60, %s12287_s2  ;;  %v2595_v17 = vadd.f32 %v9748_v0, %v9674_v48  ;;  %v2579_v25 = vadd.f32 %v9748_v0, %v9655_v15  ;;  %v2585_v15 = vadd.f32 %v9748_v0, %v9690_v5  ;;  %v2583_v22 = vadd.f32 %v9748_v0, %v9695_v29 }
 0x843   :  { %v2625_v6 = vmul.f32 0.2, %v2593_v52  ;;  %v2609_v8 = vmul.f32 0.2, %v2577_v62  ;;  %v2629_v14 = vmul.f32 0.2, %v2597_v36  ;;  %v2581_v9 = vadd.f32 %v9748_v0, %v9670_v42 }
 0x844   :  { %v2627_v50 = vmul.f32 0.2, %v2595_v17  ;;  %v2611_v12 = vmul.f32 0.2, %v2579_v25  ;;  %v2617_v58 = vmul.f32 0.2, %v2585_v15  ;;  %v2603_v42 = vadd.f32 %v9748_v0, %v9711_v21 }
 0x845   :  { %v2657_v32 = vmax.f32 %v2593_v52, %v2625_v6  ;;  %v2641_v45 = vmax.f32 %v2577_v62, %v2609_v8  ;;  %v2661_v30 = vmax.f32 %v2597_v36, %v2629_v14  ;;  %v2615_v35 = vmul.f32 0.2, %v2583_v22 }
 0x846   :  { %v2659_v48 = vmax.f32 %v2595_v17, %v2627_v50  ;;  %v2643_v24 = vmax.f32 %v2579_v25, %v2611_v12  ;;  %v2613_v28 = vmul.f32 0.2, %v2581_v9  ;;  %v2649_v5 = vmax.f32 %v2585_v15, %v2617_v58 }
 0x847   :  { %v2694_v27 = vmul.f32 %v9678_v59, %v2657_v32  ;;  %v2678_v41 = vmul.f32 %v9678_v59, %v2641_v45  ;;  %v2698_v7 = vmul.f32 %v9678_v59, %v2661_v30  ;;  %v2647_v29 = vmax.f32 %v2583_v22, %v2615_v35 }
 0x848   :  { %v2696_v63 = vmul.f32 %v9678_v59, %v2659_v48  ;;  %v2680_v18 = vmul.f32 %v9678_v59, %v2643_v24  ;;  %v2601_v23 = vadd.f32 %v9748_v0, %v9716_v43  ;;  %v2645_v51 = vmax.f32 %v2581_v9, %v2613_v28 }
 0x849   :  { %2769 = vrot.lane.b32.xlu0 %v2691_v49, %s12287_s2  ;;  %2797 = vrot.lane.b32.xlu1 %v2705_v46, %s12287_s2  ;;  %v2599_v16 = vadd.f32 %v9748_v0, %v9692_v19  ;;  %v2686_v34 = vmul.f32 %v9678_v59, %v2649_v5  ;;  %v2684_v53 = vmul.f32 %v9678_v59, %v2647_v29  ;;  %v2635_v2 = vmul.f32 0.2, %v2603_v42 }
 0x84a   :  { %2765 = vrot.lane.b32.xlu2 %v2689_v4, %s12287_s2  ;;  %v2633_v13 = vmul.f32 0.2, %v2601_v23  ;;  %v2682_v56 = vmul.f32 %v9678_v59, %v2645_v51  ;;  %v2591_v19 = vadd.f32 %v9748_v0, %v9732_v20  ;;  %v2589_v39 = vadd.f32 %v9748_v0, %v9737_v54 }
 0x84b   :  { %v2631_v47 = vmul.f32 0.2, %v2599_v16  ;;  %v2667_v21 = vmax.f32 %v2603_v42, %v2635_v2  ;;  %v2587_v3 = vadd.f32 %v9748_v0, %v9713_v38  ;;  %v2607_v38 = vadd.f32 %v9748_v0, %v9754_v31 }
 0x84c   :  { %v2665_v43 = vmax.f32 %v2601_v23, %v2633_v13  ;;  %v2623_v52 = vmul.f32 0.2, %v2591_v19  ;;  %v2621_v62 = vmul.f32 0.2, %v2589_v39  ;;  %v2605_v46 = vadd.f32 %v9748_v0, %v9734_v57 }
 0x84d   :  { %v2663_v60 = vmax.f32 %v2599_v16, %v2631_v47  ;;  %v2704_v10 = vmul.f32 %v9678_v59, %v2667_v21  ;;  %v2619_v55 = vmul.f32 0.2, %v2587_v3  ;;  %v2639_v4 = vmul.f32 0.2, %v2607_v38 }
 0x84e   :  { %v2702_v37 = vmul.f32 %v9678_v59, %v2665_v43  ;;  %v2655_v20 = vmax.f32 %v2591_v19, %v2623_v52  ;;  %v2653_v54 = vmax.f32 %v2589_v39, %v2621_v62  ;;  %v2637_v32 = vmul.f32 0.2, %v2605_v46 }
 0x84f   :  { %v2700_v44 = vmul.f32 %v9678_v59, %v2663_v60  ;;  %v2651_v49 = vmax.f32 %v2587_v3, %v2619_v55  ;;  %v2671_v45 = vmax.f32 %v2607_v38, %v2639_v4 }
 0x850   :  { %v2692_v6 = vmul.f32 %v9678_v59, %v2655_v20  ;;  %v2690_v8 = vmul.f32 %v9678_v59, %v2653_v54  ;;  %v2669_v31 = vmax.f32 %v2605_v46, %v2637_v32 }
 0x851   :  { %2775 = vrot.lane.b32.xlu1 %v2694_v27, %s12287_s2  ;;  %2743 = vrot.lane.b32.xlu0 %v2678_v41, %s12287_s2  ;;  %v2688_v40 = vmul.f32 %v9678_v59, %v2651_v49  ;;  %v2708_v36 = vmul.f32 %v9678_v59, %v2671_v45 }
 0x852   :  { %2801 = vrot.lane.b32.xlu2 %v2707_v26, %s12287_s2  ;;  %v2706_v57 = vmul.f32 %v9678_v59, %v2669_v31 }
 0x859   :  { %2783 = vrot.lane.b32.xlu1 %v2698_v7, %s12287_s2  ;;  %2779 = vrot.lane.b32.xlu0 %v2696_v63, %s12287_s2 }
 0x85a   :  { %2747 = vrot.lane.b32.xlu2 %v2680_v18, %s12287_s2 }
 0x861   :  { %2759 = vrot.lane.b32.xlu1 %v2686_v34, %s12287_s2  ;;  %2755 = vrot.lane.b32.xlu0 %v2684_v53, %s12287_s2 }
 0x862   :  { %2751 = vrot.lane.b32.xlu2 %v2682_v56, %s12287_s2 }
 0x869   :  { %2795 = vrot.lane.b32.xlu1 %v2704_v10, %s12287_s2  ;;  %2791 = vrot.lane.b32.xlu0 %v2702_v37, %s12287_s2 }
 0x86a   :  { %2787 = vrot.lane.b32.xlu2 %v2700_v44, %s12287_s2 }
 0x871   :  { %2771 = vrot.lane.b32.xlu1 %v2692_v6, %s12287_s2  ;;  %2767 = vrot.lane.b32.xlu0 %v2690_v8, %s12287_s2 }
 0x872   :  { %2763 = vrot.lane.b32.xlu2 %v2688_v40, %s12287_s2 }
 0x879   :  { %2803 = vrot.lane.b32.xlu0 %v2708_v36, %s12287_s2 }
 0x87a   :  { %2799 = vrot.lane.b32.xlu2 %v2706_v57, %s12287_s2 }
 0x884   :  { %v2742_v0 = vpop.permute.xlu2 %2741 }
 0x885   :  { %v2837_v25 = vsel %vm297_vm1, %v2742_v0, 0.0 }
 0x88c   :  { %v2778_v17 = vpop.permute.xlu2 %2777 }
 0x88d   :  { %v2891_v30 = vsel %vm297_vm1, %v2778_v17, 0.0 }
 0x894   :  { %v2754_v11 = vpop.permute.xlu2 %2753 }
 0x895   :  { %v2855_v9 = vsel %vm297_vm1, %v2754_v11, 0.0 }
 0x89b   :  { %v2774_v27 = vpop.permute.xlu0 %2773  ;;  %v2746_v41 = vpop.permute.xlu1 %2745  ;;  %2838 = vadd.xlane.f32.xlu1 %v2837_v25 }
 0x89c   :  { %v2790_v14 = vpop.permute.xlu2 %2789  ;;  %v2885_v50 = vsel %vm297_vm1, %v2774_v27, 0.0  ;;  %v2843_v26 = vsel %vm297_vm1, %v2746_v41, 0.0 }
 0x89d   :  { %v2909_v28 = vsel %vm297_vm1, %v2790_v14, 0.0 }
 0x8a3   :  { %2886 = vadd.xlane.f32.xlu2 %v2885_v50  ;;  %v2782_v12 = vpop.permute.xlu0 %2781  ;;  %v2750_v59 = vpop.permute.xlu1 %2749  ;;  %2844 = vadd.xlane.f32.xlu0 %v2843_v26 }
 0x8a4   :  { %2892 = vadd.xlane.f32.xlu1 %v2891_v30  ;;  %v2897_v48 = vsel %vm297_vm1, %v2782_v12, 0.0  ;;  %v2849_v15 = vsel %vm297_vm1, %v2750_v59, 0.0  ;;  %v2766_v7 = vpop.permute.xlu2 %2765 }
 0x8a5   :  { %v2873_v16 = vsel %vm297_vm1, %v2766_v7, 0.0 }
 0x8ab   :  { %2898 = vadd.xlane.f32.xlu2 %v2897_v48  ;;  %v2758_v22 = vpop.permute.xlu0 %2757  ;;  %v2786_v24 = vpop.permute.xlu1 %2785  ;;  %2850 = vadd.xlane.f32.xlu0 %v2849_v15 }
 0x8ac   :  { %2856 = vadd.xlane.f32.xlu1 %v2855_v9  ;;  %v2861_v63 = vsel %vm297_vm1, %v2758_v22, 0.0  ;;  %v2903_v58 = vsel %vm297_vm1, %v2786_v24, 0.0  ;;  %v2802_v5 = vpop.permute.xlu2 %2801 }
 0x8ad   :  { %v2927_v47 = vsel %vm297_vm1, %v2802_v5, 0.0 }
 0x8b3   :  { %2862 = vadd.xlane.f32.xlu2 %v2861_v63  ;;  %v2794_v35 = vpop.permute.xlu0 %2793  ;;  %v2762_v18 = vpop.permute.xlu1 %2761  ;;  %2904 = vadd.xlane.f32.xlu0 %v2903_v58 }
 0x8b4   :  { %2910 = vadd.xlane.f32.xlu1 %v2909_v28  ;;  %v2915_v29 = vsel %vm297_vm1, %v2794_v35, 0.0  ;;  %v2867_v42 = vsel %vm297_vm1, %v2762_v18, 0.0  ;;  %v2748_v34 = vpop.permute.xlu2 %2747 }
 0x8b5   :  { %v2846_v3 = vsel %vm297_vm1, %v2748_v34, 0.0 }
 0x8bb   :  { %2916 = vadd.xlane.f32.xlu2 %v2915_v29  ;;  %v2770_v23 = vpop.permute.xlu0 %2769  ;;  %v2798_v51 = vpop.permute.xlu1 %2797  ;;  %2868 = vadd.xlane.f32.xlu0 %v2867_v42 }
 0x8bc   :  { %2874 = vadd.xlane.f32.xlu1 %v2873_v16  ;;  %v2879_v53 = vsel %vm297_vm1, %v2770_v23, 0.0  ;;  %v2921_v2 = vsel %vm297_vm1, %v2798_v51, 0.0  ;;  %v2752_v21 = vpop.permute.xlu2 %2751 }
 0x8bd   :  { %v2852_v44 = vsel %vm297_vm1, %v2752_v21, 0.0 }
 0x8c3   :  { %2880 = vadd.xlane.f32.xlu2 %v2879_v53  ;;  %v2776_v13 = vpop.permute.xlu1 %2775  ;;  %2922 = vadd.xlane.f32.xlu0 %v2921_v2  ;;  %v2744_v56 = vpop.permute.xlu0 %2743 }
 0x8c4   :  { %2928 = vadd.xlane.f32.xlu1 %v2927_v47  ;;  %v2840_v43 = vsel %vm297_vm1, %v2744_v56, 0.0  ;;  %v2888_v19 = vsel %vm297_vm1, %v2776_v13, 0.0  ;;  %v2788_v55 = vpop.permute.xlu2 %2787 }
 0x8c5   :  { %v2906_v49 = vsel %vm297_vm1, %v2788_v55, 0.0 }
 0x8cb   :  { %2841 = vadd.xlane.f32.xlu2 %v2840_v43  ;;  %v2784_v39 = vpop.permute.xlu1 %2783  ;;  %2889 = vadd.xlane.f32.xlu0 %v2888_v19  ;;  %v2780_v60 = vpop.permute.xlu0 %2779 }
 0x8cc   :  { %2847 = vadd.xlane.f32.xlu1 %v2846_v3  ;;  %v2894_v10 = vsel %vm297_vm1, %v2780_v60, 0.0  ;;  %v2900_v37 = vsel %vm297_vm1, %v2784_v39, 0.0  ;;  %v2764_v6 = vpop.permute.xlu2 %2763 }
 0x8cd   :  { %v2870_v40 = vsel %vm297_vm1, %v2764_v6, 0.0 }
 0x8d3   :  { %2895 = vadd.xlane.f32.xlu2 %v2894_v10  ;;  %v2760_v52 = vpop.permute.xlu1 %2759  ;;  %2901 = vadd.xlane.f32.xlu0 %v2900_v37  ;;  %v2756_v62 = vpop.permute.xlu0 %2755 }
 0x8d4   :  { %2853 = vadd.xlane.f32.xlu1 %v2852_v44  ;;  %v2858_v20 = vsel %vm297_vm1, %v2756_v62, 0.0  ;;  %v2864_v54 = vsel %vm297_vm1, %v2760_v52, 0.0  ;;  %v2800_v31 = vpop.permute.xlu2 %2799 }
 0x8d5   :  { %v2924_v0 = vsel %vm297_vm1, %v2800_v31, 0.0 }
 0x8db   :  { %2859 = vadd.xlane.f32.xlu2 %v2858_v20  ;;  %2865 = vadd.xlane.f32.xlu0 %v2864_v54  ;;  %v2792_v38 = vpop.permute.xlu0 %2791  ;;  %v2796_v46 = vpop.permute.xlu1 %2795 }
 0x8dc   :  { %2907 = vadd.xlane.f32.xlu1 %v2906_v49  ;;  %v2912_v8 = vsel %vm297_vm1, %v2792_v38, 0.0  ;;  %v2918_v4 = vsel %vm297_vm1, %v2796_v46, 0.0 }
 0x8e3   :  { %2913 = vadd.xlane.f32.xlu2 %v2912_v8  ;;  %2919 = vadd.xlane.f32.xlu0 %v2918_v4  ;;  %v2768_v32 = vpop.permute.xlu0 %2767  ;;  %v2772_v45 = vpop.permute.xlu1 %2771 }
 0x8e4   :  { %2871 = vadd.xlane.f32.xlu1 %v2870_v40  ;;  %v2876_v36 = vsel %vm297_vm1, %v2768_v32, 0.0  ;;  %v2882_v57 = vsel %vm297_vm1, %v2772_v45, 0.0 }
 0x8eb   :  { %2877 = vadd.xlane.f32.xlu2 %v2876_v36  ;;  %2883 = vadd.xlane.f32.xlu0 %v2882_v57  ;;  %v2804_v17 = vpop.permute.xlu0 %2803 }
 0x8ec   :  { %2925 = vadd.xlane.f32.xlu1 %v2924_v0  ;;  %v2930_v11 = vsel %vm297_vm1, %v2804_v17, 0.0 }
 0x8f3   :  { %2931 = vadd.xlane.f32.xlu2 %v2930_v11 }
 0x90e   :  { %v9864_v25 = vpop.xlane.xlu1 %2838 }
 0x90f   :  { %v2965_v2 = vperm.slane %v9864_v25, %v8417_v33 }
 0x916   :  { %v9866_v27 = vpop.xlane.xlu2 %2886  ;;  %v9868_v41 = vpop.xlane.xlu0 %2844 }
 0x917   :  { %v9870_v14 = vpop.xlane.xlu1 %2892  ;;  %v2968_v13 = vperm.slane %v9868_v41, %v8417_v33  ;;  %v2989_v62 = vperm.slane %v9866_v27, %v8417_v33 }
 0x918   :  { %v2992_v44 = vperm.slane %v9870_v14, %v8417_v33 }
 0x91e   :  { %v9872_v50 = vpop.xlane.xlu2 %2898  ;;  %v9874_v26 = vpop.xlane.xlu0 %2850 }
 0x91f   :  { %v9876_v12 = vpop.xlane.xlu1 %2856  ;;  %v2971_v43 = vperm.slane %v9874_v26, %v8417_v33  ;;  %v2995_v54 = vperm.slane %v9872_v50, %v8417_v33 }
 0x920   :  { %v2974_v39 = vperm.slane %v9876_v12, %v8417_v33 }
 0x926   :  { %v9878_v59 = vpop.xlane.xlu2 %2862  ;;  %v9880_v30 = vpop.xlane.xlu0 %2904 }
 0x927   :  { %v9882_v48 = vpop.xlane.xlu1 %2910  ;;  %v2977_v38 = vperm.slane %v9878_v59, %v8417_v33  ;;  %v2998_v32 = vperm.slane %v9880_v30, %v8417_v33 }
 0x928   :  { %v3001_v57 = vperm.slane %v9882_v48, %v8417_v33 }
 0x92e   :  { %v9884_v15 = vpop.xlane.xlu2 %2916  ;;  %v9886_v22 = vpop.xlane.xlu0 %2868 }
 0x92f   :  { %v9888_v24 = vpop.xlane.xlu1 %2874  ;;  %v2980_v6 = vperm.slane %v9886_v22, %v8417_v33 }
 0x930   :  { %v2983_v0 = vperm.slane %v9888_v24, %v8417_v33 }
 0x936   :  { %v9890_v9 = vpop.xlane.xlu2 %2880  ;;  %v9892_v7 = vpop.xlane.xlu0 %2922 }
 0x937   :  { %v9894_v63 = vpop.xlane.xlu1 %2928 }
 0x93e   :  { %v9896_v58 = vpop.xlane.xlu2 %2841  ;;  %v9898_v35 = vpop.xlane.xlu0 %2889 }
 0x93f   :  { %v9900_v18 = vpop.xlane.xlu1 %2847  ;;  %v2966_v16 = vperm.slane %v9896_v58, %v8420_v61  ;;  %v2990_v49 = vperm.slane %v9898_v35, %v8420_v61 }
 0x940   :  { %v2969_v34 = vperm.slane %v9900_v18, %v8420_v61 }
 0x941   :  { %v2967_v60 = vsel %vm765_vm3, %v2966_v16, %v2965_v2  ;;  %v2991_v2 = vsel %vm765_vm3, %v2990_v49, %v2989_v62 }
 0x942   :  { %v2970_v3 = vsel %vm765_vm3, %v2969_v34, %v2968_v13 }
 0x943   :  { %v3013_v46 = vsel %vm812_vm4, %v2970_v3, %v2967_v60 }
 0x946   :  { %v9902_v28 = vpop.xlane.xlu2 %2895  ;;  %v9904_v5 = vpop.xlane.xlu0 %2901 }
 0x947   :  { %v9906_v29 = vpop.xlane.xlu1 %2853  ;;  %v2993_v10 = vperm.slane %v9902_v28, %v8420_v61  ;;  %v2996_v8 = vperm.slane %v9904_v5, %v8420_v61 }
 0x948   :  { %v2972_v53 = vperm.slane %v9906_v29, %v8420_v61 }
 0x949   :  { %v2994_v45 = vsel %vm765_vm3, %v2993_v10, %v2992_v44  ;;  %v2997_v60 = vsel %vm765_vm3, %v2996_v8, %v2995_v54 }
 0x94a   :  { %v2973_v37 = vsel %vm765_vm3, %v2972_v53, %v2971_v43  ;;  %v2986_v53 = vperm.slane %v9890_v9, %v8417_v33 }
 0x94b   :  { %v3014_v4 = vsel %vm814_vm5, %v2973_v37, %v3013_v46 }
 0x94e   :  { %v9908_v42 = vpop.xlane.xlu2 %2859  ;;  %v9910_v23 = vpop.xlane.xlu0 %2865 }
 0x94f   :  { %v9912_v51 = vpop.xlane.xlu1 %2907  ;;  %v2975_v56 = vperm.slane %v9908_v42, %v8420_v61  ;;  %v2978_v52 = vperm.slane %v9910_v23, %v8420_v61 }
 0x950   :  { %v2999_v40 = vperm.slane %v9912_v51, %v8420_v61 }
 0x951   :  { %v2976_v55 = vsel %vm765_vm3, %v2975_v56, %v2974_v39  ;;  %v2979_v36 = vsel %vm765_vm3, %v2978_v52, %v2977_v38  ;;  %v3020_v39 = vsel %vm812_vm4, %v2994_v45, %v2991_v2  ;;  %v3004_v38 = vperm.slane %v9884_v15, %v8417_v33 }
 0x952   :  { %v3015_v31 = vsel %vm816_vm6, %v2976_v55, %v3014_v4  ;;  %v3000_v3 = vsel %vm765_vm3, %v2999_v40, %v2998_v32  ;;  %v3021_v49 = vsel %vm814_vm5, %v2997_v60, %v3020_v39 }
 0x953   :  { %v3016_v10 = vsel %vm818_vm7, %v2979_v36, %v3015_v31  ;;  %v3022_v8 = vsel %vm816_vm6, %v3000_v3, %v3021_v49  ;;  %v3010_v36 = vperm.slane %v9894_v63, %v8417_v33 }
 0x956   :  { %v9926_v47 = vpop.xlane.xlu2 %2913  ;;  %v9928_v21 = vpop.xlane.xlu0 %2919 }
 0x957   :  { %v9932_v19 = vpop.xlane.xlu1 %2871  ;;  %v3002_v17 = vperm.slane %v9926_v47, %v8420_v61  ;;  %v3005_v37 = vperm.slane %v9928_v21, %v8420_v61 }
 0x958   :  { %v2981_v20 = vperm.slane %v9932_v19, %v8420_v61 }
 0x959   :  { %v3003_v55 = vsel %vm765_vm3, %v3002_v17, %v3001_v57  ;;  %v3006_v40 = vsel %vm765_vm3, %v3005_v37, %v3004_v38 }
 0x95a   :  { %v2982_v11 = vsel %vm765_vm3, %v2981_v20, %v2980_v6  ;;  %v3007_v6 = vperm.slane %v9892_v7, %v8417_v33  ;;  %v3023_v32 = vsel %vm818_vm7, %v3003_v55, %v3022_v8 }
 0x95b   :  { %v3017_v44 = vsel %vm820_vm8, %v2982_v11, %v3016_v10 }
 0x95e   :  { %v9976_v16 = vpop.xlane.xlu2 %2877  ;;  %v9978_v34 = vpop.xlane.xlu0 %2883 }
 0x95f   :  { %v2984_v13 = vperm.slane %v9976_v16, %v8420_v61  ;;  %v2987_v56 = vperm.slane %v9978_v34, %v8420_v61  ;;  %v9987_v43 = vpop.xlane.xlu1 %2925 }
 0x960   :  { %v3008_v20 = vperm.slane %v9987_v43, %v8420_v61 }
 0x961   :  { %v2985_v52 = vsel %vm765_vm3, %v2984_v13, %v2983_v0  ;;  %v2988_v62 = vsel %vm765_vm3, %v2987_v56, %v2986_v53  ;;  %v3024_v0 = vsel %vm820_vm8, %v3006_v40, %v3023_v32 }
 0x962   :  { %v3018_v54 = vsel %vm822_vm9, %v2985_v52, %v3017_v44  ;;  %v3009_v31 = vsel %vm765_vm3, %v3008_v20, %v3007_v6 }
 0x963   :  { %v3019_v46 = vsel %vm824_vm10, %v2988_v62, %v3018_v54  ;;  %v3025_v11 = vsel %vm822_vm9, %v3009_v31, %v3024_v0 }
 0x964   :  { %v3029_v4 = vsel %vm246_vm0, %v3019_v46, -inf }
 0x965   :  { %3030 = vmax.xlane.f32.xlu0 %v3029_v4 }
 0x966   :  { %v10012_v45 = vpop.xlane.xlu2 %2931 }
 0x967   :  { %v3011_v57 = vperm.slane %v10012_v45, %v8420_v61 }
 0x969   :  { %v3012_v17 = vsel %vm765_vm3, %v3011_v57, %v3010_v36 }
 0x96a   :  { %v3026_v53 = vsel %vm824_vm10, %v3012_v17, %v3025_v11 }
 0x96b   :  { %v3032_v2 = vsel %vm246_vm0, %v3026_v53, -inf }
 0x96c   :  { %3033 = vmax.xlane.f32.xlu1 %v3032_v2 }
 0x9d8   :  { %v10024_v13 = vpop.xlane.xlu0 %3030 }
 0x9d9   :  { %v3037_v56 = vperm.slane %v10024_v13, 0  ;;  %v3038_v39 = vperm.slane %v10024_v13, 1  ;;  %v3039_v46 = vperm.slane %v10024_v13, 2  ;;  %v3040_v32 = vperm.slane %v10024_v13, 3 }
 0x9db   :  { %v3069_v60 = vsub.f32 %v9864_v25, %v3037_v56  ;;  %v3070_v3 = vsub.f32 %v9896_v58, %v3037_v56  ;;  %v3071_v10 = vsub.f32 %v9868_v41, %v3038_v39  ;;  %v3072_v55 = vsub.f32 %v9900_v18, %v3038_v39 }
 0x9dd   :  { %v3101_v37 = vmul.f32 1.442695, %v3069_v60  ;;  %v3103_v52 = vmul.f32 1.442695, %v3070_v3  ;;  %v3105_v62 = vmul.f32 1.442695, %v3071_v10  ;;  %v3076_v10 = vsub.f32 %v9908_v42, %v3040_v32 }
 0x9de   :  { %v3107_v41 = vmul.f32 1.442695, %v3072_v55 }
 0x9df   :  { %v10031_v44 = vpop.xlane.xlu1 %3033  ;;  %7143 = vpow2.f32 %v3103_v52 }
 0x9e0   :  { %7145 = vpow2.f32 %v3101_v37  ;;  %v3045_v20 = vperm.slane %v10031_v44, 0  ;;  %v3046_v54 = vperm.slane %v10031_v44, 1  ;;  %v3047_v57 = vperm.slane %v10031_v44, 2 }
 0x9e1   :  { %7147 = vpow2.f32 %v3105_v62  ;;  %v3048_v56 = vperm.slane %v10031_v44, 3  ;;  %v3049_v52 = vperm.slane %v10031_v44, 4 }
 0x9e2   :  { %v3085_v25 = vsub.f32 %v9866_v27, %v3045_v20  ;;  %v3087_v58 = vsub.f32 %v9870_v14, %v3046_v54  ;;  %v3086_v27 = vsub.f32 %v9898_v35, %v3045_v20  ;;  %7149 = vpow2.f32 %v3107_v41 }
 0x9e3   :  { %v3074_v14 = vsub.f32 %v9906_v29, %v3039_v46  ;;  %v3088_v4 = vsub.f32 %v9902_v28, %v3046_v54  ;;  %v3073_v29 = vsub.f32 %v9874_v26, %v3039_v46  ;;  %v3075_v28 = vsub.f32 %v9876_v12, %v3040_v32 }
 0x9e4   :  { %v3133_v18 = vmul.f32 1.442695, %v3085_v25  ;;  %v3137_v8 = vmul.f32 1.442695, %v3087_v58  ;;  %v3135_v40 = vmul.f32 1.442695, %v3086_v27  ;;  %v3089_v11 = vsub.f32 %v9872_v50, %v3047_v57 }
 0x9e5   :  { %v10038_v38 = vpop.eup %7143  ;;  %v3111_v31 = vmul.f32 1.442695, %v3074_v14  ;;  %v3139_v0 = vmul.f32 1.442695, %v3088_v4  ;;  %v3109_v53 = vmul.f32 1.442695, %v3073_v29  ;;  %v3090_v12 = vsub.f32 %v9904_v5, %v3047_v57 }
 0x9e6   :  { %v10040_v49 = vpop.eup %7145  ;;  %3201 = vperm.xlu0 %6994, %v10038_v38   ;;  %7151 = vpow2.f32 %v3137_v8  ;;  %v3113_v2 = vmul.f32 1.442695, %v3075_v28  ;;  %v3141_v60 = vmul.f32 1.442695, %v3089_v11  ;;  %v3092_v50 = vsub.f32 %v9912_v51, %v3048_v56 }
 0x9e7   :  { %v10044_v6 = vpop.eup %7147  ;;  %3198 = vperm.xlu2 %6993, %v10040_v49   ;;  %7153 = vpow2.f32 %v3133_v18  ;;  %v3143_v37 = vmul.f32 1.442695, %v3090_v12  ;;  %v3041_v20 = vperm.slane %v10024_v13, 4  ;;  %v3115_v5 = vmul.f32 1.442695, %v3076_v10 }
 0x9e8   :  { %3204 = vperm.xlu1 %6995, %v10044_v6   ;;  %v10052_v36 = vpop.eup %7149  ;;  %7155 = vpow2.f32 %v3135_v40  ;;  %v3147_v62 = vmul.f32 1.442695, %v3092_v50  ;;  %v3091_v25 = vsub.f32 %v9880_v30, %v3048_v56  ;;  %v3093_v42 = vsub.f32 %v9882_v48, %v3049_v52 }
 0x9e9   :  { %7157 = vpow2.f32 %v3111_v31  ;;  %v3077_v58 = vsub.f32 %v9878_v59, %v3041_v20  ;;  %v3042_v46 = vperm.slane %v10024_v13, 5  ;;  %v3078_v48 = vsub.f32 %v9910_v23, %v3041_v20 }
 0x9ea   :  { %7159 = vpow2.f32 %v3139_v0  ;;  %v3145_v41 = vmul.f32 1.442695, %v3091_v25  ;;  %v3149_v18 = vmul.f32 1.442695, %v3093_v42  ;;  %v3094_v4 = vsub.f32 %v9926_v47, %v3049_v52 }
 0x9eb   :  { %7161 = vpow2.f32 %v3109_v53  ;;  %v3117_v27 = vmul.f32 1.442695, %v3077_v58  ;;  %v3080_v59 = vsub.f32 %v9932_v19, %v3042_v46  ;;  %v3119_v40 = vmul.f32 1.442695, %v3078_v48 }
 0x9ec   :  { %v10055_v17 = vpop.eup %7151  ;;  %7163 = vpow2.f32 %v3113_v2  ;;  %v3043_v32 = vperm.slane %v10024_v13, 6  ;;  %v3050_v0 = vperm.slane %v10031_v44, 5  ;;  %v3151_v23 = vmul.f32 1.442695, %v3094_v4 }
 0x9ed   :  { %v10058_v35 = vpop.eup %7153  ;;  %7165 = vpow2.f32 %v3141_v60  ;;  %v3123_v31 = vmul.f32 1.442695, %v3080_v59  ;;  %v3079_v28 = vsub.f32 %v9886_v22, %v3042_v46  ;;  %v3051_v56 = vperm.slane %v10031_v44, 6 }
 0x9ee   :  { %3207 = vperm.xlu0 %6994, %v10052_v36   ;;  %v10066_v39 = vpop.eup %7155  ;;  %7167 = vpow2.f32 %v3143_v37  ;;  %v3081_v47 = vsub.f32 %v9888_v24, %v3043_v32  ;;  %v3095_v11 = vsub.f32 %v9884_v15, %v3050_v0  ;;  %v3096_v24 = vsub.f32 %v9928_v21, %v3050_v0 }
 0x9ef   :  { %3246 = vperm.xlu2 %6993, %v10058_v35   ;;  %v10068_v3 = vpop.eup %7157  ;;  %7169 = vpow2.f32 %v3147_v62  ;;  %v3121_v53 = vmul.f32 1.442695, %v3079_v28  ;;  %v3098_v15 = vsub.f32 %v9987_v43, %v3051_v56  ;;  %v3082_v10 = vsub.f32 %v9976_v16, %v3043_v32 }
 0x9f0   :  { %3252 = vperm.xlu1 %6995, %v10055_v17   ;;  %12435 = vst [vmem:[#allocation58_spill] sm:$0xff] %v10068_v3  ;;  %v10071_v26 = vpop.eup %7159  ;;  %7171 = vpow2.f32 %v3115_v5  ;;  %v3125_v2 = vmul.f32 1.442695, %v3081_v47  ;;  %v3153_v12 = vmul.f32 1.442695, %v3095_v11  ;;  %v3052_v52 = vperm.slane %v10031_v44, 7 }
 0x9f1   :  { %v10079_v55 = vpop.eup %7161  ;;  %7173 = vpow2.f32 %v3145_v41  ;;  %v3155_v37 = vmul.f32 1.442695, %v3096_v24  ;;  %v3159_v62 = vmul.f32 1.442695, %v3098_v15  ;;  %v3044_v5 = vperm.slane %v10024_v13, 7 }
 0x9f2   :  { %12436 = vst [vmem:[#allocation61_spill] sm:$0xff] %v10079_v55  ;;  %v10082_v54 = vpop.eup %7163  ;;  %7175 = vpow2.f32 %v3149_v18  ;;  %v3127_v21 = vmul.f32 1.442695, %v3082_v10  ;;  %v3097_v42 = vsub.f32 %v9892_v7, %v3051_v56  ;;  %v3099_v16 = vsub.f32 %v9894_v63, %v3052_v52 }
 0x9f3   :  { %v10085_v51 = vpop.eup %7165  ;;  %7177 = vpow2.f32 %v3117_v27  ;;  %v3083_v44 = vsub.f32 %v9890_v9, %v3044_v5  ;;  %v3084_v27 = vsub.f32 %v9978_v34, %v3044_v5  ;;  %v3100_v9 = vsub.f32 %v10012_v45, %v3052_v52 }
 0x9f4   :  { %v10093_v8 = vpop.eup %7167  ;;  %7179 = vpow2.f32 %v3119_v40  ;;  %v3157_v13 = vmul.f32 1.442695, %v3097_v42  ;;  %v3161_v58 = vmul.f32 1.442695, %v3099_v16 }
 0x9f5   :  { %v10095_v14 = vpop.eup %7169  ;;  %7181 = vpow2.f32 %v3123_v31  ;;  %v3129_v46 = vmul.f32 1.442695, %v3083_v44  ;;  %v3131_v63 = vmul.f32 1.442695, %v3084_v27  ;;  %v3163_v59 = vmul.f32 1.442695, %v3100_v9 }
 0x9f6   :  { %3249 = vperm.xlu0 %6994, %v10066_v39   ;;  %v10098_v30 = vpop.eup %7171  ;;  %7183 = vpow2.f32 %v3151_v23 }
 0x9f7   :  { %3255 = vperm.xlu2 %6993, %v10071_v26   ;;  %v10106_v57 = vpop.eup %7173  ;;  %7185 = vpow2.f32 %v3121_v53 }
 0x9f8   :  { %3213 = vperm.xlu1 %6995, %v10068_v3   ;;  %v10109_v29 = vpop.eup %7175  ;;  %7187 = vpow2.f32 %v3125_v2 }
 0x9f9   :  { %v10112_v19 = vpop.eup %7177  ;;  %7189 = vpow2.f32 %v3153_v12 }
 0x9fa   :  { %v10120_v60 = vpop.eup %7179  ;;  %7191 = vpow2.f32 %v3155_v37 }
 0x9fb   :  { %v10122_v50 = vpop.eup %7181  ;;  %7193 = vpow2.f32 %v3159_v62 }
 0x9fc   :  { %v10125_v22 = vpop.eup %7183  ;;  %7195 = vpow2.f32 %v3127_v21 }
 0x9fd   :  { %v10133_v20 = vpop.eup %7185  ;;  %7197 = vpow2.f32 %v3157_v13 }
 0x9fe   :  { %3210 = vperm.xlu0 %6994, %v10079_v55   ;;  %v10136_v25 = vpop.eup %7187  ;;  %7199 = vpow2.f32 %v3161_v58 }
 0x9ff   :  { %3258 = vperm.xlu2 %6993, %v10085_v51   ;;  %v10139_v43 = vpop.eup %7189  ;;  %7201 = vpow2.f32 %v3129_v46 }
 0xa00   :  { %3216 = vperm.xlu1 %6995, %v10082_v54   ;;  %v10146_v41 = vpop.eup %7191  ;;  %7203 = vpow2.f32 %v3131_v63 }
 0xa01   :  { %v10148_v18 = vpop.eup %7193  ;;  %7205 = vpow2.f32 %v3163_v59 }
 0xa02   :  { %12437 = vst [vmem:[#allocation32_spill] sm:$0xff] %v10148_v18  ;;  %v10151_v7 = vpop.eup %7195 }
 0xa03   :  { %v10157_v48 = vpop.eup %7197 }
 0xa04   :  { %12438 = vst [vmem:[#allocation29_spill] sm:$0xff] %v10157_v48  ;;  %v10159_v4 = vpop.eup %7199 }
 0xa05   :  { %12439 = vst [vmem:[#allocation40_spill] sm:$0xff] %v10159_v4  ;;  %v10162_v40 = vpop.eup %7201 }
 0xa06   :  { %3261 = vperm.xlu0 %6994, %v10093_v8   ;;  %12440 = vst [vmem:[#allocation27_spill] sm:$0xff] %v10162_v40  ;;  %v10166_v34 = vpop.eup %7203 }
 0xa07   :  { %3219 = vperm.xlu2 %6993, %v10098_v30   ;;  %12441 = vst [vmem:[#allocation49_spill] sm:$0xff] %v10166_v34  ;;  %v10169_v45 = vpop.eup %7205 }
 0xa08   :  { %3267 = vperm.xlu1 %6995, %v10095_v14   ;;  %12442 = vst [vmem:[#allocation54_spill] sm:$0xff] %v10169_v45 }
 0xa0e   :  { %3264 = vperm.xlu0 %6994, %v10106_v57  }
 0xa0f   :  { %3222 = vperm.xlu2 %6993, %v10112_v19  }
 0xa10   :  { %3270 = vperm.xlu1 %6995, %v10109_v29  }
 0xa16   :  { %3225 = vperm.xlu0 %6994, %v10120_v60  }
 0xa17   :  { %3273 = vperm.xlu2 %6993, %v10125_v22  }
 0xa18   :  { %3231 = vperm.xlu1 %6995, %v10122_v50  }
 0xa1e   :  { %3228 = vperm.xlu0 %6994, %v10133_v20  }
 0xa1f   :  { %3276 = vperm.xlu2 %6993, %v10139_v43  }
 0xa20   :  { %3234 = vperm.xlu1 %6995, %v10136_v25  }
 0xa26   :  { %3279 = vperm.xlu0 %6994, %v10146_v41  }
 0xa27   :  { %3237 = vperm.xlu2 %6993, %v10151_v7  }
 0xa28   :  { %3285 = vperm.xlu1 %6995, %v10148_v18  }
 0xa2e   :  { %3282 = vperm.xlu0 %6994, %v10157_v48  }
 0xa2f   :  { %3240 = vperm.xlu2 %6993, %v10162_v40  }
 0xa30   :  { %3288 = vperm.xlu1 %6995, %v10159_v4  }
 0xa36   :  { %3243 = vperm.xlu0 %6994, %v10166_v34  }
 0xa37   :  { %3291 = vperm.xlu2 %6993, %v10169_v45  }
 0xa41   :  { %v3199_v32 = vpop.permute.xlu2 %3198 }
 0xa49   :  { %v3247_v31 = vpop.permute.xlu2 %3246 }
 0xa4a   :  { %v3317_v59 = vperm.slane %v3247_v31, %v8417_v33 }
 0xa51   :  { %v3256_v0 = vpop.permute.xlu2 %3255 }
 0xa52   :  { %v3321_v55 = vperm.slane %v3256_v0, %v8420_v61 }
 0xa58   :  { %v3202_v23 = vpop.permute.xlu0 %3201 }
 0xa59   :  { %v3259_v47 = vpop.permute.xlu2 %3258  ;;  %v3294_v18 = vperm.slane %v3202_v23, %v8420_v61 }
 0xa5a   :  { %v3205_v28 = vpop.permute.xlu1 %3204  ;;  %v3323_v45 = vperm.slane %v3259_v47, %v8417_v33  ;;  %v3293_v47 = vperm.slane %v3199_v32, %v8417_v33 }
 0xa5b   :  { %v3296_v31 = vperm.slane %v3205_v28, %v8417_v33 }
 0xa60   :  { %v3208_v11 = vpop.permute.xlu0 %3207 }
 0xa61   :  { %v10172_v2 = vpop.permute.xlu2 %3219  ;;  %v3297_v4 = vperm.slane %v3208_v11, %v8420_v61 }
 0xa62   :  { %v3253_v53 = vpop.permute.xlu1 %3252 }
 0xa63   :  { %v3320_v1 = vperm.slane %v3253_v53, %v8417_v33 }
 0xa65   :  { %v3322_v11 = vsel %vm765_vm3, %v3321_v55, %v3320_v1 }
 0xa68   :  { %v3250_v56 = vpop.permute.xlu0 %3249 }
 0xa69   :  { %v10174_v24 = vpop.permute.xlu2 %3222  ;;  %v3318_v9 = vperm.slane %v3250_v56, %v8420_v61 }
 0xa6a   :  { %v3214_v12 = vpop.permute.xlu1 %3213 }
 0xa6b   :  { %v3319_v56 = vsel %vm765_vm3, %v3318_v9, %v3317_v59  ;;  %v3298_v9 = vsel %vm765_vm3, %v3297_v4, %v3296_v31  ;;  %v3300_v28 = vperm.slane %v3214_v12, %v8420_v61  ;;  %v3303_v12 = vperm.slane %v10172_v2, %v8420_v61 }
 0xa70   :  { %v3211_v15 = vpop.permute.xlu0 %3210 }
 0xa71   :  { %v3274_v37 = vpop.permute.xlu2 %3273  ;;  %v3299_v53 = vperm.slane %v3211_v15, %v8417_v33 }
 0xa72   :  { %v3217_v10 = vpop.permute.xlu1 %3216  ;;  %v3330_v15 = vperm.slane %v3274_v37, %v8420_v61 }
 0xa73   :  { %v3301_v1 = vsel %vm765_vm3, %v3300_v28, %v3299_v53  ;;  %v3302_v55 = vperm.slane %v3217_v10, %v8417_v33 }
 0xa78   :  { %v3262_v52 = vpop.permute.xlu0 %3261 }
 0xa79   :  { %v3277_v21 = vpop.permute.xlu2 %3276  ;;  %v3324_v63 = vperm.slane %v3262_v52, %v8420_v61 }
 0xa7a   :  { %v3268_v62 = vpop.permute.xlu1 %3267  ;;  %v3332_v32 = vperm.slane %v3277_v21, %v8417_v33  ;;  %v3305_v21 = vperm.slane %v10174_v24, %v8417_v33 }
 0xa7b   :  { %v3327_v52 = vperm.slane %v3268_v62, %v8420_v61  ;;  %v3348_v62 = vsel %vm812_vm4, %v3322_v11, %v3319_v56 }
 0xa80   :  { %v3265_v5 = vpop.permute.xlu0 %3264 }
 0xa81   :  { %v10176_v13 = vpop.permute.xlu2 %3237  ;;  %v3326_v34 = vperm.slane %v3265_v5, %v8417_v33  ;;  %v3325_v5 = vsel %vm765_vm3, %v3324_v63, %v3323_v45  ;;  %v3295_v45 = vsel %vm765_vm3, %v3294_v18, %v3293_v47 }
 0xa82   :  { %v3271_v42 = vpop.permute.xlu1 %3270  ;;  %v3341_v63 = vsel %vm812_vm4, %v3298_v9, %v3295_v45 }
 0xa83   :  { %v3329_v48 = vperm.slane %v3271_v42, %v8417_v33  ;;  %v3328_v0 = vsel %vm765_vm3, %v3327_v52, %v3326_v34  ;;  %v3349_v42 = vsel %vm814_vm5, %v3325_v5, %v3348_v62  ;;  %v3342_v31 = vsel %vm814_vm5, %v3301_v1, %v3341_v63 }
 0xa84   :  { %v3304_v5 = vsel %vm765_vm3, %v3303_v12, %v3302_v55 }
 0xa85   :  { %v3331_v4 = vsel %vm765_vm3, %v3330_v15, %v3329_v48  ;;  %v3343_v28 = vsel %vm816_vm6, %v3304_v5, %v3342_v31 }
 0xa88   :  { %v3226_v16 = vpop.permute.xlu0 %3225 }
 0xa89   :  { %v10180_v27 = vpop.permute.xlu2 %3240  ;;  %v3306_v18 = vperm.slane %v3226_v16, %v8420_v61 }
 0xa8a   :  { %v3232_v44 = vpop.permute.xlu1 %3231  ;;  %v3314_v1 = vperm.slane %v10180_v27, %v8417_v33 }
 0xa8b   :  { %v3309_v47 = vperm.slane %v3232_v44, %v8420_v61  ;;  %v3312_v44 = vperm.slane %v10176_v13, %v8420_v61 }
 0xa90   :  { %v3229_v58 = vpop.permute.xlu0 %3228 }
 0xa91   :  { %v3292_v34 = vpop.permute.xlu2 %3291  ;;  %v3308_v10 = vperm.slane %v3229_v58, %v8417_v33 }
 0xa92   :  { %v10178_v46 = vpop.permute.xlu1 %3234  ;;  %v3339_v2 = vperm.slane %v3292_v34, %v8420_v61 }
 0xa93   :  { %v3311_v11 = vperm.slane %v10178_v46, %v8417_v33  ;;  %v3310_v9 = vsel %vm765_vm3, %v3309_v47, %v3308_v10 }
 0xa95   :  { %v3313_v46 = vsel %vm765_vm3, %v3312_v44, %v3311_v11 }
 0xa98   :  { %v3280_v40 = vpop.permute.xlu0 %3279 }
 0xa99   :  { %v3333_v23 = vperm.slane %v3280_v40, %v8420_v61  ;;  %v3350_v40 = vsel %vm816_vm6, %v3328_v0, %v3349_v42 }
 0xa9a   :  { %v3286_v3 = vpop.permute.xlu1 %3285  ;;  %v3351_v53 = vsel %vm818_vm7, %v3331_v4, %v3350_v40 }
 0xa9b   :  { %v3334_v37 = vsel %vm765_vm3, %v3333_v23, %v3332_v32  ;;  %v3336_v56 = vperm.slane %v3286_v3, %v8420_v61  ;;  %v3307_v3 = vsel %vm765_vm3, %v3306_v18, %v3305_v21 }
 0xa9c   :  { %v3352_v58 = vsel %vm820_vm8, %v3334_v37, %v3351_v53  ;;  %v3344_v45 = vsel %vm818_vm7, %v3307_v3, %v3343_v28 }
 0xa9d   :  { %v3345_v32 = vsel %vm820_vm8, %v3310_v9, %v3344_v45 }
 0xa9e   :  { %v3346_v4 = vsel %vm822_vm9, %v3313_v46, %v3345_v32 }
 0xaa0   :  { %v3283_v59 = vpop.permute.xlu0 %3282 }
 0xaa1   :  { %v3335_v48 = vperm.slane %v3283_v59, %v8417_v33 }
 0xaa2   :  { %v3289_v52 = vpop.permute.xlu1 %3288 }
 0xaa3   :  { %v3338_v16 = vperm.slane %v3289_v52, %v8417_v33  ;;  %v3337_v24 = vsel %vm765_vm3, %v3336_v56, %v3335_v48 }
 0xaa4   :  { %v3353_v23 = vsel %vm822_vm9, %v3337_v24, %v3352_v58 }
 0xaa5   :  { %v3340_v0 = vsel %vm765_vm3, %v3339_v2, %v3338_v16 }
 0xaa6   :  { %v3354_v62 = vsel %vm824_vm10, %v3340_v0, %v3353_v23 }
 0xaa7   :  { %v3360_v15 = vsel %vm246_vm0, %v3354_v62, 0.0 }
 0xaa8   :  { %3361 = vadd.xlane.f32.xlu1 %v3360_v15  ;;  %v3244_v42 = vpop.permute.xlu0 %3243 }
 0xaa9   :  { %v3315_v55 = vperm.slane %v3244_v42, %v8420_v61 }
 0xaab   :  { %v3316_v40 = vsel %vm765_vm3, %v3315_v55, %v3314_v1 }
 0xaac   :  { %v3347_v13 = vsel %vm824_vm10, %v3316_v40, %v3346_v4 }
 0xaad   :  { %v3357_v34 = vsel %vm246_vm0, %v3347_v13, 0.0 }
 0xaae   :  { %3358 = vadd.xlane.f32.xlu0 %v3357_v34 }
 0xb1b   :  { %v3362_v63 = vpop.xlane.xlu1 %3361 }
 0xb1c   :  { %7207 = vrcp.f32 %v3362_v63 }
 0xb21   :  { %v3359_v18 = vpop.xlane.xlu0 %3358 }
 0xb22   :  { %v10251_v12 = vpop.eup %7207  ;;  %7209 = vrcp.f32 %v3359_v18 }
 0xb23   :  { %v3376_v37 = vperm.slane %v10251_v12, 1  ;;  %v3377_v21 = vperm.slane %v10251_v12, 2  ;;  %v3380_v34 = vperm.slane %v10251_v12, 5 }
 0xb25   :  { %v3417_v27 = vmul.f32 %v10055_v17, %v3376_v37  ;;  %v3418_v59 = vmul.f32 %v10071_v26, %v3376_v37  ;;  %v3419_v31 = vmul.f32 %v10085_v51, %v3377_v21  ;;  %v3420_v53 = vmul.f32 %v10093_v8, %v3377_v21 }
 0xb26   :  { %v3378_v51 = vperm.slane %v10251_v12, 3  ;;  %v3425_v21 = vmul.f32 %v10139_v43, %v3380_v34 }
 0xb27   :  { %v3440_v10 = vpack.c.bf16 %v3418_v59, %v3417_v27  ;;  %v10267_v24 = vpack.c.bf16 %v3420_v53, %v3419_v31 }
 0xb28   :  { %v10257_v56 = vpop.eup %7209  ;;  %v3421_v23 = vmul.f32 %v10106_v57, %v3378_v51 }
 0xb29   :  { %v3487_v48 = vunpack.c.h.b16 %v3440_v10  ;;  %v3486_v52 = vunpack.c.l.b16 %v3440_v10  ;;  %v3367_v2 = vperm.slane %v10257_v56, 0  ;;  %v3370_v16 = vperm.slane %v10257_v56, 3 }
 0xb2a   :  { %v3488_v0 = vunpack.c.l.b16 %v10267_v24  ;;  %v3371_v9 = vperm.slane %v10257_v56, 4  ;;  %v3426_v10 = vmul.f32 %v10146_v41, %v3380_v34  ;;  %v3369_v43 = vperm.slane %v10257_v56, 2 }
 0xb2b   :  { %3558 = vperm.xlu1 %6995, %v3487_v48   ;;  %3555 = vperm.xlu0 %6994, %v3486_v52   ;;  %v3399_v17 = vmul.f32 %v10040_v49, %v3367_v2  ;;  %v3400_v26 = vmul.f32 %v10038_v38, %v3367_v2  ;;  %v3405_v5 = vmul.f32 %v10082_v54, %v3370_v16  ;;  %v3379_v38 = vperm.slane %v10251_v12, 4 }
 0xb2c   :  { %v3406_v47 = vmul.f32 %v10098_v30, %v3370_v16  ;;  %v3422_v49 = vmul.f32 %v10095_v14, %v3378_v51  ;;  %v3368_v54 = vperm.slane %v10257_v56, 1  ;;  %v3407_v46 = vmul.f32 %v10112_v19, %v3371_v9  ;;  %v12443_v16 = vld [vmem:[#allocation29_spill] sm:$0xff] }
 0xb2d   :  { %v3431_v58 = vpack.c.bf16 %v3400_v26, %v3399_v17  ;;  %v3423_v62 = vmul.f32 %v10109_v29, %v3379_v38  ;;  %v3424_v14 = vmul.f32 %v10125_v22, %v3379_v38  ;;  %v3408_v42 = vmul.f32 %v10120_v60, %v3371_v9  ;;  %v12444_v17 = vld [vmem:[#allocation32_spill] sm:$0xff]  ;;  %v12445_v51 = vld [vmem:[#allocation61_spill] sm:$0xff]  ;;  %v12449_v9 = vld [vmem:[#allocation27_spill] sm:$0xff] }
 0xb2e   :  { %v3434_v8 = vpack.c.bf16 %v3406_v47, %v3405_v5  ;;  %v10275_v30 = vpack.c.bf16 %v3422_v49, %v3421_v23  ;;  %v3401_v44 = vmul.f32 %v10044_v6, %v3368_v54  ;;  %v3402_v57 = vmul.f32 %v10052_v36, %v3368_v54  ;;  %v12448_v23 = vld [vmem:[#allocation54_spill] sm:$0xff] }
 0xb2f   :  { %v3468_v3 = vunpack.c.l.b16 %v3431_v58  ;;  %v3469_v28 = vunpack.c.h.b16 %v3431_v58  ;;  %v3443_v1 = vpack.c.bf16 %v3424_v14, %v3423_v62  ;;  %v10285_v29 = vpack.c.bf16 %v3408_v42, %v3407_v46 }
 0xb30   :  { %v3474_v11 = vunpack.c.l.b16 %v3434_v8  ;;  %v3491_v15 = vunpack.c.h.b16 %v10275_v30  ;;  %v3475_v45 = vunpack.c.h.b16 %v3434_v8  ;;  %v3432_v32 = vpack.c.bf16 %v3402_v57, %v3401_v44  ;;  %v12446_v8 = vld [vmem:[#allocation58_spill] sm:$0xff] }
 0xb31   :  { %3501 = vperm.xlu2 %6993, %v3468_v3   ;;  %v3372_v6 = vperm.slane %v10257_v56, 5  ;;  %v3492_v36 = vunpack.c.l.b16 %v3443_v1  ;;  %v3476_v22 = vunpack.c.l.b16 %v10285_v29  ;;  %v3375_v19 = vperm.slane %v10251_v12, 0 }
 0xb32   :  { %v3470_v55 = vunpack.c.l.b16 %v3432_v32  ;;  %v3373_v60 = vperm.slane %v10257_v56, 6  ;;  %v3471_v18 = vunpack.c.h.b16 %v3432_v32  ;;  %v3493_v37 = vunpack.c.h.b16 %v3443_v1 }
 0xb33   :  { %3519 = vperm.xlu1 %6995, %v3474_v11   ;;  %3561 = vperm.xlu0 %6994, %v3488_v0   ;;  %v3409_v40 = vmul.f32 %v10133_v20, %v3372_v6  ;;  %v3410_v4 = vmul.f32 %v10122_v50, %v3372_v6  ;;  %v3415_v63 = vmul.f32 %v10058_v35, %v3375_v19  ;;  %v3381_v35 = vperm.slane %v10251_v12, 6  ;;  %v12447_v11 = vld [vmem:[#allocation40_spill] sm:$0xff] }
 0xb34   :  { %v3416_v27 = vmul.f32 %v10066_v39, %v3375_v19  ;;  %v3411_v20 = vmul.f32 %v10136_v25, %v3373_v60  ;;  %v3412_v50 = vmul.f32 %v10151_v7, %v3373_v60  ;;  %v3444_v31 = vpack.c.bf16 %v3426_v10, %v3425_v21 }
 0xb35   :  { %v3436_v13 = vpack.c.bf16 %v3410_v4, %v3409_v40  ;;  %v3427_v25 = vmul.f32 %v12443_v16, %v3381_v35  ;;  %v3428_v26 = vmul.f32 %v12444_v17, %v3381_v35  ;;  %v3382_v41 = vperm.slane %v10251_v12, 7 }
 0xb36   :  { %v3439_v48 = vpack.c.bf16 %v3416_v27, %v3415_v63  ;;  %v3437_v52 = vpack.c.bf16 %v3412_v50, %v3411_v20  ;;  %v3494_v39 = vunpack.c.l.b16 %v3444_v31  ;;  %v3374_v5 = vperm.slane %v10257_v56, 7 }
 0xb37   :  { %v3479_v59 = vunpack.c.h.b16 %v3436_v13  ;;  %v3445_v7 = vpack.c.bf16 %v3428_v26, %v3427_v25  ;;  %v3403_v58 = vmul.f32 %v12445_v51, %v3369_v43  ;;  %v3404_v3 = vmul.f32 %v12446_v8, %v3369_v43 }
 0xb38   :  { %v3484_v53 = vunpack.c.l.b16 %v3439_v48  ;;  %v3480_v2 = vunpack.c.l.b16 %v3437_v52  ;;  %v3485_v47 = vunpack.c.h.b16 %v3439_v48  ;;  %v3429_v0 = vmul.f32 %v12447_v11, %v3382_v41 }
 0xb39   :  { %3504 = vperm.xlu2 %6993, %v3469_v28   ;;  %v3430_v49 = vmul.f32 %v12448_v23, %v3382_v41  ;;  %v3497_v38 = vunpack.c.h.b16 %v3445_v7  ;;  %v3481_v54 = vunpack.c.h.b16 %v3437_v52  ;;  %v3413_v62 = vmul.f32 %v12449_v9, %v3374_v5  ;;  %v12450_v28 = vld [vmem:[#allocation49_spill] sm:$0xff] }
 0xb3a   :  { %v3414_v44 = vmul.f32 %v12450_v28, %v3374_v5  ;;  %v3433_v12 = vpack.c.bf16 %v3404_v3, %v3403_v58  ;;  %v3489_v32 = vunpack.c.h.b16 %v10267_v24  ;;  %v3490_v1 = vunpack.c.l.b16 %v10275_v30 }
 0xb3b   :  { %3570 = vperm.xlu1 %6995, %v3491_v15   ;;  %3522 = vperm.xlu0 %6994, %v3475_v45   ;;  %v3446_v56 = vpack.c.bf16 %v3430_v49, %v3429_v0  ;;  %v3477_v6 = vunpack.c.h.b16 %v10285_v29  ;;  %v3496_v4 = vunpack.c.l.b16 %v3445_v7 }
 0xb3c   :  { %v3438_v57 = vpack.c.bf16 %v3414_v44, %v3413_v62  ;;  %v3472_v14 = vunpack.c.l.b16 %v3433_v12  ;;  %v3473_v46 = vunpack.c.h.b16 %v3433_v12 }
 0xb3d   :  { %v3498_v15 = vunpack.c.l.b16 %v3446_v56  ;;  %v3499_v42 = vunpack.c.h.b16 %v3446_v56 }
 0xb3e   :  { %v3482_v45 = vunpack.c.l.b16 %v3438_v57  ;;  %v3483_v60 = vunpack.c.h.b16 %v3438_v57 }
 0xb41   :  { %3507 = vperm.xlu2 %6993, %v3470_v55   ;;  %v3478_v55 = vunpack.c.l.b16 %v3436_v13 }
 0xb43   :  { %3573 = vperm.xlu1 %6995, %v3492_v36   ;;  %3525 = vperm.xlu0 %6994, %v3476_v22   ;;  %v3495_v22 = vunpack.c.h.b16 %v3444_v31 }
 0xb49   :  { %3510 = vperm.xlu2 %6993, %v3471_v18  }
 0xb4b   :  { %3534 = vperm.xlu1 %6995, %v3479_v59   ;;  %3576 = vperm.xlu0 %6994, %v3493_v37  }
 0xb51   :  { %3549 = vperm.xlu2 %6993, %v3484_v53  }
 0xb53   :  { %3537 = vperm.xlu1 %6995, %v3480_v2   ;;  %3579 = vperm.xlu0 %6994, %v3494_v39   ;;  %v6923_v2 = vld [vmem:[#allocation7 + $0x18] sm:$0xff] }
 0xb54   :  { %3716 = vmatpush.bf16.msrb.mxu3 %v6923_v2 }
 0xb59   :  { %3552 = vperm.xlu2 %6993, %v3485_v47  }
 0xb5b   :  { %3588 = vperm.xlu1 %6995, %v3497_v38   ;;  %3540 = vperm.xlu0 %6994, %v3481_v54  }
 0xb61   :  { %3513 = vperm.xlu2 %6993, %v3472_v14  }
 0xb63   :  { %3591 = vperm.xlu1 %6995, %v3498_v15   ;;  %3543 = vperm.xlu0 %6994, %v3482_v45  }
 0xb69   :  { %3516 = vperm.xlu2 %6993, %v3473_v46  }
 0xb6b   :  { %3594 = vperm.xlu0 %6994, %v3499_v42  }
 0xb71   :  { %3564 = vperm.xlu2 %6993, %v3489_v32  }
 0xb79   :  { %3567 = vperm.xlu2 %6993, %v3490_v1  }
 0xb81   :  { %3528 = vperm.xlu2 %6993, %v3477_v6  }
 0xb89   :  { %3531 = vperm.xlu2 %6993, %v3478_v55  }
 0xb8b   :  { %v3502_v36 = vpop.permute.xlu2 %3501 }
 0xb8c   :  { %v3596_v58 = vperm.slane %v3502_v36, %v8417_v33 }
 0xb91   :  { %3582 = vperm.xlu2 %6993, %v3495_v22  }
 0xb93   :  { %v3505_v40 = vpop.permute.xlu2 %3504 }
 0xb94   :  { %v3597_v43 = vperm.slane %v3505_v40, %v8420_v61 }
 0xb96   :  { %v3598_v38 = vsel %vm765_vm3, %v3597_v43, %v3596_v58 }
 0xb99   :  { %3585 = vperm.xlu2 %6993, %v3496_v4  }
 0xb9b   :  { %v3508_v19 = vpop.permute.xlu2 %3507 }
 0xb9c   :  { %v3599_v7 = vperm.slane %v3508_v19, %v8417_v33 }
 0xb9d   :  { %v3556_v24 = vpop.permute.xlu0 %3555  ;;  %v3559_v30 = vpop.permute.xlu1 %3558 }
 0xb9e   :  { %v3624_v5 = vperm.slane %v3559_v30, %v8420_v61  ;;  %v3623_v47 = vperm.slane %v3556_v24, %v8417_v33 }
 0xba0   :  { %v3625_v62 = vsel %vm765_vm3, %v3624_v5, %v3623_v47 }
 0xba1   :  { %3546 = vperm.xlu2 %6993, %v3483_v60  }
 0xba3   :  { %v3511_v34 = vpop.permute.xlu2 %3510 }
 0xba4   :  { %v3600_v26 = vperm.slane %v3511_v34, %v8420_v61 }
 0xba5   :  { %v3562_v18 = vpop.permute.xlu0 %3561  ;;  %v3520_v13 = vpop.permute.xlu1 %3519 }
 0xba6   :  { %v3601_v0 = vsel %vm765_vm3, %v3600_v26, %v3599_v7  ;;  %v3626_v54 = vperm.slane %v3562_v18, %v8417_v33  ;;  %v3605_v28 = vperm.slane %v3520_v13, %v8417_v33 }
 0xba7   :  { %v3644_v56 = vsel %vm812_vm4, %v3601_v0, %v3598_v38  ;;  %v6931_v0 = vld [vmem:[#allocation10 + $0x14] sm:$0xf0]  ;;  %v6929_v38 = vld [vmem:[#allocation10 + $0x4] sm:$0xf0] }
 0xbab   :  { %v3550_v63 = vpop.permute.xlu2 %3549 }
 0xbac   :  { %v3620_v23 = vperm.slane %v3550_v63, %v8417_v33 }
 0xbad   :  { %v10315_v27 = vpop.permute.xlu0 %3522  ;;  %v3571_v50 = vpop.permute.xlu1 %3570 }
 0xbae   :  { %v3630_v44 = vperm.slane %v3571_v50, %v8420_v61  ;;  %v3606_v46 = vperm.slane %v10315_v27, %v8420_v61 }
 0xbb3   :  { %v3553_v37 = vpop.permute.xlu2 %3552 }
 0xbb4   :  { %v3621_v51 = vperm.slane %v3553_v37, %v8420_v61  ;;  %v3607_v37 = vsel %vm765_vm3, %v3606_v46, %v3605_v28  ;;  %v7000_v28 = vld [vmem:[%s12451_s23] ss:$0 sm:$0xff] }
 0xbb5   :  { %v3526_v59 = vpop.permute.xlu0 %3525  ;;  %v3574_v48 = vpop.permute.xlu1 %3573 }
 0xbb6   :  { %v3622_v12 = vsel %vm765_vm3, %v3621_v51, %v3620_v23  ;;  %v3608_v55 = vperm.slane %v3526_v59, %v8417_v33  ;;  %v3632_v34 = vperm.slane %v3574_v48, %v8417_v33  ;;  %v6714_v23 = vld [vmem:[#allocation10] sm:$0xf] }
 0xbb7   :  { %v3651_v6 = vsel %vm812_vm4, %v3625_v62, %v3622_v12 }
 0xbbb   :  { %v3514_v29 = vpop.permute.xlu2 %3513 }
 0xbbc   :  { %v3602_v9 = vperm.slane %v3514_v29, %v8417_v33 }
 0xbbd   :  { %v3577_v10 = vpop.permute.xlu0 %3576  ;;  %v3535_v35 = vpop.permute.xlu1 %3534 }
 0xbbe   :  { %v3633_v36 = vperm.slane %v3577_v10, %v8420_v61  ;;  %v3612_v40 = vperm.slane %v3535_v35, %v8420_v61 }
 0xbc0   :  { %v3634_v13 = vsel %vm765_vm3, %v3633_v36, %v3632_v34 }
 0xbc3   :  { %v3517_v20 = vpop.permute.xlu2 %3516 }
 0xbc4   :  { %v3603_v8 = vperm.slane %v3517_v20, %v8420_v61 }
 0xbc5   :  { %v3580_v31 = vpop.permute.xlu0 %3579  ;;  %v10319_v25 = vpop.permute.xlu1 %3537 }
 0xbc6   :  { %v3604_v57 = vsel %vm765_vm3, %v3603_v8, %v3602_v9  ;;  %v3635_v19 = vperm.slane %v3580_v31, %v8417_v33  ;;  %v3614_v31 = vperm.slane %v10319_v25, %v8417_v33  ;;  %v6921_v8 = vld [vmem:[#allocation7 + $0x8] sm:$0xff] }
 0xbc7   :  { %v3645_v4 = vsel %vm814_vm5, %v3604_v57, %v3644_v56  ;;  %v7001_v9 = vld [vmem:[%s12152_s10] ss:$0 sm:$0xff] }
 0xbc8   :  { %v3646_v50 = vsel %vm816_vm6, %v3607_v37, %v3645_v4  ;;  %3879 = vrot.lane.b32.xlu0 %v7001_v9, %s12287_s2 }
 0xbcb   :  { %v3565_v21 = vpop.permute.xlu2 %3564 }
 0xbcc   :  { %v3627_v3 = vperm.slane %v3565_v21, %v8420_v61 }
 0xbcd   :  { %v10317_v39 = vpop.permute.xlu0 %3540  ;;  %v3589_v11 = vpop.permute.xlu1 %3588 }
 0xbce   :  { %v3628_v14 = vsel %vm765_vm3, %v3627_v3, %v3626_v54  ;;  %v3639_v24 = vperm.slane %v3589_v11, %v8420_v61  ;;  %v3615_v20 = vperm.slane %v10317_v39, %v8420_v61  ;;  %v6920_v3 = vld [vmem:[#allocation7] sm:$0xff]  ;;  %v6722_v11 = vld [vmem:[#allocation10 + $0x10] sm:$0xf]  ;;  %v6715_v54 = vor.u32 %v6929_v38, %v6714_v23 }
 0xbcf   :  { %v3652_v60 = vsel %vm814_vm5, %v3628_v14, %v3651_v6  ;;  %v12453_v14 = vld [vmem:[#allocation51_spill] sm:$0xff] }
 0xbd0   :  { %v3616_v43 = vsel %vm765_vm3, %v3615_v20, %v3614_v31 }
 0xbd3   :  { %v3568_v52 = vpop.permute.xlu2 %3567 }
 0xbd4   :  { %v3629_v49 = vperm.slane %v3568_v52, %v8417_v33 }
 0xbd5   :  { %v10323_v41 = vpop.permute.xlu0 %3543  ;;  %v3592_v59 = vpop.permute.xlu1 %3591 }
 0xbd6   :  { %v3631_v42 = vsel %vm765_vm3, %v3630_v44, %v3629_v49  ;;  %v3641_v39 = vperm.slane %v3592_v59, %v8417_v33  ;;  %v6723_v49 = vor.u32 %v6931_v0, %v6722_v11 }
 0xbd7   :  { %v3653_v63 = vsel %vm816_vm6, %v3631_v42, %v3652_v60 }
 0xbd8   :  { %v3654_v52 = vsel %vm818_vm7, %v3634_v13, %v3653_v63 }
 0xbdb   :  { %v3529_v53 = vpop.permute.xlu2 %3528 }
 0xbdc   :  { %v3609_v15 = vperm.slane %v3529_v53, %v8420_v61 }
 0xbdd   :  { %v3595_v30 = vpop.permute.xlu0 %3594 }
 0xbde   :  { %v3610_v18 = vsel %vm765_vm3, %v3609_v15, %v3608_v55  ;;  %v3642_v48 = vperm.slane %v3595_v30, %v8420_v61 }
 0xbdf   :  { %v3647_v10 = vsel %vm818_vm7, %v3610_v18, %v3646_v50 }
 0xbe0   :  { %v3643_v7 = vsel %vm765_vm3, %v3642_v48, %v3641_v39 }
 0xbe3   :  { %v3532_v16 = vpop.permute.xlu2 %3531 }
 0xbe4   :  { %v3611_v32 = vperm.slane %v3532_v16, %v8417_v33  ;;  %v3617_v16 = vperm.slane %v10323_v41, %v8417_v33  ;;  %v6922_v41 = vld [vmem:[#allocation7 + $0x10] sm:$0xff] }
 0xbe5   :  { %3717 = vmatpush.bf16.msrb.mxu3 %v6922_v41 }
 0xbe6   :  { %v3613_v27 = vsel %vm765_vm3, %v3612_v40, %v3611_v32 }
 0xbe7   :  { %v3648_v35 = vsel %vm820_vm8, %v3613_v27, %v3647_v10 }
 0xbe8   :  { %v3649_v5 = vsel %vm822_vm9, %v3616_v43, %v3648_v35 }
 0xbe9   :  { %3718 = vmatpush.bf16.msrb.mxu3 %v6921_v8 }
 0xbeb   :  { %v3583_v17 = vpop.permute.xlu2 %3582 }
 0xbec   :  { %v3636_v1 = vperm.slane %v3583_v17, %v8420_v61 }
 0xbed   :  { %3719 = vmatpush.bf16.msrb.mxu3 %v6920_v3 }
 0xbee   :  { %v3637_v29 = vsel %vm765_vm3, %v3636_v1, %v3635_v19 }
 0xbef   :  { %v3655_v53 = vsel %vm820_vm8, %v3637_v29, %v3654_v52 }
 0xbf1   :  { %6117 = vmatpush.bf16.msra.mxu3 %v6723_v49 }
 0xbf3   :  { %v3586_v45 = vpop.permute.xlu2 %3585 }
 0xbf4   :  { %v3638_v22 = vperm.slane %v3586_v45, %v8417_v33 }
 0xbf5   :  { %6118 = vmatpush.bf16.msra.mxu3 %v6715_v54 }
 0xbf6   :  { %v3640_v21 = vsel %vm765_vm3, %v3639_v24, %v3638_v22 }
 0xbf7   :  { %v3656_v17 = vsel %vm822_vm9, %v3640_v21, %v3655_v53 }
 0xbf8   :  { %v3657_v51 = vsel %vm824_vm10, %v3643_v7, %v3656_v17 }
 0xbfb   :  { %v3547_v2 = vpop.permute.xlu2 %3546 }
 0xbfc   :  { %v3618_v26 = vperm.slane %v3547_v2, %v8420_v61 }
 0xbfe   :  { %v3619_v25 = vsel %vm765_vm3, %v3618_v26, %v3617_v16 }
 0xbff   :  { %v3650_v47 = vsel %vm824_vm10, %v3619_v25, %v3649_v5 }
 0xc00   :  { %v3658_v58 = vpack.c.b16 %v3657_v51, %v3650_v47 }
 0xc02   :  { %6675 = vmatmul.msk.bf16.vlgmr.msrb.gmra.mxu2 %vm246_vm0, %v3658_v58 }
 0xc3a   :  { %v10441_v13 = vpop.permute.xlu0 %3879 }
 0xc85   :  { %v3671_v62 = vpop.f32.mrf.mxu2 }
 0xc86   :  { %v3672_v12 = vadd.f32 %v7000_v28, %v3671_v62 }
 0xc8d   :  { %v3673_v44 = vpop.f32.mrf.mxu2 }
 0xc8e   :  { %v3674_v56 = vadd.f32 %v7000_v28, %v3673_v44 }
 0xc90   :  { %v10397_v57 = vpack.c.bf16 %v3674_v56, %v3672_v12 }
 0xc92   :  { %12452 = vst [vmem:[#allocation63_spill] sm:$0xff] %v10397_v57  ;;  %6692 = vmatmul.msk.bf16.vlgmr.msrb.gmra.mxu3 %vm297_vm1, %v10397_v57 }
 0xca2   :  { %6728 = vmatmul.msk.bf16.vlgmr.msra.gmra.mxu3 %vm631_vm2, %v12453_v14 }
 0xd15   :  { %v10403_v15 = vpop.f32.mrf.mxu3 }
 0xd16   :  { %3775 = vrot.lane.b32.xlu2 %v10403_v15, %s12287_s2  ;;  %v3729_v42 = vrot.slane %v10403_v15, 1  ;;  %v3730_v32 = vrot.slane %v10403_v15, 2  ;;  %v3743_v55 = vperm.slane %v10403_v15, 0  ;;  %v3731_v59 = vrot.slane %v10403_v15, 3 }
 0xd17   :  { %v3732_v31 = vrot.slane %v10403_v15, 4  ;;  %v3733_v41 = vrot.slane %v10403_v15, 5 }
 0xd18   :  { %v10418_v36 = vperm.slane %v3729_v42, 0  ;;  %v10423_v4 = vperm.slane %v3730_v32, 0  ;;  %v10455_v26 = vperm.slane %v3731_v59, 0 }
 0xd19   :  { %v10458_v43 = vperm.slane %v3732_v31, 0  ;;  %v10474_v9 = vperm.slane %v3733_v41, 0 }
 0xd1d   :  { %v10407_v45 = vpop.f32.mrf.mxu3 }
 0xd1e   :  { %3777 = vrot.lane.b32.xlu1 %v10407_v45, %s12287_s2  ;;  %v4652_v46 = vpack.c.bf16 %v10407_v45, %v10403_v15  ;;  %v3736_v1 = vrot.slane %v10407_v45, 1  ;;  %v3737_v6 = vrot.slane %v10407_v45, 2  ;;  %v3751_v22 = vperm.slane %v10407_v45, 0 }
 0xd1f   :  { %v3738_v48 = vrot.slane %v10407_v45, 3  ;;  %v3739_v8 = vrot.slane %v10407_v45, 4  ;;  %v3740_v3 = vrot.slane %v10407_v45, 5  ;;  %v3741_v32 = vrot.slane %v10407_v45, 6 }
 0xd20   :  { %4874 = vmatpush.bf16.msra.mxu2 %v4652_v46  ;;  %v10433_v24 = vperm.slane %v3736_v1, 0  ;;  %v10437_v18 = vperm.slane %v3737_v6, 0  ;;  %v3734_v1 = vrot.slane %v10403_v15, 6  ;;  %v3735_v6 = vrot.slane %v10403_v15, 7 }
 0xd21   :  { %v10453_v17 = vperm.slane %v3738_v48, 0  ;;  %v10476_v62 = vperm.slane %v3739_v8, 0  ;;  %v10479_v28 = vperm.slane %v3740_v3, 0  ;;  %v3742_v31 = vrot.slane %v10407_v45, 7 }
 0xd70   :  { %v10421_v40 = vpop.permute.xlu2 %3775 }
 0xd71   :  { %v3781_v19 = vadd.f32 %v10421_v40, %v3743_v55  ;;  %v3783_v60 = vadd.f32 %v10421_v40, %v10418_v36  ;;  %v3797_v34 = vadd.f32 %v10421_v40, %v3751_v22  ;;  %v3785_v63 = vadd.f32 %v10421_v40, %v10423_v4 }
 0xd72   :  { %v3799_v29 = vadd.f32 %v10421_v40, %v10433_v24  ;;  %v3801_v20 = vadd.f32 %v10421_v40, %v10437_v18  ;;  %v3803_v5 = vadd.f32 %v10421_v40, %v10453_v17  ;;  %v3787_v47 = vadd.f32 %v10421_v40, %v10455_v26 }
 0xd73   :  { %v3813_v30 = vmul.f32 0.2, %v3781_v19  ;;  %v3815_v37 = vmul.f32 0.2, %v3783_v60  ;;  %v3829_v27 = vmul.f32 0.2, %v3797_v34  ;;  %v3789_v58 = vadd.f32 %v10421_v40, %v10458_v43 }
 0xd74   :  { %v3817_v52 = vmul.f32 0.2, %v3785_v63  ;;  %v3831_v39 = vmul.f32 0.2, %v3799_v29  ;;  %v3833_v16 = vmul.f32 0.2, %v3801_v20  ;;  %v3791_v56 = vadd.f32 %v10421_v40, %v10474_v9 }
 0xd75   :  { %v3845_v50 = vmax.f32 %v3781_v19, %v3813_v30  ;;  %v3847_v21 = vmax.f32 %v3783_v60, %v3815_v37  ;;  %v3861_v10 = vmax.f32 %v3797_v34, %v3829_v27  ;;  %v3835_v23 = vmul.f32 0.2, %v3803_v5 }
 0xd76   :  { %v3849_v7 = vmax.f32 %v3785_v63, %v3817_v52  ;;  %v3863_v25 = vmax.f32 %v3799_v29, %v3831_v39  ;;  %v3865_v51 = vmax.f32 %v3801_v20, %v3833_v16  ;;  %v3819_v49 = vmul.f32 0.2, %v3787_v47 }
 0xd77   :  { %v3882_v35 = vmul.f32 %v10441_v13, %v3845_v50  ;;  %v3884_v53 = vmul.f32 %v10441_v13, %v3847_v21  ;;  %v3898_v2 = vmul.f32 %v10441_v13, %v3861_v10  ;;  %v3821_v54 = vmul.f32 0.2, %v3789_v58 }
 0xd78   :  { %v3886_v11 = vmul.f32 %v10441_v13, %v3849_v7  ;;  %v3900_v0 = vmul.f32 %v10441_v13, %v3863_v25  ;;  %v3902_v38 = vmul.f32 %v10441_v13, %v3865_v51  ;;  %v3867_v44 = vmax.f32 %v3803_v5, %v3835_v23 }
 0xd79   :  { %3946 = vrot.lane.b32.xlu2 %v3882_v35, %s12287_s2  ;;  %3950 = vrot.lane.b32.xlu0 %v3884_v53, %s12287_s2  ;;  %v3851_v12 = vmax.f32 %v3787_v47, %v3819_v49  ;;  %v3805_v14 = vadd.f32 %v10421_v40, %v10476_v62  ;;  %v3853_v46 = vmax.f32 %v3789_v58, %v3821_v54  ;;  %v3823_v34 = vmul.f32 0.2, %v3791_v56 }
 0xd7a   :  { %3978 = vrot.lane.b32.xlu1 %v3898_v2, %s12287_s2  ;;  %v3807_v42 = vadd.f32 %v10421_v40, %v10479_v28  ;;  %v3904_v19 = vmul.f32 %v10441_v13, %v3867_v44  ;;  %v10495_v27 = vperm.slane %v3741_v32, 0  ;;  %v10497_v29 = vperm.slane %v3734_v1, 0 }
 0xd7b   :  { %v3888_v60 = vmul.f32 %v10441_v13, %v3851_v12  ;;  %v3837_v63 = vmul.f32 0.2, %v3805_v14  ;;  %v3890_v30 = vmul.f32 %v10441_v13, %v3853_v46  ;;  %v10500_v20 = vperm.slane %v3735_v6, 0 }
 0xd7c   :  { %v3839_v37 = vmul.f32 0.2, %v3807_v42  ;;  %v3855_v59 = vmax.f32 %v3791_v56, %v3823_v34  ;;  %v3809_v21 = vadd.f32 %v10421_v40, %v10495_v27  ;;  %v3793_v10 = vadd.f32 %v10421_v40, %v10497_v29 }
 0xd7d   :  { %v3869_v50 = vmax.f32 %v3805_v14, %v3837_v63  ;;  %v3795_v52 = vadd.f32 %v10421_v40, %v10500_v20  ;;  %v10516_v5 = vperm.slane %v3742_v31, 0 }
 0xd7e   :  { %v3871_v48 = vmax.f32 %v3807_v42, %v3839_v37  ;;  %v3892_v35 = vmul.f32 %v10441_v13, %v3855_v59  ;;  %v3841_v2 = vmul.f32 0.2, %v3809_v21  ;;  %v3825_v39 = vmul.f32 0.2, %v3793_v10 }
 0xd7f   :  { %v3906_v53 = vmul.f32 %v10441_v13, %v3869_v50  ;;  %v3827_v25 = vmul.f32 0.2, %v3795_v52  ;;  %v3811_v41 = vadd.f32 %v10421_v40, %v10516_v5 }
 0xd80   :  { %v3908_v7 = vmul.f32 %v10441_v13, %v3871_v48  ;;  %v3873_v47 = vmax.f32 %v3809_v21, %v3841_v2  ;;  %v3857_v51 = vmax.f32 %v3793_v10, %v3825_v39 }
 0xd81   :  { %3954 = vrot.lane.b32.xlu0 %v3886_v11, %s12287_s2  ;;  %3982 = vrot.lane.b32.xlu2 %v3900_v0, %s12287_s2  ;;  %v3859_v8 = vmax.f32 %v3795_v52, %v3827_v25  ;;  %v3843_v49 = vmul.f32 0.2, %v3811_v41 }
 0xd82   :  { %3986 = vrot.lane.b32.xlu1 %v3902_v38, %s12287_s2  ;;  %v3910_v11 = vmul.f32 %v10441_v13, %v3873_v47  ;;  %v3894_v0 = vmul.f32 %v10441_v13, %v3857_v51 }
 0xd83   :  { %v3896_v38 = vmul.f32 %v10441_v13, %v3859_v8 }
 0xd89   :  { %3990 = vrot.lane.b32.xlu0 %v3904_v19, %s12287_s2  ;;  %3958 = vrot.lane.b32.xlu2 %v3888_v60, %s12287_s2 }
 0xd8a   :  { %3962 = vrot.lane.b32.xlu1 %v3890_v30, %s12287_s2 }
 0xd90   :  { %v10511_v16 = vpop.permute.xlu1 %3777 }
 0xd91   :  { %3966 = vrot.lane.b32.xlu0 %v3892_v35, %s12287_s2  ;;  %3994 = vrot.lane.b32.xlu2 %v3906_v53, %s12287_s2  ;;  %v3798_v58 = vadd.f32 %v10511_v16, %v3751_v22  ;;  %v3782_v3 = vadd.f32 %v10511_v16, %v3743_v55  ;;  %v3875_v22 = vmax.f32 %v3811_v41, %v3843_v49 }
 0xd92   :  { %3998 = vrot.lane.b32.xlu1 %v3908_v7, %s12287_s2  ;;  %v3802_v15 = vadd.f32 %v10511_v16, %v10437_v18  ;;  %v3784_v55 = vadd.f32 %v10511_v16, %v10418_v36  ;;  %v3800_v44 = vadd.f32 %v10511_v16, %v10433_v24  ;;  %v3790_v24 = vadd.f32 %v10511_v16, %v10458_v43 }
 0xd93   :  { %v3830_v23 = vmul.f32 0.2, %v3798_v58  ;;  %v3814_v54 = vmul.f32 0.2, %v3782_v3  ;;  %v3912_v56 = vmul.f32 %v10441_v13, %v3875_v22  ;;  %v3786_v1 = vadd.f32 %v10511_v16, %v10423_v4 }
 0xd94   :  { %v3834_v14 = vmul.f32 0.2, %v3802_v15  ;;  %v3816_v46 = vmul.f32 0.2, %v3784_v55  ;;  %v3832_v32 = vmul.f32 0.2, %v3800_v44  ;;  %v3788_v19 = vadd.f32 %v10511_v16, %v10455_v26 }
 0xd95   :  { %v3862_v45 = vmax.f32 %v3798_v58, %v3830_v23  ;;  %v3846_v40 = vmax.f32 %v3782_v3, %v3814_v54  ;;  %v3822_v63 = vmul.f32 0.2, %v3790_v24  ;;  %v3818_v30 = vmul.f32 0.2, %v3786_v1 }
 0xd96   :  { %v3866_v36 = vmax.f32 %v3802_v15, %v3834_v14  ;;  %v3848_v18 = vmax.f32 %v3784_v55, %v3816_v46  ;;  %v3864_v6 = vmax.f32 %v3800_v44, %v3832_v32  ;;  %v3820_v59 = vmul.f32 0.2, %v3788_v19 }
 0xd97   :  { %v3899_v12 = vmul.f32 %v10441_v13, %v3862_v45  ;;  %v3883_v42 = vmul.f32 %v10441_v13, %v3846_v40  ;;  %v3854_v4 = vmax.f32 %v3790_v24, %v3822_v63  ;;  %v3850_v43 = vmax.f32 %v3786_v1, %v3818_v30 }
 0xd98   :  { %v3903_v60 = vmul.f32 %v10441_v13, %v3866_v36  ;;  %v3885_v34 = vmul.f32 %v10441_v13, %v3848_v18  ;;  %v3901_v37 = vmul.f32 %v10441_v13, %v3864_v6  ;;  %v3808_v26 = vadd.f32 %v10511_v16, %v10479_v28 }
 0xd99   :  { %4002 = vrot.lane.b32.xlu0 %v3910_v11, %s12287_s2  ;;  %3970 = vrot.lane.b32.xlu2 %v3894_v0, %s12287_s2  ;;  %v3804_v50 = vadd.f32 %v10511_v16, %v10453_v17  ;;  %v3852_v21 = vmax.f32 %v3788_v19, %v3820_v59  ;;  %v3806_v10 = vadd.f32 %v10511_v16, %v10476_v62 }
 0xd9a   :  { %3974 = vrot.lane.b32.xlu1 %v3896_v38, %s12287_s2  ;;  %v3891_v48 = vmul.f32 %v10441_v13, %v3854_v4  ;;  %v3887_v52 = vmul.f32 %v10441_v13, %v3850_v43  ;;  %v3840_v31 = vmul.f32 0.2, %v3808_v26  ;;  %v3796_v62 = vadd.f32 %v10511_v16, %v10500_v20 }
 0xd9b   :  { %v3836_v35 = vmul.f32 0.2, %v3804_v50  ;;  %v3889_v53 = vmul.f32 %v10441_v13, %v3852_v21  ;;  %v3838_v2 = vmul.f32 0.2, %v3806_v10  ;;  %v3792_v39 = vadd.f32 %v10511_v16, %v10474_v9 }
 0xd9c   :  { %v3872_v17 = vmax.f32 %v3808_v26, %v3840_v31  ;;  %v3794_v25 = vadd.f32 %v10511_v16, %v10497_v29  ;;  %v3828_v58 = vmul.f32 0.2, %v3796_v62  ;;  %v3810_v29 = vadd.f32 %v10511_v16, %v10495_v27 }
 0xd9d   :  { %v3868_v28 = vmax.f32 %v3804_v50, %v3836_v35  ;;  %v3870_v7 = vmax.f32 %v3806_v10, %v3838_v2  ;;  %v3824_v41 = vmul.f32 0.2, %v3792_v39  ;;  %v3812_v0 = vadd.f32 %v10511_v16, %v10516_v5 }
 0xd9e   :  { %v3909_v47 = vmul.f32 %v10441_v13, %v3872_v17  ;;  %v3826_v3 = vmul.f32 0.2, %v3794_v25  ;;  %v3860_v9 = vmax.f32 %v3796_v62, %v3828_v58  ;;  %v3842_v38 = vmul.f32 0.2, %v3810_v29 }
 0xd9f   :  { %v3905_v51 = vmul.f32 %v10441_v13, %v3868_v28  ;;  %v3907_v8 = vmul.f32 %v10441_v13, %v3870_v7  ;;  %v3856_v20 = vmax.f32 %v3792_v39, %v3824_v41  ;;  %v3844_v45 = vmul.f32 0.2, %v3812_v0 }
 0xda0   :  { %v3858_v11 = vmax.f32 %v3794_v25, %v3826_v3  ;;  %v3897_v23 = vmul.f32 %v10441_v13, %v3860_v9  ;;  %v3874_v22 = vmax.f32 %v3810_v29, %v3842_v38 }
 0xda1   :  { %3980 = vrot.lane.b32.xlu0 %v3899_v12, %s12287_s2  ;;  %4006 = vrot.lane.b32.xlu2 %v3912_v56, %s12287_s2  ;;  %v3893_v49 = vmul.f32 %v10441_v13, %v3856_v20  ;;  %v3876_v27 = vmax.f32 %v3812_v0, %v3844_v45 }
 0xda2   :  { %3948 = vrot.lane.b32.xlu1 %v3883_v42, %s12287_s2  ;;  %v3895_v54 = vmul.f32 %v10441_v13, %v3858_v11  ;;  %v3911_v15 = vmul.f32 %v10441_v13, %v3874_v22 }
 0xda3   :  { %v3913_v16 = vmul.f32 %v10441_v13, %v3876_v27 }
 0xda9   :  { %3988 = vrot.lane.b32.xlu0 %v3903_v60, %s12287_s2  ;;  %3952 = vrot.lane.b32.xlu2 %v3885_v34, %s12287_s2 }
 0xdaa   :  { %3984 = vrot.lane.b32.xlu1 %v3901_v37, %s12287_s2 }
 0xdb1   :  { %3964 = vrot.lane.b32.xlu0 %v3891_v48, %s12287_s2  ;;  %3956 = vrot.lane.b32.xlu2 %v3887_v52, %s12287_s2 }
 0xdb2   :  { %3960 = vrot.lane.b32.xlu1 %v3889_v53, %s12287_s2 }
 0xdb9   :  { %4000 = vrot.lane.b32.xlu0 %v3909_v47, %s12287_s2  ;;  %3992 = vrot.lane.b32.xlu2 %v3905_v51, %s12287_s2 }
 0xdba   :  { %3996 = vrot.lane.b32.xlu1 %v3907_v8, %s12287_s2 }
 0xdc1   :  { %3976 = vrot.lane.b32.xlu0 %v3897_v23, %s12287_s2  ;;  %3968 = vrot.lane.b32.xlu2 %v3893_v49, %s12287_s2 }
 0xdc2   :  { %3972 = vrot.lane.b32.xlu1 %v3895_v54, %s12287_s2 }
 0xdc9   :  { %4004 = vrot.lane.b32.xlu2 %v3911_v15, %s12287_s2 }
 0xdca   :  { %4008 = vrot.lane.b32.xlu1 %v3913_v16, %s12287_s2 }
 0xdd3   :  { %v3947_v5 = vpop.permute.xlu2 %3946 }
 0xdd4   :  { %v4042_v44 = vsel %vm297_vm1, %v3947_v5, 0.0 }
 0xddb   :  { %v3983_v55 = vpop.permute.xlu2 %3982 }
 0xddc   :  { %v4096_v42 = vsel %vm297_vm1, %v3983_v55, 0.0 }
 0xde3   :  { %v3959_v40 = vpop.permute.xlu2 %3958 }
 0xde4   :  { %v4060_v24 = vsel %vm297_vm1, %v3959_v40, 0.0 }
 0xdeb   :  { %v3951_v12 = vpop.permute.xlu0 %3950  ;;  %4043 = vadd.xlane.f32.xlu0 %v4042_v44  ;;  %v3995_v14 = vpop.permute.xlu2 %3994 }
 0xdec   :  { %v3979_v56 = vpop.permute.xlu1 %3978  ;;  %v4048_v13 = vsel %vm297_vm1, %v3951_v12, 0.0  ;;  %v4114_v63 = vsel %vm297_vm1, %v3995_v14, 0.0 }
 0xded   :  { %v4090_v46 = vsel %vm297_vm1, %v3979_v56, 0.0 }
 0xdf2   :  { %4091 = vadd.xlane.f32.xlu2 %v4090_v46 }
 0xdf3   :  { %v3955_v32 = vpop.permute.xlu0 %3954  ;;  %4097 = vadd.xlane.f32.xlu0 %v4096_v42  ;;  %v3971_v1 = vpop.permute.xlu2 %3970 }
 0xdf4   :  { %v3987_v36 = vpop.permute.xlu1 %3986  ;;  %4049 = vadd.xlane.f32.xlu1 %v4048_v13  ;;  %v4054_v19 = vsel %vm297_vm1, %v3955_v32, 0.0  ;;  %v4078_v26 = vsel %vm297_vm1, %v3971_v1, 0.0 }
 0xdf5   :  { %v4102_v18 = vsel %vm297_vm1, %v3987_v36, 0.0 }
 0xdfa   :  { %4103 = vadd.xlane.f32.xlu2 %v4102_v18 }
 0xdfb   :  { %v3991_v6 = vpop.permute.xlu0 %3990  ;;  %4061 = vadd.xlane.f32.xlu0 %v4060_v24  ;;  %v4007_v4 = vpop.permute.xlu2 %4006 }
 0xdfc   :  { %v3963_v60 = vpop.permute.xlu1 %3962  ;;  %4055 = vadd.xlane.f32.xlu1 %v4054_v19  ;;  %v4108_v37 = vsel %vm297_vm1, %v3991_v6, 0.0  ;;  %v4132_v31 = vsel %vm297_vm1, %v4007_v4, 0.0 }
 0xdfd   :  { %v4066_v34 = vsel %vm297_vm1, %v3963_v60, 0.0 }
 0xe02   :  { %4067 = vadd.xlane.f32.xlu2 %v4066_v34 }
 0xe03   :  { %v3967_v30 = vpop.permute.xlu0 %3966  ;;  %4115 = vadd.xlane.f32.xlu0 %v4114_v63  ;;  %v3953_v48 = vpop.permute.xlu2 %3952 }
 0xe04   :  { %v3999_v59 = vpop.permute.xlu1 %3998  ;;  %4109 = vadd.xlane.f32.xlu1 %v4108_v37  ;;  %v4072_v21 = vsel %vm297_vm1, %v3967_v30, 0.0  ;;  %v4051_v62 = vsel %vm297_vm1, %v3953_v48, 0.0 }
 0xe05   :  { %v4120_v43 = vsel %vm297_vm1, %v3999_v59, 0.0 }
 0xe0a   :  { %4121 = vadd.xlane.f32.xlu2 %v4120_v43 }
 0xe0b   :  { %v4003_v50 = vpop.permute.xlu0 %4002  ;;  %4079 = vadd.xlane.f32.xlu0 %v4078_v26  ;;  %v3957_v17 = vpop.permute.xlu2 %3956 }
 0xe0c   :  { %v3975_v10 = vpop.permute.xlu1 %3974  ;;  %4073 = vadd.xlane.f32.xlu1 %v4072_v21  ;;  %v4126_v53 = vsel %vm297_vm1, %v4003_v50, 0.0  ;;  %v4057_v51 = vsel %vm297_vm1, %v3957_v17, 0.0 }
 0xe0d   :  { %v4084_v52 = vsel %vm297_vm1, %v3975_v10, 0.0 }
 0xe12   :  { %4085 = vadd.xlane.f32.xlu2 %v4084_v52 }
 0xe13   :  { %v3981_v35 = vpop.permute.xlu0 %3980  ;;  %4133 = vadd.xlane.f32.xlu0 %v4132_v31  ;;  %v3993_v58 = vpop.permute.xlu2 %3992 }
 0xe14   :  { %v3949_v2 = vpop.permute.xlu1 %3948  ;;  %4127 = vadd.xlane.f32.xlu1 %v4126_v53  ;;  %v4093_v7 = vsel %vm297_vm1, %v3981_v35, 0.0  ;;  %v4111_v20 = vsel %vm297_vm1, %v3993_v58, 0.0 }
 0xe15   :  { %v4045_v28 = vsel %vm297_vm1, %v3949_v2, 0.0 }
 0xe1a   :  { %4046 = vadd.xlane.f32.xlu2 %v4045_v28 }
 0xe1b   :  { %v3989_v39 = vpop.permute.xlu0 %3988  ;;  %4052 = vadd.xlane.f32.xlu0 %v4051_v62  ;;  %v3969_v0 = vpop.permute.xlu2 %3968 }
 0xe1c   :  { %4094 = vadd.xlane.f32.xlu1 %v4093_v7  ;;  %v3985_v25 = vpop.permute.xlu1 %3984  ;;  %v4105_v41 = vsel %vm297_vm1, %v3989_v39, 0.0  ;;  %v4075_v38 = vsel %vm297_vm1, %v3969_v0, 0.0 }
 0xe1d   :  { %v4099_v47 = vsel %vm297_vm1, %v3985_v25, 0.0 }
 0xe22   :  { %4100 = vadd.xlane.f32.xlu2 %v4099_v47 }
 0xe23   :  { %4058 = vadd.xlane.f32.xlu0 %v4057_v51  ;;  %v3965_v8 = vpop.permute.xlu0 %3964  ;;  %v4005_v22 = vpop.permute.xlu2 %4004 }
 0xe24   :  { %4106 = vadd.xlane.f32.xlu1 %v4105_v41  ;;  %v3961_v3 = vpop.permute.xlu1 %3960  ;;  %v4069_v29 = vsel %vm297_vm1, %v3965_v8, 0.0  ;;  %v4129_v16 = vsel %vm297_vm1, %v4005_v22, 0.0 }
 0xe25   :  { %v4063_v9 = vsel %vm297_vm1, %v3961_v3, 0.0 }
 0xe2a   :  { %4064 = vadd.xlane.f32.xlu2 %v4063_v9 }
 0xe2b   :  { %4112 = vadd.xlane.f32.xlu0 %v4111_v20  ;;  %v4001_v23 = vpop.permute.xlu0 %4000 }
 0xe2c   :  { %4070 = vadd.xlane.f32.xlu1 %v4069_v29  ;;  %v3997_v11 = vpop.permute.xlu1 %3996  ;;  %v4123_v54 = vsel %vm297_vm1, %v4001_v23, 0.0 }
 0xe2d   :  { %v4117_v49 = vsel %vm297_vm1, %v3997_v11, 0.0 }
 0xe32   :  { %4118 = vadd.xlane.f32.xlu2 %v4117_v49 }
 0xe33   :  { %4076 = vadd.xlane.f32.xlu0 %v4075_v38  ;;  %v3977_v27 = vpop.permute.xlu0 %3976 }
 0xe34   :  { %4124 = vadd.xlane.f32.xlu1 %v4123_v54  ;;  %v3973_v45 = vpop.permute.xlu1 %3972  ;;  %v4087_v5 = vsel %vm297_vm1, %v3977_v27, 0.0 }
 0xe35   :  { %v4081_v15 = vsel %vm297_vm1, %v3973_v45, 0.0 }
 0xe3a   :  { %4082 = vadd.xlane.f32.xlu2 %v4081_v15 }
 0xe3b   :  { %4130 = vadd.xlane.f32.xlu0 %v4129_v16 }
 0xe3c   :  { %4088 = vadd.xlane.f32.xlu1 %v4087_v5  ;;  %v4009_v55 = vpop.permute.xlu1 %4008 }
 0xe3d   :  { %v4135_v40 = vsel %vm297_vm1, %v4009_v55, 0.0 }
 0xe42   :  { %4136 = vadd.xlane.f32.xlu2 %v4135_v40 }
 0xe5e   :  { %v10627_v44 = vpop.xlane.xlu0 %4043 }
 0xe5f   :  { %v4170_v31 = vperm.slane %v10627_v44, %v8417_v33 }
 0xe65   :  { %v10629_v12 = vpop.xlane.xlu2 %4091 }
 0xe66   :  { %v10631_v56 = vpop.xlane.xlu0 %4097  ;;  %v4194_v41 = vperm.slane %v10629_v12, %v8417_v33 }
 0xe67   :  { %v10633_v14 = vpop.xlane.xlu1 %4049  ;;  %v4197_v9 = vperm.slane %v10631_v56, %v8417_v33 }
 0xe68   :  { %v4173_v35 = vperm.slane %v10633_v14, %v8417_v33 }
 0xe6d   :  { %v10635_v46 = vpop.xlane.xlu2 %4103 }
 0xe6e   :  { %v10637_v42 = vpop.xlane.xlu0 %4061  ;;  %v4200_v54 = vperm.slane %v10635_v46, %v8417_v33 }
 0xe6f   :  { %v10639_v32 = vpop.xlane.xlu1 %4055  ;;  %v4179_v62 = vperm.slane %v10637_v42, %v8417_v33 }
 0xe70   :  { %v4176_v17 = vperm.slane %v10639_v32, %v8417_v33 }
 0xe75   :  { %v10641_v13 = vpop.xlane.xlu2 %4067 }
 0xe76   :  { %v10643_v36 = vpop.xlane.xlu0 %4115  ;;  %v4182_v20 = vperm.slane %v10641_v13, %v8417_v33 }
 0xe77   :  { %v10645_v18 = vpop.xlane.xlu1 %4109  ;;  %v4206_v16 = vperm.slane %v10643_v36, %v8417_v33 }
 0xe78   :  { %v4203_v15 = vperm.slane %v10645_v18, %v8417_v33 }
 0xe7d   :  { %v10647_v24 = vpop.xlane.xlu2 %4121 }
 0xe7e   :  { %v10649_v1 = vpop.xlane.xlu0 %4079 }
 0xe7f   :  { %v10651_v6 = vpop.xlane.xlu1 %4073 }
 0xe80   :  { %v4185_v0 = vperm.slane %v10651_v6, %v8417_v33 }
 0xe85   :  { %v10653_v19 = vpop.xlane.xlu2 %4085 }
 0xe86   :  { %v10655_v60 = vpop.xlane.xlu0 %4133 }
 0xe87   :  { %v10657_v34 = vpop.xlane.xlu1 %4127 }
 0xe8d   :  { %v10659_v63 = vpop.xlane.xlu2 %4046 }
 0xe8e   :  { %v10661_v30 = vpop.xlane.xlu0 %4052  ;;  %v4171_v10 = vperm.slane %v10659_v63, %v8420_v61 }
 0xe8f   :  { %v10663_v37 = vpop.xlane.xlu1 %4094  ;;  %v4174_v48 = vperm.slane %v10661_v30, %v8420_v61 }
 0xe90   :  { %v4172_v39 = vsel %vm765_vm3, %v4171_v10, %v4170_v31  ;;  %v4195_v29 = vperm.slane %v10663_v37, %v8420_v61  ;;  %v4188_v10 = vperm.slane %v10649_v1, %v8417_v33 }
 0xe91   :  { %v4175_v7 = vsel %vm765_vm3, %v4174_v48, %v4173_v35  ;;  %v4191_v48 = vperm.slane %v10653_v19, %v8417_v33 }
 0xe92   :  { %v4218_v11 = vsel %vm812_vm4, %v4175_v7, %v4172_v39 }
 0xe95   :  { %v10665_v59 = vpop.xlane.xlu2 %4100 }
 0xe96   :  { %v10667_v4 = vpop.xlane.xlu0 %4058  ;;  %v4198_v47 = vperm.slane %v10665_v59, %v8420_v61 }
 0xe97   :  { %v10669_v43 = vpop.xlane.xlu1 %4106  ;;  %v4177_v52 = vperm.slane %v10667_v4, %v8420_v61 }
 0xe98   :  { %v4201_v23 = vperm.slane %v10669_v43, %v8420_v61  ;;  %v4199_v45 = vsel %vm765_vm3, %v4198_v47, %v4197_v9 }
 0xe99   :  { %v4178_v51 = vsel %vm765_vm3, %v4177_v52, %v4176_v17  ;;  %v4196_v52 = vsel %vm765_vm3, %v4195_v29, %v4194_v41 }
 0xe9a   :  { %v4219_v49 = vsel %vm814_vm5, %v4178_v51, %v4218_v11  ;;  %v4202_v17 = vsel %vm765_vm3, %v4201_v23, %v4200_v54 }
 0xe9d   :  { %v10671_v26 = vpop.xlane.xlu2 %4064 }
 0xe9e   :  { %v10673_v50 = vpop.xlane.xlu0 %4112  ;;  %v4180_v53 = vperm.slane %v10671_v26, %v8420_v61 }
 0xe9f   :  { %v10675_v21 = vpop.xlane.xlu1 %4070  ;;  %v4204_v38 = vperm.slane %v10673_v50, %v8420_v61 }
 0xea0   :  { %v4183_v58 = vperm.slane %v10675_v21, %v8420_v61  ;;  %v4181_v8 = vsel %vm765_vm3, %v4180_v53, %v4179_v62  ;;  %v4225_v53 = vsel %vm812_vm4, %v4199_v45, %v4196_v52 }
 0xea1   :  { %v4220_v22 = vsel %vm816_vm6, %v4181_v8, %v4219_v49  ;;  %v4205_v62 = vsel %vm765_vm3, %v4204_v38, %v4203_v15  ;;  %v4226_v29 = vsel %vm814_vm5, %v4202_v17, %v4225_v53  ;;  %v4215_v15 = vperm.slane %v10655_v60, %v8417_v33 }
 0xea2   :  { %v4184_v27 = vsel %vm765_vm3, %v4183_v58, %v4182_v20  ;;  %v4209_v20 = vperm.slane %v10647_v24, %v8417_v33  ;;  %v4227_v23 = vsel %vm816_vm6, %v4205_v62, %v4226_v29 }
 0xea3   :  { %v4221_v7 = vsel %vm818_vm7, %v4184_v27, %v4220_v22 }
 0xea5   :  { %v10689_v2 = vpop.xlane.xlu2 %4118 }
 0xea6   :  { %v10693_v28 = vpop.xlane.xlu0 %4076  ;;  %v4207_v5 = vperm.slane %v10689_v2, %v8420_v61 }
 0xea7   :  { %v10699_v25 = vpop.xlane.xlu1 %4124  ;;  %v4186_v3 = vperm.slane %v10693_v28, %v8420_v61 }
 0xea8   :  { %v4210_v47 = vperm.slane %v10699_v25, %v8420_v61  ;;  %v4208_v8 = vsel %vm765_vm3, %v4207_v5, %v4206_v16 }
 0xea9   :  { %v4187_v55 = vsel %vm765_vm3, %v4186_v3, %v4185_v0  ;;  %v4212_v0 = vperm.slane %v10657_v34, %v8417_v33  ;;  %v4228_v45 = vsel %vm818_vm7, %v4208_v8, %v4227_v23 }
 0xeaa   :  { %v4222_v41 = vsel %vm820_vm8, %v4187_v55, %v4221_v7  ;;  %v4211_v38 = vsel %vm765_vm3, %v4210_v47, %v4209_v20 }
 0xeab   :  { %v4229_v5 = vsel %vm820_vm8, %v4211_v38, %v4228_v45 }
 0xead   :  { %v10737_v40 = vpop.xlane.xlu2 %4082 }
 0xeae   :  { %v4189_v31 = vperm.slane %v10737_v40, %v8420_v61  ;;  %v10746_v35 = vpop.xlane.xlu0 %4130 }
 0xeaf   :  { %v10751_v39 = vpop.xlane.xlu1 %4088  ;;  %v4213_v3 = vperm.slane %v10746_v35, %v8420_v61 }
 0xeb0   :  { %v4192_v51 = vperm.slane %v10751_v39, %v8420_v61  ;;  %v4190_v58 = vsel %vm765_vm3, %v4189_v31, %v4188_v10 }
 0xeb1   :  { %v4223_v9 = vsel %vm822_vm9, %v4190_v58, %v4222_v41  ;;  %v4214_v27 = vsel %vm765_vm3, %v4213_v3, %v4212_v0 }
 0xeb2   :  { %v4193_v11 = vsel %vm765_vm3, %v4192_v51, %v4191_v48  ;;  %v4230_v10 = vsel %vm822_vm9, %v4214_v27, %v4229_v5 }
 0xeb3   :  { %v4224_v49 = vsel %vm824_vm10, %v4193_v11, %v4223_v9 }
 0xeb4   :  { %v4234_v54 = vsel %vm246_vm0, %v4224_v49, -inf }
 0xeb5   :  { %4235 = vmax.xlane.f32.xlu1 %v4234_v54  ;;  %v10775_v22 = vpop.xlane.xlu2 %4136 }
 0xeb6   :  { %v4216_v16 = vperm.slane %v10775_v22, %v8420_v61 }
 0xeb8   :  { %v4217_v55 = vsel %vm765_vm3, %v4216_v16, %v4215_v15 }
 0xeb9   :  { %v4231_v48 = vsel %vm824_vm10, %v4217_v55, %v4230_v10 }
 0xeba   :  { %v4237_v52 = vsel %vm246_vm0, %v4231_v48, -inf }
 0xebb   :  { %4238 = vmax.xlane.f32.xlu0 %v4237_v52 }
 0xf28   :  { %v10787_v31 = vpop.xlane.xlu1 %4235 }
 0xf29   :  { %v4242_v53 = vperm.slane %v10787_v31, 0  ;;  %v4243_v17 = vperm.slane %v10787_v31, 1  ;;  %v4244_v0 = vperm.slane %v10787_v31, 2  ;;  %v4245_v10 = vperm.slane %v10787_v31, 3 }
 0xf2b   :  { %v4274_v62 = vsub.f32 %v10627_v44, %v4242_v53  ;;  %v4275_v7 = vsub.f32 %v10659_v63, %v4242_v53  ;;  %v4276_v47 = vsub.f32 %v10633_v14, %v4243_v17  ;;  %v4277_v3 = vsub.f32 %v10661_v30, %v4243_v17 }
 0xf2d   :  { %v4306_v51 = vmul.f32 1.442695, %v4274_v62  ;;  %v4308_v58 = vmul.f32 1.442695, %v4275_v7  ;;  %v4310_v41 = vmul.f32 1.442695, %v4276_v47  ;;  %v4280_v7 = vsub.f32 %v10637_v42, %v4245_v10 }
 0xf2e   :  { %v10794_v8 = vpop.xlane.xlu0 %4238  ;;  %v4312_v63 = vmul.f32 1.442695, %v4277_v3  ;;  %v4281_v47 = vsub.f32 %v10671_v26, %v4245_v10  ;;  %v4248_v10 = vperm.slane %v10787_v31, 6 }
 0xf2f   :  { %7211 = vpow2.f32 %v4308_v58  ;;  %v4250_v9 = vperm.slane %v10794_v8, 0  ;;  %v4251_v14 = vperm.slane %v10794_v8, 1  ;;  %v4252_v27 = vperm.slane %v10794_v8, 2 }
 0xf30   :  { %7213 = vpow2.f32 %v4306_v51  ;;  %v4253_v52 = vperm.slane %v10794_v8, 3  ;;  %v4318_v51 = vmul.f32 1.442695, %v4280_v7  ;;  %v4246_v58 = vperm.slane %v10787_v31, 4 }
 0xf31   :  { %7215 = vpow2.f32 %v4310_v41  ;;  %v4290_v20 = vsub.f32 %v10629_v12, %v4250_v9  ;;  %v4291_v44 = vsub.f32 %v10663_v37, %v4250_v9  ;;  %v4292_v12 = vsub.f32 %v10631_v56, %v4251_v14 }
 0xf32   :  { %7217 = vpow2.f32 %v4312_v63  ;;  %v4278_v37 = vsub.f32 %v10639_v32, %v4244_v0  ;;  %v4293_v38 = vsub.f32 %v10665_v59, %v4251_v14  ;;  %v4279_v56 = vsub.f32 %v10667_v4, %v4244_v0 }
 0xf33   :  { %v4338_v30 = vmul.f32 1.442695, %v4290_v20  ;;  %v4340_v49 = vmul.f32 1.442695, %v4291_v44  ;;  %v4342_v54 = vmul.f32 1.442695, %v4292_v12  ;;  %v4295_v32 = vsub.f32 %v10669_v43, %v4252_v27 }
 0xf34   :  { %v4314_v45 = vmul.f32 1.442695, %v4278_v37  ;;  %v4344_v16 = vmul.f32 1.442695, %v4293_v38  ;;  %v4294_v59 = vsub.f32 %v10635_v46, %v4252_v27  ;;  %v4316_v48 = vmul.f32 1.442695, %v4279_v56 }
 0xf35   :  { %v10800_v29 = vpop.eup %7211  ;;  %7219 = vpow2.f32 %v4340_v49  ;;  %v4348_v53 = vmul.f32 1.442695, %v4295_v32  ;;  %v4296_v46 = vsub.f32 %v10645_v18, %v4253_v52  ;;  %v4320_v9 = vmul.f32 1.442695, %v4281_v47 }
 0xf36   :  { %v10803_v11 = vpop.eup %7213  ;;  %4406 = vperm.xlu1 %6995, %v10800_v29   ;;  %7221 = vpow2.f32 %v4338_v30  ;;  %v4346_v4 = vmul.f32 1.442695, %v4294_v59  ;;  %v4297_v18 = vsub.f32 %v10673_v50, %v4253_v52  ;;  %v4283_v26 = vsub.f32 %v10675_v21, %v4246_v58 }
 0xf37   :  { %v10807_v23 = vpop.eup %7215  ;;  %4403 = vperm.xlu2 %6993, %v10803_v11   ;;  %7223 = vpow2.f32 %v4342_v54  ;;  %v4350_v41 = vmul.f32 1.442695, %v4296_v46  ;;  %v4282_v44 = vsub.f32 %v10641_v13, %v4246_v58  ;;  %v4254_v63 = vperm.slane %v10794_v8, 4 }
 0xf38   :  { %4409 = vperm.xlu0 %6994, %v10807_v23   ;;  %v10815_v15 = vpop.eup %7217  ;;  %7225 = vpow2.f32 %v4314_v45  ;;  %v4352_v14 = vmul.f32 1.442695, %v4297_v18  ;;  %v4247_v0 = vperm.slane %v10787_v31, 5  ;;  %v4324_v30 = vmul.f32 1.442695, %v4283_v26 }
 0xf39   :  { %7227 = vpow2.f32 %v4344_v16  ;;  %v4322_v50 = vmul.f32 1.442695, %v4282_v44  ;;  %v4298_v37 = vsub.f32 %v10643_v36, %v4254_v63  ;;  %v4299_v38 = vsub.f32 %v10689_v2, %v4254_v63 }
 0xf3a   :  { %7229 = vpow2.f32 %v4316_v48  ;;  %v4284_v13 = vsub.f32 %v10651_v6, %v4247_v0  ;;  %v4255_v27 = vperm.slane %v10794_v8, 5  ;;  %v4285_v6 = vsub.f32 %v10693_v28, %v4247_v0 }
 0xf3b   :  { %v10817_v5 = vpop.eup %7219  ;;  %7231 = vpow2.f32 %v4348_v53  ;;  %v4354_v54 = vmul.f32 1.442695, %v4298_v37  ;;  %v4356_v56 = vmul.f32 1.442695, %v4299_v38  ;;  %v4256_v52 = vperm.slane %v10794_v8, 6 }
 0xf3c   :  { %v10820_v55 = vpop.eup %7221  ;;  %7233 = vpow2.f32 %v4346_v4  ;;  %v4326_v45 = vmul.f32 1.442695, %v4284_v13  ;;  %v4301_v2 = vsub.f32 %v10699_v25, %v4255_v27  ;;  %v4300_v59 = vsub.f32 %v10647_v24, %v4255_v27 }
 0xf3d   :  { %v10829_v17 = vpop.eup %7223  ;;  %7235 = vpow2.f32 %v4318_v51  ;;  %v4328_v48 = vmul.f32 1.442695, %v4285_v6  ;;  %v4286_v46 = vsub.f32 %v10649_v1, %v4248_v10  ;;  %v4302_v24 = vsub.f32 %v10657_v34, %v4256_v52 }
 0xf3e   :  { %4454 = vperm.xlu1 %6995, %v10817_v5   ;;  %v10831_v62 = vpop.eup %7225  ;;  %7237 = vpow2.f32 %v4350_v41  ;;  %v4360_v53 = vmul.f32 1.442695, %v4301_v2  ;;  %v4358_v28 = vmul.f32 1.442695, %v4300_v59  ;;  %v4287_v47 = vsub.f32 %v10737_v40, %v4248_v10 }
 0xf3f   :  { %4412 = vperm.xlu2 %6993, %v10815_v15   ;;  %v10834_v43 = vpop.eup %7227  ;;  %7239 = vpow2.f32 %v4320_v9  ;;  %v4330_v51 = vmul.f32 1.442695, %v4286_v46  ;;  %v4249_v58 = vperm.slane %v10787_v31, 7  ;;  %v4362_v41 = vmul.f32 1.442695, %v4302_v24 }
 0xf40   :  { %4451 = vperm.xlu0 %6994, %v10820_v55   ;;  %v10842_v3 = vpop.eup %7229  ;;  %7241 = vpow2.f32 %v4352_v14  ;;  %v4332_v18 = vmul.f32 1.442695, %v4287_v47  ;;  %v4303_v34 = vsub.f32 %v10746_v35, %v4256_v52  ;;  %v4257_v44 = vperm.slane %v10794_v8, 7 }
 0xf41   :  { %v10844_v20 = vpop.eup %7231  ;;  %7243 = vpow2.f32 %v4324_v30  ;;  %v4289_v40 = vsub.f32 %v10751_v39, %v4249_v58  ;;  %v4288_v31 = vsub.f32 %v10653_v19, %v4249_v58 }
 0xf42   :  { %v10847_v42 = vpop.eup %7233  ;;  %7245 = vpow2.f32 %v4322_v50  ;;  %v4364_v63 = vmul.f32 1.442695, %v4303_v34  ;;  %v4304_v39 = vsub.f32 %v10655_v60, %v4257_v44  ;;  %v4305_v19 = vsub.f32 %v10775_v22, %v4257_v44 }
 0xf43   :  { %v10856_v49 = vpop.eup %7235  ;;  %7247 = vpow2.f32 %v4354_v54  ;;  %v4336_v14 = vmul.f32 1.442695, %v4289_v40  ;;  %v4334_v30 = vmul.f32 1.442695, %v4288_v31 }
 0xf44   :  { %v10858_v12 = vpop.eup %7237  ;;  %7249 = vpow2.f32 %v4326_v45  ;;  %v4366_v8 = vmul.f32 1.442695, %v4304_v39  ;;  %v4368_v13 = vmul.f32 1.442695, %v4305_v19 }
 0xf45   :  { %v10861_v21 = vpop.eup %7239  ;;  %7251 = vpow2.f32 %v4356_v56 }
 0xf46   :  { %4415 = vperm.xlu1 %6995, %v10831_v62   ;;  %v10869_v16 = vpop.eup %7241  ;;  %7253 = vpow2.f32 %v4328_v48 }
 0xf47   :  { %4457 = vperm.xlu2 %6993, %v10829_v17   ;;  %v10871_v32 = vpop.eup %7243  ;;  %7255 = vpow2.f32 %v4360_v53 }
 0xf48   :  { %4460 = vperm.xlu0 %6994, %v10834_v43   ;;  %v10874_v36 = vpop.eup %7245  ;;  %7257 = vpow2.f32 %v4358_v28 }
 0xf49   :  { %v10883_v4 = vpop.eup %7247  ;;  %7259 = vpow2.f32 %v4330_v51 }
 0xf4a   :  { %v10885_v7 = vpop.eup %7249  ;;  %7261 = vpow2.f32 %v4362_v41 }
 0xf4b   :  { %v10888_v25 = vpop.eup %7251  ;;  %7263 = vpow2.f32 %v4332_v18 }
 0xf4c   :  { %v10896_v9 = vpop.eup %7253  ;;  %7265 = vpow2.f32 %v4364_v63 }
 0xf4d   :  { %v10898_v26 = vpop.eup %7255  ;;  %7267 = vpow2.f32 %v4336_v14 }
 0xf4e   :  { %4466 = vperm.xlu1 %6995, %v10844_v20   ;;  %v10901_v1 = vpop.eup %7257  ;;  %7269 = vpow2.f32 %v4334_v30 }
 0xf4f   :  { %4418 = vperm.xlu2 %6993, %v10842_v3   ;;  %v10909_v0 = vpop.eup %7259  ;;  %7271 = vpow2.f32 %v4366_v8 }
 0xf50   :  { %4463 = vperm.xlu0 %6994, %v10847_v42   ;;  %12454 = vst [vmem:[#allocation60_spill] sm:$0xff] %v10909_v0  ;;  %v10911_v50 = vpop.eup %7261  ;;  %7273 = vpow2.f32 %v4368_v13 }
 0xf51   :  { %12455 = vst [vmem:[#allocation37_spill] sm:$0xff] %v10911_v50  ;;  %v10914_v35 = vpop.eup %7263 }
 0xf52   :  { %12456 = vst [vmem:[#allocation44_spill] sm:$0xff] %v10914_v35  ;;  %v10920_v37 = vpop.eup %7265 }
 0xf53   :  { %12457 = vst [vmem:[#allocation28_spill] sm:$0xff] %v10920_v37  ;;  %v10922_v38 = vpop.eup %7267 }
 0xf54   :  { %12458 = vst [vmem:[#allocation39_spill] sm:$0xff] %v10922_v38  ;;  %v10925_v54 = vpop.eup %7269 }
 0xf55   :  { %12459 = vst [vmem:[#allocation48_spill] sm:$0xff] %v10925_v54  ;;  %v10929_v60 = vpop.eup %7271 }
 0xf56   :  { %4469 = vperm.xlu1 %6995, %v10858_v12   ;;  %12460 = vst [vmem:[#allocation52_spill] sm:$0xff] %v10929_v60  ;;  %v10932_v22 = vpop.eup %7273 }
 0xf57   :  { %4421 = vperm.xlu2 %6993, %v10856_v49   ;;  %12461 = vst [vmem:[#allocation25_spill] sm:$0xff] %v10932_v22 }
 0xf58   :  { %4424 = vperm.xlu0 %6994, %v10861_v21  }
 0xf5e   :  { %4430 = vperm.xlu1 %6995, %v10871_v32  }
 0xf5f   :  { %4472 = vperm.xlu2 %6993, %v10869_v16  }
 0xf60   :  { %4427 = vperm.xlu0 %6994, %v10874_v36  }
 0xf66   :  { %4433 = vperm.xlu1 %6995, %v10885_v7  }
 0xf67   :  { %4475 = vperm.xlu2 %6993, %v10883_v4  }
 0xf68   :  { %4478 = vperm.xlu0 %6994, %v10888_v25  }
 0xf6e   :  { %4484 = vperm.xlu1 %6995, %v10898_v26  }
 0xf6f   :  { %4436 = vperm.xlu2 %6993, %v10896_v9  }
 0xf70   :  { %4481 = vperm.xlu0 %6994, %v10901_v1  }
 0xf76   :  { %4487 = vperm.xlu1 %6995, %v10911_v50  }
 0xf77   :  { %4439 = vperm.xlu2 %6993, %v10909_v0  }
 0xf78   :  { %4442 = vperm.xlu0 %6994, %v10914_v35  }
 0xf7e   :  { %4448 = vperm.xlu1 %6995, %v10922_v38  }
 0xf7f   :  { %4490 = vperm.xlu2 %6993, %v10920_v37  }
 0xf80   :  { %4445 = vperm.xlu0 %6994, %v10925_v54  }
 0xf87   :  { %4493 = vperm.xlu2 %6993, %v10929_v60  }
 0xf88   :  { %4496 = vperm.xlu0 %6994, %v10932_v22  }
 0xf91   :  { %v4404_v45 = vpop.permute.xlu2 %4403 }
 0xf92   :  { %v4498_v22 = vperm.slane %v4404_v45, %v8417_v33 }
 0xf99   :  { %v4413_v27 = vpop.permute.xlu2 %4412 }
 0xf9a   :  { %v4502_v60 = vperm.slane %v4413_v27, %v8420_v61 }
 0xfa1   :  { %v10935_v6 = vpop.permute.xlu2 %4457 }
 0xfa8   :  { %v4407_v56 = vpop.permute.xlu1 %4406 }
 0xfa9   :  { %v4419_v10 = vpop.permute.xlu2 %4418  ;;  %v4499_v39 = vperm.slane %v4407_v56, %v8420_v61 }
 0xfaa   :  { %v4410_v2 = vpop.permute.xlu0 %4409  ;;  %v4505_v54 = vperm.slane %v4419_v10, %v8420_v61  ;;  %v4525_v10 = vperm.slane %v10935_v6, %v8417_v33 }
 0xfab   :  { %v4501_v19 = vperm.slane %v4410_v2, %v8417_v33  ;;  %v4500_v56 = vsel %vm765_vm3, %v4499_v39, %v4498_v22 }
 0xfad   :  { %v4503_v2 = vsel %vm765_vm3, %v4502_v60, %v4501_v19 }
 0xfae   :  { %v4546_v22 = vsel %vm812_vm4, %v4503_v2, %v4500_v56 }
 0xfb0   :  { %v10937_v59 = vpop.permute.xlu1 %4454 }
 0xfb1   :  { %v4422_v28 = vpop.permute.xlu2 %4421 }
 0xfb2   :  { %v10939_v48 = vpop.permute.xlu0 %4451  ;;  %v4507_v37 = vperm.slane %v4422_v28, %v8417_v33 }
 0xfb8   :  { %v4416_v52 = vpop.permute.xlu1 %4415 }
 0xfb9   :  { %v10943_v47 = vpop.permute.xlu2 %4472  ;;  %v4504_v13 = vperm.slane %v4416_v52, %v8417_v33 }
 0xfba   :  { %v4461_v53 = vpop.permute.xlu0 %4460 }
 0xfbb   :  { %v4506_v45 = vsel %vm765_vm3, %v4505_v54, %v4504_v13  ;;  %v4526_v60 = vperm.slane %v4461_v53, %v8420_v61  ;;  %v4523_v54 = vperm.slane %v10937_v59, %v8420_v61  ;;  %v4522_v59 = vperm.slane %v10939_v48, %v8417_v33 }
 0xfbd   :  { %v4527_v19 = vsel %vm765_vm3, %v4526_v60, %v4525_v10  ;;  %v4524_v10 = vsel %vm765_vm3, %v4523_v54, %v4522_v59 }
 0xfc0   :  { %v10941_v46 = vpop.permute.xlu1 %4466 }
 0xfc1   :  { %v10947_v41 = vpop.permute.xlu2 %4475  ;;  %v4529_v6 = vperm.slane %v10941_v46, %v8420_v61 }
 0xfc2   :  { %v4464_v24 = vpop.permute.xlu0 %4463 }
 0xfc8   :  { %v10945_v51 = vpop.permute.xlu1 %4469 }
 0xfc9   :  { %v4437_v31 = vpop.permute.xlu2 %4436 }
 0xfca   :  { %v4425_v58 = vpop.permute.xlu0 %4424 }
 0xfcb   :  { %v4508_v38 = vperm.slane %v4425_v58, %v8420_v61 }
 0xfcd   :  { %v4509_v58 = vsel %vm765_vm3, %v4508_v38, %v4507_v37 }
 0xfd0   :  { %v4431_v18 = vpop.permute.xlu1 %4430 }
 0xfd1   :  { %v4440_v30 = vpop.permute.xlu2 %4439  ;;  %v4511_v35 = vperm.slane %v4431_v18, %v8420_v61  ;;  %v4514_v18 = vperm.slane %v4437_v31, %v8420_v61 }
 0xfd2   :  { %v4428_v34 = vpop.permute.xlu0 %4427 }
 0xfd3   :  { %v4510_v0 = vperm.slane %v4428_v34, %v8417_v33  ;;  %v4516_v34 = vperm.slane %v4440_v30, %v8417_v33  ;;  %v4531_v30 = vperm.slane %v10945_v51, %v8417_v33 }
 0xfd5   :  { %v4512_v28 = vsel %vm765_vm3, %v4511_v35, %v4510_v0 }
 0xfd8   :  { %v4434_v40 = vpop.permute.xlu1 %4433 }
 0xfd9   :  { %v4513_v52 = vperm.slane %v4434_v40, %v8417_v33  ;;  %v4491_v50 = vpop.permute.xlu2 %4490  ;;  %v4528_v40 = vperm.slane %v4464_v24, %v8417_v33  ;;  %v4532_v24 = vperm.slane %v10943_v47, %v8420_v61 }
 0xfda   :  { %v4479_v44 = vpop.permute.xlu0 %4478 }
 0xfdb   :  { %v4515_v37 = vsel %vm765_vm3, %v4514_v18, %v4513_v52  ;;  %v4535_v13 = vperm.slane %v4479_v44, %v8420_v61 }
 0xfe0   :  { %v10949_v63 = vpop.permute.xlu1 %4484 }
 0xfe1   :  { %v4538_v2 = vperm.slane %v10949_v63, %v8420_v61  ;;  %v4533_v63 = vsel %vm765_vm3, %v4532_v24, %v4531_v30  ;;  %v4494_v60 = vpop.permute.xlu2 %4493 }
 0xfe2   :  { %v10951_v14 = vpop.permute.xlu0 %4481 }
 0xfe3   :  { %v4537_v48 = vperm.slane %v10951_v14, %v8417_v33  ;;  %v4553_v14 = vsel %vm812_vm4, %v4527_v19, %v4524_v10 }
 0xfe8   :  { %v4488_v8 = vpop.permute.xlu1 %4487 }
 0xfe9   :  { %v4540_v47 = vperm.slane %v4488_v8, %v8417_v33  ;;  %v4539_v8 = vsel %vm765_vm3, %v4538_v2, %v4537_v48 }
 0xfea   :  { %v4443_v57 = vpop.permute.xlu0 %4442 }
 0xfeb   :  { %v4517_v27 = vperm.slane %v4443_v57, %v8420_v61  ;;  %v4547_v57 = vsel %vm814_vm5, %v4506_v45, %v4546_v22  ;;  %v4530_v45 = vsel %vm765_vm3, %v4529_v6, %v4528_v40  ;;  %v4541_v22 = vperm.slane %v4491_v50, %v8420_v61 }
 0xfec   :  { %v4548_v31 = vsel %vm816_vm6, %v4509_v58, %v4547_v57  ;;  %v4543_v6 = vperm.slane %v4494_v60, %v8417_v33 }
 0xfed   :  { %v4518_v53 = vsel %vm765_vm3, %v4517_v27, %v4516_v34  ;;  %v4549_v46 = vsel %vm818_vm7, %v4512_v28, %v4548_v31  ;;  %v4534_v27 = vperm.slane %v10947_v41, %v8417_v33  ;;  %v4554_v41 = vsel %vm814_vm5, %v4530_v45, %v4553_v14 }
 0xfee   :  { %v4550_v56 = vsel %vm820_vm8, %v4515_v37, %v4549_v46  ;;  %v4555_v28 = vsel %vm816_vm6, %v4533_v63, %v4554_v41  ;;  %v4542_v34 = vsel %vm765_vm3, %v4541_v22, %v4540_v47 }
 0xfef   :  { %v4551_v52 = vsel %vm822_vm9, %v4518_v53, %v4550_v56  ;;  %v4536_v18 = vsel %vm765_vm3, %v4535_v13, %v4534_v27 }
 0xff0   :  { %v4449_v38 = vpop.permute.xlu1 %4448  ;;  %v4556_v57 = vsel %vm818_vm7, %v4536_v18, %v4555_v28 }
 0xff1   :  { %v4520_v0 = vperm.slane %v4449_v38, %v8420_v61  ;;  %v4557_v38 = vsel %vm820_vm8, %v4539_v8, %v4556_v57 }
 0xff2   :  { %v4446_v35 = vpop.permute.xlu0 %4445  ;;  %v4558_v40 = vsel %vm822_vm9, %v4542_v34, %v4557_v38 }
 0xff3   :  { %v4519_v39 = vperm.slane %v4446_v35, %v8417_v33 }
 0xff5   :  { %v4521_v51 = vsel %vm765_vm3, %v4520_v0, %v4519_v39 }
 0xff6   :  { %v4552_v44 = vsel %vm824_vm10, %v4521_v51, %v4551_v52 }
 0xff7   :  { %v4562_v58 = vsel %vm246_vm0, %v4552_v44, 0.0 }
 0xff8   :  { %4563 = vadd.xlane.f32.xlu1 %v4562_v58 }
 0xffa   :  { %v4497_v54 = vpop.permute.xlu0 %4496 }
 0xffb   :  { %v4544_v37 = vperm.slane %v4497_v54, %v8420_v61 }
 0xffd   :  { %v4545_v50 = vsel %vm765_vm3, %v4544_v37, %v4543_v6 }
 0xffe   :  { %v4559_v31 = vsel %vm824_vm10, %v4545_v50, %v4558_v40 }
 0xfff   :  { %v4565_v53 = vsel %vm246_vm0, %v4559_v31, 0.0 }
0x1000   :  { %4566 = vadd.xlane.f32.xlu2 %v4565_v53 }
0x106b   :  { %v4564_v0 = vpop.xlane.xlu1 %4563 }
0x106c   :  { %7275 = vrcp.f32 %v4564_v0 }
0x1072   :  { %v11026_v35 = vpop.eup %7275 }
0x1073   :  { %v4567_v59 = vpop.xlane.xlu2 %4566  ;;  %v4572_v30 = vperm.slane %v11026_v35, 0  ;;  %v4573_v48 = vperm.slane %v11026_v35, 1  ;;  %v4576_v34 = vperm.slane %v11026_v35, 4  ;;  %v4577_v37 = vperm.slane %v11026_v35, 5 }
0x1074   :  { %7277 = vrcp.f32 %v4567_v59  ;;  %v4574_v59 = vperm.slane %v11026_v35, 2 }
0x1075   :  { %v4604_v46 = vmul.f32 %v10803_v11, %v4572_v30  ;;  %v4605_v39 = vmul.f32 %v10800_v29, %v4572_v30  ;;  %v4606_v10 = vmul.f32 %v10807_v23, %v4573_v48  ;;  %v4607_v63 = vmul.f32 %v10815_v15, %v4573_v48 }
0x1076   :  { %v4614_v31 = vmul.f32 %v10885_v7, %v4577_v37  ;;  %v4615_v53 = vmul.f32 %v10896_v9, %v4577_v37  ;;  %v4609_v7 = vmul.f32 %v10842_v3, %v4574_v59 }
0x1077   :  { %v4636_v19 = vpack.c.bf16 %v4605_v39, %v4604_v46 }
0x1078   :  { %v4641_v30 = vpack.c.bf16 %v4615_v53, %v4614_v31 }
0x1079   :  { %v4673_v24 = vunpack.c.l.b16 %v4636_v19  ;;  %v4674_v44 = vunpack.c.h.b16 %v4636_v19  ;;  %v4608_v19 = vmul.f32 %v10831_v62, %v4574_v59 }
0x107a   :  { %v11031_v13 = vpop.eup %7277 }
0x107b   :  { %4706 = vperm.xlu0 %6994, %v4673_v24   ;;  %v4581_v56 = vperm.slane %v11031_v13, 1  ;;  %v4580_v2 = vperm.slane %v11031_v13, 0  ;;  %v4582_v51 = vperm.slane %v11031_v13, 2  ;;  %v4584_v38 = vperm.slane %v11031_v13, 4 }
0x107c   :  { %v4585_v46 = vperm.slane %v11031_v13, 5  ;;  %v4683_v24 = vunpack.c.l.b16 %v4641_v30  ;;  %v4638_v48 = vpack.c.bf16 %v4609_v7, %v4608_v19 }
0x107d   :  { %v4622_v52 = vmul.f32 %v10829_v17, %v4581_v56  ;;  %v4623_v45 = vmul.f32 %v10834_v43, %v4581_v56  ;;  %v4620_v11 = vmul.f32 %v10820_v55, %v4580_v2  ;;  %v4621_v29 = vmul.f32 %v10817_v5, %v4580_v2 }
0x107e   :  { %v4624_v18 = vmul.f32 %v10847_v42, %v4582_v51  ;;  %v4625_v22 = vmul.f32 %v10844_v20, %v4582_v51  ;;  %v4637_v17 = vpack.c.bf16 %v4607_v63, %v4606_v10  ;;  %v4583_v5 = vperm.slane %v11031_v13, 3 }
0x107f   :  { %v4645_v27 = vpack.c.bf16 %v4623_v45, %v4622_v52  ;;  %v4644_v47 = vpack.c.bf16 %v4621_v29, %v4620_v11  ;;  %v4575_v43 = vperm.slane %v11026_v35, 3  ;;  %v4630_v56 = vmul.f32 %v10901_v1, %v4585_v46  ;;  %v12462_v11 = vld [vmem:[#allocation37_spill] sm:$0xff]  ;;  %v12463_v29 = vld [vmem:[#allocation28_spill] sm:$0xff] }
0x1080   :  { %v4646_v55 = vpack.c.bf16 %v4625_v22, %v4624_v18  ;;  %v4675_v60 = vunpack.c.l.b16 %v4637_v17  ;;  %v4626_v23 = vmul.f32 %v10858_v12, %v4583_v5  ;;  %v4627_v15 = vmul.f32 %v10869_v16, %v4583_v5  ;;  %v12464_v1 = vld [vmem:[#allocation60_spill] sm:$0xff]  ;;  %v12467_v5 = vld [vmem:[#allocation39_spill] sm:$0xff] }
0x1081   :  { %v4691_v58 = vunpack.c.l.b16 %v4645_v27  ;;  %v4690_v14 = vunpack.c.h.b16 %v4644_v47  ;;  %v4610_v42 = vmul.f32 %v10856_v49, %v4575_v43  ;;  %v4611_v20 = vmul.f32 %v10861_v21, %v4575_v43 }
0x1082   :  { %v4694_v41 = vunpack.c.h.b16 %v4646_v55  ;;  %v4693_v8 = vunpack.c.l.b16 %v4646_v55  ;;  %v11051_v28 = vpack.c.bf16 %v4627_v15, %v4626_v23  ;;  %v4676_v57 = vunpack.c.h.b16 %v4637_v17  ;;  %v12466_v17 = vld [vmem:[#allocation48_spill] sm:$0xff] }
0x1083   :  { %4709 = vperm.xlu0 %6994, %v4674_v44   ;;  %4760 = vperm.xlu2 %6993, %v4691_v58   ;;  %v11054_v54 = vpack.c.bf16 %v4611_v20, %v4610_v42  ;;  %v4612_v12 = vmul.f32 %v10874_v36, %v4576_v34  ;;  %v4613_v16 = vmul.f32 %v10871_v32, %v4576_v34  ;;  %v4689_v40 = vunpack.c.l.b16 %v4644_v47  ;;  %v12468_v20 = vld [vmem:[#allocation52_spill] sm:$0xff]  ;;  %v12469_v34 = vld [vmem:[#allocation25_spill] sm:$0xff] }
0x1084   :  { %4757 = vperm.xlu1 %6995, %v4690_v14   ;;  %v4695_v6 = vunpack.c.l.b16 %v11051_v28  ;;  %v4628_v36 = vmul.f32 %v10883_v4, %v4584_v38  ;;  %v4629_v32 = vmul.f32 %v10888_v25, %v4584_v38  ;;  %v4692_v9 = vunpack.c.h.b16 %v4645_v27 }
0x1085   :  { %v4680_v49 = vunpack.c.h.b16 %v11054_v54  ;;  %v4640_v21 = vpack.c.bf16 %v4613_v16, %v4612_v12  ;;  %v4631_v4 = vmul.f32 %v10898_v26, %v4585_v46  ;;  %v4586_v51 = vperm.slane %v11031_v13, 6  ;;  %v12465_v26 = vld [vmem:[#allocation44_spill] sm:$0xff] }
0x1086   :  { %v4648_v39 = vpack.c.bf16 %v4629_v32, %v4628_v36  ;;  %v4578_v52 = vperm.slane %v11026_v35, 6  ;;  %v4677_v62 = vunpack.c.l.b16 %v4638_v48  ;;  %v4579_v58 = vperm.slane %v11026_v35, 7 }
0x1087   :  { %v4682_v50 = vunpack.c.h.b16 %v4640_v21  ;;  %v4681_v0 = vunpack.c.l.b16 %v4640_v21  ;;  %v4649_v2 = vpack.c.bf16 %v4631_v4, %v4630_v56  ;;  %v4632_v3 = vmul.f32 %v12462_v11, %v4586_v51 }
0x1088   :  { %v4698_v25 = vunpack.c.h.b16 %v4648_v39  ;;  %v4633_v27 = vmul.f32 %v12463_v29, %v4586_v51  ;;  %v4616_v44 = vmul.f32 %v12464_v1, %v4578_v52  ;;  %v4617_v10 = vmul.f32 %v12465_v26, %v4578_v52  ;;  %v6927_v51 = vld [vmem:[#allocation9 + $0x18] sm:$0xff]  ;;  %v6792_v29 = vld [vmem:[%s12159_s17 + $0x38] sm:$0xf0] }
0x1089   :  { %v4700_v45 = vunpack.c.h.b16 %v4649_v2  ;;  %v4699_v47 = vunpack.c.l.b16 %v4649_v2  ;;  %v4678_v22 = vunpack.c.h.b16 %v4638_v48  ;;  %v4618_v55 = vmul.f32 %v12466_v17, %v4579_v58  ;;  %v6790_v52 = vld [vmem:[%s12159_s17 + $0x30] sm:$0xf]  ;;  %4921 = vmatpush.bf16.msra.mxu0 %v6927_v51 }
0x108a   :  { %v4650_v63 = vpack.c.bf16 %v4633_v27, %v4632_v3  ;;  %v4642_v14 = vpack.c.bf16 %v4617_v10, %v4616_v44  ;;  %v4619_v43 = vmul.f32 %v12467_v5, %v4579_v58  ;;  %v4587_v23 = vperm.slane %v11031_v13, 7  ;;  %v6946_v3 = vld [vmem:[%s12159_s17 + $0x34] sm:$0xf] }
0x108b   :  { %4712 = vperm.xlu0 %6994, %v4675_v60   ;;  %4769 = vperm.xlu2 %6993, %v4694_v41   ;;  %v4696_v12 = vunpack.c.h.b16 %v11051_v28  ;;  %v4684_v13 = vunpack.c.h.b16 %v4641_v30 }
0x108c   :  { %4766 = vperm.xlu1 %6995, %v4693_v8   ;;  %v4701_v18 = vunpack.c.l.b16 %v4650_v63  ;;  %v4686_v60 = vunpack.c.h.b16 %v4642_v14  ;;  %v4643_v41 = vpack.c.bf16 %v4619_v43, %v4618_v55  ;;  %v4679_v8 = vunpack.c.l.b16 %v11054_v54 }
0x108d   :  { %v4634_v35 = vmul.f32 %v12468_v20, %v4587_v23  ;;  %v4685_v21 = vunpack.c.l.b16 %v4642_v14  ;;  %v4702_v54 = vunpack.c.h.b16 %v4650_v63 }
0x108e   :  { %v4688_v15 = vunpack.c.h.b16 %v4643_v41  ;;  %v4687_v42 = vunpack.c.l.b16 %v4643_v41 }
0x1093   :  { %4715 = vperm.xlu0 %6994, %v4676_v57   ;;  %4772 = vperm.xlu2 %6993, %v4695_v6   ;;  %v4635_v57 = vmul.f32 %v12469_v34, %v4587_v23 }
0x1094   :  { %4727 = vperm.xlu1 %6995, %v4680_v49   ;;  %v4697_v49 = vunpack.c.l.b16 %v4648_v39 }
0x1095   :  { %v4651_v6 = vpack.c.bf16 %v4635_v57, %v4634_v35 }
0x1097   :  { %v4704_v16 = vunpack.c.h.b16 %v4651_v6  ;;  %v4703_v37 = vunpack.c.l.b16 %v4651_v6 }
0x109b   :  { %4733 = vperm.xlu2 %6993, %v4682_v50   ;;  %4754 = vperm.xlu0 %6994, %v4689_v40  }
0x109c   :  { %4730 = vperm.xlu1 %6995, %v4681_v0  }
0x10a3   :  { %4736 = vperm.xlu2 %6993, %v4683_v24   ;;  %4763 = vperm.xlu0 %6994, %v4692_v9  }
0x10a4   :  { %4781 = vperm.xlu1 %6995, %v4698_v25  }
0x10ab   :  { %4787 = vperm.xlu2 %6993, %v4700_v45   ;;  %4718 = vperm.xlu0 %6994, %v4677_v62   ;;  %v6947_v45 = vld [vmem:[%s12159_s17 + $0x34] sm:$0xf0] }
0x10ac   :  { %4784 = vperm.xlu1 %6995, %v4699_v47   ;;  %v6791_v11 = vor.u32 %v6947_v45, %v6790_v52  ;;  %v6795_v47 = vor.u32 %v6946_v3, %v6792_v29 }
0x10ae   :  { %6280 = vmatpush.bf16.msrb.mxu3 %v6791_v11  ;;  %6294 = vmatpush.bf16.msra.mxu1 %v6795_v47 }
0x10b3   :  { %4790 = vperm.xlu2 %6993, %v4701_v18   ;;  %4721 = vperm.xlu0 %6994, %v4678_v22  }
0x10b4   :  { %4745 = vperm.xlu1 %6995, %v4686_v60  }
0x10bb   :  { %4751 = vperm.xlu2 %6993, %v4688_v15   ;;  %4724 = vperm.xlu0 %6994, %v4679_v8  }
0x10bc   :  { %4748 = vperm.xlu1 %6995, %v4687_v42  }
0x10c3   :  { %4775 = vperm.xlu0 %6994, %v4696_v12  }
0x10c4   :  { %4799 = vperm.xlu1 %6995, %v4704_v16  }
0x10cb   :  { %4778 = vperm.xlu0 %6994, %v4697_v49  }
0x10d3   :  { %4739 = vperm.xlu0 %6994, %v4684_v13  }
0x10db   :  { %4742 = vperm.xlu0 %6994, %v4685_v21  }
0x10dd   :  { %v4761_v28 = vpop.permute.xlu2 %4760 }
0x10de   :  { %v4828_v58 = vperm.slane %v4761_v28, %v8417_v33 }
0x10e3   :  { %4793 = vperm.xlu0 %6994, %v4702_v54  }
0x10e5   :  { %v4770_v46 = vpop.permute.xlu2 %4769 }
0x10e6   :  { %v4832_v55 = vperm.slane %v4770_v46, %v8420_v61 }
0x10eb   :  { %4796 = vperm.xlu0 %6994, %v4703_v37  }
0x10ed   :  { %v4707_v38 = vpop.permute.xlu0 %4706  ;;  %v4773_v19 = vpop.permute.xlu2 %4772 }
0x10ee   :  { %v4801_v5 = vperm.slane %v4707_v38, %v8417_v33  ;;  %v4834_v41 = vperm.slane %v4773_v19, %v8417_v33 }
0x10f5   :  { %v4710_v50 = vpop.permute.xlu0 %4709  ;;  %v11090_v9 = vpop.permute.xlu2 %4733 }
0x10f6   :  { %v4758_v53 = vpop.permute.xlu1 %4757  ;;  %v4802_v14 = vperm.slane %v4710_v50, %v8420_v61  ;;  %v4814_v6 = vperm.slane %v11090_v9, %v8420_v61 }
0x10f7   :  { %v4826_v23 = vperm.slane %v4758_v53, %v8420_v61 }
0x10f8   :  { %v4803_v57 = vsel %vm765_vm3, %v4802_v14, %v4801_v5  ;;  %v6945_v5 = vld [vmem:[%s12159_s17 + $0x24] sm:$0xf0] }
0x10fd   :  { %v4713_v40 = vpop.permute.xlu0 %4712  ;;  %v11092_v25 = vpop.permute.xlu2 %4736 }
0x10fe   :  { %v11086_v36 = vpop.permute.xlu1 %4766  ;;  %v4804_v18 = vperm.slane %v4713_v40, %v8417_v33  ;;  %v4816_v53 = vperm.slane %v11092_v25, %v8417_v33 }
0x10ff   :  { %v4831_v42 = vperm.slane %v11086_v36, %v8417_v33 }
0x1105   :  { %v4716_v31 = vpop.permute.xlu0 %4715  ;;  %v11108_v27 = vpop.permute.xlu2 %4787 }
0x1106   :  { %v4728_v30 = vpop.permute.xlu1 %4727  ;;  %v4805_v26 = vperm.slane %v4716_v31, %v8420_v61  ;;  %v4841_v51 = vperm.slane %v11108_v27, %v8420_v61 }
0x1107   :  { %v4811_v20 = vperm.slane %v4728_v30, %v8420_v61 }
0x1108   :  { %v4806_v15 = vsel %vm765_vm3, %v4805_v26, %v4804_v18 }
0x1109   :  { %v4849_v13 = vsel %vm812_vm4, %v4806_v15, %v4803_v57 }
0x110d   :  { %v4755_v0 = vpop.permute.xlu0 %4754  ;;  %v4791_v10 = vpop.permute.xlu2 %4790 }
0x110e   :  { %v11088_v7 = vpop.permute.xlu1 %4730  ;;  %v4825_v43 = vperm.slane %v4755_v0, %v8417_v33  ;;  %v4833_v0 = vsel %vm765_vm3, %v4832_v55, %v4831_v42  ;;  %v4843_v9 = vperm.slane %v4791_v10, %v8417_v33  ;;  %v6782_v55 = vld [vmem:[%s12159_s17 + $0x20] sm:$0xf]  ;;  %v6943_v42 = vld [vmem:[%s12159_s17 + $0x14] sm:$0xf0] }
0x110f   :  { %v4813_v38 = vperm.slane %v11088_v7, %v8417_v33 }
0x1110   :  { %v4827_v21 = vsel %vm765_vm3, %v4826_v23, %v4825_v43  ;;  %v6783_v43 = vor.u32 %v6945_v5, %v6782_v55  ;;  %v6925_v23 = vld [vmem:[#allocation9 + $0x8] sm:$0xff] }
0x1112   :  { %6281 = vmatpush.bf16.msrb.mxu3 %v6783_v43 }
0x1115   :  { %v4764_v32 = vpop.permute.xlu0 %4763 }
0x1116   :  { %v4782_v56 = vpop.permute.xlu1 %4781  ;;  %v4829_v63 = vperm.slane %v4764_v32, %v8420_v61 }
0x1117   :  { %v4838_v50 = vperm.slane %v4782_v56, %v8420_v61  ;;  %v4815_v56 = vsel %vm765_vm3, %v4814_v6, %v4813_v38  ;;  %v6924_v6 = vld [vmem:[#allocation9] sm:$0xff] }
0x1118   :  { %v4830_v35 = vsel %vm765_vm3, %v4829_v63, %v4828_v58  ;;  %v6939_v38 = vld [vmem:[%s12158_s16 + $0x34] sm:$0xf0] }
0x1119   :  { %v4856_v40 = vsel %vm812_vm4, %v4830_v35, %v4827_v21  ;;  %v6768_v21 = vld [vmem:[%s12159_s17 + $0x8] sm:$0xf0] }
0x111a   :  { %v4857_v7 = vsel %vm814_vm5, %v4833_v0, %v4856_v40  ;;  %v6740_v0 = vld [vmem:[%s12158_s16 + $0x10] sm:$0xf] }
0x111d   :  { %v4719_v59 = vpop.permute.xlu0 %4718 }
0x111e   :  { %v11094_v2 = vpop.permute.xlu1 %4784  ;;  %v4807_v8 = vperm.slane %v4719_v59, %v8417_v33 }
0x111f   :  { %v4840_v19 = vperm.slane %v11094_v2, %v8417_v33 }
0x1121   :  { %v4842_v47 = vsel %vm765_vm3, %v4841_v51, %v4840_v19  ;;  %v7002_v19 = vld [vmem:[%s12153_s11] ss:$0 sm:$0xff]  ;;  %s12483_s11 = sld [smem:[#allocation80_spill]] }
0x1125   :  { %v4722_v39 = vpop.permute.xlu0 %4721 }
0x1126   :  { %v4746_v1 = vpop.permute.xlu1 %4745  ;;  %v4808_v22 = vperm.slane %v4722_v39, %v8420_v61  ;;  %v4752_v39 = vpop.permute.xlu2 %4751 }
0x1127   :  { %v4820_v32 = vperm.slane %v4746_v1, %v8420_v61 }
0x1128   :  { %v4809_v12 = vsel %vm765_vm3, %v4808_v22, %v4807_v8  ;;  %v6774_v8 = vld [vmem:[%s12159_s17 + $0x10] sm:$0xf] }
0x1129   :  { %v4850_v28 = vsel %vm814_vm5, %v4809_v12, %v4849_v13  ;;  %v6775_v35 = vor.u32 %v6943_v42, %v6774_v8  ;;  %v6766_v12 = vld [vmem:[%s12159_s17] sm:$0xf]  ;;  %v6940_v13 = vld [vmem:[%s12159_s17 + $0x4] sm:$0xf] }
0x112b   :  { %6282 = vmatpush.bf16.msrb.mxu3 %v6775_v35 }
0x112d   :  { %v4725_v24 = vpop.permute.xlu0 %4724 }
0x112e   :  { %v4749_v17 = vpop.permute.xlu1 %4748  ;;  %v4810_v60 = vperm.slane %v4725_v24, %v8417_v33 }
0x112f   :  { %v4822_v52 = vperm.slane %v4749_v17, %v8417_v33  ;;  %v6926_v17 = vld [vmem:[#allocation9 + $0x10] sm:$0xff] }
0x1130   :  { %v4812_v54 = vsel %vm765_vm3, %v4811_v20, %v4810_v60  ;;  %v6944_v60 = vld [vmem:[%s12159_s17 + $0x24] sm:$0xf]  ;;  %4922 = vmatpush.bf16.msra.mxu0 %v6926_v17  ;;  %v6942_v20 = vld [vmem:[%s12159_s17 + $0x14] sm:$0xf] }
0x1131   :  { %v4851_v59 = vsel %vm816_vm6, %v4812_v54, %v4850_v28  ;;  %v6771_v54 = vor.u32 %v6940_v13, %v6768_v21  ;;  %v6935_v28 = vld [vmem:[%s12158_s16 + $0x14] sm:$0xf0] }
0x1132   :  { %v4852_v45 = vsel %vm818_vm7, %v4815_v56, %v4851_v59  ;;  %v6933_v59 = vld [vmem:[%s12158_s16 + $0x4] sm:$0xf0] }
0x1134   :  { %4923 = vmatpush.bf16.msra.mxu0 %v6925_v23 }
0x1135   :  { %v4776_v4 = vpop.permute.xlu0 %4775 }
0x1136   :  { %v4835_v34 = vperm.slane %v4776_v4, %v8420_v61  ;;  %v4800_v4 = vpop.permute.xlu1 %4799 }
0x1137   :  { %v4847_v1 = vperm.slane %v4800_v4, %v8420_v61  ;;  %v12470_v4 = vld [vmem:[#allocation63_spill] sm:$0xff] }
0x1138   :  { %v4836_v36 = vsel %vm765_vm3, %v4835_v34, %v4834_v41  ;;  %v6784_v41 = vld [vmem:[%s12159_s17 + $0x28] sm:$0xf0]  ;;  %v6776_v34 = vld [vmem:[%s12159_s17 + $0x18] sm:$0xf0]  ;;  %4924 = vmatpush.bf16.msra.mxu0 %v6924_v6 }
0x1139   :  { %v4858_v25 = vsel %vm816_vm6, %v4836_v36, %v4857_v7  ;;  %v6787_v15 = vor.u32 %v6944_v60, %v6784_v41  ;;  %v6779_v57 = vor.u32 %v6942_v20, %v6776_v34  ;;  %v6741_v36 = vor.u32 %v6935_v28, %v6740_v0 }
0x113b   :  { %6295 = vmatpush.bf16.msra.mxu1 %v6787_v15 }
0x113d   :  { %v4779_v48 = vpop.permute.xlu0 %4778 }
0x113e   :  { %v4837_v16 = vperm.slane %v4779_v48, %v8417_v33 }
0x113f   :  { %6296 = vmatpush.bf16.msra.mxu1 %v6779_v57 }
0x1140   :  { %v4839_v46 = vsel %vm765_vm3, %v4838_v50, %v4837_v16  ;;  %v6941_v16 = vld [vmem:[%s12159_s17 + $0x4] sm:$0xf0]  ;;  %v6748_v50 = vld [vmem:[%s12158_s16 + $0x20] sm:$0xf] }
0x1141   :  { %v4859_v2 = vsel %vm818_vm7, %v4839_v46, %v4858_v25 }
0x1142   :  { %v4860_v26 = vsel %vm820_vm8, %v4842_v47, %v4859_v2 }
0x1143   :  { %6297 = vmatpush.bf16.msra.mxu1 %v6771_v54 }
0x1145   :  { %v4740_v62 = vpop.permute.xlu0 %4739 }
0x1146   :  { %v4817_v37 = vperm.slane %v4740_v62, %v8420_v61  ;;  %v4823_v62 = vperm.slane %v4752_v39, %v8420_v61 }
0x1148   :  { %v4818_v24 = vsel %vm765_vm3, %v4817_v37, %v4816_v53  ;;  %v4824_v10 = vsel %vm765_vm3, %v4823_v62, %v4822_v52  ;;  %v6756_v37 = vld [vmem:[%s12158_s16 + $0x30] sm:$0xf] }
0x1149   :  { %v4853_v11 = vsel %vm820_vm8, %v4818_v24, %v4852_v45  ;;  %v6757_v40 = vor.u32 %v6939_v38, %v6756_v37 }
0x114b   :  { %6200 = vmatpush.bf16.msrb.mxu0 %v6757_v40 }
0x114d   :  { %v4743_v44 = vpop.permute.xlu0 %4742 }
0x114e   :  { %v4819_v31 = vperm.slane %v4743_v44, %v8417_v33 }
0x1150   :  { %v4821_v48 = vsel %vm765_vm3, %v4820_v32, %v4819_v31  ;;  %v6937_v31 = vld [vmem:[%s12158_s16 + $0x24] sm:$0xf0]  ;;  %v6732_v32 = vld [vmem:[%s12158_s16] sm:$0xf] }
0x1151   :  { %v4854_v44 = vsel %vm822_vm9, %v4821_v48, %v4853_v11  ;;  %v6749_v53 = vor.u32 %v6937_v31, %v6748_v50  ;;  %v6733_v46 = vor.u32 %v6933_v59, %v6732_v32 }
0x1152   :  { %v4855_v14 = vsel %vm824_vm10, %v4824_v10, %v4854_v44 }
0x1153   :  { %6201 = vmatpush.bf16.msrb.mxu0 %v6749_v53 }
0x1155   :  { %v4794_v49 = vpop.permute.xlu0 %4793 }
0x1156   :  { %v4844_v30 = vperm.slane %v4794_v49, %v8420_v61  ;;  %v6767_v49 = vor.u32 %v6941_v16, %v6766_v12 }
0x1157   :  { %6202 = vmatpush.bf16.msrb.mxu0 %v6741_v36 }
0x1158   :  { %v4845_v3 = vsel %vm765_vm3, %v4844_v30, %v4843_v9  ;;  %6283 = vmatpush.bf16.msrb.mxu3 %v6767_v49  ;;  %v7003_v30 = vld [vmem:[%s12155_s13] ss:$0 sm:$0xff] }
0x1159   :  { %v4861_v63 = vsel %vm822_vm9, %v4845_v3, %v4860_v26  ;;  %5084 = vrot.lane.b32.xlu1 %v7003_v30, %s12287_s2 }
0x115b   :  { %6203 = vmatpush.bf16.msrb.mxu0 %v6733_v46 }
0x115d   :  { %v4797_v29 = vpop.permute.xlu0 %4796 }
0x115e   :  { %v4846_v27 = vperm.slane %v4797_v29, %v8417_v33 }
0x1160   :  { %v4848_v58 = vsel %vm765_vm3, %v4847_v1, %v4846_v27 }
0x1161   :  { %v4862_v18 = vsel %vm824_vm10, %v4848_v58, %v4861_v63 }
0x1162   :  { %v4863_v22 = vpack.c.b16 %v4862_v18, %v4855_v14 }
0x1164   :  { %6693 = vmatmul.msk.bf16.vlgmr.msra.gmra.mxu2 %vm246_vm0, %v4863_v22 }
0x11cb   :  { %v11289_v55 = vpop.permute.xlu1 %5084 }
0x11e7   :  { %v4876_v39 = vpop.f32.mrf.mxu2 }
0x11e8   :  { %v4877_v24 = vadd.f32 %v7002_v19, %v4876_v39 }
0x11ef   :  { %v4878_v7 = vpop.f32.mrf.mxu2 }
0x11f0   :  { %v4879_v9 = vadd.f32 %v7002_v19, %v4878_v7 }
0x11f2   :  { %v4881_v56 = vpack.c.bf16 %v4879_v9, %v4877_v24 }
0x11f4   :  { %6710 = vmatmul.msk.bf16.vlgmr.msra.gmra.mxu0 %vm297_vm1, %v4881_v56  ;;  %6796 = vmatmul.msk.bf16.vlgmr.msrb.gmra.mxu3 %vm297_vm1, %v4881_v56 }
0x11f5   :  { %6797 = vmatmul.msk.bf16.vlgmr.msra.gmra.mxu1 %vm297_vm1, %v4881_v56 }
0x1204   :  { %6762 = vmatmul.msk.bf16.vlgmr.msrb.gmra.mxu0 %vm297_vm1, %v12470_v4 }
0x1271   :  { %v11251_v25 = vpop.f32.mrf.mxu0 }
0x1272   :  { %4980 = vrot.lane.b32.xlu2 %v11251_v25, %s12287_s2  ;;  %v4934_v52 = vrot.slane %v11251_v25, 1  ;;  %v4935_v2 = vrot.slane %v11251_v25, 2  ;;  %v4948_v11 = vperm.slane %v11251_v25, 0  ;;  %v4936_v43 = vrot.slane %v11251_v25, 3 }
0x1273   :  { %v4937_v42 = vrot.slane %v11251_v25, 4  ;;  %v4938_v40 = vrot.slane %v11251_v25, 5 }
0x1274   :  { %v11266_v3 = vperm.slane %v4934_v52, 0  ;;  %v11271_v1 = vperm.slane %v4935_v2, 0  ;;  %v11303_v16 = vperm.slane %v4936_v43, 0 }
0x1275   :  { %v11306_v49 = vperm.slane %v4937_v42, 0  ;;  %v11322_v30 = vperm.slane %v4938_v40, 0 }
0x1279   :  { %v11255_v48 = vpop.f32.mrf.mxu0 }
0x127a   :  { %4982 = vrot.lane.b32.xlu0 %v11255_v48, %s12287_s2  ;;  %v5857_v51 = vpack.c.bf16 %v11255_v48, %v11251_v25  ;;  %v4941_v45 = vrot.slane %v11255_v48, 1  ;;  %v4942_v62 = vrot.slane %v11255_v48, 2  ;;  %v4956_v29 = vperm.slane %v11255_v48, 0 }
0x127b   :  { %v4943_v15 = vrot.slane %v11255_v48, 3  ;;  %v4944_v31 = vrot.slane %v11255_v48, 4  ;;  %v4945_v53 = vrot.slane %v11255_v48, 5  ;;  %v4946_v2 = vrot.slane %v11255_v48, 6 }
0x127c   :  { %6079 = vmatpush.bf16.msrb.mxu2 %v5857_v51  ;;  %v11281_v10 = vperm.slane %v4941_v45, 0  ;;  %v11285_v58 = vperm.slane %v4942_v62, 0  ;;  %v4939_v45 = vrot.slane %v11251_v25, 6  ;;  %v4940_v62 = vrot.slane %v11251_v25, 7 }
0x127d   :  { %v11301_v12 = vperm.slane %v4943_v15, 0  ;;  %v11324_v39 = vperm.slane %v4944_v31, 0  ;;  %v11327_v19 = vperm.slane %v4945_v53, 0  ;;  %v4947_v42 = vrot.slane %v11255_v48, 7 }
0x12cc   :  { %v11269_v47 = vpop.permute.xlu2 %4980 }
0x12cd   :  { %v4986_v44 = vadd.f32 %v11269_v47, %v4948_v11  ;;  %v4988_v27 = vadd.f32 %v11269_v47, %v11266_v3  ;;  %v5002_v26 = vadd.f32 %v11269_v47, %v4956_v29  ;;  %v4990_v63 = vadd.f32 %v11269_v47, %v11271_v1 }
0x12ce   :  { %v5004_v17 = vadd.f32 %v11269_v47, %v11281_v10  ;;  %v5006_v5 = vadd.f32 %v11269_v47, %v11285_v58  ;;  %v5008_v54 = vadd.f32 %v11269_v47, %v11301_v12  ;;  %v4992_v37 = vadd.f32 %v11269_v47, %v11303_v16 }
0x12cf   :  { %v5018_v14 = vmul.f32 0.2, %v4986_v44  ;;  %v5020_v18 = vmul.f32 0.2, %v4988_v27  ;;  %v5034_v22 = vmul.f32 0.2, %v5002_v26  ;;  %v4994_v50 = vadd.f32 %v11269_v47, %v11306_v49 }
0x12d0   :  { %v5022_v8 = vmul.f32 0.2, %v4990_v63  ;;  %v5036_v57 = vmul.f32 0.2, %v5004_v17  ;;  %v5038_v6 = vmul.f32 0.2, %v5006_v5  ;;  %v4996_v9 = vadd.f32 %v11269_v47, %v11322_v30 }
0x12d1   :  { %v5050_v60 = vmax.f32 %v4986_v44, %v5018_v14  ;;  %v5052_v41 = vmax.f32 %v4988_v27, %v5020_v18  ;;  %v5066_v23 = vmax.f32 %v5002_v26, %v5034_v22  ;;  %v5040_v36 = vmul.f32 0.2, %v5008_v54 }
0x12d2   :  { %v5054_v13 = vmax.f32 %v4990_v63, %v5022_v8  ;;  %v5068_v21 = vmax.f32 %v5004_v17, %v5036_v57  ;;  %v5070_v38 = vmax.f32 %v5006_v5, %v5038_v6  ;;  %v5024_v32 = vmul.f32 0.2, %v4992_v37 }
0x12d3   :  { %v5087_v20 = vmul.f32 %v11289_v55, %v5050_v60  ;;  %v5089_v35 = vmul.f32 %v11289_v55, %v5052_v41  ;;  %v5103_v34 = vmul.f32 %v11289_v55, %v5066_v23  ;;  %v5026_v46 = vmul.f32 0.2, %v4994_v50 }
0x12d4   :  { %v5091_v0 = vmul.f32 %v11289_v55, %v5054_v13  ;;  %v5105_v28 = vmul.f32 %v11289_v55, %v5068_v21  ;;  %v5107_v59 = vmul.f32 %v11289_v55, %v5070_v38  ;;  %v5072_v7 = vmax.f32 %v5008_v54, %v5040_v36 }
0x12d5   :  { %5151 = vrot.lane.b32.xlu2 %v5087_v20, %s12287_s2  ;;  %5155 = vrot.lane.b32.xlu1 %v5089_v35, %s12287_s2  ;;  %v5056_v24 = vmax.f32 %v4992_v37, %v5024_v32  ;;  %v5010_v56 = vadd.f32 %v11269_v47, %v11324_v39  ;;  %v5058_v51 = vmax.f32 %v4994_v50, %v5026_v46  ;;  %v5028_v26 = vmul.f32 0.2, %v4996_v9 }
0x12d6   :  { %5183 = vrot.lane.b32.xlu0 %v5103_v34, %s12287_s2  ;;  %v5012_v52 = vadd.f32 %v11269_v47, %v11327_v19  ;;  %v5109_v44 = vmul.f32 %v11289_v55, %v5072_v7  ;;  %v11343_v22 = vperm.slane %v4946_v2, 0  ;;  %v11345_v17 = vperm.slane %v4939_v45, 0 }
0x12d7   :  { %v5093_v27 = vmul.f32 %v11289_v55, %v5056_v24  ;;  %v5042_v63 = vmul.f32 0.2, %v5010_v56  ;;  %v5095_v14 = vmul.f32 %v11289_v55, %v5058_v51  ;;  %v11348_v5 = vperm.slane %v4940_v62, 0 }
0x12d8   :  { %v5044_v18 = vmul.f32 0.2, %v5012_v52  ;;  %v5060_v43 = vmax.f32 %v4996_v9, %v5028_v26  ;;  %v5014_v41 = vadd.f32 %v11269_v47, %v11343_v22  ;;  %v4998_v23 = vadd.f32 %v11269_v47, %v11345_v17 }
0x12d9   :  { %v5074_v60 = vmax.f32 %v5010_v56, %v5042_v63  ;;  %v5000_v8 = vadd.f32 %v11269_v47, %v11348_v5  ;;  %v11364_v54 = vperm.slane %v4947_v42, 0 }
0x12da   :  { %v5076_v15 = vmax.f32 %v5012_v52, %v5044_v18  ;;  %v5097_v20 = vmul.f32 %v11289_v55, %v5060_v43  ;;  %v5046_v34 = vmul.f32 0.2, %v5014_v41  ;;  %v5030_v57 = vmul.f32 0.2, %v4998_v23 }
0x12db   :  { %v5111_v35 = vmul.f32 %v11289_v55, %v5074_v60  ;;  %v5032_v21 = vmul.f32 0.2, %v5000_v8  ;;  %v5016_v40 = vadd.f32 %v11269_v47, %v11364_v54 }
0x12dc   :  { %v5113_v13 = vmul.f32 %v11289_v55, %v5076_v15  ;;  %v5078_v37 = vmax.f32 %v5014_v41, %v5046_v34  ;;  %v5062_v38 = vmax.f32 %v4998_v23, %v5030_v57 }
0x12dd   :  { %5159 = vrot.lane.b32.xlu1 %v5091_v0, %s12287_s2  ;;  %5187 = vrot.lane.b32.xlu2 %v5105_v28, %s12287_s2  ;;  %v5064_v31 = vmax.f32 %v5000_v8, %v5032_v21  ;;  %v5048_v32 = vmul.f32 0.2, %v5016_v40 }
0x12de   :  { %5191 = vrot.lane.b32.xlu0 %v5107_v59, %s12287_s2  ;;  %v5115_v0 = vmul.f32 %v11289_v55, %v5078_v37  ;;  %v5099_v28 = vmul.f32 %v11289_v55, %v5062_v38 }
0x12df   :  { %v5101_v59 = vmul.f32 %v11289_v55, %v5064_v31 }
0x12e5   :  { %5195 = vrot.lane.b32.xlu1 %v5109_v44, %s12287_s2  ;;  %5163 = vrot.lane.b32.xlu2 %v5093_v27, %s12287_s2 }
0x12e6   :  { %5167 = vrot.lane.b32.xlu0 %v5095_v14, %s12287_s2 }
0x12ec   :  { %v11359_v6 = vpop.permute.xlu0 %4982 }
0x12ed   :  { %5171 = vrot.lane.b32.xlu1 %v5097_v20, %s12287_s2  ;;  %5199 = vrot.lane.b32.xlu2 %v5111_v35, %s12287_s2  ;;  %v5003_v50 = vadd.f32 %v11359_v6, %v4956_v29  ;;  %v4987_v53 = vadd.f32 %v11359_v6, %v4948_v11  ;;  %v5080_v29 = vmax.f32 %v5016_v40, %v5048_v32 }
0x12ee   :  { %5203 = vrot.lane.b32.xlu0 %v5113_v13, %s12287_s2  ;;  %v5007_v25 = vadd.f32 %v11359_v6, %v11285_v58  ;;  %v4989_v11 = vadd.f32 %v11359_v6, %v11266_v3  ;;  %v5005_v7 = vadd.f32 %v11359_v6, %v11281_v10  ;;  %v4995_v10 = vadd.f32 %v11359_v6, %v11306_v49 }
0x12ef   :  { %v5035_v36 = vmul.f32 0.2, %v5003_v50  ;;  %v5019_v46 = vmul.f32 0.2, %v4987_v53  ;;  %v5117_v9 = vmul.f32 %v11289_v55, %v5080_v29  ;;  %v4991_v45 = vadd.f32 %v11359_v6, %v11271_v1 }
0x12f0   :  { %v5039_v56 = vmul.f32 0.2, %v5007_v25  ;;  %v5021_v51 = vmul.f32 0.2, %v4989_v11  ;;  %v5037_v2 = vmul.f32 0.2, %v5005_v7  ;;  %v4993_v44 = vadd.f32 %v11359_v6, %v11303_v16 }
0x12f1   :  { %v5067_v48 = vmax.f32 %v5003_v50, %v5035_v36  ;;  %v5051_v47 = vmax.f32 %v4987_v53, %v5019_v46  ;;  %v5027_v63 = vmul.f32 0.2, %v4995_v10  ;;  %v5023_v14 = vmul.f32 0.2, %v4991_v45 }
0x12f2   :  { %v5071_v3 = vmax.f32 %v5007_v25, %v5039_v56  ;;  %v5053_v58 = vmax.f32 %v4989_v11, %v5021_v51  ;;  %v5069_v62 = vmax.f32 %v5005_v7, %v5037_v2  ;;  %v5025_v43 = vmul.f32 0.2, %v4993_v44 }
0x12f3   :  { %v5104_v24 = vmul.f32 %v11289_v55, %v5067_v48  ;;  %v5088_v52 = vmul.f32 %v11289_v55, %v5051_v47  ;;  %v5059_v1 = vmax.f32 %v4995_v10, %v5027_v63  ;;  %v5055_v49 = vmax.f32 %v4991_v45, %v5023_v14 }
0x12f4   :  { %v5108_v27 = vmul.f32 %v11289_v55, %v5071_v3  ;;  %v5090_v26 = vmul.f32 %v11289_v55, %v5053_v58  ;;  %v5106_v18 = vmul.f32 %v11289_v55, %v5069_v62  ;;  %v5013_v16 = vadd.f32 %v11359_v6, %v11327_v19 }
0x12f5   :  { %5207 = vrot.lane.b32.xlu1 %v5115_v0, %s12287_s2  ;;  %5175 = vrot.lane.b32.xlu2 %v5099_v28, %s12287_s2  ;;  %v5009_v60 = vadd.f32 %v11359_v6, %v11301_v12  ;;  %v5057_v41 = vmax.f32 %v4993_v44, %v5025_v43  ;;  %v5011_v23 = vadd.f32 %v11359_v6, %v11324_v39 }
0x12f6   :  { %5179 = vrot.lane.b32.xlu0 %v5101_v59, %s12287_s2  ;;  %v5096_v15 = vmul.f32 %v11289_v55, %v5059_v1  ;;  %v5092_v8 = vmul.f32 %v11289_v55, %v5055_v49  ;;  %v5045_v42 = vmul.f32 0.2, %v5013_v16  ;;  %v5001_v39 = vadd.f32 %v11359_v6, %v11348_v5 }
0x12f7   :  { %v5041_v20 = vmul.f32 0.2, %v5009_v60  ;;  %v5094_v35 = vmul.f32 %v11289_v55, %v5057_v41  ;;  %v5043_v34 = vmul.f32 0.2, %v5011_v23  ;;  %v4997_v57 = vadd.f32 %v11359_v6, %v11322_v30 }
0x12f8   :  { %v5077_v12 = vmax.f32 %v5013_v16, %v5045_v42  ;;  %v4999_v21 = vadd.f32 %v11359_v6, %v11345_v17  ;;  %v5033_v50 = vmul.f32 0.2, %v5001_v39  ;;  %v5015_v17 = vadd.f32 %v11359_v6, %v11343_v22 }
0x12f9   :  { %v5073_v19 = vmax.f32 %v5009_v60, %v5041_v20  ;;  %v5075_v13 = vmax.f32 %v5011_v23, %v5043_v34  ;;  %v5029_v40 = vmul.f32 0.2, %v4997_v57  ;;  %v5017_v28 = vadd.f32 %v11359_v6, %v11364_v54 }
0x12fa   :  { %v5114_v37 = vmul.f32 %v11289_v55, %v5077_v12  ;;  %v5031_v53 = vmul.f32 0.2, %v4999_v21  ;;  %v5065_v30 = vmax.f32 %v5001_v39, %v5033_v50  ;;  %v5047_v59 = vmul.f32 0.2, %v5015_v17 }
0x12fb   :  { %v5110_v38 = vmul.f32 %v11289_v55, %v5073_v19  ;;  %v5112_v31 = vmul.f32 %v11289_v55, %v5075_v13  ;;  %v5061_v5 = vmax.f32 %v4997_v57, %v5029_v40  ;;  %v5049_v48 = vmul.f32 0.2, %v5017_v28 }
0x12fc   :  { %v5063_v0 = vmax.f32 %v4999_v21, %v5031_v53  ;;  %v5102_v36 = vmul.f32 %v11289_v55, %v5065_v30  ;;  %v5079_v29 = vmax.f32 %v5015_v17, %v5047_v59 }
0x12fd   :  { %5185 = vrot.lane.b32.xlu1 %v5104_v24, %s12287_s2  ;;  %5211 = vrot.lane.b32.xlu2 %v5117_v9, %s12287_s2  ;;  %v5098_v32 = vmul.f32 %v11289_v55, %v5061_v5  ;;  %v5081_v22 = vmax.f32 %v5017_v28, %v5049_v48 }
0x12fe   :  { %5153 = vrot.lane.b32.xlu0 %v5088_v52, %s12287_s2  ;;  %v5100_v46 = vmul.f32 %v11289_v55, %v5063_v0  ;;  %v5116_v25 = vmul.f32 %v11289_v55, %v5079_v29 }
0x12ff   :  { %v5118_v6 = vmul.f32 %v11289_v55, %v5081_v22 }
0x1305   :  { %5193 = vrot.lane.b32.xlu1 %v5108_v27, %s12287_s2  ;;  %5157 = vrot.lane.b32.xlu2 %v5090_v26, %s12287_s2 }
0x1306   :  { %5189 = vrot.lane.b32.xlu0 %v5106_v18, %s12287_s2 }
0x130d   :  { %5169 = vrot.lane.b32.xlu1 %v5096_v15, %s12287_s2  ;;  %5161 = vrot.lane.b32.xlu2 %v5092_v8, %s12287_s2 }
0x130e   :  { %5165 = vrot.lane.b32.xlu0 %v5094_v35, %s12287_s2 }
0x1315   :  { %5205 = vrot.lane.b32.xlu1 %v5114_v37, %s12287_s2  ;;  %5197 = vrot.lane.b32.xlu2 %v5110_v38, %s12287_s2 }
0x1316   :  { %5201 = vrot.lane.b32.xlu0 %v5112_v31, %s12287_s2 }
0x131d   :  { %5181 = vrot.lane.b32.xlu1 %v5102_v36, %s12287_s2  ;;  %5173 = vrot.lane.b32.xlu2 %v5098_v32, %s12287_s2 }
0x131e   :  { %5177 = vrot.lane.b32.xlu0 %v5100_v46, %s12287_s2 }
0x1325   :  { %5209 = vrot.lane.b32.xlu2 %v5116_v25, %s12287_s2 }
0x1326   :  { %5213 = vrot.lane.b32.xlu0 %v5118_v6, %s12287_s2 }
0x132f   :  { %v5152_v54 = vpop.permute.xlu2 %5151 }
0x1330   :  { %v5247_v7 = vsel %vm297_vm1, %v5152_v54, 0.0 }
0x1337   :  { %v5188_v11 = vpop.permute.xlu2 %5187 }
0x1338   :  { %v5301_v52 = vsel %vm297_vm1, %v5188_v11, 0.0 }
0x133f   :  { %v5164_v47 = vpop.permute.xlu2 %5163 }
0x1340   :  { %v5265_v10 = vsel %vm297_vm1, %v5164_v47, 0.0 }
0x1347   :  { %v5156_v24 = vpop.permute.xlu1 %5155  ;;  %5248 = vadd.xlane.f32.xlu1 %v5247_v7  ;;  %v5200_v51 = vpop.permute.xlu2 %5199 }
0x1348   :  { %v5184_v9 = vpop.permute.xlu0 %5183  ;;  %v5253_v55 = vsel %vm297_vm1, %v5156_v24, 0.0  ;;  %v5319_v63 = vsel %vm297_vm1, %v5200_v51, 0.0 }
0x1349   :  { %v5295_v56 = vsel %vm297_vm1, %v5184_v9, 0.0 }
0x134e   :  { %5296 = vadd.xlane.f32.xlu2 %v5295_v56 }
0x134f   :  { %v5160_v2 = vpop.permute.xlu1 %5159  ;;  %5302 = vadd.xlane.f32.xlu1 %v5301_v52  ;;  %v5176_v62 = vpop.permute.xlu2 %5175 }
0x1350   :  { %v5192_v3 = vpop.permute.xlu0 %5191  ;;  %5254 = vadd.xlane.f32.xlu0 %v5253_v55  ;;  %v5259_v45 = vsel %vm297_vm1, %v5160_v2, 0.0  ;;  %v5283_v16 = vsel %vm297_vm1, %v5176_v62, 0.0 }
0x1351   :  { %v5307_v58 = vsel %vm297_vm1, %v5192_v3, 0.0 }
0x1356   :  { %5308 = vadd.xlane.f32.xlu2 %v5307_v58 }
0x1357   :  { %v5196_v44 = vpop.permute.xlu1 %5195  ;;  %5266 = vadd.xlane.f32.xlu1 %v5265_v10  ;;  %v5212_v1 = vpop.permute.xlu2 %5211 }
0x1358   :  { %v5168_v27 = vpop.permute.xlu0 %5167  ;;  %5260 = vadd.xlane.f32.xlu0 %v5259_v45  ;;  %v5313_v14 = vsel %vm297_vm1, %v5196_v44, 0.0  ;;  %v5337_v42 = vsel %vm297_vm1, %v5212_v1, 0.0 }
0x1359   :  { %v5271_v26 = vsel %vm297_vm1, %v5168_v27, 0.0 }
0x135e   :  { %5272 = vadd.xlane.f32.xlu2 %v5271_v26 }
0x135f   :  { %v5172_v18 = vpop.permute.xlu1 %5171  ;;  %5320 = vadd.xlane.f32.xlu1 %v5319_v63  ;;  %v5158_v15 = vpop.permute.xlu2 %5157 }
0x1360   :  { %v5204_v43 = vpop.permute.xlu0 %5203  ;;  %5314 = vadd.xlane.f32.xlu0 %v5313_v14  ;;  %v5277_v60 = vsel %vm297_vm1, %v5172_v18, 0.0  ;;  %v5256_v39 = vsel %vm297_vm1, %v5158_v15, 0.0 }
0x1361   :  { %v5325_v49 = vsel %vm297_vm1, %v5204_v43, 0.0 }
0x1366   :  { %5326 = vadd.xlane.f32.xlu2 %v5325_v49 }
0x1367   :  { %v5208_v41 = vpop.permute.xlu1 %5207  ;;  %5284 = vadd.xlane.f32.xlu1 %v5283_v16  ;;  %v5162_v12 = vpop.permute.xlu2 %5161 }
0x1368   :  { %v5180_v23 = vpop.permute.xlu0 %5179  ;;  %5278 = vadd.xlane.f32.xlu0 %v5277_v60  ;;  %v5331_v20 = vsel %vm297_vm1, %v5208_v41, 0.0  ;;  %v5262_v38 = vsel %vm297_vm1, %v5162_v12, 0.0 }
0x1369   :  { %v5289_v8 = vsel %vm297_vm1, %v5180_v23, 0.0 }
0x136e   :  { %5290 = vadd.xlane.f32.xlu2 %v5289_v8 }
0x136f   :  { %v5186_v35 = vpop.permute.xlu1 %5185  ;;  %5338 = vadd.xlane.f32.xlu1 %v5337_v42  ;;  %v5198_v50 = vpop.permute.xlu2 %5197 }
0x1370   :  { %v5154_v34 = vpop.permute.xlu0 %5153  ;;  %5332 = vadd.xlane.f32.xlu0 %v5331_v20  ;;  %v5298_v57 = vsel %vm297_vm1, %v5186_v35, 0.0  ;;  %v5316_v5 = vsel %vm297_vm1, %v5198_v50, 0.0 }
0x1371   :  { %v5250_v19 = vsel %vm297_vm1, %v5154_v34, 0.0 }
0x1376   :  { %5251 = vadd.xlane.f32.xlu2 %v5250_v19 }
0x1377   :  { %v5194_v13 = vpop.permute.xlu1 %5193  ;;  %5257 = vadd.xlane.f32.xlu1 %v5256_v39  ;;  %v5174_v28 = vpop.permute.xlu2 %5173 }
0x1378   :  { %5299 = vadd.xlane.f32.xlu0 %v5298_v57  ;;  %v5190_v21 = vpop.permute.xlu0 %5189  ;;  %v5310_v40 = vsel %vm297_vm1, %v5194_v13, 0.0  ;;  %v5280_v59 = vsel %vm297_vm1, %v5174_v28, 0.0 }
0x1379   :  { %v5304_v37 = vsel %vm297_vm1, %v5190_v21, 0.0 }
0x137e   :  { %5305 = vadd.xlane.f32.xlu2 %v5304_v37 }
0x137f   :  { %5263 = vadd.xlane.f32.xlu1 %v5262_v38  ;;  %v5170_v31 = vpop.permute.xlu1 %5169  ;;  %v5210_v29 = vpop.permute.xlu2 %5209 }
0x1380   :  { %5311 = vadd.xlane.f32.xlu0 %v5310_v40  ;;  %v5166_v53 = vpop.permute.xlu0 %5165  ;;  %v5274_v17 = vsel %vm297_vm1, %v5170_v31, 0.0  ;;  %v5334_v6 = vsel %vm297_vm1, %v5210_v29, 0.0 }
0x1381   :  { %v5268_v30 = vsel %vm297_vm1, %v5166_v53, 0.0 }
0x1386   :  { %5269 = vadd.xlane.f32.xlu2 %v5268_v30 }
0x1387   :  { %5317 = vadd.xlane.f32.xlu1 %v5316_v5  ;;  %v5206_v36 = vpop.permute.xlu1 %5205 }
0x1388   :  { %5275 = vadd.xlane.f32.xlu0 %v5274_v17  ;;  %v5202_v0 = vpop.permute.xlu0 %5201  ;;  %v5328_v46 = vsel %vm297_vm1, %v5206_v36, 0.0 }
0x1389   :  { %v5322_v32 = vsel %vm297_vm1, %v5202_v0, 0.0 }
0x138e   :  { %5323 = vadd.xlane.f32.xlu2 %v5322_v32 }
0x138f   :  { %5281 = vadd.xlane.f32.xlu1 %v5280_v59  ;;  %v5182_v22 = vpop.permute.xlu1 %5181 }
0x1390   :  { %5329 = vadd.xlane.f32.xlu0 %v5328_v46  ;;  %v5178_v48 = vpop.permute.xlu0 %5177  ;;  %v5292_v54 = vsel %vm297_vm1, %v5182_v22, 0.0 }
0x1391   :  { %v5286_v25 = vsel %vm297_vm1, %v5178_v48, 0.0 }
0x1396   :  { %5287 = vadd.xlane.f32.xlu2 %v5286_v25 }
0x1397   :  { %5335 = vadd.xlane.f32.xlu1 %v5334_v6 }
0x1398   :  { %5293 = vadd.xlane.f32.xlu0 %v5292_v54  ;;  %v5214_v11 = vpop.permute.xlu0 %5213 }
0x1399   :  { %v5340_v47 = vsel %vm297_vm1, %v5214_v11, 0.0 }
0x139e   :  { %5341 = vadd.xlane.f32.xlu2 %v5340_v47 }
0x13ba   :  { %v11475_v7 = vpop.xlane.xlu1 %5248 }
0x13bb   :  { %v5375_v42 = vperm.slane %v11475_v7, %v8417_v33 }
0x13c1   :  { %v11477_v24 = vpop.xlane.xlu2 %5296 }
0x13c2   :  { %v11479_v9 = vpop.xlane.xlu1 %5302  ;;  %v5399_v40 = vperm.slane %v11477_v24, %v8417_v33 }
0x13c3   :  { %v11481_v56 = vpop.xlane.xlu0 %5254  ;;  %v5402_v30 = vperm.slane %v11479_v9, %v8417_v33 }
0x13c4   :  { %v5378_v20 = vperm.slane %v11481_v56, %v8417_v33 }
0x13c9   :  { %v11483_v51 = vpop.xlane.xlu2 %5308 }
0x13ca   :  { %v11485_v52 = vpop.xlane.xlu1 %5266  ;;  %v5405_v46 = vperm.slane %v11483_v51, %v8417_v33 }
0x13cb   :  { %v11487_v55 = vpop.xlane.xlu0 %5260  ;;  %v5384_v39 = vperm.slane %v11485_v52, %v8417_v33 }
0x13cc   :  { %v5381_v12 = vperm.slane %v11487_v55, %v8417_v33 }
0x13d1   :  { %v11489_v2 = vpop.xlane.xlu2 %5272 }
0x13d2   :  { %v11491_v3 = vpop.xlane.xlu1 %5320  ;;  %v5387_v5 = vperm.slane %v11489_v2, %v8417_v33 }
0x13d3   :  { %v11493_v58 = vpop.xlane.xlu0 %5314  ;;  %v5411_v6 = vperm.slane %v11491_v3, %v8417_v33 }
0x13d4   :  { %v5408_v25 = vperm.slane %v11493_v58, %v8417_v33 }
0x13d9   :  { %v11495_v10 = vpop.xlane.xlu2 %5326 }
0x13da   :  { %v11497_v45 = vpop.xlane.xlu1 %5284 }
0x13db   :  { %v11499_v62 = vpop.xlane.xlu0 %5278 }
0x13dc   :  { %v5390_v28 = vperm.slane %v11499_v62, %v8417_v33 }
0x13e1   :  { %v11501_v44 = vpop.xlane.xlu2 %5290 }
0x13e2   :  { %v11503_v27 = vpop.xlane.xlu1 %5338 }
0x13e3   :  { %v11505_v26 = vpop.xlane.xlu0 %5332 }
0x13e9   :  { %v11507_v63 = vpop.xlane.xlu2 %5251 }
0x13ea   :  { %v11509_v14 = vpop.xlane.xlu1 %5257  ;;  %v5376_v23 = vperm.slane %v11507_v63, %v8420_v61 }
0x13eb   :  { %v11511_v18 = vpop.xlane.xlu0 %5299  ;;  %v5379_v15 = vperm.slane %v11509_v14, %v8420_v61 }
0x13ec   :  { %v5377_v57 = vsel %vm765_vm3, %v5376_v23, %v5375_v42  ;;  %v5400_v17 = vperm.slane %v11511_v18, %v8420_v61  ;;  %v5393_v23 = vperm.slane %v11497_v45, %v8417_v33 }
0x13ed   :  { %v5380_v13 = vsel %vm765_vm3, %v5379_v15, %v5378_v20  ;;  %v5396_v15 = vperm.slane %v11501_v44, %v8417_v33 }
0x13ee   :  { %v5423_v0 = vsel %vm812_vm4, %v5380_v13, %v5377_v57 }
0x13f1   :  { %v11513_v43 = vpop.xlane.xlu2 %5305 }
0x13f2   :  { %v11515_v1 = vpop.xlane.xlu1 %5263  ;;  %v5403_v37 = vperm.slane %v11513_v43, %v8420_v61 }
0x13f3   :  { %v11517_v49 = vpop.xlane.xlu0 %5311  ;;  %v5382_v8 = vperm.slane %v11515_v1, %v8420_v61 }
0x13f4   :  { %v5406_v36 = vperm.slane %v11517_v49, %v8420_v61  ;;  %v5404_v48 = vsel %vm765_vm3, %v5403_v37, %v5402_v30 }
0x13f5   :  { %v5383_v38 = vsel %vm765_vm3, %v5382_v8, %v5381_v12  ;;  %v5401_v8 = vsel %vm765_vm3, %v5400_v17, %v5399_v40 }
0x13f6   :  { %v5424_v32 = vsel %vm814_vm5, %v5383_v38, %v5423_v0  ;;  %v5407_v12 = vsel %vm765_vm3, %v5406_v36, %v5405_v46 }
0x13f9   :  { %v11519_v16 = vpop.xlane.xlu2 %5269 }
0x13fa   :  { %v11521_v60 = vpop.xlane.xlu1 %5317  ;;  %v5385_v35 = vperm.slane %v11519_v16, %v8420_v61 }
0x13fb   :  { %v11523_v41 = vpop.xlane.xlu0 %5275  ;;  %v5409_v59 = vperm.slane %v11521_v60, %v8420_v61 }
0x13fc   :  { %v5388_v50 = vperm.slane %v11523_v41, %v8420_v61  ;;  %v5386_v31 = vsel %vm765_vm3, %v5385_v35, %v5384_v39  ;;  %v5430_v35 = vsel %vm812_vm4, %v5404_v48, %v5401_v8 }
0x13fd   :  { %v5425_v29 = vsel %vm816_vm6, %v5386_v31, %v5424_v32  ;;  %v5410_v57 = vsel %vm765_vm3, %v5409_v59, %v5408_v25  ;;  %v5431_v17 = vsel %vm814_vm5, %v5407_v12, %v5430_v35  ;;  %v5420_v25 = vperm.slane %v11503_v27, %v8417_v33 }
0x13fe   :  { %v5389_v22 = vsel %vm765_vm3, %v5388_v50, %v5387_v5  ;;  %v5414_v5 = vperm.slane %v11495_v10, %v8417_v33  ;;  %v5432_v36 = vsel %vm816_vm6, %v5410_v57, %v5431_v17 }
0x13ff   :  { %v5426_v39 = vsel %vm818_vm7, %v5389_v22, %v5425_v29 }
0x1401   :  { %v11537_v34 = vpop.xlane.xlu2 %5323 }
0x1402   :  { %v11541_v19 = vpop.xlane.xlu1 %5281  ;;  %v5412_v54 = vperm.slane %v11537_v34, %v8420_v61 }
0x1403   :  { %v11547_v21 = vpop.xlane.xlu0 %5329  ;;  %v5391_v53 = vperm.slane %v11541_v19, %v8420_v61 }
0x1404   :  { %v5415_v37 = vperm.slane %v11547_v21, %v8420_v61  ;;  %v5413_v31 = vsel %vm765_vm3, %v5412_v54, %v5411_v6 }
0x1405   :  { %v5392_v11 = vsel %vm765_vm3, %v5391_v53, %v5390_v28  ;;  %v5417_v28 = vperm.slane %v11505_v26, %v8417_v33  ;;  %v5433_v59 = vsel %vm818_vm7, %v5413_v31, %v5432_v36 }
0x1406   :  { %v5427_v40 = vsel %vm820_vm8, %v5392_v11, %v5426_v39  ;;  %v5416_v46 = vsel %vm765_vm3, %v5415_v37, %v5414_v5 }
0x1407   :  { %v5434_v54 = vsel %vm820_vm8, %v5416_v46, %v5433_v59 }
0x1409   :  { %v11585_v47 = vpop.xlane.xlu2 %5287 }
0x140a   :  { %v5394_v42 = vperm.slane %v11585_v47, %v8420_v61  ;;  %v11594_v20 = vpop.xlane.xlu1 %5335 }
0x140b   :  { %v11600_v13 = vpop.xlane.xlu0 %5293  ;;  %v5418_v53 = vperm.slane %v11594_v20, %v8420_v61 }
0x140c   :  { %v5395_v38 = vsel %vm765_vm3, %v5394_v42, %v5393_v23  ;;  %v5397_v50 = vperm.slane %v11600_v13, %v8420_v61 }
0x140d   :  { %v5428_v30 = vsel %vm822_vm9, %v5395_v38, %v5427_v40  ;;  %v5419_v29 = vsel %vm765_vm3, %v5418_v53, %v5417_v28 }
0x140e   :  { %v5398_v0 = vsel %vm765_vm3, %v5397_v50, %v5396_v15  ;;  %v5435_v23 = vsel %vm822_vm9, %v5419_v29, %v5434_v54 }
0x140f   :  { %v5429_v32 = vsel %vm824_vm10, %v5398_v0, %v5428_v30 }
0x1410   :  { %v5439_v48 = vsel %vm246_vm0, %v5429_v32, -inf }
0x1411   :  { %5440 = vmax.xlane.f32.xlu0 %v5439_v48  ;;  %v11624_v22 = vpop.xlane.xlu2 %5341 }
0x1412   :  { %v5421_v6 = vperm.slane %v11624_v22, %v8420_v61 }
0x1414   :  { %v5422_v11 = vsel %vm765_vm3, %v5421_v6, %v5420_v25 }
0x1415   :  { %v5436_v15 = vsel %vm824_vm10, %v5422_v11, %v5435_v23 }
0x1416   :  { %v5442_v8 = vsel %vm246_vm0, %v5436_v15, -inf }
0x1417   :  { %5443 = vmax.xlane.f32.xlu1 %v5442_v8 }
0x1484   :  { %v11635_v42 = vpop.xlane.xlu0 %5440 }
0x1485   :  { %v5447_v35 = vperm.slane %v11635_v42, 0  ;;  %v5448_v12 = vperm.slane %v11635_v42, 1  ;;  %v5449_v32 = vperm.slane %v11635_v42, 2  ;;  %v5450_v23 = vperm.slane %v11635_v42, 3 }
0x1487   :  { %v5479_v39 = vsub.f32 %v11475_v7, %v5447_v35  ;;  %v5480_v57 = vsub.f32 %v11507_v63, %v5447_v35  ;;  %v5481_v37 = vsub.f32 %v11481_v56, %v5448_v12  ;;  %v5482_v31 = vsub.f32 %v11509_v14, %v5448_v12 }
0x1488   :  { %v5486_v8 = vsub.f32 %v11519_v16, %v5450_v23 }
0x1489   :  { %v5511_v38 = vmul.f32 1.442695, %v5479_v39  ;;  %v5513_v50 = vmul.f32 1.442695, %v5480_v57  ;;  %v5515_v40 = vmul.f32 1.442695, %v5481_v37 }
0x148a   :  { %v11643_v53 = vpop.xlane.xlu1 %5443  ;;  %v5517_v5 = vmul.f32 1.442695, %v5482_v31  ;;  %v5451_v37 = vperm.slane %v11635_v42, 4 }
0x148b   :  { %7279 = vpow2.f32 %v5511_v38  ;;  %v5455_v30 = vperm.slane %v11643_v53, 0  ;;  %v5456_v63 = vperm.slane %v11643_v53, 1  ;;  %v5457_v48 = vperm.slane %v11643_v53, 2 }
0x148c   :  { %7281 = vpow2.f32 %v5513_v50  ;;  %v5458_v12 = vperm.slane %v11643_v53, 3  ;;  %v5525_v38 = vmul.f32 1.442695, %v5486_v8 }
0x148d   :  { %7283 = vpow2.f32 %v5515_v40  ;;  %v5495_v0 = vsub.f32 %v11477_v24, %v5455_v30  ;;  %v5496_v14 = vsub.f32 %v11511_v18, %v5455_v30  ;;  %v5498_v28 = vsub.f32 %v11513_v43, %v5456_v63 }
0x148e   :  { %7285 = vpow2.f32 %v5517_v5  ;;  %v5497_v24 = vsub.f32 %v11479_v9, %v5456_v63  ;;  %v5483_v18 = vsub.f32 %v11487_v55, %v5449_v32  ;;  %v5499_v25 = vsub.f32 %v11483_v51, %v5457_v48 }
0x148f   :  { %v5543_v36 = vmul.f32 1.442695, %v5495_v0  ;;  %v5545_v59 = vmul.f32 1.442695, %v5496_v14  ;;  %v5549_v29 = vmul.f32 1.442695, %v5498_v28  ;;  %v5484_v9 = vsub.f32 %v11515_v1, %v5449_v32 }
0x1490   :  { %v5547_v43 = vmul.f32 1.442695, %v5497_v24  ;;  %v5519_v6 = vmul.f32 1.442695, %v5483_v18  ;;  %v5551_v15 = vmul.f32 1.442695, %v5499_v25  ;;  %v5500_v51 = vsub.f32 %v11517_v49, %v5457_v48 }
0x1491   :  { %v11646_v17 = vpop.eup %7279  ;;  %7287 = vpow2.f32 %v5543_v36  ;;  %v5521_v35 = vmul.f32 1.442695, %v5484_v9  ;;  %v5485_v49 = vsub.f32 %v11485_v52, %v5450_v23  ;;  %v5501_v50 = vsub.f32 %v11493_v58, %v5458_v12 }
0x1492   :  { %v11648_v7 = vpop.eup %7281  ;;  %5608 = vperm.xlu2 %6993, %v11646_v17   ;;  %7289 = vpow2.f32 %v5545_v59  ;;  %v5553_v39 = vmul.f32 1.442695, %v5500_v51  ;;  %v5487_v40 = vsub.f32 %v11489_v2, %v5451_v37  ;;  %v5459_v0 = vperm.slane %v11643_v53, 4 }
0x1493   :  { %v11652_v56 = vpop.eup %7283  ;;  %5611 = vperm.xlu0 %6994, %v11648_v7   ;;  %7291 = vpow2.f32 %v5549_v29  ;;  %v5523_v31 = vmul.f32 1.442695, %v5485_v49  ;;  %v5555_v30 = vmul.f32 1.442695, %v5501_v50  ;;  %v5502_v58 = vsub.f32 %v11521_v60, %v5458_v12 }
0x1494   :  { %5614 = vperm.xlu1 %6995, %v11652_v56   ;;  %v11660_v46 = vpop.eup %7285  ;;  %7293 = vpow2.f32 %v5547_v43  ;;  %v5527_v52 = vmul.f32 1.442695, %v5487_v40  ;;  %v5488_v2 = vsub.f32 %v11523_v41, %v5451_v37  ;;  %v5504_v28 = vsub.f32 %v11537_v34, %v5459_v0 }
0x1495   :  { %7295 = vpow2.f32 %v5519_v6  ;;  %v5557_v36 = vmul.f32 1.442695, %v5502_v58  ;;  %v5452_v32 = vperm.slane %v11635_v42, 5  ;;  %v5460_v60 = vperm.slane %v11643_v53, 5 }
0x1496   :  { %7297 = vpow2.f32 %v5551_v15  ;;  %v5529_v59 = vmul.f32 1.442695, %v5488_v2  ;;  %v5561_v24 = vmul.f32 1.442695, %v5504_v28  ;;  %v5503_v41 = vsub.f32 %v11491_v3, %v5459_v0 }
0x1497   :  { %v11667_v54 = vpop.eup %7287  ;;  %7299 = vpow2.f32 %v5521_v35  ;;  %v5489_v34 = vsub.f32 %v11499_v62, %v5452_v32  ;;  %v5505_v25 = vsub.f32 %v11495_v10, %v5460_v60  ;;  %v5453_v3 = vperm.slane %v11635_v42, 6 }
0x1498   :  { %v11669_v11 = vpop.eup %7289  ;;  %7301 = vpow2.f32 %v5553_v39  ;;  %v5559_v43 = vmul.f32 1.442695, %v5503_v41  ;;  %v5490_v51 = vsub.f32 %v11541_v19, %v5452_v32  ;;  %v5506_v10 = vsub.f32 %v11547_v21, %v5460_v60 }
0x1499   :  { %v11675_v55 = vpop.eup %7291  ;;  %7303 = vpow2.f32 %v5525_v38  ;;  %v5531_v6 = vmul.f32 1.442695, %v5489_v34  ;;  %v5563_v9 = vmul.f32 1.442695, %v5505_v25  ;;  %v5492_v8 = vsub.f32 %v11585_v47, %v5453_v3 }
0x149a   :  { %5656 = vperm.xlu2 %6993, %v11667_v54   ;;  %v11681_v57 = vpop.eup %7293  ;;  %7305 = vpow2.f32 %v5523_v31  ;;  %v5533_v35 = vmul.f32 1.442695, %v5490_v51  ;;  %v5461_v12 = vperm.slane %v11643_v53, 6  ;;  %v5565_v39 = vmul.f32 1.442695, %v5506_v10 }
0x149b   :  { %5617 = vperm.xlu0 %6994, %v11660_v46   ;;  %v11683_v1 = vpop.eup %7295  ;;  %7307 = vpow2.f32 %v5555_v30  ;;  %v5454_v38 = vperm.slane %v11635_v42, 7  ;;  %v5537_v49 = vmul.f32 1.442695, %v5492_v8  ;;  %v5491_v21 = vsub.f32 %v11497_v45, %v5453_v3 }
0x149c   :  { %5665 = vperm.xlu1 %6995, %v11675_v55   ;;  %v11689_v16 = vpop.eup %7297  ;;  %7309 = vpow2.f32 %v5527_v52  ;;  %v5507_v50 = vsub.f32 %v11505_v26, %v5461_v12  ;;  %v5462_v0 = vperm.slane %v11643_v53, 7  ;;  %v5508_v26 = vsub.f32 %v11594_v20, %v5461_v12 }
0x149d   :  { %v11694_v5 = vpop.eup %7299  ;;  %7311 = vpow2.f32 %v5557_v36  ;;  %v5493_v40 = vsub.f32 %v11501_v44, %v5454_v38  ;;  %v5535_v31 = vmul.f32 1.442695, %v5491_v21  ;;  %v5494_v44 = vsub.f32 %v11600_v13, %v5454_v38 }
0x149e   :  { %v11696_v63 = vpop.eup %7301  ;;  %7313 = vpow2.f32 %v5529_v59  ;;  %v5567_v42 = vmul.f32 1.442695, %v5507_v50  ;;  %v5510_v2 = vsub.f32 %v11624_v22, %v5462_v0  ;;  %v5569_v28 = vmul.f32 1.442695, %v5508_v26 }
0x149f   :  { %v11702_v14 = vpop.eup %7303  ;;  %7315 = vpow2.f32 %v5561_v24  ;;  %v5539_v45 = vmul.f32 1.442695, %v5493_v40  ;;  %v5541_v36 = vmul.f32 1.442695, %v5494_v44  ;;  %v5509_v20 = vsub.f32 %v11503_v27, %v5462_v0 }
0x14a0   :  { %v11708_v48 = vpop.eup %7305  ;;  %7317 = vpow2.f32 %v5559_v43  ;;  %v5573_v59 = vmul.f32 1.442695, %v5510_v2 }
0x14a1   :  { %v11710_v29 = vpop.eup %7307  ;;  %7319 = vpow2.f32 %v5531_v6  ;;  %v5571_v22 = vmul.f32 1.442695, %v5509_v20 }
0x14a2   :  { %5662 = vperm.xlu2 %6993, %v11681_v57   ;;  %v11716_v18 = vpop.eup %7309  ;;  %7321 = vpow2.f32 %v5563_v9 }
0x14a3   :  { %5659 = vperm.xlu0 %6994, %v11669_v11   ;;  %v11721_v23 = vpop.eup %7311  ;;  %7323 = vpow2.f32 %v5533_v35 }
0x14a4   :  { %5668 = vperm.xlu1 %6995, %v11689_v16   ;;  %v11723_v15 = vpop.eup %7313  ;;  %7325 = vpow2.f32 %v5565_v39 }
0x14a5   :  { %v11729_v62 = vpop.eup %7315  ;;  %7327 = vpow2.f32 %v5537_v49 }
0x14a6   :  { %v11735_v37 = vpop.eup %7317  ;;  %7329 = vpow2.f32 %v5535_v31 }
0x14a7   :  { %v11737_v19 = vpop.eup %7319  ;;  %7331 = vpow2.f32 %v5567_v42 }
0x14a8   :  { %v11743_v47 = vpop.eup %7321  ;;  %7333 = vpow2.f32 %v5539_v45 }
0x14a9   :  { %v11748_v30 = vpop.eup %7323  ;;  %7335 = vpow2.f32 %v5569_v28 }
0x14aa   :  { %5623 = vperm.xlu2 %6993, %v11694_v5   ;;  %v11750_v52 = vpop.eup %7325  ;;  %7337 = vpow2.f32 %v5541_v36 }
0x14ab   :  { %5620 = vperm.xlu0 %6994, %v11683_v1   ;;  %v11756_v58 = vpop.eup %7327  ;;  %7339 = vpow2.f32 %v5573_v59 }
0x14ac   :  { %5629 = vperm.xlu1 %6995, %v11702_v14   ;;  %v11761_v53 = vpop.eup %7329  ;;  %7341 = vpow2.f32 %v5571_v22 }
0x14ad   :  { %v11763_v32 = vpop.eup %7331 }
0x14ae   :  { %v11768_v13 = vpop.eup %7333 }
0x14af   :  { %12471 = vst [vmem:[#allocation31_spill] sm:$0xff] %v11768_v13  ;;  %v11771_v60 = vpop.eup %7335 }
0x14b0   :  { %12472 = vst [vmem:[#allocation30_spill] sm:$0xff] %v11771_v60  ;;  %v11773_v24 = vpop.eup %7337 }
0x14b1   :  { %12473 = vst [vmem:[#allocation43_spill] sm:$0xff] %v11773_v24  ;;  %v11777_v27 = vpop.eup %7339 }
0x14b2   :  { %5626 = vperm.xlu2 %6993, %v11708_v48   ;;  %12474 = vst [vmem:[#allocation42_spill] sm:$0xff] %v11777_v27  ;;  %v11780_v41 = vpop.eup %7341 }
0x14b3   :  { %5671 = vperm.xlu0 %6994, %v11696_v63   ;;  %12475 = vst [vmem:[#allocation65_spill] sm:$0xff] %v11780_v41 }
0x14b4   :  { %5632 = vperm.xlu1 %6995, %v11716_v18  }
0x14ba   :  { %5677 = vperm.xlu2 %6993, %v11721_v23  }
0x14bb   :  { %5674 = vperm.xlu0 %6994, %v11710_v29  }
0x14bc   :  { %5683 = vperm.xlu1 %6995, %v11729_v62  }
0x14c2   :  { %5680 = vperm.xlu2 %6993, %v11735_v37  }
0x14c3   :  { %5635 = vperm.xlu0 %6994, %v11723_v15  }
0x14c4   :  { %5686 = vperm.xlu1 %6995, %v11743_v47  }
0x14ca   :  { %5641 = vperm.xlu2 %6993, %v11748_v30  }
0x14cb   :  { %5638 = vperm.xlu0 %6994, %v11737_v19  }
0x14cc   :  { %5647 = vperm.xlu1 %6995, %v11756_v58  }
0x14d2   :  { %5644 = vperm.xlu2 %6993, %v11761_v53  }
0x14d3   :  { %5689 = vperm.xlu0 %6994, %v11750_v52  }
0x14d4   :  { %5650 = vperm.xlu1 %6995, %v11768_v13  }
0x14da   :  { %5695 = vperm.xlu2 %6993, %v11771_v60  }
0x14db   :  { %5692 = vperm.xlu0 %6994, %v11763_v32  }
0x14dc   :  { %5701 = vperm.xlu1 %6995, %v11777_v27  }
0x14e2   :  { %5698 = vperm.xlu2 %6993, %v11780_v41  }
0x14e3   :  { %5653 = vperm.xlu0 %6994, %v11773_v24  }
0x14ec   :  { %v5609_v34 = vpop.permute.xlu2 %5608 }
0x14ed   :  { %v5703_v3 = vperm.slane %v5609_v34, %v8417_v33 }
0x14f4   :  { %v5657_v25 = vpop.permute.xlu2 %5656 }
0x14fc   :  { %v5663_v43 = vpop.permute.xlu2 %5662 }
0x14fd   :  { %v5730_v41 = vperm.slane %v5663_v43, %v8417_v33 }
0x1504   :  { %v5624_v12 = vpop.permute.xlu2 %5623 }
0x1505   :  { %v5612_v6 = vpop.permute.xlu0 %5611 }
0x1506   :  { %v5704_v9 = vperm.slane %v5612_v6, %v8420_v61  ;;  %v5615_v10 = vpop.permute.xlu1 %5614 }
0x1507   :  { %v5706_v35 = vperm.slane %v5615_v10, %v8417_v33  ;;  %v5710_v10 = vperm.slane %v5624_v12, %v8420_v61 }
0x1508   :  { %v5705_v51 = vsel %vm765_vm3, %v5704_v9, %v5703_v3 }
0x150c   :  { %v5627_v40 = vpop.permute.xlu2 %5626 }
0x150d   :  { %v5618_v8 = vpop.permute.xlu0 %5617  ;;  %v5712_v13 = vperm.slane %v5627_v40, %v8417_v33 }
0x150e   :  { %v5707_v39 = vperm.slane %v5618_v8, %v8420_v61  ;;  %v5666_v50 = vpop.permute.xlu1 %5665 }
0x1510   :  { %v5708_v38 = vsel %vm765_vm3, %v5707_v39, %v5706_v35  ;;  %v5731_v35 = vperm.slane %v5666_v50, %v8420_v61 }
0x1511   :  { %v5751_v49 = vsel %vm812_vm4, %v5708_v38, %v5705_v51  ;;  %v5727_v38 = vperm.slane %v5657_v25, %v8417_v33 }
0x1512   :  { %v5732_v25 = vsel %vm765_vm3, %v5731_v35, %v5730_v41 }
0x1514   :  { %v5678_v45 = vpop.permute.xlu2 %5677 }
0x1515   :  { %v5660_v21 = vpop.permute.xlu0 %5659 }
0x1516   :  { %v5669_v42 = vpop.permute.xlu1 %5668  ;;  %v5728_v8 = vperm.slane %v5660_v21, %v8420_v61 }
0x1517   :  { %v5733_v21 = vperm.slane %v5669_v42, %v8417_v33 }
0x1518   :  { %v5729_v12 = vsel %vm765_vm3, %v5728_v8, %v5727_v38 }
0x151c   :  { %v5681_v44 = vpop.permute.xlu2 %5680 }
0x151d   :  { %v5621_v31 = vpop.permute.xlu0 %5620 }
0x151e   :  { %v5630_v26 = vpop.permute.xlu1 %5629  ;;  %v5709_v9 = vperm.slane %v5621_v31, %v8417_v33 }
0x151f   :  { %v5713_v24 = vperm.slane %v5630_v26, %v8420_v61 }
0x1520   :  { %v5711_v4 = vsel %vm765_vm3, %v5710_v10, %v5709_v9  ;;  %v5737_v9 = vperm.slane %v5678_v45, %v8420_v61 }
0x1521   :  { %v5752_v26 = vsel %vm814_vm5, %v5711_v4, %v5751_v49  ;;  %v5714_v43 = vsel %vm765_vm3, %v5713_v24, %v5712_v13  ;;  %v5739_v4 = vperm.slane %v5681_v44, %v8417_v33 }
0x1524   :  { %v5642_v59 = vpop.permute.xlu2 %5641 }
0x1525   :  { %v5672_v0 = vpop.permute.xlu0 %5671  ;;  %v5719_v8 = vperm.slane %v5642_v59, %v8420_v61 }
0x1526   :  { %v5633_v28 = vpop.permute.xlu1 %5632  ;;  %v5734_v27 = vperm.slane %v5672_v0, %v8420_v61 }
0x1527   :  { %v5715_v40 = vperm.slane %v5633_v28, %v8417_v33 }
0x152c   :  { %v5645_v6 = vpop.permute.xlu2 %5644 }
0x152d   :  { %v5675_v2 = vpop.permute.xlu0 %5674  ;;  %v5721_v44 = vperm.slane %v5645_v6, %v8417_v33 }
0x152e   :  { %v5684_v20 = vpop.permute.xlu1 %5683  ;;  %v5736_v31 = vperm.slane %v5675_v2, %v8417_v33  ;;  %v5735_v2 = vsel %vm765_vm3, %v5734_v27, %v5733_v21  ;;  %v5753_v27 = vsel %vm816_vm6, %v5714_v43, %v5752_v26 }
0x152f   :  { %v5740_v10 = vperm.slane %v5684_v20, %v8420_v61 }
0x1530   :  { %v5738_v41 = vsel %vm765_vm3, %v5737_v9, %v5736_v31 }
0x1534   :  { %v5696_v39 = vpop.permute.xlu2 %5695 }
0x1535   :  { %v5636_v36 = vpop.permute.xlu0 %5635  ;;  %v5746_v35 = vperm.slane %v5696_v39, %v8420_v61 }
0x1536   :  { %v5687_v34 = vpop.permute.xlu1 %5686  ;;  %v5716_v50 = vperm.slane %v5636_v36, %v8420_v61  ;;  %v5758_v36 = vsel %vm812_vm4, %v5732_v25, %v5729_v12 }
0x1537   :  { %v5759_v28 = vsel %vm814_vm5, %v5735_v2, %v5758_v36  ;;  %v5742_v20 = vperm.slane %v5687_v34, %v8417_v33 }
0x1538   :  { %v5717_v49 = vsel %vm765_vm3, %v5716_v50, %v5715_v40 }
0x153c   :  { %v5699_v38 = vpop.permute.xlu2 %5698 }
0x153d   :  { %v5639_v22 = vpop.permute.xlu0 %5638  ;;  %v5748_v39 = vperm.slane %v5699_v38, %v8417_v33 }
0x153e   :  { %v5648_v51 = vpop.permute.xlu1 %5647  ;;  %v5718_v0 = vperm.slane %v5639_v22, %v8417_v33  ;;  %v5760_v22 = vsel %vm816_vm6, %v5738_v41, %v5759_v28 }
0x153f   :  { %v5722_v13 = vperm.slane %v5648_v51, %v8420_v61  ;;  %v5754_v51 = vsel %vm818_vm7, %v5717_v49, %v5753_v27 }
0x1540   :  { %v5720_v59 = vsel %vm765_vm3, %v5719_v8, %v5718_v0 }
0x1541   :  { %v5723_v31 = vsel %vm765_vm3, %v5722_v13, %v5721_v44  ;;  %v5755_v21 = vsel %vm820_vm8, %v5720_v59, %v5754_v51 }
0x1542   :  { %v5756_v40 = vsel %vm822_vm9, %v5723_v31, %v5755_v21 }
0x1545   :  { %v5690_v3 = vpop.permute.xlu0 %5689 }
0x1546   :  { %v5651_v42 = vpop.permute.xlu1 %5650  ;;  %v5743_v45 = vperm.slane %v5690_v3, %v8420_v61  ;;  %v5741_v3 = vsel %vm765_vm3, %v5740_v10, %v5739_v4 }
0x1547   :  { %v5761_v50 = vsel %vm818_vm7, %v5741_v3, %v5760_v22  ;;  %v5724_v25 = vperm.slane %v5651_v42, %v8417_v33 }
0x154d   :  { %v5693_v60 = vpop.permute.xlu0 %5692 }
0x154e   :  { %v5745_v24 = vperm.slane %v5693_v60, %v8417_v33  ;;  %v5744_v60 = vsel %vm765_vm3, %v5743_v45, %v5742_v20  ;;  %v5702_v9 = vpop.permute.xlu1 %5701 }
0x154f   :  { %v5762_v26 = vsel %vm820_vm8, %v5744_v60, %v5761_v50  ;;  %v5749_v0 = vperm.slane %v5702_v9, %v8420_v61 }
0x1550   :  { %v5747_v12 = vsel %vm765_vm3, %v5746_v35, %v5745_v24 }
0x1551   :  { %v5763_v43 = vsel %vm822_vm9, %v5747_v12, %v5762_v26  ;;  %v5750_v36 = vsel %vm765_vm3, %v5749_v0, %v5748_v39 }
0x1552   :  { %v5764_v8 = vsel %vm824_vm10, %v5750_v36, %v5763_v43 }
0x1553   :  { %v5770_v41 = vsel %vm246_vm0, %v5764_v8, 0.0 }
0x1554   :  { %5771 = vadd.xlane.f32.xlu2 %v5770_v41 }
0x1555   :  { %v5654_v34 = vpop.permute.xlu0 %5653 }
0x1556   :  { %v5725_v6 = vperm.slane %v5654_v34, %v8420_v61 }
0x1558   :  { %v5726_v2 = vsel %vm765_vm3, %v5725_v6, %v5724_v25 }
0x1559   :  { %v5757_v10 = vsel %vm824_vm10, %v5726_v2, %v5756_v40 }
0x155a   :  { %v5767_v42 = vsel %vm246_vm0, %v5757_v10, 0.0 }
0x155b   :  { %5768 = vadd.xlane.f32.xlu0 %v5767_v42 }
0x15c7   :  { %v5772_v4 = vpop.xlane.xlu2 %5771 }
0x15ce   :  { %v5769_v45 = vpop.xlane.xlu0 %5768 }
0x15cf   :  { %7343 = vrcp.f32 %v5769_v45 }
0x15d0   :  { %7345 = vrcp.f32 %v5772_v4 }
0x15d5   :  { %v11847_v49 = vpop.eup %7343 }
0x15d6   :  { %v5777_v13 = vperm.slane %v11847_v49, 0  ;;  %v11850_v24 = vpop.eup %7345  ;;  %v5780_v27 = vperm.slane %v11847_v49, 3  ;;  %v5778_v25 = vperm.slane %v11847_v49, 1  ;;  %v5781_v40 = vperm.slane %v11847_v49, 4 }
0x15d7   :  { %v5786_v28 = vperm.slane %v11850_v24, 1  ;;  %v5785_v20 = vperm.slane %v11850_v24, 0  ;;  %v5787_v3 = vperm.slane %v11850_v24, 2  ;;  %v5789_v2 = vperm.slane %v11850_v24, 4 }
0x15d8   :  { %v5809_v59 = vmul.f32 %v11646_v17, %v5777_v13  ;;  %v5810_v22 = vmul.f32 %v11648_v7, %v5777_v13  ;;  %v5815_v34 = vmul.f32 %v11708_v48, %v5780_v27  ;;  %v5816_v17 = vmul.f32 %v11702_v14, %v5780_v27 }
0x15d9   :  { %v5827_v44 = vmul.f32 %v11681_v57, %v5786_v28  ;;  %v5828_v35 = vmul.f32 %v11675_v55, %v5786_v28  ;;  %v5825_v51 = vmul.f32 %v11667_v54, %v5785_v20  ;;  %v5826_v38 = vmul.f32 %v11669_v11, %v5785_v20 }
0x15da   :  { %v5841_v60 = vpack.c.bf16 %v5810_v22, %v5809_v59  ;;  %v5829_v57 = vmul.f32 %v11689_v16, %v5787_v3  ;;  %v5830_v55 = vmul.f32 %v11696_v63, %v5787_v3  ;;  %v5844_v54 = vpack.c.bf16 %v5816_v17, %v5815_v34 }
0x15db   :  { %v11862_v31 = vpack.c.bf16 %v5828_v35, %v5827_v44  ;;  %v5849_v12 = vpack.c.bf16 %v5826_v38, %v5825_v51  ;;  %v5788_v11 = vperm.slane %v11850_v24, 3  ;;  %v5811_v16 = vmul.f32 %v11652_v56, %v5778_v25 }
0x15dc   :  { %v5878_v21 = vunpack.c.l.b16 %v5841_v60  ;;  %v11871_v6 = vpack.c.bf16 %v5830_v55, %v5829_v57  ;;  %v5884_v48 = vunpack.c.l.b16 %v5844_v54  ;;  %v5879_v39 = vunpack.c.h.b16 %v5841_v60 }
0x15dd   :  { %v5897_v7 = vunpack.c.h.b16 %v11862_v31  ;;  %v5895_v50 = vunpack.c.h.b16 %v5849_v12  ;;  %v5831_v14 = vmul.f32 %v11710_v29, %v5788_v11  ;;  %v5832_v9 = vmul.f32 %v11721_v23, %v5788_v11 }
0x15de   :  { %5911 = vperm.xlu1 %6995, %v5878_v21   ;;  %v5812_v63 = vmul.f32 %v11660_v46, %v5778_v25  ;;  %v5898_v26 = vunpack.c.l.b16 %v11871_v6  ;;  %v5885_v10 = vunpack.c.h.b16 %v5844_v54  ;;  %v5833_v56 = vmul.f32 %v11735_v37, %v5789_v2  ;;  %v12478_v25 = vld [vmem:[#allocation65_spill] sm:$0xff] }
0x15df   :  { %5968 = vperm.xlu2 %6993, %v5897_v7   ;;  %5962 = vperm.xlu0 %6994, %v5895_v50   ;;  %v11878_v0 = vpack.c.bf16 %v5832_v9, %v5831_v14  ;;  %v5834_v46 = vmul.f32 %v11729_v62, %v5789_v2  ;;  %v5817_v36 = vmul.f32 %v11716_v18, %v5781_v40  ;;  %v5782_v45 = vperm.slane %v11847_v49, 5  ;;  %v12479_v14 = vld [vmem:[#allocation42_spill] sm:$0xff] }
0x15e0   :  { %v5842_v43 = vpack.c.bf16 %v5812_v63, %v5811_v16  ;;  %v5818_v42 = vmul.f32 %v11723_v15, %v5781_v40  ;;  %v5783_v18 = vperm.slane %v11847_v49, 6  ;;  %v5790_v28 = vperm.slane %v11850_v24, 5 }
0x15e1   :  { %v5901_v29 = vunpack.c.h.b16 %v11878_v0  ;;  %v5853_v8 = vpack.c.bf16 %v5834_v46, %v5833_v56  ;;  %v5819_v37 = vmul.f32 %v11737_v19, %v5782_v45  ;;  %v5820_v62 = vmul.f32 %v11748_v30, %v5782_v45 }
0x15e2   :  { %v5880_v23 = vunpack.c.l.b16 %v5842_v43  ;;  %v11887_v41 = vpack.c.bf16 %v5818_v42, %v5817_v36  ;;  %v5881_v4 = vunpack.c.h.b16 %v5842_v43  ;;  %v5894_v20 = vunpack.c.l.b16 %v5849_v12 }
0x15e3   :  { %v5902_v13 = vunpack.c.l.b16 %v5853_v8  ;;  %v5846_v15 = vpack.c.bf16 %v5820_v62, %v5819_v37  ;;  %v5821_v59 = vmul.f32 %v11761_v53, %v5783_v18  ;;  %v5822_v22 = vmul.f32 %v11756_v58, %v5783_v18 }
0x15e4   :  { %v5886_v27 = vunpack.c.l.b16 %v11887_v41  ;;  %v5903_v44 = vunpack.c.h.b16 %v5853_v8  ;;  %v5835_v35 = vmul.f32 %v11743_v47, %v5790_v28  ;;  %v5836_v19 = vmul.f32 %v11750_v52, %v5790_v28  ;;  %v12476_v52 = vld [vmem:[#allocation30_spill] sm:$0xff] }
0x15e5   :  { %v5889_v3 = vunpack.c.h.b16 %v5846_v15  ;;  %v5779_v30 = vperm.slane %v11847_v49, 2  ;;  %v5847_v51 = vpack.c.bf16 %v5822_v22, %v5821_v59  ;;  %v5791_v60 = vperm.slane %v11850_v24, 6 }
0x15e6   :  { %5914 = vperm.xlu1 %6995, %v5879_v39   ;;  %v5854_v38 = vpack.c.bf16 %v5836_v19, %v5835_v35  ;;  %v5896_v12 = vunpack.c.l.b16 %v11862_v31  ;;  %v5784_v50 = vperm.slane %v11847_v49, 7  ;;  %v5792_v55 = vperm.slane %v11850_v24, 7  ;;  %v12480_v39 = vld [vmem:[#allocation43_spill] sm:$0xff]  ;;  %v6615_v24 = vld [vmem:[%s12166_s24 + $0x8] sm:$0xff] }
0x15e7   :  { %5929 = vperm.xlu2 %6993, %v5884_v48   ;;  %5971 = vperm.xlu0 %6994, %v5898_v26   ;;  %v5813_v53 = vmul.f32 %v11683_v1, %v5779_v30  ;;  %v5814_v58 = vmul.f32 %v11694_v5, %v5779_v30  ;;  %v5890_v34 = vunpack.c.l.b16 %v5847_v51  ;;  %v5837_v47 = vmul.f32 %v11763_v32, %v5791_v60  ;;  %v12477_v1 = vld [vmem:[#allocation31_spill] sm:$0xff] }
0x15e8   :  { %v5904_v17 = vunpack.c.l.b16 %v5854_v38  ;;  %v5838_v21 = vmul.f32 %v12476_v52, %v5791_v60  ;;  %v5891_v31 = vunpack.c.h.b16 %v5847_v51  ;;  %v5823_v11 = vmul.f32 %v12477_v1, %v5784_v50 }
0x15e9   :  { %v5843_v7 = vpack.c.bf16 %v5814_v58, %v5813_v53  ;;  %v5839_v48 = vmul.f32 %v12478_v25, %v5792_v55  ;;  %v5840_v32 = vmul.f32 %v12479_v14, %v5792_v55  ;;  %v5824_v9 = vmul.f32 %v12480_v39, %v5784_v50  ;;  %v6936_v25 = vld [vmem:[%s12158_s16 + $0x24] sm:$0xf]  ;;  %v6934_v39 = vld [vmem:[%s12158_s16 + $0x14] sm:$0xf] }
0x15ea   :  { %v5855_v57 = vpack.c.bf16 %v5838_v21, %v5837_v47  ;;  %v5899_v2 = vunpack.c.h.b16 %v11871_v6  ;;  %v5905_v56 = vunpack.c.h.b16 %v5854_v38  ;;  %v6614_v6 = vld [vmem:[%s12166_s24] sm:$0xff] }
0x15eb   :  { %v5882_v54 = vunpack.c.l.b16 %v5843_v7  ;;  %v5856_v16 = vpack.c.bf16 %v5840_v32, %v5839_v48  ;;  %v5848_v63 = vpack.c.bf16 %v5824_v9, %v5823_v11  ;;  %v5883_v49 = vunpack.c.h.b16 %v5843_v7  ;;  %v6750_v48 = vld [vmem:[%s12158_s16 + $0x28] sm:$0xf0]  ;;  %v6742_v9 = vld [vmem:[%s12158_s16 + $0x18] sm:$0xf0] }
0x15ec   :  { %v5907_v5 = vunpack.c.h.b16 %v5855_v57  ;;  %v5906_v46 = vunpack.c.l.b16 %v5855_v57  ;;  %v6753_v32 = vor.u32 %v6936_v25, %v6750_v48  ;;  %v6954_v25 = vld [vmem:[%s12160_s18 + $0x34] sm:$0xf]  ;;  %v6826_v48 = vld [vmem:[%s12160_s18 + $0x38] sm:$0xf0] }
0x15ed   :  { %v5908_v26 = vunpack.c.l.b16 %v5856_v16  ;;  %v5892_v43 = vunpack.c.l.b16 %v5848_v63  ;;  %v5909_v40 = vunpack.c.h.b16 %v5856_v16  ;;  %v5893_v36 = vunpack.c.h.b16 %v5848_v63  ;;  %v6932_v63 = vld [vmem:[%s12158_s16 + $0x4] sm:$0xf] }
0x15ee   :  { %5917 = vperm.xlu1 %6995, %v5880_v23   ;;  %v5888_v23 = vunpack.c.l.b16 %v5846_v15  ;;  %v6745_v16 = vor.u32 %v6934_v39, %v6742_v9 }
0x15ef   :  { %5980 = vperm.xlu2 %6993, %v5901_v29   ;;  %5932 = vperm.xlu0 %6994, %v5885_v10   ;;  %v5900_v29 = vunpack.c.l.b16 %v11878_v0  ;;  %v5887_v10 = vunpack.c.h.b16 %v11887_v41 }
0x15f6   :  { %5920 = vperm.xlu1 %6995, %v5881_v4  }
0x15f7   :  { %5983 = vperm.xlu2 %6993, %v5902_v13   ;;  %5935 = vperm.xlu0 %6994, %v5886_v27  }
0x15fe   :  { %5959 = vperm.xlu1 %6995, %v5894_v20  }
0x15ff   :  { %5944 = vperm.xlu2 %6993, %v5889_v3   ;;  %5986 = vperm.xlu0 %6994, %v5903_v44  }
0x1606   :  { %5965 = vperm.xlu1 %6995, %v5896_v12  }
0x1607   :  { %5947 = vperm.xlu2 %6993, %v5890_v34   ;;  %5989 = vperm.xlu0 %6994, %v5904_v17  }
0x160e   :  { %5923 = vperm.xlu1 %6995, %v5882_v54   ;;  %v6758_v54 = vld [vmem:[%s12158_s16 + $0x38] sm:$0xf0] }
0x160f   :  { %5998 = vperm.xlu2 %6993, %v5907_v5   ;;  %5950 = vperm.xlu0 %6994, %v5891_v31   ;;  %v6938_v31 = vld [vmem:[%s12158_s16 + $0x34] sm:$0xf] }
0x1610   :  { %v6761_v5 = vor.u32 %v6938_v31, %v6758_v54 }
0x1612   :  { %6214 = vmatpush.bf16.msra.mxu2 %v6761_v5 }
0x1616   :  { %5926 = vperm.xlu1 %6995, %v5883_v49   ;;  %6215 = vmatpush.bf16.msra.mxu2 %v6753_v32  ;;  %v6734_v49 = vld [vmem:[%s12158_s16 + $0x8] sm:$0xf0] }
0x1617   :  { %6001 = vperm.xlu2 %6993, %v5908_v26   ;;  %5953 = vperm.xlu0 %6994, %v5892_v43  }
0x161a   :  { %6216 = vmatpush.bf16.msra.mxu2 %v6745_v16  ;;  %v6829_v16 = vor.u32 %v6954_v25, %v6826_v48 }
0x161e   :  { %5974 = vperm.xlu1 %6995, %v5899_v2  }
0x161f   :  { %6625 = vperm.xlu2 %6993, %v6615_v24   ;;  %6004 = vperm.xlu0 %6994, %v5909_v40   ;;  %v6737_v24 = vor.u32 %v6932_v63, %v6734_v49  ;;  %v12481_v49 = vld [vmem:[#allocation63_spill] sm:$0xff] }
0x1621   :  { %6217 = vmatpush.bf16.msra.mxu2 %v6737_v24  ;;  %v6952_v24 = vld [vmem:[%s12160_s18 + $0x24] sm:$0xf] }
0x1626   :  { %5977 = vperm.xlu1 %6995, %v5900_v29  }
0x162e   :  { %5938 = vperm.xlu1 %6995, %v5887_v10  }
0x1636   :  { %5941 = vperm.xlu1 %6995, %v5888_v23  }
0x1639   :  { %v5969_v20 = vpop.permute.xlu2 %5968 }
0x163a   :  { %v6034_v44 = vperm.slane %v5969_v20, %v8420_v61 }
0x163e   :  { %5992 = vperm.xlu1 %6995, %v5905_v56  }
0x1641   :  { %v11939_v53 = vpop.permute.xlu2 %5929 }
0x1646   :  { %5995 = vperm.xlu1 %6995, %v5906_v46  }
0x1649   :  { %v5981_v17 = vpop.permute.xlu2 %5980 }
0x164a   :  { %v6040_v46 = vperm.slane %v5981_v17, %v8420_v61 }
0x164e   :  { %5956 = vperm.xlu1 %6995, %v5893_v36   ;;  %v6824_v36 = vld [vmem:[%s12160_s18 + $0x30] sm:$0xf] }
0x1650   :  { %v5912_v42 = vpop.permute.xlu1 %5911 }
0x1651   :  { %v6006_v0 = vperm.slane %v5912_v42, %v8417_v33  ;;  %v5963_v18 = vpop.permute.xlu0 %5962  ;;  %v11945_v21 = vpop.permute.xlu2 %5983  ;;  %v6955_v42 = vld [vmem:[%s12160_s18 + $0x34] sm:$0xf0] }
0x1652   :  { %v6031_v35 = vperm.slane %v5963_v18, %v8420_v61 }
0x1656   :  { %6620 = vperm.xlu1 %6995, %v6614_v6  }
0x1658   :  { %v5915_v8 = vpop.permute.xlu1 %5914 }
0x1659   :  { %v6007_v41 = vperm.slane %v5915_v8, %v8420_v61  ;;  %v5972_v59 = vpop.permute.xlu0 %5971  ;;  %v5945_v57 = vpop.permute.xlu2 %5944 }
0x165a   :  { %v6036_v23 = vperm.slane %v5972_v59, %v8417_v33  ;;  %v6022_v59 = vperm.slane %v5945_v57, %v8420_v61 }
0x165b   :  { %v6008_v45 = vsel %vm765_vm3, %v6007_v41, %v6006_v0 }
0x1660   :  { %v5918_v4 = vpop.permute.xlu1 %5917 }
0x1661   :  { %v6009_v27 = vperm.slane %v5918_v4, %v8417_v33  ;;  %v11937_v60 = vpop.permute.xlu0 %5932  ;;  %v11961_v14 = vpop.permute.xlu2 %5947 }
0x1662   :  { %v6016_v4 = vperm.slane %v11937_v60, %v8420_v61 }
0x1668   :  { %v5921_v13 = vpop.permute.xlu1 %5920 }
0x1669   :  { %v6010_v37 = vperm.slane %v5921_v13, %v8420_v61  ;;  %v11941_v34 = vpop.permute.xlu0 %5935  ;;  %v5999_v2 = vpop.permute.xlu2 %5998 }
0x166a   :  { %v6018_v18 = vperm.slane %v11941_v34, %v8417_v33 }
0x166b   :  { %v6011_v62 = vsel %vm765_vm3, %v6010_v37, %v6009_v27 }
0x166c   :  { %v11928_v15 = vsel %vm812_vm4, %v6011_v62, %v6008_v45  ;;  %v6825_v45 = vor.u32 %v6955_v42, %v6824_v36  ;;  %v6015_v62 = vperm.slane %v11939_v53, %v8417_v33 }
0x166e   :  { %6364 = vmatpush.bf16.msra.mxu0 %v6825_v45  ;;  %v6802_v45 = vld [vmem:[%s12160_s18 + $0x8] sm:$0xf0] }
0x1670   :  { %v5960_v28 = vpop.permute.xlu1 %5959 }
0x1671   :  { %v6030_v22 = vperm.slane %v5960_v28, %v8417_v33  ;;  %v11943_v52 = vpop.permute.xlu0 %5986  ;;  %v6002_v34 = vpop.permute.xlu2 %6001 }
0x1672   :  { %v6043_v28 = vperm.slane %v11943_v52, %v8420_v61  ;;  %v6051_v54 = vperm.slane %v6002_v34, %v8417_v33  ;;  %v6966_v34 = vld [vmem:[%s12162_s20 + $0x50] sm:$0xff] }
0x1673   :  { %v6032_v30 = vsel %vm765_vm3, %v6031_v35, %v6030_v22  ;;  %v6042_v35 = vperm.slane %v11945_v21, %v8417_v33 }
0x1678   :  { %v5966_v3 = vpop.permute.xlu1 %5965 }
0x1679   :  { %v6033_v19 = vperm.slane %v5966_v3, %v8417_v33  ;;  %v5990_v50 = vpop.permute.xlu0 %5989 }
0x167a   :  { %v6045_v22 = vperm.slane %v5990_v50, %v8417_v33  ;;  %v6024_v50 = vperm.slane %v11961_v14, %v8417_v33 }
0x167b   :  { %v6035_v51 = vsel %vm765_vm3, %v6034_v44, %v6033_v19  ;;  %v6049_v19 = vperm.slane %v5999_v2, %v8420_v61 }
0x167c   :  { %v6061_v38 = vsel %vm812_vm4, %v6035_v51, %v6032_v30 }
0x1680   :  { %v5924_v12 = vpop.permute.xlu1 %5923 }
0x1681   :  { %v11953_v1 = vpop.permute.xlu0 %5950  ;;  %v6012_v56 = vperm.slane %v5924_v12, %v8417_v33  ;;  %v6017_v12 = vsel %vm765_vm3, %v6016_v4, %v6015_v62  ;;  %v6970_v62 = vld [vmem:[%s12162_s20 + $0x70] sm:$0xff] }
0x1688   :  { %v5927_v58 = vpop.permute.xlu1 %5926 }
0x1689   :  { %v5954_v43 = vpop.permute.xlu0 %5953  ;;  %v6013_v40 = vperm.slane %v5927_v58, %v8420_v61 }
0x168b   :  { %v6014_v6 = vsel %vm765_vm3, %v6013_v40, %v6012_v56  ;;  %v6818_v40 = vld [vmem:[%s12160_s18 + $0x28] sm:$0xf0]  ;;  %v6950_v56 = vld [vmem:[%s12160_s18 + $0x14] sm:$0xf] }
0x168c   :  { %v6055_v3 = vsel %vm814_vm5, %v6014_v6, %v11928_v15  ;;  %v6044_v15 = vsel %vm765_vm3, %v6043_v28, %v6042_v35  ;;  %v6800_v6 = vld [vmem:[%s12160_s18] sm:$0xf]  ;;  %v6969_v28 = vld [vmem:[%s12162_s20 + $0x68] sm:$0xff] }
0x168d   :  { %v6056_v17 = vsel %vm816_vm6, %v6017_v12, %v6055_v3  ;;  %v6967_v12 = vld [vmem:[%s12162_s20 + $0x58] sm:$0xff] }
0x1690   :  { %v5975_v47 = vpop.permute.xlu1 %5974 }
0x1691   :  { %v6037_v29 = vperm.slane %v5975_v47, %v8420_v61  ;;  %v6005_v30 = vpop.permute.xlu0 %6004 }
0x1692   :  { %v6052_v52 = vperm.slane %v6005_v30, %v8420_v61  ;;  %v6959_v30 = vld [vmem:[%s12162_s20 + $0x18] sm:$0xff] }
0x1693   :  { %v6038_v8 = vsel %vm765_vm3, %v6037_v29, %v6036_v23  ;;  %v6808_v29 = vld [vmem:[%s12160_s18 + $0x10] sm:$0xf]  ;;  %v6821_v23 = vor.u32 %v6952_v24, %v6818_v40 }
0x1694   :  { %v6062_v44 = vsel %vm814_vm5, %v6038_v8, %v6061_v38  ;;  %v6025_v38 = vperm.slane %v11953_v1, %v8420_v61  ;;  %v6027_v1 = vperm.slane %v5954_v43, %v8417_v33  ;;  %v6053_v32 = vsel %vm765_vm3, %v6052_v52, %v6051_v54  ;;  %v6953_v43 = vld [vmem:[%s12160_s18 + $0x24] sm:$0xf0] }
0x1695   :  { %v6949_v8 = vld [vmem:[%s12160_s18 + $0x4] sm:$0xf0] }
0x1696   :  { %v6026_v14 = vsel %vm765_vm3, %v6025_v38, %v6024_v50  ;;  %v6956_v38 = vld [vmem:[%s12162_s20] sm:$0xff] }
0x1698   :  { %v5978_v7 = vpop.permute.xlu1 %5977 }
0x1699   :  { %v6039_v10 = vperm.slane %v5978_v7, %v8417_v33 }
0x169b   :  { %v6041_v13 = vsel %vm765_vm3, %v6040_v46, %v6039_v10  ;;  %v6951_v10 = vld [vmem:[%s12160_s18 + $0x14] sm:$0xf0]  ;;  %v6810_v46 = vld [vmem:[%s12160_s18 + $0x18] sm:$0xf0] }
0x169c   :  { %v6063_v51 = vsel %vm816_vm6, %v6041_v13, %v6062_v44  ;;  %v6809_v36 = vor.u32 %v6951_v10, %v6808_v29  ;;  %v6813_v42 = vor.u32 %v6950_v56, %v6810_v46  ;;  %v6963_v13 = vld [vmem:[%s12162_s20 + $0x38] sm:$0xff] }
0x169d   :  { %v6064_v7 = vsel %vm818_vm7, %v6044_v15, %v6063_v51  ;;  %6530 = vmatpush.bf16.msra.mxu3 %v6963_v13  ;;  %v6968_v51 = vld [vmem:[%s12162_s20 + $0x60] sm:$0xff]  ;;  %v6205_v15 = vpop.f32.mrf.mxu0  ;;  %v6974_v13 = vld [vmem:[#allocation15 + $0x10] sm:$0xff] }
0x16a0   :  { %v5939_v55 = vpop.permute.xlu1 %5938 }
0x16a1   :  { %v6019_v0 = vperm.slane %v5939_v55, %v8420_v61 }
0x16a3   :  { %v6020_v60 = vsel %vm765_vm3, %v6019_v0, %v6018_v18  ;;  %v6948_v0 = vld [vmem:[%s12160_s18 + $0x4] sm:$0xf]  ;;  %v6961_v18 = vld [vmem:[%s12162_s20 + $0x28] sm:$0xff] }
0x16a4   :  { %v6057_v21 = vsel %vm818_vm7, %v6020_v60, %v6056_v17  ;;  %v6805_v4 = vor.u32 %v6948_v0, %v6802_v45  ;;  %v6958_v60 = vld [vmem:[%s12162_s20 + $0x10] sm:$0xff]  ;;  %v6134_v17 = vpop.f32.mrf.mxu1 }
0x16a5   :  { %v6207_v50 = vpop.f32.mrf.mxu0 }
0x16a8   :  { %v5942_v11 = vpop.permute.xlu1 %5941 }
0x16a9   :  { %v6021_v27 = vperm.slane %v5942_v11, %v8417_v33 }
0x16ab   :  { %v6023_v53 = vsel %vm765_vm3, %v6022_v59, %v6021_v27  ;;  %v6971_v27 = vld [vmem:[%s12162_s20 + $0x78] sm:$0xff]  ;;  %v6960_v59 = vld [vmem:[%s12162_s20 + $0x20] sm:$0xff] }
0x16ac   :  { %v6058_v57 = vsel %vm820_vm8, %v6023_v53, %v6057_v21  ;;  %6544 = vmatpush.bf16.msrb.mxu1 %v6971_v27  ;;  %v6120_v53 = vpop.f32.mrf.mxu3  ;;  %v6973_v27 = vld [vmem:[#allocation15 + $0x8] sm:$0xff] }
0x16ad   :  { %v6059_v39 = vsel %vm822_vm9, %v6026_v14, %v6058_v57  ;;  %v6086_v57 = vld [vmem:[#allocation12] sm:$0x3] }
0x16ae   :  { %v6141_v25 = vperm.slane %v6086_v57, 1 }
0x16b0   :  { %v5993_v26 = vpop.permute.xlu1 %5992  ;;  %6545 = vmatpush.bf16.msrb.mxu1 %v6970_v62 }
0x16b1   :  { %v6046_v37 = vperm.slane %v5993_v26, %v8420_v61  ;;  %v6816_v26 = vld [vmem:[%s12160_s18 + $0x20] sm:$0xf] }
0x16b2   :  { %v6817_v2 = vor.u32 %v6953_v43, %v6816_v26 }
0x16b3   :  { %v6047_v58 = vsel %vm765_vm3, %v6046_v37, %v6045_v22  ;;  %v6962_v37 = vld [vmem:[%s12162_s20 + $0x30] sm:$0xff]  ;;  %v7004_v22 = vld [vmem:[%s12482_s12] ss:$0 sm:$0xff] }
0x16b4   :  { %v6065_v55 = vsel %vm820_vm8, %v6047_v58, %v6064_v7  ;;  %6365 = vmatpush.bf16.msra.mxu0 %v6817_v2  ;;  %6531 = vmatpush.bf16.msra.mxu3 %v6962_v37  ;;  %v6957_v58 = vld [vmem:[%s12162_s20 + $0x8] sm:$0xff]  ;;  %v6122_v52 = vpop.f32.mrf.mxu3  ;;  %v6964_v7 = vld [vmem:[%s12162_s20 + $0x40] sm:$0xff] }
0x16b5   :  { %6546 = vmatpush.bf16.msrb.mxu1 %v6969_v28  ;;  %v6972_v37 = vld [vmem:[#allocation15] sm:$0xff]  ;;  %v7005_v28 = vld [vmem:[#allocation13] ss:$0 sm:$0xff] }
0x16b8   :  { %v5996_v41 = vpop.permute.xlu1 %5995  ;;  %6366 = vmatpush.bf16.msra.mxu0 %v6809_v36  ;;  %6532 = vmatpush.bf16.msra.mxu3 %v6961_v18 }
0x16b9   :  { %v6048_v20 = vperm.slane %v5996_v41, %v8417_v33  ;;  %v6801_v41 = vor.u32 %v6949_v8, %v6800_v6  ;;  %6547 = vmatpush.bf16.msrb.mxu1 %v6968_v51 }
0x16bb   :  { %v6050_v47 = vsel %vm765_vm3, %v6049_v19, %v6048_v20 }
0x16bc   :  { %v6066_v11 = vsel %vm822_vm9, %v6050_v47, %v6065_v55  ;;  %6367 = vmatpush.bf16.msra.mxu0 %v6801_v41  ;;  %6533 = vmatpush.bf16.msra.mxu3 %v6960_v59  ;;  %v6965_v47 = vld [vmem:[%s12162_s20 + $0x48] sm:$0xff]  ;;  %v6136_v55 = vpop.f32.mrf.mxu1  ;;  %v6285_v54 = vpop.f32.mrf.mxu3 }
0x16bd   :  { %v6067_v9 = vsel %vm824_vm10, %v6053_v32, %v6066_v11  ;;  %6548 = vmatpush.bf16.msrb.mxu1 %v6967_v12 }
0x16c0   :  { %v5957_v31 = vpop.permute.xlu1 %5956  ;;  %6534 = vmatpush.bf16.msra.mxu3 %v6959_v30 }
0x16c1   :  { %v6028_v5 = vperm.slane %v5957_v31, %v8420_v61  ;;  %6549 = vmatpush.bf16.msrb.mxu1 %v6966_v34  ;;  %v6140_v31 = vperm.slane %v6086_v57, 0 }
0x16c3   :  { %v6029_v33 = vsel %vm765_vm3, %v6028_v5, %v6027_v1  ;;  %v6144_v11 = vadd.f32 %v6140_v31, %v6120_v53  ;;  %v6146_v48 = vadd.f32 %v6140_v31, %v6122_v52  ;;  %v6626_v52 = vpop.permute.xlu2 %6625 }
0x16c4   :  { %v6060_v61 = vsel %vm824_vm10, %v6029_v33, %v6059_v39  ;;  %6535 = vmatpush.bf16.msra.mxu3 %v6958_v60  ;;  %v6299_v32 = vpop.f32.mrf.mxu1  ;;  %v6145_v33 = vadd.f32 %v6141_v25, %v6134_v17  ;;  %v7006_v60 = vld [vmem:[#allocation16] ss:$0 sm:$0xff] }
0x16c5   :  { %v6068_v63 = vpack.c.b16 %v6067_v9, %v6060_v61  ;;  %6550 = vmatpush.bf16.msrb.mxu1 %v6965_v47  ;;  %v6224_v14 = vadd.f32 %v6205_v15, %v6144_v11  ;;  %v6226_v39 = vadd.f32 %v6207_v50, %v6146_v48  ;;  %v6287_v61 = vpop.f32.mrf.mxu3 }
0x16c7   :  { %6711 = vmatmul.msk.bf16.vlgmr.msrb.gmra.mxu2 %vm246_vm0, %v6068_v63  ;;  %v6304_v9 = vadd.f32 %v6285_v54, %v6224_v14  ;;  %v6147_v63 = vadd.f32 %v6141_v25, %v6136_v55  ;;  %v6306_v43 = vadd.f32 %v6287_v61, %v6226_v39 }
0x16c8   :  { %6378 = vmatpush.bf16.msrb.mxu2 %v6829_v16  ;;  %6536 = vmatpush.bf16.msra.mxu3 %v6957_v58  ;;  %v6621_v15 = vpop.permute.xlu1 %6620 }
0x16c9   :  { %6551 = vmatpush.bf16.msrb.mxu1 %v6964_v7 }
0x16cc   :  { %6379 = vmatpush.bf16.msrb.mxu2 %v6821_v23  ;;  %6537 = vmatpush.bf16.msra.mxu3 %v6956_v38  ;;  %v6301_v56 = vpop.f32.mrf.mxu1 }
0x16d0   :  { %6380 = vmatpush.bf16.msrb.mxu2 %v6813_v42 }
0x16d4   :  { %6381 = vmatpush.bf16.msrb.mxu2 %v6805_v4  ;;  %v6975_v4 = vld [vmem:[#allocation15 + $0x18] sm:$0xff] }
0x16d5   :  { %6604 = vmatpush.bf16.msrb.mxu0 %v6975_v4 }
0x16d7   :  { %6763 = vmatmul.msk.bf16.vlgmr.msra.gmra.mxu2 %vm297_vm1, %v12481_v49 }
0x16d9   :  { %6605 = vmatpush.bf16.msrb.mxu0 %v6974_v13 }
0x16dd   :  { %6606 = vmatpush.bf16.msrb.mxu0 %v6973_v27 }
0x16e1   :  { %6607 = vmatpush.bf16.msrb.mxu0 %v6972_v37 }
0x174a   :  { %v6081_v20 = vpop.f32.mrf.mxu2 }
0x174b   :  { %v6082_v44 = vadd.f32 %v7004_v22, %v6081_v20 }
0x1752   :  { %v6083_v3 = vpop.f32.mrf.mxu2 }
0x1753   :  { %v6084_v35 = vadd.f32 %v7004_v22, %v6083_v3 }
0x1755   :  { %v6308_v19 = vpack.c.bf16 %v6084_v35, %v6082_v44 }
0x1757   :  { %6830 = vmatmul.msk.bf16.vlgmr.msra.gmra.mxu0 %vm297_vm1, %v6308_v19  ;;  %6831 = vmatmul.msk.bf16.vlgmr.msrb.gmra.mxu2 %vm297_vm1, %v6308_v19 }
0x175a   :  { %v6219_v21 = vpop.f32.mrf.mxu2 }
0x175b   :  { %v6225_v49 = vadd.f32 %v6219_v21, %v6145_v33 }
0x175d   :  { %v6305_v10 = vadd.f32 %v6299_v32, %v6225_v49 }
0x1762   :  { %v6221_v1 = vpop.f32.mrf.mxu2 }
0x1763   :  { %v6227_v2 = vadd.f32 %v6221_v1, %v6147_v63 }
0x1765   :  { %v6307_v42 = vadd.f32 %v6301_v56, %v6227_v2 }
0x17d4   :  { %v6369_v5 = vpop.f32.mrf.mxu0 }
0x17d5   :  { %v6388_v26 = vadd.f32 %v6369_v5, %v6304_v9 }
0x17d7   :  { %v6392_v29 = vmax.f32 %v6388_v26, 0.0 }
0x17da   :  { %v6383_v16 = vpop.f32.mrf.mxu2 }
0x17db   :  { %v6389_v46 = vadd.f32 %v6383_v16, %v6305_v10 }
0x17dc   :  { %v6371_v24 = vpop.f32.mrf.mxu0 }
0x17dd   :  { %v6390_v40 = vadd.f32 %v6371_v24, %v6306_v43  ;;  %v6393_v0 = vmax.f32 %v6389_v46, 0.0 }
0x17df   :  { %v6394_v23 = vmax.f32 %v6390_v40, 0.0 }
0x17e1   :  { %v6396_v36 = vpack.c.bf16 %v6394_v23, %v6392_v29 }
0x17e2   :  { %v6385_v6 = vpop.f32.mrf.mxu2 }
0x17e3   :  { %v6391_v8 = vadd.f32 %v6385_v6, %v6307_v42  ;;  %6538 = vmatmul.bf16.vlgmr.msra.gmra.mxu3 %v6396_v36 }
0x17e5   :  { %v6395_v41 = vmax.f32 %v6391_v8, 0.0 }
0x17e7   :  { %v6397_v45 = vpack.c.bf16 %v6395_v41, %v6393_v0 }
0x17e9   :  { %6552 = vmatmul.bf16.vlgmr.msrb.gmra.mxu1 %v6397_v45 }
0x1866   :  { %v6539_v62 = vpop.f32.mrf.mxu3  ;;  %v6553_v18 = vpop.f32.mrf.mxu1 }
0x1867   :  { %v6540_v20 = vadd.f32 %v7005_v28, %v6539_v62 }
0x1869   :  { %v6554_v22 = vadd.f32 %v6553_v18, %v6540_v20 }
0x186b   :  { %v6558_v19 = vmax.f32 %v6554_v22, 0.0 }
0x186e   :  { %v6541_v59 = vpop.f32.mrf.mxu3  ;;  %v6555_v44 = vpop.f32.mrf.mxu1 }
0x186f   :  { %v6542_v3 = vadd.f32 %v7005_v28, %v6541_v59 }
0x1871   :  { %v6556_v35 = vadd.f32 %v6555_v44, %v6542_v3 }
0x1873   :  { %v6559_v30 = vmax.f32 %v6556_v35, 0.0 }
0x1875   :  { %v6560_v51 = vpack.c.bf16 %v6559_v30, %v6558_v19 }
0x1877   :  { %6912 = vmatmul.msk.bf16.vlgmr.msrb.gmra.mxu0 %vm297_vm1, %v6560_v51 }
0x18f4   :  { %v6609_v12 = vpop.f32.mrf.mxu0 }
0x18f5   :  { %v6610_v53 = vadd.f32 %v7006_v60, %v6609_v12 }
0x18f7   :  { %7347 = vtanh.f32 %v6610_v53 }
0x18fc   :  { %v6611_v58 = vpop.f32.mrf.mxu0 }
0x18fd   :  { %v7348_v34 = vpop.eup %7347  ;;  %v6612_v38 = vadd.f32 %v7006_v60, %v6611_v58 }
0x18fe   :  { %v6628_v17 = vmul.f32 %v7348_v34, %v6621_v15 }
0x18ff   :  { %7349 = vtanh.f32 %v6612_v38 }
0x1900   :  { %6630 = vst [vmem:[%s12483_s11] sm:$0xff] %v6628_v17 }
0x1905   :  { %v7350_v47 = vpop.eup %7349 }
0x1906   :  { %v6629_v21 = vmul.f32 %v7350_v47, %v6626_v52 }
0x1908   :  { %6631 = vst [vmem:[%s12483_s11 + $0x8] sm:$0xff] %v6629_v21 }
0x1909   :  { %6636 = vsyncpa [#allocation3], 1 }
0x190a   :  { %6637 = vsyncpa [#allocation5], 1 }
0x190b   :  { %6638 = vsyncpa [#allocation8], 1 }
0x190c   :  { %6639 = vsyncpa [#allocation11], 1 }
0x190d   :  { %6640 = vsyncpa [#allocation14], 1 }
0x190e   :  { %6641 = vsyncpa [#allocation17], 1 }

</bundles_post_ra>
